<compile_context>
chip_gen: v5e
topology: v5e:2x2
jax: 0.10.0
libtpu: 0.0.40
codegen_flags: <defaults>
</compile_context>

<pallas_src>
import math
import functools

import jax
import jax.numpy as jnp
from jax import lax
from jax.experimental import pallas as pl
from jax.experimental.pallas import tpu as pltpu


# Order of the small per-layer vectors packed into one [NL, NV, VD] table.
_VEC_ORDER = ("bq", "bk", "bv", "bo", "g1", "be1", "bi", "bo2", "g2", "be2")
_VIDX = {name: i for i, name in enumerate(_VEC_ORDER)}
_NUM_VECS = len(_VEC_ORDER)


def _layer_norm(x, gamma, beta, eps=1e-12):
    # Matches the reference LayerNorm: biased variance, eps inside the sqrt.
    u = jnp.mean(x, axis=-1, keepdims=True)
    d = x - u
    s = jnp.mean(d * d, axis=-1, keepdims=True)
    return gamma * (d * lax.rsqrt(s + eps)) + beta


def encoder_stack_kernel(x_ref, pe_ref, mask_ref,
                         wqkv_ref, wo_ref, wi_ref, wo2_ref, vec_ref,
                         y_ref, probs_ref,
                         h_ref,
                         *, num_heads, head_dim, write_every_layer):
    l = pl.program_id(1)
    last_layer = pl.num_programs(1) - 1

    Bt, S, H = h_ref.shape
    I = wi_ref.shape[-1]
    M = Bt * S
    dh = head_dim
    NH = num_heads

    # Fold the positional-encoding add into the first layer iteration.
    @pl.when(l == 0)
    def _():
        h_ref[...] = x_ref[...].astype(jnp.float32) + pe_ref[...]

    x = h_ref[...]                               # [Bt, S, H] f32 VMEM-resident carry
    x2d = x.reshape(M, H)                        # leading-dim merge only (free)
    xb = x2d.astype(jnp.bfloat16)

    def vec_row(name, n):
        i = _VIDX[name]
        return vec_ref[0, i:i + 1, :n]           # [1, n] f32 (prefix lane slice)

    # ---- QKV projections: three full-width [M,H]@[H,H] bf16 MXU matmuls -------------
    # q/k/v split is on the leading axis of wqkv_ref -> no lane slicing / relayouts.
    q2d = jnp.dot(xb, wqkv_ref[0, 0], preferred_element_type=jnp.float32) + vec_row("bq", H)
    k2d = jnp.dot(xb, wqkv_ref[0, 1], preferred_element_type=jnp.float32) + vec_row("bk", H)
    v2d = jnp.dot(xb, wqkv_ref[0, 2], preferred_element_type=jnp.float32) + vec_row("bv", H)

    q3 = q2d.astype(jnp.bfloat16).reshape(Bt, S, H)
    k3 = k2d.astype(jnp.bfloat16).reshape(Bt, S, H)
    v3 = v2d.astype(jnp.bfloat16).reshape(Bt, S, H)

    mask = mask_ref[...].reshape(Bt, 1, S)       # additive attention mask
    scale = 1.0 / math.sqrt(dh)

    # ---- multi-head attention (batched over the batch tile, per-head score matmuls) --
    ctx_heads = []
    for n in range(NH):
        lo, hi = n * dh, (n + 1) * dh
        qn = q3[..., lo:hi]                      # [Bt, S, dh]
        kn = k3[..., lo:hi]
        vn = v3[..., lo:hi]

        s_n = jnp.einsum('bqd,bkd->bqk', qn, kn,
                         preferred_element_type=jnp.float32) * scale + mask
        m_n = jnp.max(s_n, axis=-1, keepdims=True)
        e_n = jnp.exp(s_n - m_n)
        denom = jnp.sum(e_n, axis=-1, keepdims=True)
        p_n = e_n * pl.reciprocal(denom, approx=False)        # exact softmax

        # Only the last layer's attention probs are ever returned -> only store then.
        @pl.when(l == last_layer)
        def _():
            probs_ref[:, n, :, :] = p_n.astype(probs_ref.dtype)

        ctx_heads.append(jnp.einsum('bqk,bkd->bqd', p_n.astype(jnp.bfloat16), vn,
                                    preferred_element_type=jnp.float32))

    ctx2d = jnp.concatenate(ctx_heads, axis=-1).reshape(M, H)          # [M, H] f32

    # ---- SelfOutput: dense ([M,H]@[H,H]) + dropout(identity) + LayerNorm(residual) ---
    # TODO(synk): dropout layers are treated as identity (eval-mode semantics).
    attn2d = jnp.dot(ctx2d.astype(jnp.bfloat16), wo_ref[0],
                     preferred_element_type=jnp.float32) + vec_row("bo", H)
    attn2d = _layer_norm(attn2d + x2d, vec_row("g1", H), vec_row("be1", H))

    # ---- FFN: dense + ReLU, dense + residual + LayerNorm ------------------------------
    inter = jnp.dot(attn2d.astype(jnp.bfloat16), wi_ref[0],
                    preferred_element_type=jnp.float32) + vec_row("bi", I)
    inter = jnp.maximum(inter, 0.0)
    out2d = jnp.dot(inter.astype(jnp.bfloat16), wo2_ref[0],
                    preferred_element_type=jnp.float32) + vec_row("bo2", H)
    out2d = _layer_norm(out2d + attn2d, vec_row("g2", H), vec_row("be2", H))
    out3 = out2d.reshape(Bt, S, H)

    h_ref[...] = out3                            # carry to next layer (stays in VMEM)

    if write_every_layer:
        y_ref[0] = out3.astype(y_ref.dtype)
    else:
        @pl.when(l == last_layer)
        def _():
            y_ref[0] = out3.astype(y_ref.dtype)


def make_layer_params(key, hidden_size, intermediate_size):
    """Deterministic synthetic parameters. Linear weights stored as [in, out]."""
    ks = jax.random.split(key, 6)
    scale = 0.05
    H, I = hidden_size, intermediate_size
    return {
        "wq": scale * jax.random.normal(ks[0], (H, H), jnp.float32),
        "bq": jnp.zeros((H,), jnp.float32),
        "wk": scale * jax.random.normal(ks[1], (H, H), jnp.float32),
        "bk": jnp.zeros((H,), jnp.float32),
        "wv": scale * jax.random.normal(ks[2], (H, H), jnp.float32),
        "bv": jnp.zeros((H,), jnp.float32),
        "wo": scale * jax.random.normal(ks[3], (H, H), jnp.float32),
        "bo": jnp.zeros((H,), jnp.float32),
        "g1": jnp.ones((H,), jnp.float32),
        "be1": jnp.zeros((H,), jnp.float32),
        "wi": scale * jax.random.normal(ks[4], (H, I), jnp.float32),
        "bi": jnp.zeros((I,), jnp.float32),
        "wo2": scale * jax.random.normal(ks[5], (I, H), jnp.float32),
        "bo2": jnp.zeros((H,), jnp.float32),
        "g2": jnp.ones((H,), jnp.float32),
        "be2": jnp.zeros((H,), jnp.float32),
    }


def pack_layer_params(params):
    """Pre-pack one layer's weights: bf16 matmul weights, [3,H,H] qkv, one f32 vec table."""
    H = params["wq"].shape[0]
    I = params["wi"].shape[1]
    VD = max(H, I)

    def pad_vec(v):
        v = v.reshape(-1).astype(jnp.float32)
        return jnp.pad(v, (0, VD - v.shape[0]))

    return {
        "wqkv": jnp.stack([params["wq"], params["wk"], params["wv"]], 0).astype(jnp.bfloat16),
        "wo": params["wo"].astype(jnp.bfloat16),
        "wi": params["wi"].astype(jnp.bfloat16),
        "wo2": params["wo2"].astype(jnp.bfloat16),
        "vecs": jnp.stack([pad_vec(params[k]) for k in _VEC_ORDER], 0),   # [NV, VD] f32
    }


def positional_encoding_table(max_len, d_model):
    position = jnp.arange(max_len, dtype=jnp.float32)[:, None]
    div_term = jnp.exp(jnp.arange(0, d_model, 2, dtype=jnp.float32)
                       * (-math.log(10000.0) / d_model))
    pe = jnp.zeros((max_len, d_model), jnp.float32)
    pe = pe.at[:, 0::2].set(jnp.sin(position * div_term))
    pe = pe.at[:, 1::2].set(jnp.cos(position * div_term))
    return pe[None]   # [1, max_len, d_model]


def _pick_vmem_limit_bytes():
    """Per-generation VMEM budget (leave headroom below physical capacity)."""
    phys = 64 * 1024 * 1024
    try:
        phys = int(pltpu.get_tpu_info().vmem_capacity_bytes)
    except Exception:
        pass
    return int(max(32 * 1024 * 1024, min(int(phys * 0.85), 100 * 1024 * 1024)))


def encoder_1d_forward(hidden_states, attention_mask, layer_params_list, num_heads,
                       output_all_encoded_layers=True, batch_tile=None):
    B, S, H = hidden_states.shape
    assert S == 128, "PositionalEncoding in the reference module fixes max_len = 128"
    assert H % num_heads == 0
    head_dim = H // num_heads
    NH = num_heads
    NL = len(layer_params_list)
    I = layer_params_list[0]["wi"].shape[1]
    VD = max(H, I)

    # Batch tile: amortize weight DMA / fill the MXU, but keep >= 2 grid blocks for megacore.
    if batch_tile is None:
        batch_tile = 1
        for cand in (4, 2):
            if B % cand == 0 and B // cand >= 2:
                batch_tile = cand
                break
    assert B % batch_tile == 0
    Bt = batch_tile

    pe = positional_encoding_table(S, H)                          # [1, S, H]

    packed = [pack_layer_params(p) for p in layer_params_list]
    wqkv = jnp.stack([p["wqkv"] for p in packed], 0)              # [NL, 3, H, H] bf16
    wo = jnp.stack([p["wo"] for p in packed], 0)                  # [NL, H, H]    bf16
    wi = jnp.stack([p["wi"] for p in packed], 0)                  # [NL, H, I]    bf16
    wo2 = jnp.stack([p["wo2"] for p in packed], 0)                # [NL, I, H]    bf16
    vecs = jnp.stack([p["vecs"] for p in packed], 0)              # [NL, NV, VD]  f32

    kernel = functools.partial(encoder_stack_kernel,
                               num_heads=NH, head_dim=head_dim,
                               write_every_layer=output_all_encoded_layers)

    in_specs = [
        pl.BlockSpec((Bt, S, H), lambda b, l: (b, 0, 0)),             # hidden_states
        pl.BlockSpec((1, S, H), lambda b, l: (0, 0, 0)),              # positional encoding
        pl.BlockSpec((Bt, 1, 1, S), lambda b, l: (b, 0, 0, 0)),       # attention mask
        pl.BlockSpec((1, 3, H, H), lambda b, l: (l, 0, 0, 0)),        # packed wq/wk/wv
        pl.BlockSpec((1, H, H), lambda b, l: (l, 0, 0)),              # wo
        pl.BlockSpec((1, H, I), lambda b, l: (l, 0, 0)),              # wi
        pl.BlockSpec((1, I, H), lambda b, l: (l, 0, 0)),              # wo2
        pl.BlockSpec((1, _NUM_VECS, VD), lambda b, l: (l, 0, 0)),     # packed biases / LN params
    ]

    if output_all_encoded_layers:
        y_shape = jax.ShapeDtypeStruct((NL, B, S, H), hidden_states.dtype)
        y_spec = pl.BlockSpec((1, Bt, S, H), lambda b, l: (l, b, 0, 0))
    else:
        # Revisited output block across the layer axis: only the last layer is written.
        y_shape = jax.ShapeDtypeStruct((1, B, S, H), hidden_states.dtype)
        y_spec = pl.BlockSpec((1, Bt, S, H), lambda b, l: (0, b, 0, 0))

    out_specs = (
        y_spec,
        pl.BlockSpec((Bt, NH, S, S), lambda b, l: (b, 0, 0, 0)),      # last layer's probs
    )

    y_all, probs = pl.pallas_call(
        kernel,
        out_shape=(y_shape,
                   jax.ShapeDtypeStruct((B, NH, S, S), jnp.float32)),
        grid=(B // Bt, NL),
        in_specs=in_specs,
        out_specs=out_specs,
        scratch_shapes=[pltpu.VMEM((Bt, S, H), jnp.float32)],         # hidden-state carry
        compiler_params=pltpu.CompilerParams(
            dimension_semantics=("parallel", "arbitrary"),
            vmem_limit_bytes=_pick_vmem_limit_bytes()),
    )(hidden_states, pe, attention_mask, wqkv, wo, wi, wo2, vecs)

    if output_all_encoded_layers:
        all_encoder_layers = [y_all[i] for i in range(NL)]
    else:
        all_encoder_layers = [y_all[0]]
    return all_encoder_layers, probs


if __name__ == "__main__":
    # small config: n_layer=2, hidden=32, intermediate=64, heads=4; seq fixed to 128 by max_len
    B, S, H, NH, I, NL = 2, 128, 32, 4, 64, 2

    key = jax.random.PRNGKey(0)
    k_x, k_p = jax.random.split(key)

    x = jax.random.normal(k_x, (B, S, H), jnp.float32)

    # additive attention mask: last 16 key positions masked out for batch element 1
    mask = jnp.zeros((B, 1, 1, S), jnp.float32)
    mask = mask.at[1, 0, 0, S - 16:].set(-10000.0)

    # the PyTorch module deepcopies one layer -> all layers share the same init
    shared = make_layer_params(k_p, H, I)
    layer_params_list = [shared for _ in range(NL)]

    all_layers, attn_probs = encoder_1d_forward(x, mask, layer_params_list, NH,
                                                output_all_encoded_layers=True)
    for h in all_layers:
        jax.block_until_ready(h)
    jax.block_until_ready(attn_probs)

    assert len(all_layers) == NL
    assert all_layers[-1].shape == (B, S, H)
    assert attn_probs.shape == (B, NH, S, S)
    assert bool(jnp.all(jnp.isfinite(all_layers[-1])))
    assert bool(jnp.all(jnp.isfinite(attn_probs)))

    # exercise the reduced-writeback path (only the last layer's hidden state hits HBM)
    last_only, probs2 = encoder_1d_forward(x, mask, layer_params_list, NH,
                                           output_all_encoded_layers=False)
    jax.block_until_ready(last_only[0])
    jax.block_until_ready(probs2)
    assert last_only[0].shape == (B, S, H)
    assert bool(jnp.allclose(last_only[0], all_layers[-1], atol=1e-5))

    print("KERNEL_OK")
</pallas_src>

<mosaic_0001>
module attributes {stable_mosaic.version = 11 : i64} {
  func.func @encoder_stack_kernel(%arg0: i32, %arg1: i32, %arg2: memref<1x128x32xf32, #tpu.memory_space<vmem>>, %arg3: memref<1x128x32xf32, #tpu.memory_space<vmem>>, %arg4: memref<1x1x1x128xf32, #tpu.memory_space<vmem>>, %arg5: memref<1x3x32x32xbf16, #tpu.memory_space<vmem>>, %arg6: memref<1x32x32xbf16, #tpu.memory_space<vmem>>, %arg7: memref<1x32x64xbf16, #tpu.memory_space<vmem>>, %arg8: memref<1x64x32xbf16, #tpu.memory_space<vmem>>, %arg9: memref<1x10x64xf32, #tpu.memory_space<vmem>>, %arg10: memref<1x1x128x32xf32, #tpu.memory_space<vmem>>, %arg11: memref<1x4x128x128xf32, #tpu.memory_space<vmem>>, %arg12: memref<1x128x32xf32, #tpu.memory_space<vmem>>) attributes {dimension_semantics = [#tpu.dimension_semantics<parallel>, #tpu.dimension_semantics<arbitrary>], iteration_bounds = array<i64: 2, 2>, scalar_prefetch = 0 : i64, scratch_operands = 1 : i64, tpu.core_type = #tpu.core_type<tc>, window_params = [{transform_indices = @transform_0, window_bounds = array<i64: 1, 128, 32>}, {pipeline_mode = #tpu.pipeline_mode<synchronous>, transform_indices = @transform_1, window_bounds = array<i64: 1, 128, 32>}, {transform_indices = @transform_2, window_bounds = array<i64: 1, 1, 1, 128>}, {transform_indices = @transform_3, window_bounds = array<i64: 1, 3, 32, 32>}, {transform_indices = @transform_4, window_bounds = array<i64: 1, 32, 32>}, {transform_indices = @transform_5, window_bounds = array<i64: 1, 32, 64>}, {transform_indices = @transform_6, window_bounds = array<i64: 1, 64, 32>}, {transform_indices = @transform_7, window_bounds = array<i64: 1, 10, 64>}, {transform_indices = @transform_8, window_bounds = array<i64: 1, 1, 128, 32>}, {transform_indices = @transform_9, window_bounds = array<i64: 1, 4, 128, 128>}]} {
    %c0_i32 = arith.constant 0 : i32
    %0 = arith.cmpi eq, %arg1, %c0_i32 : i32
    %1 = arith.extui %0 : i1 to i32
    %c0_i32_0 = arith.constant 0 : i32
    %2 = arith.cmpi ne, %1, %c0_i32_0 : i32
    scf.if %2 {
      %c0_99 = arith.constant 0 : index
      %c0_100 = arith.constant 0 : index
      %c0_101 = arith.constant 0 : index
      %210 = vector.load %arg2[%c0_99, %c0_100, %c0_101] : memref<1x128x32xf32, #tpu.memory_space<vmem>>, vector<1x128x32xf32>
      %c0_102 = arith.constant 0 : index
      %c0_103 = arith.constant 0 : index
      %c0_104 = arith.constant 0 : index
      %211 = vector.load %arg3[%c0_102, %c0_103, %c0_104] : memref<1x128x32xf32, #tpu.memory_space<vmem>>, vector<1x128x32xf32>
      %212 = arith.addf %210, %211 : vector<1x128x32xf32>
      %c0_105 = arith.constant 0 : index
      %c0_106 = arith.constant 0 : index
      %c0_107 = arith.constant 0 : index
      %213 = vector.load %arg12[%c0_105, %c0_106, %c0_107] : memref<1x128x32xf32, #tpu.memory_space<vmem>>, vector<1x128x32xf32>
      tpu.vector_store %arg12[%c0_105, %c0_106, %c0_107], %212 {strides = array<i32>} : memref<1x128x32xf32, #tpu.memory_space<vmem>>, vector<1x128x32xf32>,
    } else {
    }
    %c0 = arith.constant 0 : index
    %c0_1 = arith.constant 0 : index
    %c0_2 = arith.constant 0 : index
    %3 = vector.load %arg12[%c0, %c0_1, %c0_2] : memref<1x128x32xf32, #tpu.memory_space<vmem>>, vector<1x128x32xf32>
    %4 = vector.shape_cast %3 : vector<1x128x32xf32> to vector<128x32xf32>
    %5 = arith.truncf %4 : vector<128x32xf32> to vector<128x32xbf16>
    %c0_3 = arith.constant 0 : index
    %c0_4 = arith.constant 0 : index
    %c0_5 = arith.constant 0 : index
    %c0_6 = arith.constant 0 : index
    %6 = vector.load %arg5[%c0_3, %c0_4, %c0_5, %c0_6] : memref<1x3x32x32xbf16, #tpu.memory_space<vmem>>, vector<1x1x32x32xbf16>
    %7 = vector.shape_cast %6 : vector<1x1x32x32xbf16> to vector<32x32xbf16>
    %cst = arith.constant dense<0.000000e+00> : vector<128x32xf32>
    %8 = tpu.matmul %5, %7, %cst {dimension_numbers = #tpu.dot_dimension_numbers<[1], [0], [0], [1], [0, 0, 1, 1], [], []>} : vector<128x32xbf16>, vector<32x32xbf16>, vector<128x32xf32> -> vector<128x32xf32>
    %c0_7 = arith.constant 0 : index
    %c0_8 = arith.constant 0 : index
    %c0_9 = arith.constant 0 : index
    %9 = vector.load %arg9[%c0_7, %c0_8, %c0_9] : memref<1x10x64xf32, #tpu.memory_space<vmem>>, vector<1x1x32xf32>
    %10 = vector.shape_cast %9 : vector<1x1x32xf32> to vector<1x32xf32>
    %11 = vector.broadcast %10 : vector<1x32xf32> to vector<128x32xf32>
    %12 = arith.addf %8, %11 : vector<128x32xf32>
    %c0_10 = arith.constant 0 : index
    %c1 = arith.constant 1 : index
    %c0_11 = arith.constant 0 : index
    %c0_12 = arith.constant 0 : index
    %13 = vector.load %arg5[%c0_10, %c1, %c0_11, %c0_12] : memref<1x3x32x32xbf16, #tpu.memory_space<vmem>>, vector<1x1x32x32xbf16>
    %14 = vector.shape_cast %13 : vector<1x1x32x32xbf16> to vector<32x32xbf16>
    %cst_13 = arith.constant dense<0.000000e+00> : vector<128x32xf32>
    %15 = tpu.matmul %5, %14, %cst_13 {dimension_numbers = #tpu.dot_dimension_numbers<[1], [0], [0], [1], [0, 0, 1, 1], [], []>} : vector<128x32xbf16>, vector<32x32xbf16>, vector<128x32xf32> -> vector<128x32xf32>
    %c0_14 = arith.constant 0 : index
    %c1_15 = arith.constant 1 : index
    %c0_16 = arith.constant 0 : index
    %16 = vector.load %arg9[%c0_14, %c1_15, %c0_16] : memref<1x10x64xf32, #tpu.memory_space<vmem>>, vector<1x1x32xf32>
    %17 = vector.shape_cast %16 : vector<1x1x32xf32> to vector<1x32xf32>
    %18 = vector.broadcast %17 : vector<1x32xf32> to vector<128x32xf32>
    %19 = arith.addf %15, %18 : vector<128x32xf32>
    %c0_17 = arith.constant 0 : index
    %c2 = arith.constant 2 : index
    %c0_18 = arith.constant 0 : index
    %c0_19 = arith.constant 0 : index
    %20 = vector.load %arg5[%c0_17, %c2, %c0_18, %c0_19] : memref<1x3x32x32xbf16, #tpu.memory_space<vmem>>, vector<1x1x32x32xbf16>
    %21 = vector.shape_cast %20 : vector<1x1x32x32xbf16> to vector<32x32xbf16>
    %cst_20 = arith.constant dense<0.000000e+00> : vector<128x32xf32>
    %22 = tpu.matmul %5, %21, %cst_20 {dimension_numbers = #tpu.dot_dimension_numbers<[1], [0], [0], [1], [0, 0, 1, 1], [], []>} : vector<128x32xbf16>, vector<32x32xbf16>, vector<128x32xf32> -> vector<128x32xf32>
    %c0_21 = arith.constant 0 : index
    %c2_22 = arith.constant 2 : index
    %c0_23 = arith.constant 0 : index
    %23 = vector.load %arg9[%c0_21, %c2_22, %c0_23] : memref<1x10x64xf32, #tpu.memory_space<vmem>>, vector<1x1x32xf32>
    %24 = vector.shape_cast %23 : vector<1x1x32xf32> to vector<1x32xf32>
    %25 = vector.broadcast %24 : vector<1x32xf32> to vector<128x32xf32>
    %26 = arith.addf %22, %25 : vector<128x32xf32>
    %27 = arith.truncf %12 : vector<128x32xf32> to vector<128x32xbf16>
    %28 = vector.shape_cast %27 : vector<128x32xbf16> to vector<1x128x32xbf16>
    %29 = arith.truncf %19 : vector<128x32xf32> to vector<128x32xbf16>
    %30 = vector.shape_cast %29 : vector<128x32xbf16> to vector<1x128x32xbf16>
    %31 = arith.truncf %26 : vector<128x32xf32> to vector<128x32xbf16>
    %32 = vector.shape_cast %31 : vector<128x32xbf16> to vector<1x128x32xbf16>
    %c0_24 = arith.constant 0 : index
    %c0_25 = arith.constant 0 : index
    %c0_26 = arith.constant 0 : index
    %c0_27 = arith.constant 0 : index
    %33 = vector.load %arg4[%c0_24, %c0_25, %c0_26, %c0_27] : memref<1x1x1x128xf32, #tpu.memory_space<vmem>>, vector<1x1x1x128xf32>
    %34 = vector.shape_cast %33 : vector<1x1x1x128xf32> to vector<1x1x128xf32>
    %35 = vector.extract_strided_slice %28 {offsets = [0, 0, 0], sizes = [1, 128, 8], strides = [1, 1, 1]} : vector<1x128x32xbf16> to vector<1x128x8xbf16>
    %36 = vector.extract_strided_slice %30 {offsets = [0, 0, 0], sizes = [1, 128, 8], strides = [1, 1, 1]} : vector<1x128x32xbf16> to vector<1x128x8xbf16>
    %37 = vector.extract_strided_slice %32 {offsets = [0, 0, 0], sizes = [1, 128, 8], strides = [1, 1, 1]} : vector<1x128x32xbf16> to vector<1x128x8xbf16>
    "tpu.trace_start"() <{level = 10 : i32, message = "bqd,bkd->bqk"}> : () -> ()
    %cst_28 = arith.constant dense<0.000000e+00> : vector<1x128x128xf32>
    %38 = tpu.matmul %35, %36, %cst_28 {dimension_numbers = #tpu.dot_dimension_numbers<[2], [2], [1], [1], [0, 0, 0, 1, 1, 1], [0], [0]>} : vector<1x128x8xbf16>, vector<1x128x8xbf16>, vector<1x128x128xf32> -> vector<1x128x128xf32>
    "tpu.trace_stop"() : () -> ()
    %cst_29 = arith.constant 0.353553385 : f32
    %39 = vector.broadcast %cst_29 : f32 to vector<1x128x128xf32>
    %40 = arith.mulf %38, %39 : vector<1x128x128xf32>
    %41 = vector.broadcast %34 : vector<1x1x128xf32> to vector<1x128x128xf32>
    %42 = arith.addf %40, %41 : vector<1x128x128xf32>
    %cst_30 = arith.constant dense<0xFF800000> : vector<1x128xf32>
    %43 = vector.multi_reduction <maximumf>, %42, %cst_30 [2] : vector<1x128x128xf32> to vector<1x128xf32>
    %44 = vector.shape_cast %43 : vector<1x128xf32> to vector<1x128x1xf32>
    %45 = vector.broadcast %44 : vector<1x128x1xf32> to vector<1x128x128xf32>
    %46 = arith.subf %42, %45 : vector<1x128x128xf32>
    %47 = math.exp %46 : vector<1x128x128xf32>
    %cst_31 = arith.constant dense<0.000000e+00> : vector<1x128xf32>
    %48 = vector.multi_reduction <add>, %47, %cst_31 [2] : vector<1x128x128xf32> to vector<1x128xf32>
    %49 = vector.shape_cast %48 : vector<1x128xf32> to vector<1x128x1xf32>
    %50 = tpu.reciprocal %49 : vector<1x128x1xf32> -> vector<1x128x1xf32>
    %51 = vector.broadcast %50 : vector<1x128x1xf32> to vector<1x128x128xf32>
    %52 = arith.mulf %47, %51 : vector<1x128x128xf32>
    %c1_i32 = arith.constant 1 : i32
    %53 = arith.cmpi eq, %arg1, %c1_i32 : i32
    %54 = arith.extui %53 : i1 to i32
    %c0_i32_32 = arith.constant 0 : i32
    %55 = arith.cmpi ne, %54, %c0_i32_32 : i32
    scf.if %55 {
      %c0_99 = arith.constant 0 : index
      %c0_100 = arith.constant 0 : index
      %c0_101 = arith.constant 0 : index
      %c0_102 = arith.constant 0 : index
      %210 = vector.load %arg11[%c0_99, %c0_100, %c0_101, %c0_102] : memref<1x4x128x128xf32, #tpu.memory_space<vmem>>, vector<1x1x128x128xf32>
      %211 = vector.shape_cast %210 : vector<1x1x128x128xf32> to vector<1x128x128xf32>
      %212 = vector.shape_cast %52 : vector<1x128x128xf32> to vector<1x1x128x128xf32>
      tpu.vector_store %arg11[%c0_99, %c0_100, %c0_101, %c0_102], %212 {strides = array<i32>} : memref<1x4x128x128xf32, #tpu.memory_space<vmem>>, vector<1x1x128x128xf32>,
    } else {
    }
    %56 = arith.truncf %52 : vector<1x128x128xf32> to vector<1x128x128xbf16>
    "tpu.trace_start"() <{level = 10 : i32, message = "bqk,bkd->bqd"}> : () -> ()
    %cst_33 = arith.constant dense<0.000000e+00> : vector<1x128x8xf32>
    %57 = tpu.matmul %56, %37, %cst_33 {dimension_numbers = #tpu.dot_dimension_numbers<[2], [1], [1], [2], [0, 0, 0, 1, 1, 2], [0], [0]>} : vector<1x128x128xbf16>, vector<1x128x8xbf16>, vector<1x128x8xf32> -> vector<1x128x8xf32>
    "tpu.trace_stop"() : () -> ()
    %58 = vector.extract_strided_slice %28 {offsets = [0, 0, 8], sizes = [1, 128, 8], strides = [1, 1, 1]} : vector<1x128x32xbf16> to vector<1x128x8xbf16>
    %59 = vector.extract_strided_slice %30 {offsets = [0, 0, 8], sizes = [1, 128, 8], strides = [1, 1, 1]} : vector<1x128x32xbf16> to vector<1x128x8xbf16>
    %60 = vector.extract_strided_slice %32 {offsets = [0, 0, 8], sizes = [1, 128, 8], strides = [1, 1, 1]} : vector<1x128x32xbf16> to vector<1x128x8xbf16>
    "tpu.trace_start"() <{level = 10 : i32, message = "bqd,bkd->bqk"}> : () -> ()
    %cst_34 = arith.constant dense<0.000000e+00> : vector<1x128x128xf32>
    %61 = tpu.matmul %58, %59, %cst_34 {dimension_numbers = #tpu.dot_dimension_numbers<[2], [2], [1], [1], [0, 0, 0, 1, 1, 1], [0], [0]>} : vector<1x128x8xbf16>, vector<1x128x8xbf16>, vector<1x128x128xf32> -> vector<1x128x128xf32>
    "tpu.trace_stop"() : () -> ()
    %cst_35 = arith.constant 0.353553385 : f32
    %62 = vector.broadcast %cst_35 : f32 to vector<1x128x128xf32>
    %63 = arith.mulf %61, %62 : vector<1x128x128xf32>
    %64 = vector.broadcast %34 : vector<1x1x128xf32> to vector<1x128x128xf32>
    %65 = arith.addf %63, %64 : vector<1x128x128xf32>
    %cst_36 = arith.constant dense<0xFF800000> : vector<1x128xf32>
    %66 = vector.multi_reduction <maximumf>, %65, %cst_36 [2] : vector<1x128x128xf32> to vector<1x128xf32>
    %67 = vector.shape_cast %66 : vector<1x128xf32> to vector<1x128x1xf32>
    %68 = vector.broadcast %67 : vector<1x128x1xf32> to vector<1x128x128xf32>
    %69 = arith.subf %65, %68 : vector<1x128x128xf32>
    %70 = math.exp %69 : vector<1x128x128xf32>
    %cst_37 = arith.constant dense<0.000000e+00> : vector<1x128xf32>
    %71 = vector.multi_reduction <add>, %70, %cst_37 [2] : vector<1x128x128xf32> to vector<1x128xf32>
    %72 = vector.shape_cast %71 : vector<1x128xf32> to vector<1x128x1xf32>
    %73 = tpu.reciprocal %72 : vector<1x128x1xf32> -> vector<1x128x1xf32>
    %74 = vector.broadcast %73 : vector<1x128x1xf32> to vector<1x128x128xf32>
    %75 = arith.mulf %70, %74 : vector<1x128x128xf32>
    %c1_i32_38 = arith.constant 1 : i32
    %76 = arith.cmpi eq, %arg1, %c1_i32_38 : i32
    %77 = arith.extui %76 : i1 to i32
    %c0_i32_39 = arith.constant 0 : i32
    %78 = arith.cmpi ne, %77, %c0_i32_39 : i32
    scf.if %78 {
      %c0_99 = arith.constant 0 : index
      %c1_100 = arith.constant 1 : index
      %c0_101 = arith.constant 0 : index
      %c0_102 = arith.constant 0 : index
      %210 = vector.load %arg11[%c0_99, %c1_100, %c0_101, %c0_102] : memref<1x4x128x128xf32, #tpu.memory_space<vmem>>, vector<1x1x128x128xf32>
      %211 = vector.shape_cast %210 : vector<1x1x128x128xf32> to vector<1x128x128xf32>
      %212 = vector.shape_cast %75 : vector<1x128x128xf32> to vector<1x1x128x128xf32>
      tpu.vector_store %arg11[%c0_99, %c1_100, %c0_101, %c0_102], %212 {strides = array<i32>} : memref<1x4x128x128xf32, #tpu.memory_space<vmem>>, vector<1x1x128x128xf32>,
    } else {
    }
    %79 = arith.truncf %75 : vector<1x128x128xf32> to vector<1x128x128xbf16>
    "tpu.trace_start"() <{level = 10 : i32, message = "bqk,bkd->bqd"}> : () -> ()
    %cst_40 = arith.constant dense<0.000000e+00> : vector<1x128x8xf32>
    %80 = tpu.matmul %79, %60, %cst_40 {dimension_numbers = #tpu.dot_dimension_numbers<[2], [1], [1], [2], [0, 0, 0, 1, 1, 2], [0], [0]>} : vector<1x128x128xbf16>, vector<1x128x8xbf16>, vector<1x128x8xf32> -> vector<1x128x8xf32>
    "tpu.trace_stop"() : () -> ()
    %81 = vector.extract_strided_slice %28 {offsets = [0, 0, 16], sizes = [1, 128, 8], strides = [1, 1, 1]} : vector<1x128x32xbf16> to vector<1x128x8xbf16>
    %82 = vector.extract_strided_slice %30 {offsets = [0, 0, 16], sizes = [1, 128, 8], strides = [1, 1, 1]} : vector<1x128x32xbf16> to vector<1x128x8xbf16>
    %83 = vector.extract_strided_slice %32 {offsets = [0, 0, 16], sizes = [1, 128, 8], strides = [1, 1, 1]} : vector<1x128x32xbf16> to vector<1x128x8xbf16>
    "tpu.trace_start"() <{level = 10 : i32, message = "bqd,bkd->bqk"}> : () -> ()
    %cst_41 = arith.constant dense<0.000000e+00> : vector<1x128x128xf32>
    %84 = tpu.matmul %81, %82, %cst_41 {dimension_numbers = #tpu.dot_dimension_numbers<[2], [2], [1], [1], [0, 0, 0, 1, 1, 1], [0], [0]>} : vector<1x128x8xbf16>, vector<1x128x8xbf16>, vector<1x128x128xf32> -> vector<1x128x128xf32>
    "tpu.trace_stop"() : () -> ()
    %cst_42 = arith.constant 0.353553385 : f32
    %85 = vector.broadcast %cst_42 : f32 to vector<1x128x128xf32>
    %86 = arith.mulf %84, %85 : vector<1x128x128xf32>
    %87 = vector.broadcast %34 : vector<1x1x128xf32> to vector<1x128x128xf32>
    %88 = arith.addf %86, %87 : vector<1x128x128xf32>
    %cst_43 = arith.constant dense<0xFF800000> : vector<1x128xf32>
    %89 = vector.multi_reduction <maximumf>, %88, %cst_43 [2] : vector<1x128x128xf32> to vector<1x128xf32>
    %90 = vector.shape_cast %89 : vector<1x128xf32> to vector<1x128x1xf32>
    %91 = vector.broadcast %90 : vector<1x128x1xf32> to vector<1x128x128xf32>
    %92 = arith.subf %88, %91 : vector<1x128x128xf32>
    %93 = math.exp %92 : vector<1x128x128xf32>
    %cst_44 = arith.constant dense<0.000000e+00> : vector<1x128xf32>
    %94 = vector.multi_reduction <add>, %93, %cst_44 [2] : vector<1x128x128xf32> to vector<1x128xf32>
    %95 = vector.shape_cast %94 : vector<1x128xf32> to vector<1x128x1xf32>
    %96 = tpu.reciprocal %95 : vector<1x128x1xf32> -> vector<1x128x1xf32>
    %97 = vector.broadcast %96 : vector<1x128x1xf32> to vector<1x128x128xf32>
    %98 = arith.mulf %93, %97 : vector<1x128x128xf32>
    %c1_i32_45 = arith.constant 1 : i32
    %99 = arith.cmpi eq, %arg1, %c1_i32_45 : i32
    %100 = arith.extui %99 : i1 to i32
    %c0_i32_46 = arith.constant 0 : i32
    %101 = arith.cmpi ne, %100, %c0_i32_46 : i32
    scf.if %101 {
      %c0_99 = arith.constant 0 : index
      %c2_100 = arith.constant 2 : index
      %c0_101 = arith.constant 0 : index
      %c0_102 = arith.constant 0 : index
      %210 = vector.load %arg11[%c0_99, %c2_100, %c0_101, %c0_102] : memref<1x4x128x128xf32, #tpu.memory_space<vmem>>, vector<1x1x128x128xf32>
      %211 = vector.shape_cast %210 : vector<1x1x128x128xf32> to vector<1x128x128xf32>
      %212 = vector.shape_cast %98 : vector<1x128x128xf32> to vector<1x1x128x128xf32>
      tpu.vector_store %arg11[%c0_99, %c2_100, %c0_101, %c0_102], %212 {strides = array<i32>} : memref<1x4x128x128xf32, #tpu.memory_space<vmem>>, vector<1x1x128x128xf32>,
    } else {
    }
    %102 = arith.truncf %98 : vector<1x128x128xf32> to vector<1x128x128xbf16>
    "tpu.trace_start"() <{level = 10 : i32, message = "bqk,bkd->bqd"}> : () -> ()
    %cst_47 = arith.constant dense<0.000000e+00> : vector<1x128x8xf32>
    %103 = tpu.matmul %102, %83, %cst_47 {dimension_numbers = #tpu.dot_dimension_numbers<[2], [1], [1], [2], [0, 0, 0, 1, 1, 2], [0], [0]>} : vector<1x128x128xbf16>, vector<1x128x8xbf16>, vector<1x128x8xf32> -> vector<1x128x8xf32>
    "tpu.trace_stop"() : () -> ()
    %104 = vector.extract_strided_slice %28 {offsets = [0, 0, 24], sizes = [1, 128, 8], strides = [1, 1, 1]} : vector<1x128x32xbf16> to vector<1x128x8xbf16>
    %105 = vector.extract_strided_slice %30 {offsets = [0, 0, 24], sizes = [1, 128, 8], strides = [1, 1, 1]} : vector<1x128x32xbf16> to vector<1x128x8xbf16>
    %106 = vector.extract_strided_slice %32 {offsets = [0, 0, 24], sizes = [1, 128, 8], strides = [1, 1, 1]} : vector<1x128x32xbf16> to vector<1x128x8xbf16>
    "tpu.trace_start"() <{level = 10 : i32, message = "bqd,bkd->bqk"}> : () -> ()
    %cst_48 = arith.constant dense<0.000000e+00> : vector<1x128x128xf32>
    %107 = tpu.matmul %104, %105, %cst_48 {dimension_numbers = #tpu.dot_dimension_numbers<[2], [2], [1], [1], [0, 0, 0, 1, 1, 1], [0], [0]>} : vector<1x128x8xbf16>, vector<1x128x8xbf16>, vector<1x128x128xf32> -> vector<1x128x128xf32>
    "tpu.trace_stop"() : () -> ()
    %cst_49 = arith.constant 0.353553385 : f32
    %108 = vector.broadcast %cst_49 : f32 to vector<1x128x128xf32>
    %109 = arith.mulf %107, %108 : vector<1x128x128xf32>
    %110 = vector.broadcast %34 : vector<1x1x128xf32> to vector<1x128x128xf32>
    %111 = arith.addf %109, %110 : vector<1x128x128xf32>
    %cst_50 = arith.constant dense<0xFF800000> : vector<1x128xf32>
    %112 = vector.multi_reduction <maximumf>, %111, %cst_50 [2] : vector<1x128x128xf32> to vector<1x128xf32>
    %113 = vector.shape_cast %112 : vector<1x128xf32> to vector<1x128x1xf32>
    %114 = vector.broadcast %113 : vector<1x128x1xf32> to vector<1x128x128xf32>
    %115 = arith.subf %111, %114 : vector<1x128x128xf32>
    %116 = math.exp %115 : vector<1x128x128xf32>
    %cst_51 = arith.constant dense<0.000000e+00> : vector<1x128xf32>
    %117 = vector.multi_reduction <add>, %116, %cst_51 [2] : vector<1x128x128xf32> to vector<1x128xf32>
    %118 = vector.shape_cast %117 : vector<1x128xf32> to vector<1x128x1xf32>
    %119 = tpu.reciprocal %118 : vector<1x128x1xf32> -> vector<1x128x1xf32>
    %120 = vector.broadcast %119 : vector<1x128x1xf32> to vector<1x128x128xf32>
    %121 = arith.mulf %116, %120 : vector<1x128x128xf32>
    %c1_i32_52 = arith.constant 1 : i32
    %122 = arith.cmpi eq, %arg1, %c1_i32_52 : i32
    %123 = arith.extui %122 : i1 to i32
    %c0_i32_53 = arith.constant 0 : i32
    %124 = arith.cmpi ne, %123, %c0_i32_53 : i32
    scf.if %124 {
      %c0_99 = arith.constant 0 : index
      %c3_100 = arith.constant 3 : index
      %c0_101 = arith.constant 0 : index
      %c0_102 = arith.constant 0 : index
      %210 = vector.load %arg11[%c0_99, %c3_100, %c0_101, %c0_102] : memref<1x4x128x128xf32, #tpu.memory_space<vmem>>, vector<1x1x128x128xf32>
      %211 = vector.shape_cast %210 : vector<1x1x128x128xf32> to vector<1x128x128xf32>
      %212 = vector.shape_cast %121 : vector<1x128x128xf32> to vector<1x1x128x128xf32>
      tpu.vector_store %arg11[%c0_99, %c3_100, %c0_101, %c0_102], %212 {strides = array<i32>} : memref<1x4x128x128xf32, #tpu.memory_space<vmem>>, vector<1x1x128x128xf32>,
    } else {
    }
    %125 = arith.truncf %121 : vector<1x128x128xf32> to vector<1x128x128xbf16>
    "tpu.trace_start"() <{level = 10 : i32, message = "bqk,bkd->bqd"}> : () -> ()
    %cst_54 = arith.constant dense<0.000000e+00> : vector<1x128x8xf32>
    %126 = tpu.matmul %125, %106, %cst_54 {dimension_numbers = #tpu.dot_dimension_numbers<[2], [1], [1], [2], [0, 0, 0, 1, 1, 2], [0], [0]>} : vector<1x128x128xbf16>, vector<1x128x8xbf16>, vector<1x128x8xf32> -> vector<1x128x8xf32>
    "tpu.trace_stop"() : () -> ()
    %127 = tpu.concatenate %57, %80, %103, %126 in 2 : vector<1x128x8xf32>, vector<1x128x8xf32>, vector<1x128x8xf32>, vector<1x128x8xf32> -> vector<1x128x32xf32>
    %128 = vector.shape_cast %127 : vector<1x128x32xf32> to vector<128x32xf32>
    %129 = arith.truncf %128 : vector<128x32xf32> to vector<128x32xbf16>
    %c0_55 = arith.constant 0 : index
    %c0_56 = arith.constant 0 : index
    %c0_57 = arith.constant 0 : index
    %130 = vector.load %arg6[%c0_55, %c0_56, %c0_57] : memref<1x32x32xbf16, #tpu.memory_space<vmem>>, vector<1x32x32xbf16>
    %131 = vector.shape_cast %130 : vector<1x32x32xbf16> to vector<32x32xbf16>
    %cst_58 = arith.constant dense<0.000000e+00> : vector<128x32xf32>
    %132 = tpu.matmul %129, %131, %cst_58 {dimension_numbers = #tpu.dot_dimension_numbers<[1], [0], [0], [1], [0, 0, 1, 1], [], []>} : vector<128x32xbf16>, vector<32x32xbf16>, vector<128x32xf32> -> vector<128x32xf32>
    %c0_59 = arith.constant 0 : index
    %c3 = arith.constant 3 : index
    %c0_60 = arith.constant 0 : index
    %133 = vector.load %arg9[%c0_59, %c3, %c0_60] : memref<1x10x64xf32, #tpu.memory_space<vmem>>, vector<1x1x32xf32>
    %134 = vector.shape_cast %133 : vector<1x1x32xf32> to vector<1x32xf32>
    %135 = vector.broadcast %134 : vector<1x32xf32> to vector<128x32xf32>
    %136 = arith.addf %132, %135 : vector<128x32xf32>
    %137 = arith.addf %136, %4 : vector<128x32xf32>
    %c0_61 = arith.constant 0 : index
    %c4 = arith.constant 4 : index
    %c0_62 = arith.constant 0 : index
    %138 = vector.load %arg9[%c0_61, %c4, %c0_62] : memref<1x10x64xf32, #tpu.memory_space<vmem>>, vector<1x1x32xf32>
    %139 = vector.shape_cast %138 : vector<1x1x32xf32> to vector<1x32xf32>
    %c0_63 = arith.constant 0 : index
    %c5 = arith.constant 5 : index
    %c0_64 = arith.constant 0 : index
    %140 = vector.load %arg9[%c0_63, %c5, %c0_64] : memref<1x10x64xf32, #tpu.memory_space<vmem>>, vector<1x1x32xf32>
    %141 = vector.shape_cast %140 : vector<1x1x32xf32> to vector<1x32xf32>
    %cst_65 = arith.constant dense<0.000000e+00> : vector<128xf32>
    %142 = vector.multi_reduction <add>, %137, %cst_65 [1] : vector<128x32xf32> to vector<128xf32>
    %143 = vector.shape_cast %142 : vector<128xf32> to vector<128x1xf32>
    %cst_66 = arith.constant 3.200000e+01 : f32
    %144 = vector.broadcast %cst_66 : f32 to vector<128x1xf32>
    %145 = arith.divf %143, %144 : vector<128x1xf32>
    %146 = vector.broadcast %145 : vector<128x1xf32> to vector<128x32xf32>
    %147 = arith.subf %137, %146 : vector<128x32xf32>
    %148 = arith.mulf %147, %147 : vector<128x32xf32>
    %cst_67 = arith.constant dense<0.000000e+00> : vector<128xf32>
    %149 = vector.multi_reduction <add>, %148, %cst_67 [1] : vector<128x32xf32> to vector<128xf32>
    %150 = vector.shape_cast %149 : vector<128xf32> to vector<128x1xf32>
    %cst_68 = arith.constant 3.200000e+01 : f32
    %151 = vector.broadcast %cst_68 : f32 to vector<128x1xf32>
    %152 = arith.divf %150, %151 : vector<128x1xf32>
    %cst_69 = arith.constant 9.99999996E-13 : f32
    %153 = vector.broadcast %cst_69 : f32 to vector<128x1xf32>
    %154 = arith.addf %152, %153 : vector<128x1xf32>
    %155 = math.rsqrt %154 : vector<128x1xf32>
    %156 = vector.broadcast %155 : vector<128x1xf32> to vector<128x32xf32>
    %157 = arith.mulf %147, %156 : vector<128x32xf32>
    %158 = vector.broadcast %139 : vector<1x32xf32> to vector<128x32xf32>
    %159 = arith.mulf %158, %157 : vector<128x32xf32>
    %160 = vector.broadcast %141 : vector<1x32xf32> to vector<128x32xf32>
    %161 = arith.addf %159, %160 : vector<128x32xf32>
    %162 = arith.truncf %161 : vector<128x32xf32> to vector<128x32xbf16>
    %c0_70 = arith.constant 0 : index
    %c0_71 = arith.constant 0 : index
    %c0_72 = arith.constant 0 : index
    %163 = vector.load %arg7[%c0_70, %c0_71, %c0_72] : memref<1x32x64xbf16, #tpu.memory_space<vmem>>, vector<1x32x64xbf16>
    %164 = vector.shape_cast %163 : vector<1x32x64xbf16> to vector<32x64xbf16>
    %cst_73 = arith.constant dense<0.000000e+00> : vector<128x64xf32>
    %165 = tpu.matmul %162, %164, %cst_73 {dimension_numbers = #tpu.dot_dimension_numbers<[1], [0], [0], [1], [0, 0, 1, 1], [], []>} : vector<128x32xbf16>, vector<32x64xbf16>, vector<128x64xf32> -> vector<128x64xf32>
    %c0_74 = arith.constant 0 : index
    %c6 = arith.constant 6 : index
    %c0_75 = arith.constant 0 : index
    %166 = vector.load %arg9[%c0_74, %c6, %c0_75] : memref<1x10x64xf32, #tpu.memory_space<vmem>>, vector<1x1x64xf32>
    %167 = vector.shape_cast %166 : vector<1x1x64xf32> to vector<1x64xf32>
    %168 = vector.broadcast %167 : vector<1x64xf32> to vector<128x64xf32>
    %169 = arith.addf %165, %168 : vector<128x64xf32>
    %cst_76 = arith.constant 0.000000e+00 : f32
    %170 = vector.broadcast %cst_76 : f32 to vector<128x64xf32>
    %171 = arith.maximumf %169, %170 : vector<128x64xf32>
    %172 = arith.truncf %171 : vector<128x64xf32> to vector<128x64xbf16>
    %c0_77 = arith.constant 0 : index
    %c0_78 = arith.constant 0 : index
    %c0_79 = arith.constant 0 : index
    %173 = vector.load %arg8[%c0_77, %c0_78, %c0_79] : memref<1x64x32xbf16, #tpu.memory_space<vmem>>, vector<1x64x32xbf16>
    %174 = vector.shape_cast %173 : vector<1x64x32xbf16> to vector<64x32xbf16>
    %cst_80 = arith.constant dense<0.000000e+00> : vector<128x32xf32>
    %175 = tpu.matmul %172, %174, %cst_80 {dimension_numbers = #tpu.dot_dimension_numbers<[1], [0], [0], [1], [0, 0, 1, 1], [], []>} : vector<128x64xbf16>, vector<64x32xbf16>, vector<128x32xf32> -> vector<128x32xf32>
    %c0_81 = arith.constant 0 : index
    %c7 = arith.constant 7 : index
    %c0_82 = arith.constant 0 : index
    %176 = vector.load %arg9[%c0_81, %c7, %c0_82] : memref<1x10x64xf32, #tpu.memory_space<vmem>>, vector<1x1x32xf32>
    %177 = vector.shape_cast %176 : vector<1x1x32xf32> to vector<1x32xf32>
    %178 = vector.broadcast %177 : vector<1x32xf32> to vector<128x32xf32>
    %179 = arith.addf %175, %178 : vector<128x32xf32>
    %180 = arith.addf %179, %161 : vector<128x32xf32>
    %c0_83 = arith.constant 0 : index
    %c8 = arith.constant 8 : index
    %c0_84 = arith.constant 0 : index
    %181 = vector.load %arg9[%c0_83, %c8, %c0_84] : memref<1x10x64xf32, #tpu.memory_space<vmem>>, vector<1x1x32xf32>
    %182 = vector.shape_cast %181 : vector<1x1x32xf32> to vector<1x32xf32>
    %c0_85 = arith.constant 0 : index
    %c9 = arith.constant 9 : index
    %c0_86 = arith.constant 0 : index
    %183 = vector.load %arg9[%c0_85, %c9, %c0_86] : memref<1x10x64xf32, #tpu.memory_space<vmem>>, vector<1x1x32xf32>
    %184 = vector.shape_cast %183 : vector<1x1x32xf32> to vector<1x32xf32>
    %cst_87 = arith.constant dense<0.000000e+00> : vector<128xf32>
    %185 = vector.multi_reduction <add>, %180, %cst_87 [1] : vector<128x32xf32> to vector<128xf32>
    %186 = vector.shape_cast %185 : vector<128xf32> to vector<128x1xf32>
    %cst_88 = arith.constant 3.200000e+01 : f32
    %187 = vector.broadcast %cst_88 : f32 to vector<128x1xf32>
    %188 = arith.divf %186, %187 : vector<128x1xf32>
    %189 = vector.broadcast %188 : vector<128x1xf32> to vector<128x32xf32>
    %190 = arith.subf %180, %189 : vector<128x32xf32>
    %191 = arith.mulf %190, %190 : vector<128x32xf32>
    %cst_89 = arith.constant dense<0.000000e+00> : vector<128xf32>
    %192 = vector.multi_reduction <add>, %191, %cst_89 [1] : vector<128x32xf32> to vector<128xf32>
    %193 = vector.shape_cast %192 : vector<128xf32> to vector<128x1xf32>
    %cst_90 = arith.constant 3.200000e+01 : f32
    %194 = vector.broadcast %cst_90 : f32 to vector<128x1xf32>
    %195 = arith.divf %193, %194 : vector<128x1xf32>
    %cst_91 = arith.constant 9.99999996E-13 : f32
    %196 = vector.broadcast %cst_91 : f32 to vector<128x1xf32>
    %197 = arith.addf %195, %196 : vector<128x1xf32>
    %198 = math.rsqrt %197 : vector<128x1xf32>
    %199 = vector.broadcast %198 : vector<128x1xf32> to vector<128x32xf32>
    %200 = arith.mulf %190, %199 : vector<128x32xf32>
    %201 = vector.broadcast %182 : vector<1x32xf32> to vector<128x32xf32>
    %202 = arith.mulf %201, %200 : vector<128x32xf32>
    %203 = vector.broadcast %184 : vector<1x32xf32> to vector<128x32xf32>
    %204 = arith.addf %202, %203 : vector<128x32xf32>
    %205 = vector.shape_cast %204 : vector<128x32xf32> to vector<1x128x32xf32>
    %c0_92 = arith.constant 0 : index
    %c0_93 = arith.constant 0 : index
    %c0_94 = arith.constant 0 : index
    %206 = vector.load %arg12[%c0_92, %c0_93, %c0_94] : memref<1x128x32xf32, #tpu.memory_space<vmem>>, vector<1x128x32xf32>
    tpu.vector_store %arg12[%c0_92, %c0_93, %c0_94], %205 {strides = array<i32>} : memref<1x128x32xf32, #tpu.memory_space<vmem>>, vector<1x128x32xf32>,
    %c0_95 = arith.constant 0 : index
    %c0_96 = arith.constant 0 : index
    %c0_97 = arith.constant 0 : index
    %c0_98 = arith.constant 0 : index
    %207 = vector.load %arg10[%c0_95, %c0_96, %c0_97, %c0_98] : memref<1x1x128x32xf32, #tpu.memory_space<vmem>>, vector<1x1x128x32xf32>
    %208 = vector.shape_cast %207 : vector<1x1x128x32xf32> to vector<1x128x32xf32>
    %209 = vector.shape_cast %205 : vector<1x128x32xf32> to vector<1x1x128x32xf32>
    tpu.vector_store %arg10[%c0_95, %c0_96, %c0_97, %c0_98], %209 {strides = array<i32>} : memref<1x1x128x32xf32, #tpu.memory_space<vmem>>, vector<1x1x128x32xf32>,
    return
  }
  func.func @transform_0(%arg0: i32, %arg1: i32) -> (i32, i32, i32) {
    %c0_i32 = arith.constant 0 : i32
    %c0_i32_0 = arith.constant 0 : i32
    %c0_i32_1 = arith.constant 0 : i32
    return %arg0, %c0_i32, %c0_i32_0 : i32, i32, i32
  }
  func.func @transform_1(%arg0: i32, %arg1: i32) -> (i32, i32, i32) {
    %c0_i32 = arith.constant 0 : i32
    %c0_i32_0 = arith.constant 0 : i32
    %c0_i32_1 = arith.constant 0 : i32
    %c0_i32_2 = arith.constant 0 : i32
    return %c0_i32, %c0_i32_0, %c0_i32_1 : i32, i32, i32
  }
  func.func @transform_2(%arg0: i32, %arg1: i32) -> (i32, i32, i32, i32) {
    %c0_i32 = arith.constant 0 : i32
    %c0_i32_0 = arith.constant 0 : i32
    %c0_i32_1 = arith.constant 0 : i32
    %c0_i32_2 = arith.constant 0 : i32
    return %arg0, %c0_i32, %c0_i32_0, %c0_i32_1 : i32, i32, i32, i32
  }
  func.func @transform_3(%arg0: i32, %arg1: i32) -> (i32, i32, i32, i32) {
    %c0_i32 = arith.constant 0 : i32
    %c0_i32_0 = arith.constant 0 : i32
    %c0_i32_1 = arith.constant 0 : i32
    %c0_i32_2 = arith.constant 0 : i32
    return %arg1, %c0_i32, %c0_i32_0, %c0_i32_1 : i32, i32, i32, i32
  }
  func.func @transform_4(%arg0: i32, %arg1: i32) -> (i32, i32, i32) {
    %c0_i32 = arith.constant 0 : i32
    %c0_i32_0 = arith.constant 0 : i32
    %c0_i32_1 = arith.constant 0 : i32
    return %arg1, %c0_i32, %c0_i32_0 : i32, i32, i32
  }
  func.func @transform_5(%arg0: i32, %arg1: i32) -> (i32, i32, i32) {
    %c0_i32 = arith.constant 0 : i32
    %c0_i32_0 = arith.constant 0 : i32
    %c0_i32_1 = arith.constant 0 : i32
    return %arg1, %c0_i32, %c0_i32_0 : i32, i32, i32
  }
  func.func @transform_6(%arg0: i32, %arg1: i32) -> (i32, i32, i32) {
    %c0_i32 = arith.constant 0 : i32
    %c0_i32_0 = arith.constant 0 : i32
    %c0_i32_1 = arith.constant 0 : i32
    return %arg1, %c0_i32, %c0_i32_0 : i32, i32, i32
  }
  func.func @transform_7(%arg0: i32, %arg1: i32) -> (i32, i32, i32) {
    %c0_i32 = arith.constant 0 : i32
    %c0_i32_0 = arith.constant 0 : i32
    %c0_i32_1 = arith.constant 0 : i32
    return %arg1, %c0_i32, %c0_i32_0 : i32, i32, i32
  }
  func.func @transform_8(%arg0: i32, %arg1: i32) -> (i32, i32, i32, i32) {
    %c0_i32 = arith.constant 0 : i32
    %c0_i32_0 = arith.constant 0 : i32
    %c0_i32_1 = arith.constant 0 : i32
    return %arg1, %arg0, %c0_i32, %c0_i32_0 : i32, i32, i32, i32
  }
  func.func @transform_9(%arg0: i32, %arg1: i32) -> (i32, i32, i32, i32) {
    %c0_i32 = arith.constant 0 : i32
    %c0_i32_0 = arith.constant 0 : i32
    %c0_i32_1 = arith.constant 0 : i32
    %c0_i32_2 = arith.constant 0 : i32
    return %arg0, %c0_i32, %c0_i32_0, %c0_i32_1 : i32, i32, i32, i32
  }
}

</mosaic_0001>

<bundles_post_ra>
// kernel: tpu_custom_call.1
= control target key start
LH: loop header
LB: loop body
LE: loop exit
PB: predicated region body
PF: predicated region fallthrough
CT: control target
= control target key end

     0   :  { %s8968_s0 = inlined_call_operand.vmem [shape: f32[2,128,32], index: 0, kind: input, shape index: {}]   ;;  %s8969_s1 = inlined_call_operand.vmem [shape: f32[1,128,32], index: 1, kind: input, shape index: {}]   ;;  %s8970_s2 = inlined_call_operand.vmem [shape: f32[2,1,1,128], index: 2, kind: input, shape index: {}]   ;;  %s8971_s3 = inlined_call_operand.vmem [shape: bf16[2,3,32,32], index: 3, kind: input, shape index: {}]   ;;  %s8972_s4 = inlined_call_operand.vmem [shape: bf16[2,32,32], index: 4, kind: input, shape index: {}]   ;;  %s8973_s5 = inlined_call_operand.vmem [shape: bf16[2,32,64], index: 5, kind: input, shape index: {}]   ;;  %s8974_s6 = inlined_call_operand.vmem [shape: bf16[2,64,32], index: 6, kind: input, shape index: {}]   ;;  %s8975_s7 = inlined_call_operand.vmem [shape: f32[2,10,64], index: 7, kind: input, shape index: {}]   ;;  %s8976_s8 = inlined_call_operand.vmem [shape: f32[2,2,128,32], index: 8, kind: output, shape index: {0}]   ;;  %s8977_s9 = inlined_call_operand.hbm [shape: f32[2,4,128,128], index: 9, kind: output, shape index: {1}]  }
   0x1   :  { %9016 = sst [smem:[#allocation61_spill]] %s8968_s0 }
   0x2   :  { %9017 = sst [smem:[#allocation62_spill]] %s8971_s3 }
   0x3   :  { %9018 = sst [smem:[#allocation63_spill]] %s8972_s4 }
   0x4   :  { %15 = vsyncpa [#allocation4], 0 }
   0x5   :  { %17 = vsyncpa [#allocation4 + $0x1], 0  ;;  %s6170_s30 = smov 0   ;;  %s6172_s10 = smov 0  }
   0x6   :  { %s6174_s11 = smov 0   ;;  %s6176_s12 = smov 0  }
   0x7   :  { %s6178_s13 = smov 0   ;;  %s6180_s14 = smov 0  }
   0x8   :  { %s6182_s15 = smov 0   ;;  %s6184_s16 = smov 0  }
   0x9 LB: > { %9019 = sst [smem:[#allocation6_spill]] %s6082_s30  ;;  %s5237_s17 = sadd.s32 4294967295, %s6110_s16   ;;  %s6110_s16 = sphi %s6184_s16, %s23_s16   ;;  %s6106_s15 = sphi %s6182_s15, %s9165_s15   ;;  %s6102_s14 = sphi %s6180_s14, %s9164_s14   ;;  %s6098_s13 = sphi %s6178_s13, %s9163_s13   ;;  %s6094_s12 = sphi %s6176_s12, %s9162_s12   ;;  %s6090_s11 = sphi %s6174_s11, %s9161_s11   ;;  %s6086_s10 = sphi %s6172_s10, %s9160_s10   ;;  %s6082_s30 = sphi %s6170_s30, %s9159_s30  }
   0xa   : > { %9020 = sst [smem:[#allocation7_spill]] %s6086_s10  ;;  %s5238_s18 = sadd.s32 4294967294, %s6110_s16  }
   0xb   : > { %9021 = sst [smem:[#allocation8_spill]] %s6090_s11  ;;  %s32_s19 = sadd.s32 1, %s6102_s14 }
   0xc   : > { %9022 = sst [smem:[#allocation9_spill]] %s6102_s14  ;;  %p33_p0 = scmp.ge.s32.totalorder %s32_s19, 2 }
   0xd   : > { %9023 = sst [smem:[#allocation10_spill]] %s6106_s15  ;;  %s35_s20 = sadd.s32 1, %s6106_s15 }
   0xe   : > { %9024 = sst [smem:[#allocation11_spill]] %s6110_s16  ;;  %p283_p1 = scmp.ne.s32.totalorder %s6090_s11, %s6086_s10 }
   0xf   : > { %p284_p2 = scmp.eq.s32.totalorder %s5237_s17, 3  ;;  %s9167_s19 = smov (%p33_p0, %s32_s19), 0 }
  0x10   : > { %9025 = sst [smem:[#allocation12_spill]] %s9167_s19  ;;  %s9169_s20 = smov (!%p33_p0, %s35_s20), %s6106_s15 }
  0x11   : > { %p6219_p3 = por %p284_p2, %p283_p1  ;;  %p289_p4 = scmp.ne.s32.totalorder %s6086_s10, %s6082_s30 }
  0x12   : > { %p37_p5 = scmp.ge.s32.totalorder %s9169_s20, 2  ;;  %p290_p6 = scmp.eq.s32.totalorder %s5238_s18, 3 }
  0x13   : > { %s9026_s21 = scalar_select %p6219_p3, 1, 0 }
  0x14   : > { %p5241_p7 = scmp.ge.s32.totalorder %s6110_s16, 1  ;;  %p365_p8 = scmp.lt.s32.totalorder %s6110_s16, 5 }
  0x15   : > { %9027 = sst [smem:[#allocation13_spill]] %s9026_s21  ;;  %s9171_s20 = smov (%p37_p5, %s9169_s20), 0 }
  0x16   : > { %9028 = sst [smem:[#allocation14_spill]] %s9171_s20  ;;  %p6229_p9 = por %p290_p6, %p289_p4 }
  0x17   : > { %p366_p10 = pnand %p5241_p7, %p365_p8  ;;  %s270_s23 = ssub.s32 %s6106_s15, %s9171_s20 }
  0x18   : > { %s9029_s22 = scalar_select %p6229_p9, 1, 0 }
  0x19   : > { %s273_s24 = sadd.s32 1, %s6090_s11  ;;  %p271_p11 = scmp.eq.s32.totalorder %s270_s23, 0 }
  0x1a   : > { %9030 = sst [smem:[#allocation15_spill]] %s9029_s22  ;;  %369 = sbr.rel (%p366_p10) target bundleno = 4617 (0x1209), region = 52 }
  0x1b   : > { %s6237_s25 = scalar_select %p271_p11, %s6090_s11, %s273_s24  }
  0x1d   : > { %9031 = sst [smem:[#allocation16_spill]] %s6237_s25 }
  0x1f   : > { %s8981_s26 = sand.u32 1, %s6086_s10   ;;  %p438_p12 = scmp.lt.s32.totalorder %s6098_s13, 1 }
  0x20   : > { %s5242_s27 = sshll.u32 %s8981_s26, 9  ;;  %p446_p13 = scmp.lt.s32.totalorder %s6094_s12, 1 }
  0x21   : > { %s6245_s28 = scalar_select %p438_p12, %s6098_s13, 1 }
  0x22   : > { %s447_s29 = scalar_select %p446_p13, %s6094_s12, 1 }
  0x23   : > { %s5459_s17 = sshll.u32 %s6245_s28, 7  ;;  %s9032_s0 = sld [smem:[#allocation61_spill]] }
  0x24   : > { %s5483_s14 = smul.u32 48, %s447_s29  ;;  %s5460_s25 = sshll.u32 %s447_s29, 4 }
  0x25   : > { %s5462_s26 = sshll.u32 %s447_s29, 5  ;;  %s9033_s3 = sld [smem:[#allocation62_spill]] }
  0x26   : > { %s9034_s4 = sld [smem:[#allocation63_spill]]  ;;  %s6271_s24 = scalar_lea.vmem %s8973_s5, %s5460_s25 }
  0x27   : > { %s6281_s11 = scalar_lea.vmem %s8975_s7, %s5460_s25  ;;  %s6289_s18 = scalar_lea.vmem [#allocation3], %s5242_s27 }
  0x28   : > { %p5257_p0 = scmp.ne.s32.totalorder %s6094_s12, 0 }
  0x29   : > { %s6256_s15 = scalar_lea.vmem %s9032_s0, %s5459_s17  ;;  %s6276_s17 = scalar_lea.vmem %s8974_s6, %s5462_s26 }
  0x2a   : > { %484 = sbr.rel (%p5257_p0) target bundleno = 67 (0x43), region = 56 }
  0x2b   : > { %s6261_s30 = scalar_lea.vmem %s9033_s3, %s5483_s14  ;;  %s5254_s14 = sshll.u32 %s6245_s28, 4 }
  0x2c   : > { %s6266_s10 = scalar_lea.vmem %s9034_s4, %s5460_s25  ;;  %s477_s22 = sadd.s32 %s5462_s26, %s5254_s14 }
  0x2d   : > { %s5256_s16 = sshll.u32 %s477_s22, 3 }
  0x2e   : > { %s6287_s4 = scalar_lea.vmem %s8976_s8, %s5256_s16 }
  0x2f   : > { %v485_v0 = vld [vmem:[%s6256_s15] sm:$0xff]  ;;  %vm533_vm0 = vcmask 261120   ;;  %v486_v2 = vld [vmem:[%s6256_s15 + $0x8] sm:$0xff]  ;;  %v487_v5 = vld [vmem:[%s6256_s15 + $0x10] sm:$0xff] }
  0x30   : > { %v501_v1 = vld [vmem:[%s8969_s1] sm:$0xff]  ;;  %v502_v4 = vld [vmem:[%s8969_s1 + $0x8] sm:$0xff]  ;;  %v503_v6 = vld [vmem:[%s8969_s1 + $0x10] sm:$0xff] }
  0x31   : > { %v517_v3 = vadd.f32 %v501_v1, %v485_v0  ;;  %v518_v7 = vadd.f32 %v502_v4, %v486_v2  ;;  %v519_v8 = vadd.f32 %v503_v6, %v487_v5  ;;  %v488_v9 = vld [vmem:[%s6256_s15 + $0x18] sm:$0xff]  ;;  %v489_v11 = vld [vmem:[%s6256_s15 + $0x20] sm:$0xff]  ;;  %v490_v14 = vld [vmem:[%s6256_s15 + $0x28] sm:$0xff] }
  0x32   : > { %v504_v10 = vld [vmem:[%s8969_s1 + $0x18] sm:$0xff]  ;;  %v505_v13 = vld [vmem:[%s8969_s1 + $0x20] sm:$0xff]  ;;  %v506_v15 = vld [vmem:[%s8969_s1 + $0x28] sm:$0xff] }
  0x33   : > { %534 = vst.msk [vmem:[#allocation2] sm:$0xff] %vm533_vm0, %v517_v3  ;;  %v520_v12 = vadd.f32 %v504_v10, %v488_v9  ;;  %v521_v16 = vadd.f32 %v505_v13, %v489_v11  ;;  %v522_v17 = vadd.f32 %v506_v15, %v490_v14  ;;  %v491_v18 = vld [vmem:[%s6256_s15 + $0x30] sm:$0xff]  ;;  %v492_v20 = vld [vmem:[%s6256_s15 + $0x38] sm:$0xff]  ;;  %v493_v23 = vld [vmem:[%s6256_s15 + $0x40] sm:$0xff] }
  0x34   : > { %535 = vst.msk [vmem:[#allocation2 + $0x8] sm:$0xff] %vm533_vm0, %v518_v7  ;;  %v507_v19 = vld [vmem:[%s8969_s1 + $0x30] sm:$0xff]  ;;  %v508_v22 = vld [vmem:[%s8969_s1 + $0x38] sm:$0xff]  ;;  %v509_v24 = vld [vmem:[%s8969_s1 + $0x40] sm:$0xff] }
  0x35   : > { %536 = vst.msk [vmem:[#allocation2 + $0x10] sm:$0xff] %vm533_vm0, %v519_v8  ;;  %v523_v21 = vadd.f32 %v507_v19, %v491_v18  ;;  %v524_v25 = vadd.f32 %v508_v22, %v492_v20  ;;  %v494_v26 = vld [vmem:[%s6256_s15 + $0x48] sm:$0xff]  ;;  %v495_v28 = vld [vmem:[%s6256_s15 + $0x50] sm:$0xff]  ;;  %v525_v29 = vadd.f32 %v509_v24, %v493_v23  ;;  %v496_v31 = vld [vmem:[%s6256_s15 + $0x58] sm:$0xff] }
  0x36   : > { %537 = vst.msk [vmem:[#allocation2 + $0x18] sm:$0xff] %vm533_vm0, %v520_v12  ;;  %v510_v27 = vld [vmem:[%s8969_s1 + $0x48] sm:$0xff]  ;;  %v511_v30 = vld [vmem:[%s8969_s1 + $0x50] sm:$0xff]  ;;  %v512_v32 = vld [vmem:[%s8969_s1 + $0x58] sm:$0xff] }
  0x37   : > { %538 = vst.msk [vmem:[#allocation2 + $0x20] sm:$0xff] %vm533_vm0, %v521_v16  ;;  %v526_v33 = vadd.f32 %v510_v27, %v494_v26  ;;  %v497_v34 = vld [vmem:[%s6256_s15 + $0x60] sm:$0xff]  ;;  %v527_v36 = vadd.f32 %v511_v30, %v495_v28  ;;  %v498_v37 = vld [vmem:[%s6256_s15 + $0x68] sm:$0xff]  ;;  %v528_v39 = vadd.f32 %v512_v32, %v496_v31  ;;  %v499_v40 = vld [vmem:[%s6256_s15 + $0x70] sm:$0xff] }
  0x38   : > { %539 = vst.msk [vmem:[#allocation2 + $0x28] sm:$0xff] %vm533_vm0, %v522_v17  ;;  %v513_v35 = vld [vmem:[%s8969_s1 + $0x60] sm:$0xff]  ;;  %v514_v38 = vld [vmem:[%s8969_s1 + $0x68] sm:$0xff]  ;;  %v515_v41 = vld [vmem:[%s8969_s1 + $0x70] sm:$0xff] }
  0x39   : > { %540 = vst.msk [vmem:[#allocation2 + $0x30] sm:$0xff] %vm533_vm0, %v523_v21  ;;  %v529_v42 = vadd.f32 %v513_v35, %v497_v34  ;;  %v500_v43 = vld [vmem:[%s6256_s15 + $0x78] sm:$0xff]  ;;  %v530_v45 = vadd.f32 %v514_v38, %v498_v37  ;;  %v531_v46 = vadd.f32 %v515_v41, %v499_v40 }
  0x3a   : > { %541 = vst.msk [vmem:[#allocation2 + $0x38] sm:$0xff] %vm533_vm0, %v524_v25  ;;  %v516_v44 = vld [vmem:[%s8969_s1 + $0x78] sm:$0xff] }
  0x3b   : > { %542 = vst.msk [vmem:[#allocation2 + $0x40] sm:$0xff] %vm533_vm0, %v525_v29  ;;  %v532_v47 = vadd.f32 %v516_v44, %v500_v43 }
  0x3c   : > { %543 = vst.msk [vmem:[#allocation2 + $0x48] sm:$0xff] %vm533_vm0, %v526_v33 }
  0x3d   : > { %544 = vst.msk [vmem:[#allocation2 + $0x50] sm:$0xff] %vm533_vm0, %v527_v36 }
  0x3e   : > { %545 = vst.msk [vmem:[#allocation2 + $0x58] sm:$0xff] %vm533_vm0, %v528_v39 }
  0x3f   : > { %546 = vst.msk [vmem:[#allocation2 + $0x60] sm:$0xff] %vm533_vm0, %v529_v42 }
  0x40   : > { %547 = vst.msk [vmem:[#allocation2 + $0x68] sm:$0xff] %vm533_vm0, %v530_v45 }
  0x41   : > { %548 = vst.msk [vmem:[#allocation2 + $0x70] sm:$0xff] %vm533_vm0, %v531_v46 }
  0x42   : > { %549 = vst.msk [vmem:[#allocation2 + $0x78] sm:$0xff] %vm533_vm0, %v532_v47 }
  0x43 PF: > { %v5467_v48 = vld [vmem:[%s6261_s30 + $0x18] sm:$0xff]  ;;  %v5466_v49 = vld [vmem:[%s6261_s30 + $0x10] sm:$0xff]  ;;  %v6374_v50 = vld [vmem:[#allocation2] sm:$0xff]  ;;  %vm592_vm1 = vcmask 261120   ;;  %vm931_vm2 = vcmask 64512   ;;  %s9052_s20 = scalar_lea.vmem %s8970_s2, %s6245_s28  ;;  %p5322_p1 = scmp.ne.s32.totalorder %s6094_s12, 1 }
  0x44   : > { %9035 = vst [vmem:[#allocation17_spill] sm:$0xff] %v6374_v50  ;;  %691 = vmatpush.bf16.msra.mxu1 %v5467_v48  ;;  %5481 = vmatpush.bf16.msra.mxu2 %v5467_v48  ;;  %v6376_v51 = vld [vmem:[#allocation2 + $0x8] sm:$0xff]  ;;  %v6378_v52 = vld [vmem:[#allocation2 + $0x50] sm:$0xff]  ;;  %v6396_v57 = vld [vmem:[#allocation2 + $0x18] sm:$0xff] }
  0x45   : > { %9036 = vst [vmem:[#allocation18_spill] sm:$0xff] %v6376_v51  ;;  %v6380_v53 = vld [vmem:[#allocation2 + $0x58] sm:$0xff]  ;;  %v6384_v54 = vpack.c.bf16 %v6376_v51, %v6374_v50  ;;  %v6394_v56 = vld [vmem:[#allocation2 + $0x10] sm:$0xff]  ;;  %v6414_v62 = vld [vmem:[#allocation2 + $0x20] sm:$0xff] }
  0x46   : > { %9037 = vst [vmem:[#allocation19_spill] sm:$0xff] %v6378_v52  ;;  %v6388_v55 = vpack.c.bf16 %v6380_v53, %v6378_v52  ;;  %v6398_v58 = vld [vmem:[#allocation2 + $0x60] sm:$0xff]  ;;  %v6404_v60 = vpack.c.bf16 %v6396_v57, %v6394_v56  ;;  %v6416_v63 = vld [vmem:[#allocation2 + $0x28] sm:$0xff]  ;;  %v6436_v6 = vld [vmem:[#allocation2 + $0x30] sm:$0xff] }
  0x47   : > { %9038 = vst [vmem:[#allocation20_spill] sm:$0xff] %v6380_v53  ;;  %v6400_v59 = vld [vmem:[#allocation2 + $0x68] sm:$0xff]  ;;  %v6424_v2 = vpack.c.bf16 %v6416_v63, %v6414_v62  ;;  %v5464_v5 = vld [vmem:[%s6261_s30] sm:$0xff]  ;;  %v6438_v7 = vld [vmem:[#allocation2 + $0x38] sm:$0xff] }
  0x48   : > { %692 = vmatpush.bf16.msra.mxu1 %v5466_v49  ;;  %5482 = vmatpush.bf16.msra.mxu2 %v5466_v49  ;;  %9039 = vst [vmem:[#allocation21_spill] sm:$0xff] %v6394_v56  ;;  %v6408_v61 = vpack.c.bf16 %v6400_v59, %v6398_v58  ;;  %v6418_v0 = vld [vmem:[#allocation2 + $0x70] sm:$0xff]  ;;  %v5465_v4 = vld [vmem:[%s6261_s30 + $0x8] sm:$0xff]  ;;  %v6446_v8 = vpack.c.bf16 %v6438_v7, %v6436_v6  ;;  %v6450_v9 = vld [vmem:[#allocation2 + $0x40] sm:$0xff] }
  0x49   : > { %9040 = vst [vmem:[#allocation22_spill] sm:$0xff] %v6396_v57  ;;  %v6420_v1 = vld [vmem:[#allocation2 + $0x78] sm:$0xff]  ;;  %623 = vmatpush.bf16.msra.mxu0 %v5465_v4  ;;  %5479 = vmatpush.bf16.msra.mxu3 %v5465_v4  ;;  %v6452_v10 = vld [vmem:[#allocation2 + $0x48] sm:$0xff]  ;;  %v6473_v13 = vld [vmem:[%s6281_s11 + $0x1] ss:$0 sm:$0xff] }
  0x4a   : > { %9041 = vst [vmem:[#allocation23_spill] sm:$0xff] %v6398_v58  ;;  %v6428_v3 = vpack.c.bf16 %v6420_v1, %v6418_v0  ;;  %v6460_v11 = vpack.c.bf16 %v6452_v10, %v6450_v9 }
  0x4b   : > { %5286 = vmatmul.msk.bf16.vlgmr.msra.gmra.mxu1 %vm592_vm1, %v6384_v54  ;;  %5291 = vmatmul.msk.bf16.vlgmr.msra.gmra.mxu2 %vm592_vm1, %v6388_v55  ;;  %9042 = vst [vmem:[#allocation24_spill] sm:$0xff] %v6400_v59 }
  0x4c   : > { %9043 = vst [vmem:[#allocation25_spill] sm:$0xff] %v6414_v62 }
  0x4d   : > { %9044 = vst [vmem:[#allocation26_spill] sm:$0xff] %v6416_v63  ;;  %624 = vmatpush.bf16.msra.mxu0 %v5464_v5  ;;  %5480 = vmatpush.bf16.msra.mxu3 %v5464_v5 }
  0x4e   : > { %9045 = vst [vmem:[#allocation27_spill] sm:$0xff] %v6418_v0 }
  0x4f   : > { %9046 = vst [vmem:[#allocation28_spill] sm:$0xff] %v6420_v1 }
  0x50   : > { %9047 = vst [vmem:[#allocation29_spill] sm:$0xff] %v6436_v6  ;;  %5266 = vmatmul.msk.bf16.vlgmr.msra.gmra.mxu0 %vm592_vm1, %v6384_v54  ;;  %5271 = vmatmul.msk.bf16.vlgmr.msra.gmra.mxu3 %vm592_vm1, %v6388_v55 }
  0x51   : > { %9048 = vst [vmem:[#allocation30_spill] sm:$0xff] %v6438_v7 }
  0x52   : > { %9049 = vst [vmem:[#allocation31_spill] sm:$0xff] %v6450_v9 }
  0x53   : > { %9050 = vst [vmem:[#allocation32_spill] sm:$0xff] %v6452_v10 }
  0x5b   : > { %5287 = vmatmul.msk.bf16.gmra.mxu1 %vm592_vm1, %v6404_v60  ;;  %5292 = vmatmul.msk.bf16.gmra.mxu2 %vm592_vm1, %v6408_v61 }
  0x60   : > { %5267 = vmatmul.msk.bf16.gmra.mxu0 %vm592_vm1, %v6404_v60  ;;  %5272 = vmatmul.msk.bf16.gmra.mxu3 %vm592_vm1, %v6408_v61 }
  0x6b   : > { %5288 = vmatmul.msk.bf16.gmra.mxu1 %vm592_vm1, %v6424_v2  ;;  %5293 = vmatmul.msk.bf16.gmra.mxu2 %vm592_vm1, %v6428_v3 }
  0x70   : > { %5268 = vmatmul.msk.bf16.gmra.mxu0 %vm592_vm1, %v6424_v2  ;;  %5273 = vmatmul.msk.bf16.gmra.mxu3 %vm592_vm1, %v6428_v3 }
  0x7b   : > { %5289 = vmatmul.msk.bf16.gmra.mxu1 %vm592_vm1, %v6446_v8 }
  0x80   : > { %5269 = vmatmul.msk.bf16.gmra.mxu0 %vm592_vm1, %v6446_v8 }
  0x8b   : > { %5290 = vmatmul.msk.bf16.gmra.mxu1 %vm592_vm1, %v6460_v11 }
  0x90   : > { %5270 = vmatmul.msk.bf16.gmra.mxu0 %vm592_vm1, %v6460_v11 }
  0xc8   : > { %v694_v12 = vpop.f32.mrf.mxu1 }
  0xc9   : > { %v695_v14 = vadd.f32 %v6473_v13, %v694_v12 }
  0xcb   : > { %v818_v17 = vpack.c.bf16 %v695_v14, %v695_v14 }
  0xcd   : > { %v907_v20 = vunpack.c.l.b16 %v818_v17 }
  0xce   : > { %v719_v15 = vpop.f32.mrf.mxu2 }
  0xcf   : > { %v720_v17 = vadd.f32 %v6473_v13, %v719_v15 }
  0xd0   : > { %v696_v16 = vpop.f32.mrf.mxu1 }
  0xd1   : > { %v697_v18 = vadd.f32 %v6473_v13, %v696_v16 }
  0xd3   : > { %v819_v19 = vpack.c.bf16 %v697_v18, %v697_v18 }
  0xd5   : > { %v908_v21 = vunpack.c.l.b16 %v819_v19 }
  0xd6   : > { %v721_v22 = vpop.f32.mrf.mxu2 }
  0xd7   : > { %v6477_v23 = vpack.c.b16 %v908_v21, %v907_v20  ;;  %v722_v5 = vadd.f32 %v6473_v13, %v721_v22  ;;  %v828_v21 = vpack.c.bf16 %v720_v17, %v720_v17 }
  0xd8   : > { %v699_v24 = vpop.f32.mrf.mxu1 }
  0xd9   : > { %v700_v25 = vadd.f32 %v6473_v13, %v699_v24  ;;  %v829_v19 = vpack.c.bf16 %v722_v5, %v722_v5  ;;  %v917_v22 = vunpack.c.l.b16 %v828_v21 }
  0xdb   : > { %v820_v28 = vpack.c.bf16 %v700_v25, %v700_v25  ;;  %v918_v24 = vunpack.c.l.b16 %v829_v19 }
  0xdd   : > { %v909_v31 = vunpack.c.l.b16 %v820_v28 }
  0xde   : > { %v724_v26 = vpop.f32.mrf.mxu2 }
  0xdf   : > { %v725_v44 = vadd.f32 %v6473_v13, %v724_v26 }
  0xe0   : > { %v701_v27 = vpop.f32.mrf.mxu1 }
  0xe1   : > { %v702_v29 = vadd.f32 %v6473_v13, %v701_v27  ;;  %v830_v49 = vpack.c.bf16 %v725_v44, %v725_v44  ;;  %v6497_v27 = vpack.c.b16 %v918_v24, %v917_v22 }
  0xe3   : > { %v821_v30 = vpack.c.bf16 %v702_v29, %v702_v29  ;;  %v919_v18 = vunpack.c.l.b16 %v830_v49  ;;  %v972_v29 = vsel %vm931_vm2, %v6497_v27, 0 }
  0xe5   : > { %v910_v32 = vunpack.c.l.b16 %v821_v30 }
  0xe6   : > { %v726_v33 = vpop.f32.mrf.mxu2 }
  0xe7   : > { %v6481_v34 = vpack.c.b16 %v910_v32, %v909_v31  ;;  %v727_v40 = vadd.f32 %v6473_v13, %v726_v33 }
  0xe8   : > { %v704_v35 = vpop.f32.mrf.mxu1 }
  0xe9   : > { %v831_v46 = vpack.c.bf16 %v727_v40, %v727_v40 }
  0xeb   : > { %v920_v12 = vunpack.c.l.b16 %v831_v46 }
  0xed   : > { %v6493_v20 = vpack.c.b16 %v920_v12, %v919_v18 }
  0xee   : > { %v729_v36 = vpop.f32.mrf.mxu2 }
  0xef   : > { %v730_v38 = vadd.f32 %v6473_v13, %v729_v36  ;;  %v975_v25 = vsel %vm931_vm2, %v6493_v20, 0 }
  0xf0   : > { %v706_v37 = vpop.f32.mrf.mxu1 }
  0xf1   : > { %v832_v41 = vpack.c.bf16 %v730_v38, %v730_v38 }
  0xf3   : > { %v921_v47 = vunpack.c.l.b16 %v832_v41  ;;  %v626_v41 = vpop.f32.mrf.mxu0 }
  0xf6   : > { %v731_v39 = vpop.f32.mrf.mxu2 }
  0xf7   : > { %v732_v42 = vadd.f32 %v6473_v13, %v731_v39 }
  0xf8   : > { %v709_v43 = vpop.f32.mrf.mxu1 }
  0xf9   : > { %v833_v45 = vpack.c.bf16 %v732_v42, %v732_v42  ;;  %v710_v33 = vadd.f32 %v6473_v13, %v709_v43 }
  0xfb   : > { %v922_v48 = vunpack.c.l.b16 %v833_v45  ;;  %v824_v42 = vpack.c.bf16 %v710_v33, %v710_v33  ;;  %v707_v45 = vadd.f32 %v6473_v13, %v706_v37 }
  0xfd   : > { %v6487_v4 = vpack.c.b16 %v922_v48, %v921_v47  ;;  %v705_v48 = vadd.f32 %v6473_v13, %v704_v35  ;;  %v913_v49 = vunpack.c.l.b16 %v824_v42  ;;  %v823_v43 = vpack.c.bf16 %v707_v45, %v707_v45 }
  0xfe   : > { %v960_v35 = vsel %vm931_vm2, %v6481_v34, 0 }
  0xff   : > { %v978_v14 = vsel %vm931_vm2, %v6487_v4, 0  ;;  %v822_v12 = vpack.c.bf16 %v705_v48, %v705_v48 }
 0x100   : > { %v711_v16 = vpop.f32.mrf.mxu1  ;;  %980 = vmatpush.bf16.xpose.msrb.mxu3 %v978_v14  ;;  %v628_v14 = vpop.f32.mrf.mxu0 }
 0x101   : > { %v712_v30 = vadd.f32 %v6473_v13, %v711_v16  ;;  %v912_v16 = vunpack.c.l.b16 %v823_v43  ;;  %v911_v37 = vunpack.c.l.b16 %v822_v12 }
 0x103   : > { %v825_v38 = vpack.c.bf16 %v712_v30, %v712_v30  ;;  %v6515_v18 = vpack.c.b16 %v912_v16, %v911_v37 }
 0x105   : > { %v914_v46 = vunpack.c.l.b16 %v825_v38  ;;  %v963_v19 = vsel %vm931_vm2, %v6515_v18, 0 }
 0x107   : > { %v6511_v5 = vpack.c.b16 %v914_v46, %v913_v49 }
 0x108   : > { %v714_v26 = vpop.f32.mrf.mxu1  ;;  %981 = vmatpush.bf16.xpose.msrb.mxu3 %v975_v25  ;;  %v631_v21 = vpop.f32.mrf.mxu0 }
 0x109   : > { %v715_v28 = vadd.f32 %v6473_v13, %v714_v26  ;;  %v966_v17 = vsel %vm931_vm2, %v6511_v5, 0 }
 0x10b   : > { %v826_v31 = vpack.c.bf16 %v715_v28, %v715_v28 }
 0x10d   : > { %v915_v39 = vunpack.c.l.b16 %v826_v31 }
 0x110   : > { %v716_v15 = vpop.f32.mrf.mxu1  ;;  %982 = vmatpush.bf16.xpose.msrb.mxu3 %v972_v29  ;;  %v633_v26 = vpop.f32.mrf.mxu0  ;;  %v957_v29 = vsel %vm931_vm2, %v6477_v23, 0 }
 0x111   : > { %v717_v32 = vadd.f32 %v6473_v13, %v716_v15  ;;  %v6520_v13 = vld [vmem:[%s6281_s11] ss:$0 sm:$0xff] }
 0x112   : > { %v627_v24 = vadd.f32 %v6520_v13, %v626_v41  ;;  %v629_v25 = vadd.f32 %v6520_v13, %v628_v14  ;;  %v632_v33 = vadd.f32 %v6520_v13, %v631_v21 }
 0x113   : > { %v827_v36 = vpack.c.bf16 %v717_v32, %v717_v32 }
 0x114   : > { %v802_v22 = vpack.c.bf16 %v627_v24, %v627_v24  ;;  %v803_v28 = vpack.c.bf16 %v629_v25, %v629_v25  ;;  %v804_v38 = vpack.c.bf16 %v632_v33, %v632_v33 }
 0x115   : > { %v916_v40 = vunpack.c.l.b16 %v827_v36  ;;  %v634_v36 = vadd.f32 %v6520_v13, %v633_v26 }
 0x116   : > { %v867_v15 = vunpack.c.l.b16 %v802_v22  ;;  %v868_v30 = vunpack.c.l.b16 %v803_v28  ;;  %v869_v41 = vunpack.c.l.b16 %v804_v38  ;;  %v651_v22 = vpop.f32.mrf.mxu3 }
 0x117   : > { %v6505_v44 = vpack.c.b16 %v916_v40, %v915_v39  ;;  %v805_v39 = vpack.c.bf16 %v634_v36, %v634_v36 }
 0x118   : > { %v636_v31 = vpop.f32.mrf.mxu0  ;;  %v6528_v32 = vpack.c.b16 %v868_v30, %v867_v15 }
 0x119   : > { %v969_v47 = vsel %vm931_vm2, %v6505_v44, 0  ;;  %v870_v42 = vunpack.c.l.b16 %v805_v39 }
 0x11a   : > { %983 = vmatpush.bf16.xpose.msrb.mxu3 %v969_v47  ;;  %v637_v47 = vadd.f32 %v6520_v13, %v636_v31 }
 0x11b   : > { %v6534_v45 = vpack.c.b16 %v870_v42, %v869_v41  ;;  %v652_v42 = vadd.f32 %v6520_v13, %v651_v22 }
 0x11c   : > { %v806_v49 = vpack.c.bf16 %v637_v47, %v637_v47 }
 0x11d   : > { %v812_v47 = vpack.c.bf16 %v652_v42, %v652_v42 }
 0x11e   : > { %v871_v12 = vunpack.c.l.b16 %v806_v49  ;;  %v653_v36 = vpop.f32.mrf.mxu3 }
 0x11f   : > { %v877_v49 = vunpack.c.l.b16 %v812_v47 }
 0x120   : > { %v638_v40 = vpop.f32.mrf.mxu0 }
 0x121   : > { %v639_v48 = vadd.f32 %v6520_v13, %v638_v40 }
 0x122   : > { %984 = vmatpush.bf16.xpose.msrb.mxu3 %v966_v17 }
 0x123   : > { %v807_v43 = vpack.c.bf16 %v639_v48, %v639_v48 }
 0x125   : > { %v872_v14 = vunpack.c.l.b16 %v807_v43 }
 0x126   : > { %v656_v41 = vpop.f32.mrf.mxu3 }
 0x127   : > { %v6540_v17 = vpack.c.b16 %v872_v14, %v871_v12 }
 0x128   : > { %v641_v46 = vpop.f32.mrf.mxu0 }
 0x129   : > { %v642_v37 = vadd.f32 %v6520_v13, %v641_v46  ;;  %v654_v46 = vadd.f32 %v6520_v13, %v653_v36 }
 0x12a   : > { %985 = vmatpush.bf16.xpose.msrb.mxu3 %v963_v19 }
 0x12b   : > { %v813_v48 = vpack.c.bf16 %v654_v46, %v654_v46 }
 0x12d   : > { %v878_v43 = vunpack.c.l.b16 %v813_v48 }
 0x12e   : > { %v658_v12 = vpop.f32.mrf.mxu3 }
 0x12f   : > { %v6558_v14 = vpack.c.b16 %v878_v43, %v877_v49 }
 0x130   : > { %v643_v16 = vpop.f32.mrf.mxu0 }
 0x131   : > { %v644_v19 = vadd.f32 %v6520_v13, %v643_v16  ;;  %v657_v16 = vadd.f32 %v6520_v13, %v656_v41 }
 0x132   : > { %986 = vmatpush.bf16.xpose.msrb.mxu3 %v960_v35  ;;  %v808_v35 = vpack.c.bf16 %v642_v37, %v642_v37  ;;  %v659_v37 = vadd.f32 %v6520_v13, %v658_v12 }
 0x133   : > { %v809_v24 = vpack.c.bf16 %v644_v19, %v644_v19 }
 0x134   : > { %v873_v25 = vunpack.c.l.b16 %v808_v35  ;;  %v815_v35 = vpack.c.bf16 %v659_v37, %v659_v37 }
 0x135   : > { %v874_v26 = vunpack.c.l.b16 %v809_v24 }
 0x136   : > { %v661_v19 = vpop.f32.mrf.mxu3 }
 0x137   : > { %v6546_v28 = vpack.c.b16 %v874_v26, %v873_v25  ;;  %v880_v25 = vunpack.c.l.b16 %v815_v35 }
 0x138   : > { %v646_v21 = vpop.f32.mrf.mxu0 }
 0x139   : > { %v647_v15 = vadd.f32 %v6520_v13, %v646_v21  ;;  %v814_v21 = vpack.c.bf16 %v657_v16, %v657_v16 }
 0x13a   : > { %987 = vmatpush.bf16.xpose.msrb.mxu3 %v957_v29 }
 0x13b   : > { %v810_v31 = vpack.c.bf16 %v647_v15, %v647_v15  ;;  %v879_v24 = vunpack.c.l.b16 %v814_v21 }
 0x13d   : > { %v875_v38 = vunpack.c.l.b16 %v810_v31  ;;  %v6564_v26 = vpack.c.b16 %v880_v25, %v879_v24 }
 0x13e   : > { %v663_v22 = vpop.f32.mrf.mxu3 }
 0x13f   : > { %v664_v15 = vadd.f32 %v6520_v13, %v663_v22 }
 0x140   : > { %v648_v29 = vpop.f32.mrf.mxu0 }
 0x141   : > { %5314 = vmatmul.msk.bf16.vlgmr.msrb.gmra.mxu3 %vm931_vm2, %v6528_v32  ;;  %v649_v30 = vadd.f32 %v6520_v13, %v648_v29  ;;  %v662_v29 = vadd.f32 %v6520_v13, %v661_v19  ;;  %v817_v31 = vpack.c.bf16 %v664_v15, %v664_v15 }
 0x143   : > { %v811_v33 = vpack.c.bf16 %v649_v30, %v649_v30  ;;  %v816_v30 = vpack.c.bf16 %v662_v29, %v662_v29  ;;  %v882_v36 = vunpack.c.l.b16 %v817_v31  ;;  %v5469_v31 = vld [vmem:[%s6261_s30 + $0x28] sm:$0xff] }
 0x144   : > { %759 = vmatpush.bf16.msrb.mxu2 %v5469_v31 }
 0x145   : > { %v876_v39 = vunpack.c.l.b16 %v811_v33  ;;  %v881_v33 = vunpack.c.l.b16 %v816_v30 }
 0x147   : > { %v6552_v40 = vpack.c.b16 %v876_v39, %v875_v38  ;;  %v6570_v38 = vpack.c.b16 %v882_v36, %v881_v33  ;;  %v6579_v39 = vld [vmem:[%s9052_s20] ss:$0 sm:$0xff] }
 0x149   : > { %9051 = vst [vmem:[#allocation33_spill] sm:$0xff] %v6570_v38 }
 0x151   : > { %5315 = vmatmul.msk.bf16.gmra.mxu3 %vm931_vm2, %v6534_v45 }
 0x161   : > { %5316 = vmatmul.msk.bf16.gmra.mxu3 %vm931_vm2, %v6540_v17 }
 0x171   : > { %5317 = vmatmul.msk.bf16.gmra.mxu3 %vm931_vm2, %v6546_v28 }
 0x181   : > { %5318 = vmatmul.msk.bf16.gmra.mxu3 %vm931_vm2, %v6552_v40 }
 0x191   : > { %5319 = vmatmul.msk.bf16.gmra.mxu3 %vm931_vm2, %v6558_v14 }
 0x1a1   : > { %5320 = vmatmul.msk.bf16.gmra.mxu3 %vm931_vm2, %v6564_v26 }
 0x1b1   : > { %5321 = vmatmul.msk.bf16.gmra.mxu3 %vm931_vm2, %v6570_v38 }
 0x1c4   : > { %v989_v41 = vpop.f32.mrf.mxu3 }
 0x1c5   : > { %v1029_v42 = vmul.f32 0.35355338, %v989_v41 }
 0x1c7   : > { %v6582_v46 = vadd.f32 %v6579_v39, %v1029_v42 }
 0x1c9   : > { %1064 = vmax.xlane.f32.xlu0 %v6582_v46 }
 0x1cc   : > { %v991_v13 = vpop.f32.mrf.mxu3 }
 0x1cd   : > { %v1030_v47 = vmul.f32 0.35355338, %v991_v13 }
 0x1cf   : > { %v6586_v48 = vadd.f32 %v6579_v39, %v1030_v47 }
 0x1d1   : > { %1066 = vmax.xlane.f32.xlu0 %v6586_v48 }
 0x1d4   : > { %v994_v49 = vpop.f32.mrf.mxu3 }
 0x1d5   : > { %v1031_v43 = vmul.f32 0.35355338, %v994_v49 }
 0x1d7   : > { %v6590_v12 = vadd.f32 %v6579_v39, %v1031_v43 }
 0x1d9   : > { %1068 = vmax.xlane.f32.xlu1 %v6590_v12 }
 0x1dc   : > { %v996_v16 = vpop.f32.mrf.mxu3 }
 0x1dd   : > { %v1032_v37 = vmul.f32 0.35355338, %v996_v16 }
 0x1df   : > { %v6594_v19 = vadd.f32 %v6579_v39, %v1032_v37  ;;  %v5468_v37 = vld [vmem:[%s6261_s30 + $0x20] sm:$0xff] }
 0x1e0   : > { %760 = vmatpush.bf16.msrb.mxu2 %v5468_v37 }
 0x1e1   : > { %1070 = vmax.xlane.f32.xlu1 %v6594_v19 }
 0x1e3   : > { %5306 = vmatmul.msk.bf16.vlgmr.msrb.gmra.mxu2 %vm592_vm1, %v6384_v54 }
 0x1e4   : > { %v999_v21 = vpop.f32.mrf.mxu3 }
 0x1e5   : > { %v1033_v35 = vmul.f32 0.35355338, %v999_v21 }
 0x1e7   : > { %v6598_v24 = vadd.f32 %v6579_v39, %v1033_v35 }
 0x1e9   : > { %1072 = vmax.xlane.f32.xlu2 %v6598_v24 }
 0x1ec   : > { %v1001_v25 = vpop.f32.mrf.mxu3 }
 0x1ed   : > { %v1034_v22 = vmul.f32 0.35355338, %v1001_v25 }
 0x1ef   : > { %v6602_v29 = vadd.f32 %v6579_v39, %v1034_v22 }
 0x1f1   : > { %1074 = vmax.xlane.f32.xlu2 %v6602_v29 }
 0x1f3   : > { %5307 = vmatmul.msk.bf16.gmra.mxu2 %vm592_vm1, %v6404_v60 }
 0x1f4   : > { %v1004_v15 = vpop.f32.mrf.mxu3 }
 0x1f5   : > { %v1035_v30 = vmul.f32 0.35355338, %v1004_v15 }
 0x1f7   : > { %v6607_v33 = vadd.f32 %v6579_v39, %v1035_v30 }
 0x1f9   : > { %1076 = vmax.xlane.f32.xlu0 %v6607_v33 }
 0x1fc   : > { %v1006_v36 = vpop.f32.mrf.mxu3 }
 0x1fd   : > { %v1036_v41 = vmul.f32 0.35355338, %v1006_v36 }
 0x1ff   : > { %v6611_v42 = vadd.f32 %v6579_v39, %v1036_v41 }
 0x201   : > { %1078 = vmax.xlane.f32.xlu1 %v6611_v42 }
 0x203   : > { %5308 = vmatmul.msk.bf16.gmra.mxu2 %vm592_vm1, %v6424_v2 }
 0x204   : > { %v1009_v13 = vpop.f32.mrf.mxu3 }
 0x205   : > { %v1037_v47 = vmul.f32 0.35355338, %v1009_v13 }
 0x207   : > { %v6615_v49 = vadd.f32 %v6579_v39, %v1037_v47 }
 0x209   : > { %1080 = vmax.xlane.f32.xlu2 %v6615_v49 }
 0x20c   : > { %v1011_v43 = vpop.f32.mrf.mxu3 }
 0x20d   : > { %v1038_v16 = vmul.f32 0.35355338, %v1011_v43 }
 0x20f   : > { %v6620_v21 = vadd.f32 %v6579_v39, %v1038_v16 }
 0x211   : > { %1082 = vmax.xlane.f32.xlu0 %v6620_v21 }
 0x213   : > { %5309 = vmatmul.msk.bf16.gmra.mxu2 %vm592_vm1, %v6446_v8 }
 0x214   : > { %v1014_v35 = vpop.f32.mrf.mxu3 }
 0x215   : > { %v1039_v25 = vmul.f32 0.35355338, %v1014_v35 }
 0x217   : > { %v6626_v22 = vadd.f32 %v6579_v39, %v1039_v25 }
 0x219   : > { %1084 = vmax.xlane.f32.xlu1 %v6626_v22 }
 0x21c   : > { %v1016_v15 = vpop.f32.mrf.mxu3 }
 0x21d   : > { %v1040_v30 = vmul.f32 0.35355338, %v1016_v15 }
 0x21f   : > { %v6630_v31 = vadd.f32 %v6579_v39, %v1040_v30 }
 0x221   : > { %1086 = vmax.xlane.f32.xlu2 %v6630_v31 }
 0x223   : > { %5310 = vmatmul.msk.bf16.gmra.mxu2 %vm592_vm1, %v6460_v11 }
 0x224   : > { %v1019_v36 = vpop.f32.mrf.mxu3 }
 0x225   : > { %v1041_v41 = vmul.f32 0.35355338, %v1019_v36 }
 0x227   : > { %v6636_v54 = vadd.f32 %v6579_v39, %v1041_v41 }
 0x229   : > { %1088 = vmax.xlane.f32.xlu0 %v6636_v54 }
 0x22c   : > { %v1021_v13 = vpop.f32.mrf.mxu3 }
 0x22d   : > { %v1042_v47 = vmul.f32 0.35355338, %v1021_v13 }
 0x22f   : > { %v6640_v43 = vadd.f32 %v6579_v39, %v1042_v47 }
 0x231   : > { %1090 = vmax.xlane.f32.xlu1 %v6640_v43 }
 0x233   : > { %5311 = vmatmul.msk.bf16.gmra.mxu2 %vm592_vm1, %v6388_v55 }
 0x234   : > { %v1024_v16 = vpop.f32.mrf.mxu3 }
 0x235   : > { %v1043_v37 = vmul.f32 0.35355338, %v1024_v16 }
 0x237   : > { %v6646_v60 = vadd.f32 %v6579_v39, %v1043_v37 }
 0x239   : > { %1092 = vmax.xlane.f32.xlu2 %v6646_v60 }
 0x23c   : > { %v1065_v35 = vpop.xlane.xlu0 %1064  ;;  %v1026_v25 = vpop.f32.mrf.mxu3 }
 0x23d   : > { %v1096_v15 = vsub.f32 %v6582_v46, %v1065_v35  ;;  %v1044_v30 = vmul.f32 0.35355338, %v1026_v25 }
 0x23f   : > { %v1112_v36 = vmul.f32 1.442695, %v1096_v15  ;;  %v6651_v41 = vadd.f32 %v6579_v39, %v1044_v30 }
 0x241   : > { %5567 = vpow2.f32 %v1112_v36  ;;  %1094 = vmax.xlane.f32.xlu0 %v6651_v41 }
 0x243   : > { %5312 = vmatmul.msk.bf16.gmra.mxu2 %vm592_vm1, %v6408_v61 }
 0x244   : > { %v1067_v2 = vpop.xlane.xlu0 %1066 }
 0x245   : > { %v1097_v13 = vsub.f32 %v6586_v48, %v1067_v2 }
 0x247   : > { %v6657_v47 = vpop.eup %5567  ;;  %v1114_v16 = vmul.f32 1.442695, %v1097_v13 }
 0x248   : > { %1144 = vadd.xlane.f32.xlu1 %v6657_v47 }
 0x249   : > { %5569 = vpow2.f32 %v1114_v16 }
 0x24c   : > { %v1069_v46 = vpop.xlane.xlu1 %1068 }
 0x24d   : > { %v1098_v37 = vsub.f32 %v6590_v12, %v1069_v46 }
 0x24f   : > { %v6661_v35 = vpop.eup %5569  ;;  %v1116_v25 = vmul.f32 1.442695, %v1098_v37 }
 0x250   : > { %1146 = vadd.xlane.f32.xlu2 %v6661_v35 }
 0x251   : > { %5571 = vpow2.f32 %v1116_v25 }
 0x253   : > { %5313 = vmatmul.msk.bf16.gmra.mxu2 %vm592_vm1, %v6428_v3 }
 0x254   : > { %v1071_v8 = vpop.xlane.xlu1 %1070 }
 0x255   : > { %v1099_v48 = vsub.f32 %v6594_v19, %v1071_v8 }
 0x257   : > { %v6667_v15 = vpop.eup %5571  ;;  %v1118_v30 = vmul.f32 1.442695, %v1099_v48 }
 0x258   : > { %1148 = vadd.xlane.f32.xlu0 %v6667_v15 }
 0x259   : > { %5573 = vpow2.f32 %v1118_v30 }
 0x25c   : > { %v1073_v36 = vpop.xlane.xlu2 %1072 }
 0x25d   : > { %v1100_v12 = vsub.f32 %v6598_v24, %v1073_v36 }
 0x25f   : > { %v6671_v2 = vpop.eup %5573  ;;  %v1120_v13 = vmul.f32 1.442695, %v1100_v12 }
 0x260   : > { %1150 = vadd.xlane.f32.xlu1 %v6671_v2 }
 0x261   : > { %5575 = vpow2.f32 %v1120_v13 }
 0x264   : > { %v1075_v11 = vpop.xlane.xlu2 %1074 }
 0x265   : > { %v1101_v19 = vsub.f32 %v6602_v29, %v1075_v11 }
 0x267   : > { %v6677_v16 = vpop.eup %5575  ;;  %v1122_v46 = vmul.f32 1.442695, %v1101_v19 }
 0x268   : > { %1152 = vadd.xlane.f32.xlu2 %v6677_v16 }
 0x269   : > { %5577 = vpow2.f32 %v1122_v46 }
 0x26c   : > { %v1077_v37 = vpop.xlane.xlu0 %1076 }
 0x26d   : > { %v1102_v24 = vsub.f32 %v6607_v33, %v1077_v37 }
 0x26f   : > { %v6681_v25 = vpop.eup %5577  ;;  %v1124_v8 = vmul.f32 1.442695, %v1102_v24 }
 0x270   : > { %1154 = vadd.xlane.f32.xlu0 %v6681_v25 }
 0x271   : > { %5579 = vpow2.f32 %v1124_v8 }
 0x274   : > { %v1079_v55 = vpop.xlane.xlu1 %1078 }
 0x275   : > { %v1103_v29 = vsub.f32 %v6611_v42, %v1079_v55 }
 0x277   : > { %v6687_v48 = vpop.eup %5579  ;;  %v1126_v30 = vmul.f32 1.442695, %v1103_v29 }
 0x278   : > { %1156 = vadd.xlane.f32.xlu1 %v6687_v48 }
 0x279   : > { %5581 = vpow2.f32 %v1126_v30 }
 0x27c   : > { %v1081_v36 = vpop.xlane.xlu2 %1080 }
 0x27d   : > { %v1104_v33 = vsub.f32 %v6615_v49, %v1081_v36 }
 0x27f   : > { %v6691_v12 = vpop.eup %5581  ;;  %v1128_v13 = vmul.f32 1.442695, %v1104_v33  ;;  %v762_v33 = vpop.f32.mrf.mxu2 }
 0x280   : > { %1158 = vadd.xlane.f32.xlu2 %v6691_v12 }
 0x281   : > { %5583 = vpow2.f32 %v1128_v13 }
 0x284   : > { %v1083_v61 = vpop.xlane.xlu0 %1082 }
 0x285   : > { %v1105_v42 = vsub.f32 %v6620_v21, %v1083_v61 }
 0x287   : > { %v6697_v11 = vpop.eup %5583  ;;  %v1130_v19 = vmul.f32 1.442695, %v1105_v42 }
 0x288   : > { %1160 = vadd.xlane.f32.xlu0 %v6697_v11 }
 0x289   : > { %5585 = vpow2.f32 %v1130_v19  ;;  %v6717_v19 = vld [vmem:[%s6281_s11 + $0x2] ss:$0 sm:$0xff] }
 0x28c   : > { %v1085_v46 = vpop.xlane.xlu1 %1084 }
 0x28d   : > { %v1106_v49 = vsub.f32 %v6626_v22, %v1085_v46  ;;  %v764_v46 = vpop.f32.mrf.mxu2 }
 0x28f   : > { %v6701_v37 = vpop.eup %5585  ;;  %v1132_v24 = vmul.f32 1.442695, %v1106_v49  ;;  %v6723_v49 = vadd.f32 %v6717_v19, %v764_v46 }
 0x290   : > { %1162 = vadd.xlane.f32.xlu1 %v6701_v37 }
 0x291   : > { %5587 = vpow2.f32 %v1132_v24  ;;  %9054 = vst [vmem:[#allocation35_spill] sm:$0xff] %v6723_v49 }
 0x294   : > { %v1087_v8 = vpop.xlane.xlu2 %1086 }
 0x295   : > { %v1107_v3 = vsub.f32 %v6630_v31, %v1087_v8 }
 0x297   : > { %v6705_v55 = vpop.eup %5587  ;;  %v1134_v21 = vmul.f32 1.442695, %v1107_v3 }
 0x298   : > { %1164 = vadd.xlane.f32.xlu2 %v6705_v55 }
 0x299   : > { %5589 = vpow2.f32 %v1134_v21 }
 0x29c   : > { %v1089_v29 = vpop.xlane.xlu0 %1088 }
 0x29d   : > { %v1108_v30 = vsub.f32 %v6636_v54, %v1089_v29  ;;  %v6720_v54 = vadd.f32 %v6717_v19, %v762_v33 }
 0x29f   : > { %v6709_v22 = vpop.eup %5589  ;;  %v1136_v36 = vmul.f32 1.442695, %v1108_v30  ;;  %9053 = vst [vmem:[#allocation34_spill] sm:$0xff] %v6720_v54  ;;  %v767_v30 = vpop.f32.mrf.mxu2 }
 0x2a0   : > { %1166 = vadd.xlane.f32.xlu0 %v6709_v22  ;;  %v6738_v46 = vadd.f32 %v6717_v19, %v767_v30 }
 0x2a1   : > { %5591 = vpow2.f32 %v1136_v36 }
 0x2a2   : > { %9055 = vst [vmem:[#allocation36_spill] sm:$0xff] %v6738_v46 }
 0x2a4   : > { %v1091_v13 = vpop.xlane.xlu1 %1090 }
 0x2a5   : > { %v1109_v31 = vsub.f32 %v6640_v43, %v1091_v13 }
 0x2a7   : > { %v6713_v61 = vpop.eup %5591  ;;  %v1138_v42 = vmul.f32 1.442695, %v1109_v31 }
 0x2a8   : > { %1168 = vadd.xlane.f32.xlu1 %v6713_v61 }
 0x2a9   : > { %5593 = vpow2.f32 %v1138_v42  ;;  %v769_v42 = vpop.f32.mrf.mxu2 }
 0x2ac   : > { %v1093_v24 = vpop.xlane.xlu2 %1092 }
 0x2ad   : > { %v1110_v8 = vsub.f32 %v6646_v60, %v1093_v24  ;;  %v6741_v24 = vadd.f32 %v6717_v19, %v769_v42 }
 0x2af   : > { %v6730_v21 = vpop.eup %5593  ;;  %v1140_v29 = vmul.f32 1.442695, %v1110_v8  ;;  %9056 = vst [vmem:[#allocation37_spill] sm:$0xff] %v6741_v24 }
 0x2b0   : > { %1170 = vadd.xlane.f32.xlu2 %v6730_v21 }
 0x2b1   : > { %5595 = vpow2.f32 %v1140_v29  ;;  %v772_v3 = vpop.f32.mrf.mxu2 }
 0x2b4   : > { %v1095_v36 = vpop.xlane.xlu0 %1094 }
 0x2b5   : > { %v1111_v33 = vsub.f32 %v6651_v41, %v1095_v36 }
 0x2b7   : > { %v6734_v13 = vpop.eup %5595  ;;  %v1142_v31 = vmul.f32 1.442695, %v1111_v33 }
 0x2b8   : > { %1172 = vadd.xlane.f32.xlu0 %v6734_v13 }
 0x2b9   : > { %5597 = vpow2.f32 %v1142_v31  ;;  %v774_v52 = vpop.f32.mrf.mxu2 }
 0x2bb   : > { %v1145_v60 = vpop.xlane.xlu1 %1144 }
 0x2bc   : > { %5599 = vrcp.f32 %v1145_v60  ;;  %v1187_v43 = vand.u32 2147483648, %v1145_v60  ;;  %v1185_v42 = vand.u32 2147483647, %v1145_v60  ;;  %vm1181_vm4 = vweird.f32 %v1145_v60 }
 0x2be   : > { %v1188_v41 = vor.u32 1.1754944e-38, %v1187_v43  ;;  %vm1186_vm6 = vcmp.eq.f32.partialorder %v1185_v42, 8.507059e+37 }
 0x2bf   : > { %v6743_v8 = vpop.eup %5597 }
 0x2c0   : > { %1174 = vadd.xlane.f32.xlu1 %v6743_v8 }
 0x2c2   : > { %v5600_v36 = vpop.eup %5599 }
 0x2c3   : > { %v1177_v33 = vmul.f32 %v5600_v36, %v1145_v60  ;;  %v1147_v31 = vpop.xlane.xlu2 %1146  ;;  %vm1182_vm3 = vweird.f32 %v5600_v36 }
 0x2c4   : > { %5601 = vrcp.f32 %v1147_v31  ;;  %vm1183_vm5 = vmor %vm1181_vm4, %vm1182_vm3  ;;  %v1201_v7 = vand.u32 2147483648, %v1147_v31  ;;  %vm1195_vm8 = vweird.f32 %v1147_v31 }
 0x2c5   : > { %v1178_v30 = vsub.f32 1.0, %v1177_v33 }
 0x2c7   : > { %v1179_v1 = vmul.f32 %v5600_v36, %v1178_v30  ;;  %v6754_v30 = vadd.f32 %v6717_v19, %v772_v3 }
 0x2c9   : > { %v1180_v0 = vadd.f32 %v5600_v36, %v1179_v1  ;;  %v6757_v1 = vadd.f32 %v6717_v19, %v774_v52  ;;  %v777_v52 = vpop.f32.mrf.mxu2 }
 0x2ca   : > { %v5602_v59 = vpop.eup %5601 }
 0x2cb   : > { %v1184_v58 = vsel %vm1183_vm5, %v5600_v36, %v1180_v0  ;;  %v1191_v29 = vmul.f32 %v5602_v59, %v1147_v31  ;;  %v1149_v53 = vpop.xlane.xlu0 %1148  ;;  %vm1196_vm7 = vweird.f32 %v5602_v59  ;;  %v1199_v0 = vand.u32 2147483647, %v1147_v31 }
 0x2cc   : > { %v1189_v10 = vsel %vm1186_vm6, %v1188_v41, %v1184_v58  ;;  %5603 = vrcp.f32 %v1149_v53  ;;  %vm1197_vm9 = vmor %vm1195_vm8, %vm1196_vm7  ;;  %v1215_v43 = vand.u32 2147483648, %v1149_v53  ;;  %v1213_v58 = vand.u32 2147483647, %v1149_v53 }
 0x2cd   : > { %v6751_v9 = vmul.f32 %v6657_v47, %v1189_v10  ;;  %v1192_v33 = vsub.f32 1.0, %v1191_v29  ;;  %v1202_v47 = vor.u32 1.1754944e-38, %v1201_v7  ;;  %vm1200_vm10 = vcmp.eq.f32.partialorder %v1199_v0, 8.507059e+37 }
 0x2ce   : > { %vm1209_vm12 = vweird.f32 %v1149_v53  ;;  %v1216_v7 = vor.u32 1.1754944e-38, %v1215_v43  ;;  %vm1214_vm14 = vcmp.eq.f32.partialorder %v1213_v58, 8.507059e+37 }
 0x2cf   : > { %v1193_v60 = vmul.f32 %v5602_v59, %v1192_v33 }
 0x2d1   : > { %v1194_v41 = vadd.f32 %v5602_v59, %v1193_v60  ;;  %v779_v62 = vpop.f32.mrf.mxu2 }
 0x2d2   : > { %v5604_v10 = vpop.eup %5603 }
 0x2d3   : > { %v1198_v3 = vsel %vm1197_vm9, %v5602_v59, %v1194_v41  ;;  %v1205_v29 = vmul.f32 %v5604_v10, %v1149_v53  ;;  %v1151_v36 = vpop.xlane.xlu1 %1150  ;;  %vm1210_vm11 = vweird.f32 %v5604_v10  ;;  %v6773_v53 = vadd.f32 %v6717_v19, %v779_v62 }
 0x2d4   : > { %v1203_v42 = vsel %vm1200_vm10, %v1202_v47, %v1198_v3  ;;  %5605 = vrcp.f32 %v1151_v36  ;;  %vm1211_vm13 = vmor %vm1209_vm12, %vm1210_vm11  ;;  %v1227_v43 = vand.u32 2147483647, %v1151_v36  ;;  %vm1223_vm0 = vweird.f32 %v1151_v36 }
 0x2d5   : > { %v6764_v33 = vmul.f32 %v6661_v35, %v1203_v42  ;;  %v1206_v6 = vsub.f32 1.0, %v1205_v29  ;;  %v1229_v29 = vand.u32 2147483648, %v1151_v36 }
 0x2d6   : > { %vm1228_vm4 = vcmp.eq.f32.partialorder %v1227_v43, 8.507059e+37 }
 0x2d7   : > { %v1207_v63 = vmul.f32 %v5604_v10, %v1206_v6  ;;  %v6770_v6 = vadd.f32 %v6717_v19, %v777_v52 }
 0x2d9   : > { %v1208_v60 = vadd.f32 %v5604_v10, %v1207_v63  ;;  %v782_v62 = vpop.f32.mrf.mxu2 }
 0x2da   : > { %v5606_v31 = vpop.eup %5605 }
 0x2db   : > { %v1212_v59 = vsel %vm1211_vm13, %v5604_v10, %v1208_v60  ;;  %v1219_v0 = vmul.f32 %v5606_v31, %v1151_v36  ;;  %v1153_v41 = vpop.xlane.xlu2 %1152  ;;  %vm1224_vm15 = vweird.f32 %v5606_v31  ;;  %v1230_v60 = vor.u32 1.1754944e-38, %v1229_v29 }
 0x2dc   : > { %v1217_v47 = vsel %vm1214_vm14, %v1216_v7, %v1212_v59  ;;  %5607 = vrcp.f32 %v1153_v41  ;;  %vm1225_vm3 = vmor %vm1223_vm0, %vm1224_vm15  ;;  %v1243_v58 = vand.u32 2147483648, %v1153_v41  ;;  %v1241_v10 = vand.u32 2147483647, %v1153_v41 }
 0x2dd   : > { %v6767_v35 = vmul.f32 %v6667_v15, %v1217_v47  ;;  %v1220_v3 = vsub.f32 1.0, %v1219_v0  ;;  %vm1237_vm6 = vweird.f32 %v1153_v41 }
 0x2de   : > { %v1244_v29 = vor.u32 1.1754944e-38, %v1243_v58  ;;  %vm1242_vm8 = vcmp.eq.f32.partialorder %v1241_v10, 8.507059e+37 }
 0x2df   : > { %v1221_v63 = vmul.f32 %v5606_v31, %v1220_v3 }
 0x2e1   : > { %v1222_v42 = vadd.f32 %v5606_v31, %v1221_v63  ;;  %v784_v56 = vpop.f32.mrf.mxu2 }
 0x2e2   : > { %v5608_v15 = vpop.eup %5607 }
 0x2e3   : > { %v1226_v52 = vsel %vm1225_vm3, %v5606_v31, %v1222_v42  ;;  %v1233_v7 = vmul.f32 %v5608_v15, %v1153_v41  ;;  %v1155_v59 = vpop.xlane.xlu0 %1154  ;;  %vm1238_vm5 = vweird.f32 %v5608_v15 }
 0x2e4   : > { %v1231_v0 = vsel %vm1228_vm4, %v1230_v60, %v1226_v52  ;;  %5609 = vrcp.f32 %v1155_v59  ;;  %vm1239_vm7 = vmor %vm1237_vm6, %vm1238_vm5  ;;  %v1255_v58 = vand.u32 2147483647, %v1155_v59  ;;  %vm1251_vm10 = vweird.f32 %v1155_v59 }
 0x2e5   : > { %v6780_v47 = vmul.f32 %v6671_v2, %v1231_v0  ;;  %v1234_v3 = vsub.f32 1.0, %v1233_v7  ;;  %v6786_v7 = vadd.f32 %v6717_v19, %v782_v62  ;;  %v1257_v0 = vand.u32 2147483648, %v1155_v59 }
 0x2e6   : > { %vm1256_vm12 = vcmp.eq.f32.partialorder %v1255_v58, 8.507059e+37 }
 0x2e7   : > { %v1235_v57 = vmul.f32 %v5608_v15, %v1234_v3 }
 0x2e9   : > { %v1236_v63 = vadd.f32 %v5608_v15, %v1235_v57  ;;  %v6789_v57 = vadd.f32 %v6717_v19, %v784_v56  ;;  %v787_v56 = vpop.f32.mrf.mxu2 }
 0x2ea   : > { %v5610_v36 = vpop.eup %5609 }
 0x2eb   : > { %v1240_v31 = vsel %vm1239_vm7, %v5608_v15, %v1236_v63  ;;  %v1247_v43 = vmul.f32 %v5610_v36, %v1155_v59  ;;  %v1157_v42 = vpop.xlane.xlu1 %1156  ;;  %vm1252_vm9 = vweird.f32 %v5610_v36  ;;  %v1258_v63 = vor.u32 1.1754944e-38, %v1257_v0 }
 0x2ec   : > { %v1245_v60 = vsel %vm1242_vm8, %v1244_v29, %v1240_v31  ;;  %5611 = vrcp.f32 %v1157_v42  ;;  %vm1253_vm11 = vmor %vm1251_vm10, %vm1252_vm9  ;;  %v1271_v10 = vand.u32 2147483648, %v1157_v42  ;;  %v1269_v15 = vand.u32 2147483647, %v1157_v42 }
 0x2ed   : > { %v6783_v2 = vmul.f32 %v6677_v16, %v1245_v60  ;;  %v1248_v52 = vsub.f32 1.0, %v1247_v43  ;;  %vm1265_vm14 = vweird.f32 %v1157_v42 }
 0x2ee   : > { %v1272_v0 = vor.u32 1.1754944e-38, %v1271_v10  ;;  %vm1270_vm0 = vcmp.eq.f32.partialorder %v1269_v15, 8.507059e+37 }
 0x2ef   : > { %v1249_v41 = vmul.f32 %v5610_v36, %v1248_v52 }
 0x2f1   : > { %v1250_v3 = vadd.f32 %v5610_v36, %v1249_v41  ;;  %v789_v50 = vpop.f32.mrf.mxu2 }
 0x2f2   : > { %v5612_v16 = vpop.eup %5611 }
 0x2f3   : > { %v1254_v62 = vsel %vm1253_vm11, %v5610_v36, %v1250_v3  ;;  %v1261_v29 = vmul.f32 %v5612_v16, %v1157_v42  ;;  %v1159_v31 = vpop.xlane.xlu2 %1158  ;;  %vm1266_vm13 = vweird.f32 %v5612_v16 }
 0x2f4   : > { %v1259_v43 = vsel %vm1256_vm12, %v1258_v63, %v1254_v62  ;;  %5613 = vrcp.f32 %v1159_v31  ;;  %vm1267_vm15 = vmor %vm1265_vm14, %vm1266_vm13  ;;  %v1283_v10 = vand.u32 2147483647, %v1159_v31  ;;  %vm1279_vm4 = vweird.f32 %v1159_v31 }
 0x2f5   : > { %v6796_v60 = vmul.f32 %v6681_v25, %v1259_v43  ;;  %v1262_v52 = vsub.f32 1.0, %v1261_v29  ;;  %v6802_v29 = vadd.f32 %v6717_v19, %v787_v56  ;;  %v1285_v43 = vand.u32 2147483648, %v1159_v31 }
 0x2f6   : > { %vm1284_vm6 = vcmp.eq.f32.partialorder %v1283_v10, 8.507059e+37 }
 0x2f7   : > { %v1263_v51 = vmul.f32 %v5612_v16, %v1262_v52 }
 0x2f9   : > { %v1264_v41 = vadd.f32 %v5612_v16, %v1263_v51  ;;  %v6805_v51 = vadd.f32 %v6717_v19, %v789_v50  ;;  %v792_v50 = vpop.f32.mrf.mxu2 }
 0x2fa   : > { %v5614_v59 = vpop.eup %5613 }
 0x2fb   : > { %v1268_v36 = vsel %vm1267_vm15, %v5612_v16, %v1264_v41  ;;  %v1275_v58 = vmul.f32 %v5614_v59, %v1159_v31  ;;  %v1161_v3 = vpop.xlane.xlu0 %1160  ;;  %vm1280_vm3 = vweird.f32 %v5614_v59  ;;  %v1286_v41 = vor.u32 1.1754944e-38, %v1285_v43 }
 0x2fc   : > { %v1273_v63 = vsel %vm1270_vm0, %v1272_v0, %v1268_v36  ;;  %5615 = vrcp.f32 %v1161_v3  ;;  %vm1281_vm5 = vmor %vm1279_vm4, %vm1280_vm3  ;;  %v1299_v15 = vand.u32 2147483648, %v1161_v3  ;;  %v1297_v16 = vand.u32 2147483647, %v1161_v3 }
 0x2fd   : > { %v6799_v25 = vmul.f32 %v6687_v48, %v1273_v63  ;;  %v1276_v62 = vsub.f32 1.0, %v1275_v58  ;;  %vm1293_vm8 = vweird.f32 %v1161_v3 }
 0x2fe   : > { %v1300_v43 = vor.u32 1.1754944e-38, %v1299_v15  ;;  %vm1298_vm10 = vcmp.eq.f32.partialorder %v1297_v16, 8.507059e+37 }
 0x2ff   : > { %v1277_v42 = vmul.f32 %v5614_v59, %v1276_v62 }
 0x301   : > { %v1278_v52 = vadd.f32 %v5614_v59, %v1277_v42  ;;  %v794_v54 = vpop.f32.mrf.mxu2 }
 0x302   : > { %v5616_v48 = vpop.eup %5615 }
 0x303   : > { %v1282_v56 = vsel %vm1281_vm5, %v5614_v59, %v1278_v52  ;;  %v1289_v0 = vmul.f32 %v5616_v48, %v1161_v3  ;;  %v1163_v36 = vpop.xlane.xlu1 %1162  ;;  %vm1294_vm7 = vweird.f32 %v5616_v48 }
 0x304   : > { %v1287_v58 = vsel %vm1284_vm6, %v1286_v41, %v1282_v56  ;;  %5617 = vrcp.f32 %v1163_v36  ;;  %vm1295_vm9 = vmor %vm1293_vm8, %vm1294_vm7  ;;  %v1311_v15 = vand.u32 2147483647, %v1163_v36  ;;  %vm1307_vm12 = vweird.f32 %v1163_v36 }
 0x305   : > { %v6812_v63 = vmul.f32 %v6691_v12, %v1287_v58  ;;  %v1290_v62 = vsub.f32 1.0, %v1289_v0  ;;  %v6818_v0 = vadd.f32 %v6717_v19, %v792_v50  ;;  %v1313_v58 = vand.u32 2147483648, %v1163_v36 }
 0x306   : > { %vm1312_vm14 = vcmp.eq.f32.partialorder %v1311_v15, 8.507059e+37 }
 0x307   : > { %v1291_v49 = vmul.f32 %v5616_v48, %v1290_v62 }
 0x309   : > { %v1292_v42 = vadd.f32 %v5616_v48, %v1291_v49  ;;  %v6821_v49 = vadd.f32 %v6717_v19, %v794_v54  ;;  %v797_v54 = vpop.f32.mrf.mxu2 }
 0x30a   : > { %v5618_v31 = vpop.eup %5617 }
 0x30b   : > { %v1296_v59 = vsel %vm1295_vm9, %v5616_v48, %v1292_v42  ;;  %v1303_v10 = vmul.f32 %v5618_v31, %v1163_v36  ;;  %v1165_v52 = vpop.xlane.xlu2 %1164  ;;  %vm1308_vm11 = vweird.f32 %v5618_v31  ;;  %v1314_v42 = vor.u32 1.1754944e-38, %v1313_v58 }
 0x30c   : > { %v1301_v41 = vsel %vm1298_vm10, %v1300_v43, %v1296_v59  ;;  %5619 = vrcp.f32 %v1165_v52  ;;  %vm1309_vm13 = vmor %vm1307_vm12, %vm1308_vm11  ;;  %v1327_v16 = vand.u32 2147483648, %v1165_v52  ;;  %v1325_v48 = vand.u32 2147483647, %v1165_v52 }
 0x30d   : > { %v6815_v12 = vmul.f32 %v6697_v11, %v1301_v41  ;;  %v1304_v56 = vsub.f32 1.0, %v1303_v10  ;;  %vm1321_vm0 = vweird.f32 %v1165_v52 }
 0x30e   : > { %v1328_v58 = vor.u32 1.1754944e-38, %v1327_v16  ;;  %vm1326_vm4 = vcmp.eq.f32.partialorder %v1325_v48, 8.507059e+37 }
 0x30f   : > { %v1305_v3 = vmul.f32 %v5618_v31, %v1304_v56 }
 0x311   : > { %v1306_v62 = vadd.f32 %v5618_v31, %v1305_v3  ;;  %v799_v46 = vpop.f32.mrf.mxu2 }
 0x312   : > { %v5620_v11 = vpop.eup %5619 }
 0x313   : > { %v1310_v50 = vsel %vm1309_vm13, %v5618_v31, %v1306_v62  ;;  %v1317_v43 = vmul.f32 %v5620_v11, %v1165_v52  ;;  %v1167_v59 = vpop.xlane.xlu0 %1166  ;;  %vm1322_vm15 = vweird.f32 %v5620_v11 }
 0x314   : > { %v1315_v10 = vsel %vm1312_vm14, %v1314_v42, %v1310_v50  ;;  %5621 = vrcp.f32 %v1167_v59  ;;  %vm1323_vm3 = vmor %vm1321_vm0, %vm1322_vm15  ;;  %v1339_v16 = vand.u32 2147483647, %v1167_v59  ;;  %vm1335_vm6 = vweird.f32 %v1167_v59 }
 0x315   : > { %v6828_v41 = vmul.f32 %v6701_v37, %v1315_v10  ;;  %v1318_v56 = vsub.f32 1.0, %v1317_v43  ;;  %v6834_v43 = vadd.f32 %v6717_v19, %v797_v54  ;;  %v1341_v10 = vand.u32 2147483648, %v1167_v59 }
 0x316   : > { %vm1340_vm8 = vcmp.eq.f32.partialorder %v1339_v16, 8.507059e+37 }
 0x317   : > { %v1319_v24 = vmul.f32 %v5620_v11, %v1318_v56 }
 0x319   : > { %v1320_v3 = vadd.f32 %v5620_v11, %v1319_v24  ;;  %v6837_v24 = vadd.f32 %v6717_v19, %v799_v46 }
 0x31a   : > { %v5622_v36 = vpop.eup %5621 }
 0x31b   : > { %v1324_v31 = vsel %vm1323_vm3, %v5620_v11, %v1320_v3  ;;  %v1331_v15 = vmul.f32 %v5622_v36, %v1167_v59  ;;  %v1169_v62 = vpop.xlane.xlu1 %1168  ;;  %vm1336_vm5 = vweird.f32 %v5622_v36  ;;  %v1342_v3 = vor.u32 1.1754944e-38, %v1341_v10 }
 0x31c   : > { %v1329_v42 = vsel %vm1326_vm4, %v1328_v58, %v1324_v31  ;;  %5623 = vrcp.f32 %v1169_v62  ;;  %vm1337_vm7 = vmor %vm1335_vm6, %vm1336_vm5  ;;  %v1353_v48 = vand.u32 2147483647, %v1169_v62  ;;  %vm1349_vm10 = vweird.f32 %v1169_v62 }
 0x31d   : > { %v6831_v37 = vmul.f32 %v6705_v55, %v1329_v42  ;;  %v1332_v50 = vsub.f32 1.0, %v1331_v15  ;;  %v1355_v42 = vand.u32 2147483648, %v1169_v62 }
 0x31e   : > { %vm1354_vm12 = vcmp.eq.f32.partialorder %v1353_v48, 8.507059e+37 }
 0x31f   : > { %v1333_v52 = vmul.f32 %v5622_v36, %v1332_v50 }
 0x321   : > { %v1334_v56 = vadd.f32 %v5622_v36, %v1333_v52  ;;  %v1356_v52 = vor.u32 1.1754944e-38, %v1355_v42 }
 0x322   : > { %v5624_v55 = vpop.eup %5623 }
 0x323   : > { %v1338_v54 = vsel %vm1337_vm7, %v5622_v36, %v1334_v56  ;;  %v1345_v58 = vmul.f32 %v5624_v55, %v1169_v62  ;;  %v1171_v31 = vpop.xlane.xlu2 %1170  ;;  %vm1350_vm9 = vweird.f32 %v5624_v55 }
 0x324   : > { %v1343_v19 = vsel %vm1340_vm8, %v1342_v3, %v1338_v54  ;;  %5625 = vrcp.f32 %v1171_v31  ;;  %vm1351_vm11 = vmor %vm1349_vm10, %vm1350_vm9  ;;  %v1369_v54 = vand.u32 2147483648, %v1171_v31  ;;  %vm1363_vm14 = vweird.f32 %v1171_v31 }
 0x325   : > { %v6844_v46 = vmul.f32 %v6709_v22, %v1343_v19  ;;  %v1346_v15 = vsub.f32 1.0, %v1345_v58  ;;  %v1367_v19 = vand.u32 2147483647, %v1171_v31 }
 0x327   : > { %v1347_v50 = vmul.f32 %v5624_v55, %v1346_v15  ;;  %vm1368_vm0 = vcmp.eq.f32.partialorder %v1367_v19, 8.507059e+37 }
 0x329   : > { %v1348_v11 = vadd.f32 %v5624_v55, %v1347_v50  ;;  %v1370_v50 = vor.u32 1.1754944e-38, %v1369_v54 }
 0x32a   : > { %v5626_v59 = vpop.eup %5625 }
 0x32b   : > { %v1352_v10 = vsel %vm1351_vm11, %v5624_v55, %v1348_v11  ;;  %v1359_v36 = vmul.f32 %v5626_v59, %v1171_v31  ;;  %v1173_v16 = vpop.xlane.xlu0 %1172  ;;  %vm1364_vm13 = vweird.f32 %v5626_v59 }
 0x32c   : > { %v1357_v56 = vsel %vm1354_vm12, %v1356_v52, %v1352_v10  ;;  %5627 = vrcp.f32 %v1173_v16  ;;  %vm1365_vm15 = vmor %vm1363_vm14, %vm1364_vm13  ;;  %v1383_v10 = vand.u32 2147483648, %v1173_v16  ;;  %vm1377_vm4 = vweird.f32 %v1173_v16 }
 0x32d   : > { %v6847_v3 = vmul.f32 %v6713_v61, %v1357_v56  ;;  %v1360_v22 = vsub.f32 1.0, %v1359_v36  ;;  %v1381_v56 = vand.u32 2147483647, %v1173_v16 }
 0x32f   : > { %v1361_v58 = vmul.f32 %v5626_v59, %v1360_v22  ;;  %vm1382_vm6 = vcmp.eq.f32.partialorder %v1381_v56, 8.507059e+37 }
 0x331   : > { %v1362_v15 = vadd.f32 %v5626_v59, %v1361_v58  ;;  %v1384_v58 = vor.u32 1.1754944e-38, %v1383_v10 }
 0x332   : > { %v5628_v62 = vpop.eup %5627 }
 0x333   : > { %v1366_v42 = vsel %vm1365_vm15, %v5626_v59, %v1362_v15  ;;  %v1373_v48 = vmul.f32 %v5628_v62, %v1173_v16  ;;  %v1175_v11 = vpop.xlane.xlu1 %1174  ;;  %vm1378_vm3 = vweird.f32 %v5628_v62 }
 0x334   : > { %v1371_v55 = vsel %vm1368_vm0, %v1370_v50, %v1366_v42  ;;  %5629 = vrcp.f32 %v1175_v11  ;;  %vm1379_vm5 = vmor %vm1377_vm4, %vm1378_vm3  ;;  %vm1391_vm8 = vweird.f32 %v1175_v11 }
 0x335   : > { %v6850_v52 = vmul.f32 %v6730_v21, %v1371_v55  ;;  %v1374_v61 = vsub.f32 1.0, %v1373_v48  ;;  %v1397_v21 = vand.u32 2147483648, %v1175_v11  ;;  %v1395_v48 = vand.u32 2147483647, %v1175_v11 }
 0x337   : > { %v1375_v36 = vmul.f32 %v5628_v62, %v1374_v61  ;;  %v1398_v61 = vor.u32 1.1754944e-38, %v1397_v21  ;;  %vm1396_vm10 = vcmp.eq.f32.partialorder %v1395_v48, 8.507059e+37 }
 0x339   : > { %v1376_v22 = vadd.f32 %v5628_v62, %v1375_v36 }
 0x33a   : > { %v5630_v31 = vpop.eup %5629 }
 0x33b   : > { %v1380_v54 = vsel %vm1379_vm5, %v5628_v62, %v1376_v22  ;;  %v1387_v59 = vmul.f32 %v5630_v31, %v1175_v11  ;;  %vm1392_vm7 = vweird.f32 %v5630_v31 }
 0x33c   : > { %v1385_v19 = vsel %vm1382_vm6, %v1384_v58, %v1380_v54  ;;  %vm1393_vm9 = vmor %vm1391_vm8, %vm1392_vm7 }
 0x33d   : > { %v6853_v15 = vmul.f32 %v6734_v13, %v1385_v19  ;;  %v1388_v50 = vsub.f32 1.0, %v1387_v59 }
 0x33f   : > { %v1389_v42 = vmul.f32 %v5630_v31, %v1388_v50 }
 0x341   : > { %v1390_v55 = vadd.f32 %v5630_v31, %v1389_v42  ;;  %1419 = sbr.rel (%p5322_p1) target bundleno = 854 (0x356), region = 60 }
 0x343   : > { %v1394_v16 = vsel %vm1393_vm9, %v5630_v31, %v1390_v55 }
 0x344   : > { %v1399_v36 = vsel %vm1396_vm10, %v1398_v61, %v1394_v16 }
 0x345   : > { %v6856_v62 = vmul.f32 %v6743_v8, %v1399_v36 }
 0x346   : > { %1420 = vst [vmem:[%s6289_s18] sm:$0xff] %v6751_v9 }
 0x347   : > { %1421 = vst [vmem:[%s6289_s18 + $0x8] sm:$0xff] %v6764_v33 }
 0x348   : > { %1422 = vst [vmem:[%s6289_s18 + $0x10] sm:$0xff] %v6767_v35 }
 0x349   : > { %1423 = vst [vmem:[%s6289_s18 + $0x18] sm:$0xff] %v6780_v47 }
 0x34a   : > { %1424 = vst [vmem:[%s6289_s18 + $0x20] sm:$0xff] %v6783_v2 }
 0x34b   : > { %1425 = vst [vmem:[%s6289_s18 + $0x28] sm:$0xff] %v6796_v60 }
 0x34c   : > { %1426 = vst [vmem:[%s6289_s18 + $0x30] sm:$0xff] %v6799_v25 }
 0x34d   : > { %1427 = vst [vmem:[%s6289_s18 + $0x38] sm:$0xff] %v6812_v63 }
 0x34e   : > { %1428 = vst [vmem:[%s6289_s18 + $0x40] sm:$0xff] %v6815_v12 }
 0x34f   : > { %1429 = vst [vmem:[%s6289_s18 + $0x48] sm:$0xff] %v6828_v41 }
 0x350   : > { %1430 = vst [vmem:[%s6289_s18 + $0x50] sm:$0xff] %v6831_v37 }
 0x351   : > { %1431 = vst [vmem:[%s6289_s18 + $0x58] sm:$0xff] %v6844_v46 }
 0x352   : > { %1432 = vst [vmem:[%s6289_s18 + $0x60] sm:$0xff] %v6847_v3 }
 0x353   : > { %1433 = vst [vmem:[%s6289_s18 + $0x68] sm:$0xff] %v6850_v52 }
 0x354   : > { %1434 = vst [vmem:[%s6289_s18 + $0x70] sm:$0xff] %v6853_v15 }
 0x355   : > { %1435 = vst [vmem:[%s6289_s18 + $0x78] sm:$0xff] %v6856_v62 }
 0x356 PF: > { %s6112_s30 = smov 120  }
 0x357   : > { %1627 = vrot.lane.b32.xlu0 %v6487_v4, %s6112_s30  ;;  %1623 = vrot.lane.b32.xlu1 %v6497_v27, %s6112_s30 }
 0x358   : > { %1619 = vrot.lane.b32.xlu2 %v6511_v5, %s6112_s30 }
 0x35f   : > { %1625 = vrot.lane.b32.xlu0 %v6493_v20, %s6112_s30  ;;  %1621 = vrot.lane.b32.xlu1 %v6505_v44, %s6112_s30 }
 0x360   : > { %1617 = vrot.lane.b32.xlu2 %v6515_v18, %s6112_s30 }
 0x367   : > { %1615 = vrot.lane.b32.xlu0 %v6481_v34, %s6112_s30  ;;  %1613 = vrot.lane.b32.xlu1 %v6477_v23, %s6112_s30 }
 0x368   : > { %1597 = vrot.lane.b32.xlu2 %v6528_v32, %s6112_s30 }
 0x36f   : > { %1599 = vrot.lane.b32.xlu0 %v6534_v45, %s6112_s30  ;;  %1601 = vrot.lane.b32.xlu1 %v6540_v17, %s6112_s30 }
 0x370   : > { %1603 = vrot.lane.b32.xlu2 %v6546_v28, %s6112_s30 }
 0x377   : > { %1605 = vrot.lane.b32.xlu0 %v6552_v40, %s6112_s30  ;;  %1607 = vrot.lane.b32.xlu1 %v6558_v14, %s6112_s30 }
 0x378   : > { %1609 = vrot.lane.b32.xlu2 %v6564_v26, %s6112_s30 }
 0x37f   : > { %1611 = vrot.lane.b32.xlu0 %v6570_v38, %s6112_s30 }
 0x3b2   : > { %v1620_v54 = vpop.permute.xlu2 %1619 }
 0x3b3   : > { %v1663_v59 = vsel %vm931_vm2, %v1620_v54, 0 }
 0x3ba   : > { %v1618_v19 = vpop.permute.xlu2 %1617 }
 0x3bb   : > { %v1660_v50 = vsel %vm931_vm2, %v1618_v19, 0 }
 0x3c2   : > { %v1598_v61 = vpop.permute.xlu2 %1597 }
 0x3c9   : > { %v1628_v13 = vpop.permute.xlu0 %1627  ;;  %v1624_v56 = vpop.permute.xlu1 %1623 }
 0x3ca   : > { %v1675_v8 = vsel %vm931_vm2, %v1628_v13, 0  ;;  %v1669_v22 = vsel %vm931_vm2, %v1624_v56, 0  ;;  %v1604_v13 = vpop.permute.xlu2 %1603 }
 0x3cb   : > { %1677 = vmatpush.bf16.xpose.msrb.mxu1 %v1675_v8 }
 0x3d1   : > { %v1626_v11 = vpop.permute.xlu0 %1625  ;;  %v1622_v31 = vpop.permute.xlu1 %1621 }
 0x3d2   : > { %v1672_v10 = vsel %vm931_vm2, %v1626_v11, 0  ;;  %v1666_v58 = vsel %vm931_vm2, %v1622_v31, 0 }
 0x3d3   : > { %1678 = vmatpush.bf16.xpose.msrb.mxu1 %v1672_v10  ;;  %v1610_v10 = vpop.permute.xlu2 %1609 }
 0x3d9   : > { %v1616_v21 = vpop.permute.xlu0 %1615  ;;  %v1614_v48 = vpop.permute.xlu1 %1613 }
 0x3da   : > { %v1657_v42 = vsel %vm931_vm2, %v1616_v21, 0  ;;  %v1654_v55 = vsel %vm931_vm2, %v1614_v48, 0 }
 0x3db   : > { %1679 = vmatpush.bf16.xpose.msrb.mxu1 %v1669_v22 }
 0x3e1   : > { %v1600_v16 = vpop.permute.xlu0 %1599  ;;  %v1602_v36 = vpop.permute.xlu1 %1601 }
 0x3e3   : > { %1680 = vmatpush.bf16.xpose.msrb.mxu1 %v1666_v58 }
 0x3e9   : > { %v1606_v8 = vpop.permute.xlu0 %1605  ;;  %v1608_v11 = vpop.permute.xlu1 %1607 }
 0x3eb   : > { %1681 = vmatpush.bf16.xpose.msrb.mxu1 %v1663_v59 }
 0x3f1   : > { %v1612_v56 = vpop.permute.xlu0 %1611 }
 0x3f3   : > { %1682 = vmatpush.bf16.xpose.msrb.mxu1 %v1660_v50 }
 0x3fb   : > { %1683 = vmatpush.bf16.xpose.msrb.mxu1 %v1657_v42 }
 0x403   : > { %1684 = vmatpush.bf16.xpose.msrb.mxu1 %v1654_v55 }
 0x40a   : > { %5323 = vmatmul.msk.bf16.vlgmr.msrb.gmra.mxu1 %vm931_vm2, %v1598_v61 }
 0x41a   : > { %5324 = vmatmul.msk.bf16.gmra.mxu1 %vm931_vm2, %v1600_v16 }
 0x42a   : > { %5325 = vmatmul.msk.bf16.gmra.mxu1 %vm931_vm2, %v1602_v36 }
 0x43a   : > { %5326 = vmatmul.msk.bf16.gmra.mxu1 %vm931_vm2, %v1604_v13 }
 0x44a   : > { %5327 = vmatmul.msk.bf16.gmra.mxu1 %vm931_vm2, %v1606_v8 }
 0x45a   : > { %5328 = vmatmul.msk.bf16.gmra.mxu1 %vm931_vm2, %v1608_v11 }
 0x46a   : > { %5329 = vmatmul.msk.bf16.gmra.mxu1 %vm931_vm2, %v1610_v10 }
 0x47a   : > { %5330 = vmatmul.msk.bf16.gmra.mxu1 %vm931_vm2, %v1612_v56 }
 0x487   : > { %v1686_v22 = vpop.f32.mrf.mxu1 }
 0x488   : > { %v1726_v31 = vmul.f32 0.35355338, %v1686_v22 }
 0x48a   : > { %v6942_v58 = vadd.f32 %v6579_v39, %v1726_v31 }
 0x48c   : > { %1758 = vmax.xlane.f32.xlu1 %v6942_v58 }
 0x48f   : > { %v1688_v54 = vpop.f32.mrf.mxu1 }
 0x490   : > { %v1727_v59 = vmul.f32 0.35355338, %v1688_v54 }
 0x492   : > { %v6946_v19 = vadd.f32 %v6579_v39, %v1727_v59 }
 0x494   : > { %1760 = vmax.xlane.f32.xlu2 %v6946_v19 }
 0x497   : > { %v1691_v50 = vpop.f32.mrf.mxu1 }
 0x498   : > { %v1728_v21 = vmul.f32 0.35355338, %v1691_v50 }
 0x49a   : > { %v6950_v42 = vadd.f32 %v6579_v39, %v1728_v21 }
 0x49c   : > { %1762 = vmax.xlane.f32.xlu0 %v6950_v42 }
 0x49f   : > { %v1693_v48 = vpop.f32.mrf.mxu1 }
 0x4a0   : > { %v1729_v55 = vmul.f32 0.35355338, %v1693_v48 }
 0x4a2   : > { %v6954_v61 = vadd.f32 %v6579_v39, %v1729_v55  ;;  %v9057_v55 = vpack.c.bf16 %v6834_v43, %v6834_v43  ;;  %v9060_v43 = vpack.c.bf16 %v6821_v49, %v6821_v49  ;;  %v9063_v49 = vpack.c.bf16 %v6786_v7, %v6786_v7 }
 0x4a4   : > { %1764 = vmax.xlane.f32.xlu2 %v6954_v61 }
 0x4a7   : > { %v1696_v16 = vpop.f32.mrf.mxu1 }
 0x4a8   : > { %v1730_v36 = vmul.f32 0.35355338, %v1696_v16  ;;  %v1530_v16 = vunpack.c.l.b16 %v9057_v55 }
 0x4aa   : > { %v6958_v13 = vadd.f32 %v6579_v39, %v1730_v36  ;;  %v9058_v36 = vpack.c.bf16 %v6837_v24, %v6837_v24 }
 0x4ac   : > { %1766 = vmax.xlane.f32.xlu1 %v6958_v13 }
 0x4af   : > { %v1698_v8 = vpop.f32.mrf.mxu1 }
 0x4b0   : > { %v1731_v11 = vmul.f32 0.35355338, %v1698_v8  ;;  %v1531_v8 = vunpack.c.l.b16 %v9058_v36  ;;  %v9062_v36 = vpack.c.bf16 %v6805_v51, %v6805_v51 }
 0x4b2   : > { %v6962_v10 = vadd.f32 %v6579_v39, %v1731_v11 }
 0x4b4   : > { %1768 = vmax.xlane.f32.xlu2 %v6962_v10 }
 0x4b7   : > { %v1701_v56 = vpop.f32.mrf.mxu1 }
 0x4b8   : > { %v1732_v22 = vmul.f32 0.35355338, %v1701_v56  ;;  %v6982_v56 = vpack.c.b16 %v1531_v8, %v1530_v16  ;;  %v1527_v8 = vunpack.c.l.b16 %v9062_v36 }
 0x4ba   : > { %v6966_v31 = vadd.f32 %v6579_v39, %v1732_v22  ;;  %1548 = vmatpush.bf16.msrb.mxu0 %v6982_v56  ;;  %v9059_v22 = vpack.c.bf16 %v6818_v0, %v6818_v0 }
 0x4bc   : > { %1770 = vmax.xlane.f32.xlu0 %v6966_v31 }
 0x4bf   : > { %v1703_v54 = vpop.f32.mrf.mxu1 }
 0x4c0   : > { %v1733_v59 = vmul.f32 0.35355338, %v1703_v54  ;;  %v1528_v54 = vunpack.c.l.b16 %v9059_v22 }
 0x4c2   : > { %v6970_v50 = vadd.f32 %v6579_v39, %v1733_v59  ;;  %v1529_v59 = vunpack.c.l.b16 %v9060_v43 }
 0x4c4   : > { %1772 = vmax.xlane.f32.xlu1 %v6970_v50 }
 0x4c7   : > { %v1706_v21 = vpop.f32.mrf.mxu1 }
 0x4c8   : > { %v1734_v48 = vmul.f32 0.35355338, %v1706_v21  ;;  %v6992_v21 = vpack.c.b16 %v1529_v59, %v1528_v54  ;;  %v1524_v54 = vunpack.c.l.b16 %v9063_v49 }
 0x4ca   : > { %v6980_v11 = vadd.f32 %v6579_v39, %v1734_v48  ;;  %1549 = vmatpush.bf16.msrb.mxu0 %v6992_v21  ;;  %v9061_v48 = vpack.c.bf16 %v6802_v29, %v6802_v29  ;;  %v9064_v29 = vpack.c.bf16 %v6789_v57, %v6789_v57  ;;  %v9067_v57 = vpack.c.bf16 %v6754_v30, %v6754_v30 }
 0x4cc   : > { %1774 = vmax.xlane.f32.xlu2 %v6980_v11  ;;  %v1526_v16 = vunpack.c.l.b16 %v9061_v48  ;;  %v1525_v43 = vunpack.c.l.b16 %v9064_v29  ;;  %v1520_v49 = vunpack.c.l.b16 %v9067_v57 }
 0x4ce   : > { %v7004_v22 = vpack.c.b16 %v1527_v8, %v1526_v16  ;;  %v7014_v59 = vpack.c.b16 %v1525_v43, %v1524_v54  ;;  %v9066_v16 = vpack.c.bf16 %v6773_v53, %v6773_v53 }
 0x4cf   : > { %v1708_v24 = vpop.f32.mrf.mxu1 }
 0x4d0   : > { %v1735_v55 = vmul.f32 0.35355338, %v1708_v24  ;;  %1550 = vmatpush.bf16.msrb.mxu0 %v7004_v22  ;;  %v1523_v36 = vunpack.c.l.b16 %v9066_v16 }
 0x4d2   : > { %v7002_v0 = vadd.f32 %v6579_v39, %v1735_v55  ;;  %v9065_v55 = vpack.c.bf16 %v6770_v6, %v6770_v6  ;;  %v9068_v6 = vpack.c.bf16 %v6757_v1, %v6757_v1  ;;  %v9073_v1 = vld [vmem:[#allocation34_spill] sm:$0xff] }
 0x4d4   : > { %1776 = vmax.xlane.f32.xlu0 %v7002_v0  ;;  %1551 = vmatpush.bf16.msrb.mxu0 %v7014_v59  ;;  %v1522_v48 = vunpack.c.l.b16 %v9065_v55  ;;  %v1521_v54 = vunpack.c.l.b16 %v9068_v6 }
 0x4d6   : > { %v7026_v8 = vpack.c.b16 %v1523_v36, %v1522_v48  ;;  %v7036_v29 = vpack.c.b16 %v1521_v54, %v1520_v49  ;;  %v9071_v48 = vld [vmem:[#allocation37_spill] sm:$0xff]  ;;  %v9074_v49 = vpack.c.bf16 %v9073_v1, %v9073_v1  ;;  %v9075_v54 = vld [vmem:[#allocation35_spill] sm:$0xff] }
 0x4d7   : > { %v1711_v51 = vpop.f32.mrf.mxu1  ;;  %v9072_v16 = vpack.c.bf16 %v9071_v48, %v9071_v48 }
 0x4d8   : > { %v1736_v24 = vmul.f32 0.35355338, %v1711_v51  ;;  %1552 = vmatpush.bf16.msrb.mxu0 %v7026_v8  ;;  %v9069_v51 = vld [vmem:[#allocation36_spill] sm:$0xff]  ;;  %v1516_v6 = vunpack.c.l.b16 %v9074_v49 }
 0x4d9   : > { %v1519_v36 = vunpack.c.l.b16 %v9072_v16 }
 0x4da   : > { %v7024_v7 = vadd.f32 %v6579_v39, %v1736_v24  ;;  %v9070_v24 = vpack.c.bf16 %v9069_v51, %v9069_v51 }
 0x4dc   : > { %1778 = vmax.xlane.f32.xlu1 %v7024_v7  ;;  %1553 = vmatpush.bf16.msrb.mxu0 %v7036_v29  ;;  %v1518_v55 = vunpack.c.l.b16 %v9070_v24  ;;  %v1436_v24 = vpack.c.bf16 %v6751_v9, %v6751_v9 }
 0x4de   : > { %v7048_v57 = vpack.c.b16 %v1519_v36, %v1518_v55  ;;  %v1468_v16 = vunpack.c.l.b16 %v1436_v24 }
 0x4df   : > { %v1713_v53 = vpop.f32.mrf.mxu1 }
 0x4e0   : > { %v1737_v43 = vmul.f32 0.35355338, %v1713_v53  ;;  %1554 = vmatpush.bf16.msrb.mxu0 %v7048_v57  ;;  %v9076_v53 = vpack.c.bf16 %v9075_v54, %v9075_v54 }
 0x4e2   : > { %v7046_v30 = vadd.f32 %v6579_v39, %v1737_v43  ;;  %v1517_v51 = vunpack.c.l.b16 %v9076_v53  ;;  %v1437_v43 = vpack.c.bf16 %v6764_v33, %v6764_v33  ;;  %v1438_v33 = vpack.c.bf16 %v6767_v35, %v6767_v35 }
 0x4e4   : > { %1780 = vmax.xlane.f32.xlu2 %v7046_v30  ;;  %v7062_v55 = vpack.c.b16 %v1517_v51, %v1516_v6  ;;  %v1469_v36 = vunpack.c.l.b16 %v1437_v43  ;;  %v1439_v6 = vpack.c.bf16 %v6780_v47, %v6780_v47  ;;  %v1470_v24 = vunpack.c.l.b16 %v1438_v33 }
 0x4e5   : > { %v1440_v47 = vpack.c.bf16 %v6783_v2, %v6783_v2  ;;  %v1441_v33 = vpack.c.bf16 %v6796_v60, %v6796_v60  ;;  %v1442_v60 = vpack.c.bf16 %v6799_v25, %v6799_v25 }
 0x4e6   : > { %9077 = vst [vmem:[#allocation36_spill] sm:$0xff] %v7062_v55  ;;  %1555 = vmatpush.bf16.msrb.mxu0 %v7062_v55  ;;  %v1484_v1 = vpack.c.b16 %v1469_v36, %v1468_v16 }
 0x4e7   : > { %v1716_v48 = vpop.f32.mrf.mxu1 }
 0x4e8   : > { %v1738_v38 = vmul.f32 0.35355338, %v1716_v48 }
 0x4e9   : > { %1556 = vmatmul.bf16.vlgmr.msrb.gmra.mxu0 %v1484_v1 }
 0x4ea   : > { %v7066_v49 = vadd.f32 %v6579_v39, %v1738_v38  ;;  %v1471_v38 = vunpack.c.l.b16 %v1439_v6 }
 0x4ec   : > { %1782 = vmax.xlane.f32.xlu0 %v7066_v49  ;;  %v1485_v48 = vpack.c.b16 %v1471_v38, %v1470_v24  ;;  %v1473_v24 = vunpack.c.l.b16 %v1441_v33 }
 0x4ef   : > { %v1718_v54 = vpop.f32.mrf.mxu1 }
 0x4f0   : > { %v1739_v9 = vmul.f32 0.35355338, %v1718_v54 }
 0x4f2   : > { %v7070_v53 = vadd.f32 %v6579_v39, %v1739_v9 }
 0x4f4   : > { %1784 = vmax.xlane.f32.xlu1 %v7070_v53 }
 0x4f7   : > { %v1721_v51 = vpop.f32.mrf.mxu1 }
 0x4f8   : > { %v1740_v43 = vmul.f32 0.35355338, %v1721_v51  ;;  %v1472_v51 = vunpack.c.l.b16 %v1440_v47 }
 0x4f9   : > { %1561 = vmatmul.bf16.gmra.mxu0 %v1485_v48 }
 0x4fa   : > { %v7078_v16 = vadd.f32 %v6579_v39, %v1740_v43 }
 0x4fc   : > { %1786 = vmax.xlane.f32.xlu2 %v7078_v16 }
 0x4ff   : > { %v1759_v36 = vpop.xlane.xlu1 %1758  ;;  %v1723_v1 = vpop.f32.mrf.mxu1 }
 0x500   : > { %v1790_v54 = vsub.f32 %v6942_v58, %v1759_v36  ;;  %v1741_v9 = vmul.f32 0.35355338, %v1723_v1  ;;  %v1486_v58 = vpack.c.b16 %v1473_v24, %v1472_v51 }
 0x502   : > { %v1806_v35 = vmul.f32 1.442695, %v1790_v54  ;;  %v7083_v55 = vadd.f32 %v6579_v39, %v1741_v9 }
 0x504   : > { %5631 = vpow2.f32 %v1806_v35  ;;  %1788 = vmax.xlane.f32.xlu0 %v7083_v55  ;;  %v1474_v35 = vunpack.c.l.b16 %v1442_v60 }
 0x507   : > { %v1761_v6 = vpop.xlane.xlu2 %1760 }
 0x508   : > { %v1791_v38 = vsub.f32 %v6946_v19, %v1761_v6  ;;  %v1443_v19 = vpack.c.bf16 %v6812_v63, %v6812_v63  ;;  %v1444_v63 = vpack.c.bf16 %v6815_v12, %v6815_v12 }
 0x509   : > { %1566 = vmatmul.bf16.gmra.mxu0 %v1486_v58 }
 0x50a   : > { %v7091_v43 = vpop.eup %5631  ;;  %v1808_v48 = vmul.f32 1.442695, %v1791_v38  ;;  %v1475_v47 = vunpack.c.l.b16 %v1443_v19 }
 0x50b   : > { %1838 = vadd.xlane.f32.xlu1 %v7091_v43 }
 0x50c   : > { %5633 = vpow2.f32 %v1808_v48  ;;  %v1487_v6 = vpack.c.b16 %v1475_v47, %v1474_v35 }
 0x50f   : > { %v1763_v36 = vpop.xlane.xlu0 %1762 }
 0x510   : > { %v1792_v1 = vsub.f32 %v6950_v42, %v1763_v36  ;;  %v1476_v36 = vunpack.c.l.b16 %v1444_v63 }
 0x512   : > { %v7095_v2 = vpop.eup %5633  ;;  %v1810_v54 = vmul.f32 1.442695, %v1792_v1 }
 0x513   : > { %1840 = vadd.xlane.f32.xlu2 %v7095_v2 }
 0x514   : > { %5635 = vpow2.f32 %v1810_v54 }
 0x517   : > { %v1765_v9 = vpop.xlane.xlu2 %1764 }
 0x518   : > { %v1793_v33 = vsub.f32 %v6954_v61, %v1765_v9  ;;  %v1445_v61 = vpack.c.bf16 %v6828_v41, %v6828_v41  ;;  %v1446_v41 = vpack.c.bf16 %v6831_v37, %v6831_v37 }
 0x519   : > { %1571 = vmatmul.bf16.gmra.mxu0 %v1487_v6 }
 0x51a   : > { %v7103_v51 = vpop.eup %5635  ;;  %v1812_v42 = vmul.f32 1.442695, %v1793_v33  ;;  %v1477_v1 = vunpack.c.l.b16 %v1445_v61  ;;  %v1478_v6 = vunpack.c.l.b16 %v1446_v41 }
 0x51b   : > { %1842 = vadd.xlane.f32.xlu0 %v7103_v51 }
 0x51c   : > { %5637 = vpow2.f32 %v1812_v42  ;;  %v1488_v60 = vpack.c.b16 %v1477_v1, %v1476_v36 }
 0x51f   : > { %v1767_v24 = vpop.xlane.xlu1 %1766 }
 0x520   : > { %v1794_v38 = vsub.f32 %v6958_v13, %v1767_v24 }
 0x522   : > { %v7107_v25 = vpop.eup %5637  ;;  %v1814_v58 = vmul.f32 1.442695, %v1794_v38 }
 0x523   : > { %1844 = vadd.xlane.f32.xlu1 %v7107_v25 }
 0x524   : > { %5639 = vpow2.f32 %v1814_v58 }
 0x527   : > { %v1769_v48 = vpop.xlane.xlu2 %1768 }
 0x528   : > { %v1795_v54 = vsub.f32 %v6962_v10, %v1769_v48  ;;  %v1447_v10 = vpack.c.bf16 %v6844_v46, %v6844_v46  ;;  %v1448_v46 = vpack.c.bf16 %v6847_v3, %v6847_v3 }
 0x529   : > { %1576 = vmatmul.bf16.gmra.mxu0 %v1488_v60 }
 0x52a   : > { %v7115_v19 = vpop.eup %5639  ;;  %v1816_v13 = vmul.f32 1.442695, %v1795_v54  ;;  %v1479_v42 = vunpack.c.l.b16 %v1447_v10  ;;  %v1480_v1 = vunpack.c.l.b16 %v1448_v46 }
 0x52b   : > { %1846 = vadd.xlane.f32.xlu2 %v7115_v19 }
 0x52c   : > { %5641 = vpow2.f32 %v1816_v13  ;;  %v1489_v38 = vpack.c.b16 %v1479_v42, %v1478_v6 }
 0x52f   : > { %v1771_v9 = vpop.xlane.xlu0 %1770 }
 0x530   : > { %v1796_v35 = vsub.f32 %v6966_v31, %v1771_v9 }
 0x532   : > { %v7119_v12 = vpop.eup %5641  ;;  %v1818_v47 = vmul.f32 1.442695, %v1796_v35 }
 0x533   : > { %1848 = vadd.xlane.f32.xlu0 %v7119_v12 }
 0x534   : > { %5643 = vpow2.f32 %v1818_v47 }
 0x537   : > { %v1773_v33 = vpop.xlane.xlu1 %1772 }
 0x538   : > { %v1797_v24 = vsub.f32 %v6970_v50, %v1773_v33  ;;  %v1449_v50 = vpack.c.bf16 %v6850_v52, %v6850_v52  ;;  %v1450_v52 = vpack.c.bf16 %v6853_v15, %v6853_v15 }
 0x539   : > { %1581 = vmatmul.bf16.gmra.mxu0 %v1489_v38 }
 0x53a   : > { %v7127_v58 = vpop.eup %5643  ;;  %v1820_v31 = vmul.f32 1.442695, %v1797_v24  ;;  %v1481_v54 = vunpack.c.l.b16 %v1449_v50  ;;  %v1482_v33 = vunpack.c.l.b16 %v1450_v52 }
 0x53b   : > { %1850 = vadd.xlane.f32.xlu1 %v7127_v58 }
 0x53c   : > { %5645 = vpow2.f32 %v1820_v31  ;;  %v1490_v13 = vpack.c.b16 %v1481_v54, %v1480_v1 }
 0x53f   : > { %v1775_v63 = vpop.xlane.xlu2 %1774 }
 0x540   : > { %v1798_v61 = vsub.f32 %v6980_v11, %v1775_v63 }
 0x542   : > { %v7131_v37 = vpop.eup %5645  ;;  %v1822_v48 = vmul.f32 1.442695, %v1798_v61 }
 0x543   : > { %1852 = vadd.xlane.f32.xlu2 %v7131_v37 }
 0x544   : > { %5647 = vpow2.f32 %v1822_v48 }
 0x547   : > { %v1777_v36 = vpop.xlane.xlu0 %1776 }
 0x548   : > { %v1799_v60 = vsub.f32 %v7002_v0, %v1777_v36  ;;  %v1451_v0 = vpack.c.bf16 %v6856_v62, %v6856_v62 }
 0x549   : > { %1586 = vmatmul.bf16.gmra.mxu0 %v1490_v13 }
 0x54a   : > { %v7139_v9 = vpop.eup %5647  ;;  %v1824_v11 = vmul.f32 1.442695, %v1799_v60  ;;  %v1483_v6 = vunpack.c.l.b16 %v1451_v0 }
 0x54b   : > { %1854 = vadd.xlane.f32.xlu0 %v7139_v9 }
 0x54c   : > { %5649 = vpow2.f32 %v1824_v11  ;;  %v1491_v24 = vpack.c.b16 %v1483_v6, %v1482_v33 }
 0x54f   : > { %v1779_v35 = vpop.xlane.xlu1 %1778 }
 0x550   : > { %v1800_v47 = vsub.f32 %v7024_v7, %v1779_v35 }
 0x552   : > { %v7143_v3 = vpop.eup %5649  ;;  %v1826_v41 = vmul.f32 1.442695, %v1800_v47 }
 0x553   : > { %1856 = vadd.xlane.f32.xlu1 %v7143_v3 }
 0x554   : > { %5651 = vpow2.f32 %v1826_v41 }
 0x557   : > { %v1781_v10 = vpop.xlane.xlu2 %1780 }
 0x558   : > { %v1801_v42 = vsub.f32 %v7046_v30, %v1781_v10 }
 0x559   : > { %1591 = vmatmul.bf16.gmra.mxu0 %v1491_v24 }
 0x55a   : > { %v7151_v38 = vpop.eup %5651  ;;  %v1828_v7 = vmul.f32 1.442695, %v1801_v42 }
 0x55b   : > { %1858 = vadd.xlane.f32.xlu2 %v7151_v38 }
 0x55c   : > { %5653 = vpow2.f32 %v1828_v7 }
 0x55f   : > { %v1783_v31 = vpop.xlane.xlu0 %1782 }
 0x560   : > { %v1802_v63 = vsub.f32 %v7066_v49, %v1783_v31 }
 0x562   : > { %v7155_v15 = vpop.eup %5653  ;;  %v1830_v61 = vmul.f32 1.442695, %v1802_v63 }
 0x563   : > { %1860 = vadd.xlane.f32.xlu0 %v7155_v15 }
 0x564   : > { %5655 = vpow2.f32 %v1830_v61 }
 0x566   : > { %v7159_v48 = vpop.f32.mrf.mxu0 }
 0x567   : > { %v1785_v62 = vpop.xlane.xlu1 %1784  ;;  %9078 = vst [vmem:[#allocation37_spill] sm:$0xff] %v7159_v48 }
 0x568   : > { %v1803_v30 = vsub.f32 %v7070_v53, %v1785_v62 }
 0x56a   : > { %v7161_v46 = vpop.eup %5655  ;;  %v1832_v50 = vmul.f32 1.442695, %v1803_v30 }
 0x56b   : > { %1862 = vadd.xlane.f32.xlu1 %v7161_v46 }
 0x56c   : > { %5657 = vpow2.f32 %v1832_v50 }
 0x56e   : > { %v7165_v1 = vpop.f32.mrf.mxu0 }
 0x56f   : > { %v1787_v36 = vpop.xlane.xlu2 %1786  ;;  %9079 = vst [vmem:[#allocation34_spill] sm:$0xff] %v7165_v1 }
 0x570   : > { %v1804_v49 = vsub.f32 %v7078_v16, %v1787_v36 }
 0x572   : > { %v7167_v54 = vpop.eup %5657  ;;  %v1834_v60 = vmul.f32 1.442695, %v1804_v49 }
 0x573   : > { %1864 = vadd.xlane.f32.xlu2 %v7167_v54 }
 0x574   : > { %5659 = vpow2.f32 %v1834_v60 }
 0x576   : > { %v7171_v11 = vpop.f32.mrf.mxu0 }
 0x577   : > { %v1789_v53 = vpop.xlane.xlu0 %1788  ;;  %9080 = vst [vmem:[#allocation35_spill] sm:$0xff] %v7171_v11 }
 0x578   : > { %v1805_v13 = vsub.f32 %v7083_v55, %v1789_v53 }
 0x57a   : > { %v7173_v35 = vpop.eup %5659  ;;  %v1836_v47 = vmul.f32 1.442695, %v1805_v13 }
 0x57b   : > { %1866 = vadd.xlane.f32.xlu0 %v7173_v35 }
 0x57c   : > { %5661 = vpow2.f32 %v1836_v47 }
 0x57e   : > { %v1839_v16 = vpop.xlane.xlu1 %1838  ;;  %v7176_v41 = vpop.f32.mrf.mxu0 }
 0x57f   : > { %5663 = vrcp.f32 %v1839_v16  ;;  %9081 = vst [vmem:[#allocation38_spill] sm:$0xff] %v7176_v41  ;;  %v1881_v6 = vand.u32 2147483648, %v1839_v16  ;;  %v1879_v7 = vand.u32 2147483647, %v1839_v16  ;;  %vm1875_vm12 = vweird.f32 %v1839_v16 }
 0x581   : > { %v1882_v61 = vor.u32 1.1754944e-38, %v1881_v6  ;;  %vm1880_vm14 = vcmp.eq.f32.partialorder %v1879_v7, 8.507059e+37 }
 0x582   : > { %v7178_v52 = vpop.eup %5661 }
 0x583   : > { %1868 = vadd.xlane.f32.xlu1 %v7178_v52 }
 0x585   : > { %v5664_v0 = vpop.eup %5663 }
 0x586   : > { %v1871_v10 = vmul.f32 %v5664_v0, %v1839_v16  ;;  %v1841_v33 = vpop.xlane.xlu2 %1840  ;;  %v7181_v42 = vpop.f32.mrf.mxu0  ;;  %vm1876_vm11 = vweird.f32 %v5664_v0 }
 0x587   : > { %5665 = vrcp.f32 %v1841_v33  ;;  %9082 = vst [vmem:[#allocation39_spill] sm:$0xff] %v7181_v42  ;;  %vm1877_vm13 = vmor %vm1875_vm12, %vm1876_vm11  ;;  %v1895_v53 = vand.u32 2147483648, %v1841_v33  ;;  %vm1889_vm0 = vweird.f32 %v1841_v33 }
 0x588   : > { %v1872_v55 = vsub.f32 1.0, %v1871_v10  ;;  %v1893_v10 = vand.u32 2147483647, %v1841_v33 }
 0x58a   : > { %v1873_v24 = vmul.f32 %v5664_v0, %v1872_v55  ;;  %vm1894_vm4 = vcmp.eq.f32.partialorder %v1893_v10, 8.507059e+37 }
 0x58c   : > { %v1874_v31 = vadd.f32 %v5664_v0, %v1873_v24 }
 0x58d   : > { %v5666_v63 = vpop.eup %5665 }
 0x58e   : > { %v1878_v62 = vsel %vm1877_vm13, %v5664_v0, %v1874_v31  ;;  %v1885_v30 = vmul.f32 %v5666_v63, %v1841_v33  ;;  %v1843_v50 = vpop.xlane.xlu0 %1842  ;;  %v7186_v13 = vpop.f32.mrf.mxu0  ;;  %vm1890_vm15 = vweird.f32 %v5666_v63  ;;  %v1896_v0 = vor.u32 1.1754944e-38, %v1895_v53 }
 0x58f   : > { %v1883_v36 = vsel %vm1880_vm14, %v1882_v61, %v1878_v62  ;;  %5667 = vrcp.f32 %v1843_v50  ;;  %9083 = vst [vmem:[#allocation40_spill] sm:$0xff] %v7186_v13  ;;  %vm1891_vm3 = vmor %vm1889_vm0, %vm1890_vm15  ;;  %v1909_v62 = vand.u32 2147483648, %v1843_v50  ;;  %vm1903_vm6 = vweird.f32 %v1843_v50 }
 0x590   : > { %v7184_v49 = vmul.f32 %v7091_v43, %v1883_v36  ;;  %v1886_v60 = vsub.f32 1.0, %v1885_v30 }
 0x592   : > { %v1887_v47 = vmul.f32 %v5666_v63, %v1886_v60  ;;  %v1907_v60 = vand.u32 2147483647, %v1843_v50 }
 0x594   : > { %v1888_v16 = vadd.f32 %v5666_v63, %v1887_v47  ;;  %vm1908_vm8 = vcmp.eq.f32.partialorder %v1907_v60, 8.507059e+37 }
 0x595   : > { %v5668_v55 = vpop.eup %5667 }
 0x596   : > { %v1892_v6 = vsel %vm1891_vm3, %v5666_v63, %v1888_v16  ;;  %v1899_v24 = vmul.f32 %v5668_v55, %v1843_v50  ;;  %v1845_v7 = vpop.xlane.xlu1 %1844  ;;  %v7191_v30 = vpop.f32.mrf.mxu0  ;;  %vm1904_vm5 = vweird.f32 %v5668_v55  ;;  %v1910_v63 = vor.u32 1.1754944e-38, %v1909_v62 }
 0x597   : > { %v1897_v31 = vsel %vm1894_vm4, %v1896_v0, %v1892_v6  ;;  %5669 = vrcp.f32 %v1845_v7  ;;  %9084 = vst [vmem:[#allocation41_spill] sm:$0xff] %v7191_v30  ;;  %vm1905_vm7 = vmor %vm1903_vm6, %vm1904_vm5  ;;  %vm1917_vm10 = vweird.f32 %v1845_v7 }
 0x598   : > { %v7189_v43 = vmul.f32 %v7095_v2, %v1897_v31  ;;  %v1900_v61 = vsub.f32 1.0, %v1899_v24  ;;  %v1923_v24 = vand.u32 2147483648, %v1845_v7 }
 0x59a   : > { %v1901_v36 = vmul.f32 %v5668_v55, %v1900_v61 }
 0x59c   : > { %v1902_v33 = vadd.f32 %v5668_v55, %v1901_v36  ;;  %v1921_v36 = vand.u32 2147483647, %v1845_v7 }
 0x59d   : > { %v5670_v47 = vpop.eup %5669 }
 0x59e   : > { %v1906_v53 = vsel %vm1905_vm7, %v5668_v55, %v1902_v33  ;;  %v1913_v10 = vmul.f32 %v5670_v47, %v1845_v7  ;;  %v1847_v16 = vpop.xlane.xlu2 %1846  ;;  %v7196_v31 = vpop.f32.mrf.mxu0  ;;  %vm1918_vm9 = vweird.f32 %v5670_v47  ;;  %v1924_v55 = vor.u32 1.1754944e-38, %v1923_v24 }
 0x59f   : > { %v1911_v0 = vsel %vm1908_vm8, %v1910_v63, %v1906_v53  ;;  %5671 = vrcp.f32 %v1847_v16  ;;  %9085 = vst [vmem:[#allocation42_spill] sm:$0xff] %v7196_v31  ;;  %vm1919_vm11 = vmor %vm1917_vm10, %vm1918_vm9  ;;  %vm1922_vm12 = vcmp.eq.f32.partialorder %v1921_v36, 8.507059e+37  ;;  %vm1931_vm14 = vweird.f32 %v1847_v16 }
 0x5a0   : > { %v7194_v2 = vmul.f32 %v7103_v51, %v1911_v0  ;;  %v1914_v6 = vsub.f32 1.0, %v1913_v10  ;;  %v1937_v10 = vand.u32 2147483648, %v1847_v16 }
 0x5a2   : > { %v1915_v61 = vmul.f32 %v5670_v47, %v1914_v6 }
 0x5a4   : > { %v1916_v50 = vadd.f32 %v5670_v47, %v1915_v61  ;;  %v1935_v61 = vand.u32 2147483647, %v1847_v16 }
 0x5a5   : > { %v5672_v30 = vpop.eup %5671 }
 0x5a6   : > { %v1920_v62 = vsel %vm1919_vm11, %v5670_v47, %v1916_v50  ;;  %v1927_v60 = vmul.f32 %v5672_v30, %v1847_v16  ;;  %v1849_v33 = vpop.xlane.xlu0 %1848  ;;  %v7201_v0 = vpop.f32.mrf.mxu0  ;;  %vm1932_vm13 = vweird.f32 %v5672_v30  ;;  %v1938_v47 = vor.u32 1.1754944e-38, %v1937_v10 }
 0x5a7   : > { %v1925_v63 = vsel %vm1922_vm12, %v1924_v55, %v1920_v62  ;;  %5673 = vrcp.f32 %v1849_v33  ;;  %9086 = vst [vmem:[#allocation43_spill] sm:$0xff] %v7201_v0  ;;  %vm1933_vm15 = vmor %vm1931_vm14, %vm1932_vm13  ;;  %vm1936_vm0 = vcmp.eq.f32.partialorder %v1935_v61, 8.507059e+37  ;;  %vm1945_vm4 = vweird.f32 %v1849_v33 }
 0x5a8   : > { %v7199_v51 = vmul.f32 %v7107_v25, %v1925_v63  ;;  %v1928_v53 = vsub.f32 1.0, %v1927_v60  ;;  %v1951_v60 = vand.u32 2147483648, %v1849_v33 }
 0x5aa   : > { %v1929_v6 = vmul.f32 %v5672_v30, %v1928_v53 }
 0x5ac   : > { %v1930_v7 = vadd.f32 %v5672_v30, %v1929_v6  ;;  %v1949_v6 = vand.u32 2147483647, %v1849_v33 }
 0x5ad   : > { %v5674_v31 = vpop.eup %5673 }
 0x5ae   : > { %v1934_v24 = vsel %vm1933_vm15, %v5672_v30, %v1930_v7  ;;  %v1941_v36 = vmul.f32 %v5674_v31, %v1849_v33  ;;  %v1851_v50 = vpop.xlane.xlu1 %1850  ;;  %v7206_v63 = vpop.f32.mrf.mxu0  ;;  %vm1946_vm3 = vweird.f32 %v5674_v31  ;;  %v1952_v30 = vor.u32 1.1754944e-38, %v1951_v60 }
 0x5af   : > { %v1939_v55 = vsel %vm1936_vm0, %v1938_v47, %v1934_v24  ;;  %5675 = vrcp.f32 %v1851_v50  ;;  %9087 = vst [vmem:[#allocation44_spill] sm:$0xff] %v7206_v63  ;;  %vm1947_vm5 = vmor %vm1945_vm4, %vm1946_vm3  ;;  %vm1950_vm6 = vcmp.eq.f32.partialorder %v1949_v6, 8.507059e+37  ;;  %vm1959_vm8 = vweird.f32 %v1851_v50 }
 0x5b0   : > { %v7204_v25 = vmul.f32 %v7115_v19, %v1939_v55  ;;  %v1942_v62 = vsub.f32 1.0, %v1941_v36  ;;  %v1965_v36 = vand.u32 2147483648, %v1851_v50 }
 0x5b2   : > { %v1943_v53 = vmul.f32 %v5674_v31, %v1942_v62 }
 0x5b4   : > { %v1944_v16 = vadd.f32 %v5674_v31, %v1943_v53  ;;  %v1963_v53 = vand.u32 2147483647, %v1851_v50 }
 0x5b5   : > { %v5676_v0 = vpop.eup %5675 }
 0x5b6   : > { %v1948_v10 = vsel %vm1947_vm5, %v5674_v31, %v1944_v16  ;;  %v1955_v61 = vmul.f32 %v5676_v0, %v1851_v50  ;;  %v1853_v7 = vpop.xlane.xlu2 %1852  ;;  %v7211_v55 = vpop.f32.mrf.mxu0  ;;  %vm1960_vm7 = vweird.f32 %v5676_v0  ;;  %v1966_v31 = vor.u32 1.1754944e-38, %v1965_v36 }
 0x5b7   : > { %v1953_v47 = vsel %vm1950_vm6, %v1952_v30, %v1948_v10  ;;  %5677 = vrcp.f32 %v1853_v7  ;;  %9088 = vst [vmem:[#allocation45_spill] sm:$0xff] %v7211_v55  ;;  %vm1961_vm9 = vmor %vm1959_vm8, %vm1960_vm7  ;;  %vm1964_vm10 = vcmp.eq.f32.partialorder %v1963_v53, 8.507059e+37  ;;  %vm1973_vm12 = vweird.f32 %v1853_v7 }
 0x5b8   : > { %v7209_v19 = vmul.f32 %v7119_v12, %v1953_v47  ;;  %v1956_v24 = vsub.f32 1.0, %v1955_v61  ;;  %v1979_v61 = vand.u32 2147483648, %v1853_v7 }
 0x5ba   : > { %v1957_v62 = vmul.f32 %v5676_v0, %v1956_v24 }
 0x5bc   : > { %v1958_v33 = vadd.f32 %v5676_v0, %v1957_v62  ;;  %v1977_v62 = vand.u32 2147483647, %v1853_v7 }
 0x5bd   : > { %v5678_v63 = vpop.eup %5677 }
 0x5be   : > { %v1962_v60 = vsel %vm1961_vm9, %v5676_v0, %v1958_v33  ;;  %v1969_v6 = vmul.f32 %v5678_v63, %v1853_v7  ;;  %v1855_v16 = vpop.xlane.xlu0 %1854  ;;  %v7216_v47 = vpop.f32.mrf.mxu0  ;;  %vm1974_vm11 = vweird.f32 %v5678_v63  ;;  %v1980_v0 = vor.u32 1.1754944e-38, %v1979_v61 }
 0x5bf   : > { %v1967_v30 = vsel %vm1964_vm10, %v1966_v31, %v1962_v60  ;;  %5679 = vrcp.f32 %v1855_v16  ;;  %9089 = vst [vmem:[#allocation46_spill] sm:$0xff] %v7216_v47  ;;  %vm1975_vm13 = vmor %vm1973_vm12, %vm1974_vm11  ;;  %vm1978_vm14 = vcmp.eq.f32.partialorder %v1977_v62, 8.507059e+37  ;;  %vm1987_vm0 = vweird.f32 %v1855_v16 }
 0x5c0   : > { %v7214_v12 = vmul.f32 %v7127_v58, %v1967_v30  ;;  %v1970_v10 = vsub.f32 1.0, %v1969_v6  ;;  %v1993_v6 = vand.u32 2147483648, %v1855_v16 }
 0x5c2   : > { %v1971_v24 = vmul.f32 %v5678_v63, %v1970_v10 }
 0x5c4   : > { %v1972_v50 = vadd.f32 %v5678_v63, %v1971_v24  ;;  %v1991_v24 = vand.u32 2147483647, %v1855_v16 }
 0x5c5   : > { %v5680_v55 = vpop.eup %5679 }
 0x5c6   : > { %v1976_v36 = vsel %vm1975_vm13, %v5678_v63, %v1972_v50  ;;  %v1983_v53 = vmul.f32 %v5680_v55, %v1855_v16  ;;  %v1857_v33 = vpop.xlane.xlu1 %1856  ;;  %v7221_v30 = vpop.f32.mrf.mxu0  ;;  %vm1988_vm15 = vweird.f32 %v5680_v55  ;;  %v1994_v63 = vor.u32 1.1754944e-38, %v1993_v6 }
 0x5c7   : > { %v1981_v31 = vsel %vm1978_vm14, %v1980_v0, %v1976_v36  ;;  %5681 = vrcp.f32 %v1857_v33  ;;  %9090 = vst [vmem:[#allocation47_spill] sm:$0xff] %v7221_v30  ;;  %vm1989_vm3 = vmor %vm1987_vm0, %vm1988_vm15  ;;  %vm1992_vm4 = vcmp.eq.f32.partialorder %v1991_v24, 8.507059e+37  ;;  %vm2001_vm6 = vweird.f32 %v1857_v33 }
 0x5c8   : > { %v7219_v58 = vmul.f32 %v7131_v37, %v1981_v31  ;;  %v1984_v60 = vsub.f32 1.0, %v1983_v53  ;;  %v2007_v53 = vand.u32 2147483648, %v1857_v33 }
 0x5ca   : > { %v1985_v10 = vmul.f32 %v5680_v55, %v1984_v60 }
 0x5cc   : > { %v1986_v7 = vadd.f32 %v5680_v55, %v1985_v10  ;;  %v2005_v10 = vand.u32 2147483647, %v1857_v33 }
 0x5cd   : > { %v5682_v47 = vpop.eup %5681 }
 0x5ce   : > { %v1990_v61 = vsel %vm1989_vm3, %v5680_v55, %v1986_v7  ;;  %v1997_v62 = vmul.f32 %v5682_v47, %v1857_v33  ;;  %v1859_v50 = vpop.xlane.xlu2 %1858  ;;  %v7226_v31 = vpop.f32.mrf.mxu0  ;;  %vm2002_vm5 = vweird.f32 %v5682_v47  ;;  %v2008_v55 = vor.u32 1.1754944e-38, %v2007_v53 }
 0x5cf   : > { %v1995_v0 = vsel %vm1992_vm4, %v1994_v63, %v1990_v61  ;;  %5683 = vrcp.f32 %v1859_v50  ;;  %9091 = vst [vmem:[#allocation48_spill] sm:$0xff] %v7226_v31  ;;  %vm2003_vm7 = vmor %vm2001_vm6, %vm2002_vm5  ;;  %vm2006_vm8 = vcmp.eq.f32.partialorder %v2005_v10, 8.507059e+37  ;;  %vm2015_vm10 = vweird.f32 %v1859_v50 }
 0x5d0   : > { %v7224_v37 = vmul.f32 %v7139_v9, %v1995_v0  ;;  %v1998_v36 = vsub.f32 1.0, %v1997_v62  ;;  %v2021_v62 = vand.u32 2147483648, %v1859_v50 }
 0x5d2   : > { %v1999_v60 = vmul.f32 %v5682_v47, %v1998_v36 }
 0x5d4   : > { %v2000_v16 = vadd.f32 %v5682_v47, %v1999_v60  ;;  %v2019_v60 = vand.u32 2147483647, %v1859_v50 }
 0x5d5   : > { %v5684_v30 = vpop.eup %5683 }
 0x5d6   : > { %v2004_v6 = vsel %vm2003_vm7, %v5682_v47, %v2000_v16  ;;  %v2011_v24 = vmul.f32 %v5684_v30, %v1859_v50  ;;  %v1861_v7 = vpop.xlane.xlu0 %1860  ;;  %v7231_v0 = vpop.f32.mrf.mxu0  ;;  %vm2016_vm9 = vweird.f32 %v5684_v30  ;;  %v2022_v47 = vor.u32 1.1754944e-38, %v2021_v62 }
 0x5d7   : > { %v2009_v63 = vsel %vm2006_vm8, %v2008_v55, %v2004_v6  ;;  %5685 = vrcp.f32 %v1861_v7  ;;  %9092 = vst [vmem:[#allocation49_spill] sm:$0xff] %v7231_v0  ;;  %vm2017_vm11 = vmor %vm2015_vm10, %vm2016_vm9  ;;  %vm2020_vm12 = vcmp.eq.f32.partialorder %v2019_v60, 8.507059e+37  ;;  %vm2029_vm14 = vweird.f32 %v1861_v7 }
 0x5d8   : > { %v7229_v9 = vmul.f32 %v7143_v3, %v2009_v63  ;;  %v2012_v61 = vsub.f32 1.0, %v2011_v24  ;;  %v2035_v24 = vand.u32 2147483648, %v1861_v7 }
 0x5da   : > { %v2013_v36 = vmul.f32 %v5684_v30, %v2012_v61 }
 0x5dc   : > { %v2014_v33 = vadd.f32 %v5684_v30, %v2013_v36  ;;  %v2033_v36 = vand.u32 2147483647, %v1861_v7 }
 0x5dd   : > { %v5686_v31 = vpop.eup %5685 }
 0x5de   : > { %v2018_v53 = vsel %vm2017_vm11, %v5684_v30, %v2014_v33  ;;  %v2025_v10 = vmul.f32 %v5686_v31, %v1861_v7  ;;  %v1863_v16 = vpop.xlane.xlu1 %1862  ;;  %v7236_v63 = vpop.f32.mrf.mxu0  ;;  %vm2030_vm13 = vweird.f32 %v5686_v31  ;;  %v2036_v30 = vor.u32 1.1754944e-38, %v2035_v24 }
 0x5df   : > { %v2023_v55 = vsel %vm2020_vm12, %v2022_v47, %v2018_v53  ;;  %5687 = vrcp.f32 %v1863_v16  ;;  %9093 = vst [vmem:[#allocation50_spill] sm:$0xff] %v7236_v63  ;;  %vm2031_vm15 = vmor %vm2029_vm14, %vm2030_vm13  ;;  %vm2034_vm0 = vcmp.eq.f32.partialorder %v2033_v36, 8.507059e+37  ;;  %vm2043_vm4 = vweird.f32 %v1863_v16 }
 0x5e0   : > { %v7234_v3 = vmul.f32 %v7151_v38, %v2023_v55  ;;  %v2026_v6 = vsub.f32 1.0, %v2025_v10  ;;  %v2049_v10 = vand.u32 2147483648, %v1863_v16 }
 0x5e2   : > { %v2027_v61 = vmul.f32 %v5686_v31, %v2026_v6  ;;  %v2047_v6 = vand.u32 2147483647, %v1863_v16 }
 0x5e4   : > { %v2028_v50 = vadd.f32 %v5686_v31, %v2027_v61  ;;  %v2050_v61 = vor.u32 1.1754944e-38, %v2049_v10  ;;  %vm2048_vm6 = vcmp.eq.f32.partialorder %v2047_v6, 8.507059e+37 }
 0x5e5   : > { %v5688_v0 = vpop.eup %5687 }
 0x5e6   : > { %v2032_v62 = vsel %vm2031_vm15, %v5686_v31, %v2028_v50  ;;  %v2039_v60 = vmul.f32 %v5688_v0, %v1863_v16  ;;  %v1865_v33 = vpop.xlane.xlu2 %1864  ;;  %vm2044_vm3 = vweird.f32 %v5688_v0 }
 0x5e7   : > { %v2037_v47 = vsel %vm2034_vm0, %v2036_v30, %v2032_v62  ;;  %5689 = vrcp.f32 %v1865_v33  ;;  %vm2045_vm5 = vmor %vm2043_vm4, %vm2044_vm3  ;;  %v2063_v62 = vand.u32 2147483648, %v1865_v33  ;;  %vm2057_vm8 = vweird.f32 %v1865_v33 }
 0x5e8   : > { %v7239_v38 = vmul.f32 %v7155_v15, %v2037_v47  ;;  %v2040_v53 = vsub.f32 1.0, %v2039_v60  ;;  %v2061_v47 = vand.u32 2147483647, %v1865_v33 }
 0x5ea   : > { %v2041_v55 = vmul.f32 %v5688_v0, %v2040_v53  ;;  %vm2062_vm10 = vcmp.eq.f32.partialorder %v2061_v47, 8.507059e+37 }
 0x5ec   : > { %v2042_v63 = vadd.f32 %v5688_v0, %v2041_v55  ;;  %v2064_v55 = vor.u32 1.1754944e-38, %v2063_v62 }
 0x5ed   : > { %v5690_v7 = vpop.eup %5689 }
 0x5ee   : > { %v2046_v24 = vsel %vm2045_vm5, %v5688_v0, %v2042_v63  ;;  %v2053_v31 = vmul.f32 %v5690_v7, %v1865_v33  ;;  %v1867_v36 = vpop.xlane.xlu0 %1866  ;;  %vm2058_vm7 = vweird.f32 %v5690_v7 }
 0x5ef   : > { %v2051_v50 = vsel %vm2048_vm6, %v2050_v61, %v2046_v24  ;;  %5691 = vrcp.f32 %v1867_v36  ;;  %vm2059_vm9 = vmor %vm2057_vm8, %vm2058_vm7  ;;  %v2077_v24 = vand.u32 2147483648, %v1867_v36  ;;  %vm2071_vm12 = vweird.f32 %v1867_v36 }
 0x5f0   : > { %v7242_v30 = vmul.f32 %v7161_v46, %v2051_v50  ;;  %v2054_v15 = vsub.f32 1.0, %v2053_v31  ;;  %v2075_v50 = vand.u32 2147483647, %v1867_v36 }
 0x5f2   : > { %v2055_v60 = vmul.f32 %v5690_v7, %v2054_v15  ;;  %vm2076_vm14 = vcmp.eq.f32.partialorder %v2075_v50, 8.507059e+37 }
 0x5f4   : > { %v2056_v53 = vadd.f32 %v5690_v7, %v2055_v60  ;;  %v2078_v60 = vor.u32 1.1754944e-38, %v2077_v24 }
 0x5f5   : > { %v5692_v16 = vpop.eup %5691 }
 0x5f6   : > { %v2060_v10 = vsel %vm2059_vm9, %v5690_v7, %v2056_v53  ;;  %v2067_v0 = vmul.f32 %v5692_v16, %v1867_v36  ;;  %v1869_v63 = vpop.xlane.xlu1 %1868  ;;  %vm2072_vm11 = vweird.f32 %v5692_v16 }
 0x5f7   : > { %v2065_v6 = vsel %vm2062_vm10, %v2064_v55, %v2060_v10  ;;  %5693 = vrcp.f32 %v1869_v63  ;;  %vm2073_vm13 = vmor %vm2071_vm12, %vm2072_vm11  ;;  %vm2085_vm0 = vweird.f32 %v1869_v63 }
 0x5f8   : > { %v7245_v61 = vmul.f32 %v7167_v54, %v2065_v6  ;;  %v2068_v46 = vsub.f32 1.0, %v2067_v0  ;;  %v2091_v54 = vand.u32 2147483648, %v1869_v63  ;;  %v2089_v0 = vand.u32 2147483647, %v1869_v63 }
 0x5fa   : > { %v2069_v31 = vmul.f32 %v5692_v16, %v2068_v46  ;;  %v2092_v46 = vor.u32 1.1754944e-38, %v2091_v54  ;;  %vm2090_vm4 = vcmp.eq.f32.partialorder %v2089_v0, 8.507059e+37 }
 0x5fc   : > { %v2070_v15 = vadd.f32 %v5692_v16, %v2069_v31 }
 0x5fd   : > { %v5694_v33 = vpop.eup %5693 }
 0x5fe   : > { %v2074_v62 = vsel %vm2073_vm13, %v5692_v16, %v2070_v15  ;;  %v2081_v7 = vmul.f32 %v5694_v33, %v1869_v63  ;;  %vm2086_vm15 = vweird.f32 %v5694_v33 }
 0x5ff   : > { %v2079_v47 = vsel %vm2076_vm14, %v2078_v60, %v2074_v62  ;;  %vm2087_vm3 = vmor %vm2085_vm0, %vm2086_vm15 }
 0x600   : > { %v7248_v53 = vmul.f32 %v7173_v35, %v2079_v47  ;;  %v2082_v55 = vsub.f32 1.0, %v2081_v7 }
 0x602   : > { %v2083_v10 = vmul.f32 %v5694_v33, %v2082_v55 }
 0x604   : > { %v2084_v6 = vadd.f32 %v5694_v33, %v2083_v10  ;;  %2112 = sbr.rel (%p5322_p1) target bundleno = 1561 (0x619), region = 64 }
 0x606   : > { %v2088_v36 = vsel %vm2087_vm3, %v5694_v33, %v2084_v6 }
 0x607   : > { %v2093_v31 = vsel %vm2090_vm4, %v2092_v46, %v2088_v36 }
 0x608   : > { %v7251_v16 = vmul.f32 %v7178_v52, %v2093_v31 }
 0x609   : > { %5332 = vst [vmem:[%s6289_s18 + $0x80] sm:$0xff] %v7184_v49 }
 0x60a   : > { %5333 = vst [vmem:[%s6289_s18 + $0x88] sm:$0xff] %v7189_v43 }
 0x60b   : > { %5334 = vst [vmem:[%s6289_s18 + $0x90] sm:$0xff] %v7194_v2 }
 0x60c   : > { %5335 = vst [vmem:[%s6289_s18 + $0x98] sm:$0xff] %v7199_v51 }
 0x60d   : > { %5336 = vst [vmem:[%s6289_s18 + $0xa0] sm:$0xff] %v7204_v25 }
 0x60e   : > { %5337 = vst [vmem:[%s6289_s18 + $0xa8] sm:$0xff] %v7209_v19 }
 0x60f   : > { %5338 = vst [vmem:[%s6289_s18 + $0xb0] sm:$0xff] %v7214_v12 }
 0x610   : > { %5339 = vst [vmem:[%s6289_s18 + $0xb8] sm:$0xff] %v7219_v58 }
 0x611   : > { %5340 = vst [vmem:[%s6289_s18 + $0xc0] sm:$0xff] %v7224_v37 }
 0x612   : > { %5341 = vst [vmem:[%s6289_s18 + $0xc8] sm:$0xff] %v7229_v9 }
 0x613   : > { %5342 = vst [vmem:[%s6289_s18 + $0xd0] sm:$0xff] %v7234_v3 }
 0x614   : > { %5343 = vst [vmem:[%s6289_s18 + $0xd8] sm:$0xff] %v7239_v38 }
 0x615   : > { %5344 = vst [vmem:[%s6289_s18 + $0xe0] sm:$0xff] %v7242_v30 }
 0x616   : > { %5345 = vst [vmem:[%s6289_s18 + $0xe8] sm:$0xff] %v7245_v61 }
 0x617   : > { %5346 = vst [vmem:[%s6289_s18 + $0xf0] sm:$0xff] %v7248_v53 }
 0x618   : > { %5347 = vst [vmem:[%s6289_s18 + $0xf8] sm:$0xff] %v7251_v16 }
 0x619 PF: > { %s6113_s28 = smov 112   ;;  %v9094_v35 = vld [vmem:[#allocation36_spill] sm:$0xff]  ;;  %v9095_v52 = vld [vmem:[#allocation33_spill] sm:$0xff] }
 0x61a   : > { %2297 = vrot.lane.b32.xlu0 %v6487_v4, %s6113_s28  ;;  %2293 = vrot.lane.b32.xlu1 %v6497_v27, %s6113_s28 }
 0x61b   : > { %2289 = vrot.lane.b32.xlu2 %v6511_v5, %s6113_s28 }
 0x622   : > { %2295 = vrot.lane.b32.xlu0 %v6493_v20, %s6113_s28  ;;  %2291 = vrot.lane.b32.xlu1 %v6505_v44, %s6113_s28 }
 0x623   : > { %2287 = vrot.lane.b32.xlu2 %v6515_v18, %s6113_s28 }
 0x62a   : > { %2285 = vrot.lane.b32.xlu0 %v6481_v34, %s6113_s28  ;;  %2283 = vrot.lane.b32.xlu1 %v6477_v23, %s6113_s28 }
 0x62b   : > { %2267 = vrot.lane.b32.xlu2 %v6528_v32, %s6113_s28 }
 0x632   : > { %2269 = vrot.lane.b32.xlu0 %v6534_v45, %s6113_s28  ;;  %2271 = vrot.lane.b32.xlu1 %v6540_v17, %s6113_s28 }
 0x633   : > { %2273 = vrot.lane.b32.xlu2 %v6546_v28, %s6113_s28 }
 0x63a   : > { %2275 = vrot.lane.b32.xlu0 %v6552_v40, %s6113_s28  ;;  %2277 = vrot.lane.b32.xlu1 %v6558_v14, %s6113_s28 }
 0x63b   : > { %2208 = vrot.lane.b32.xlu2 %v6982_v56, %s6112_s30 }
 0x642   : > { %2206 = vrot.lane.b32.xlu0 %v6992_v21, %s6112_s30  ;;  %2204 = vrot.lane.b32.xlu1 %v7004_v22, %s6112_s30 }
 0x643   : > { %2202 = vrot.lane.b32.xlu2 %v7014_v59, %s6112_s30 }
 0x64a   : > { %2279 = vrot.lane.b32.xlu0 %v6564_v26, %s6113_s28  ;;  %2200 = vrot.lane.b32.xlu1 %v7026_v8, %s6112_s30 }
 0x64b   : > { %2198 = vrot.lane.b32.xlu2 %v7036_v29, %s6112_s30 }
 0x652   : > { %2196 = vrot.lane.b32.xlu0 %v7048_v57, %s6112_s30  ;;  %2194 = vrot.lane.b32.xlu1 %v9094_v35, %s6112_s30 }
 0x653   : > { %2281 = vrot.lane.b32.xlu2 %v9095_v52, %s6113_s28 }
 0x675   : > { %v2290_v47 = vpop.permute.xlu2 %2289 }
 0x676   : > { %v2333_v55 = vsel %vm931_vm2, %v2290_v47, 0 }
 0x67d   : > { %v2288_v54 = vpop.permute.xlu2 %2287 }
 0x67e   : > { %v2330_v10 = vsel %vm931_vm2, %v2288_v54, 0 }
 0x685   : > { %v2268_v31 = vpop.permute.xlu2 %2267 }
 0x68c   : > { %v2298_v63 = vpop.permute.xlu0 %2297  ;;  %v2294_v33 = vpop.permute.xlu1 %2293 }
 0x68d   : > { %v2345_v24 = vsel %vm931_vm2, %v2298_v63, 0  ;;  %v2339_v60 = vsel %vm931_vm2, %v2294_v33, 0  ;;  %v2274_v63 = vpop.permute.xlu2 %2273 }
 0x68e   : > { %2347 = vmatpush.bf16.xpose.msra.mxu3 %v2345_v24 }
 0x694   : > { %v2296_v50 = vpop.permute.xlu0 %2295  ;;  %v2292_v62 = vpop.permute.xlu1 %2291 }
 0x695   : > { %v2342_v15 = vsel %vm931_vm2, %v2296_v50, 0  ;;  %v2336_v7 = vsel %vm931_vm2, %v2292_v62, 0 }
 0x696   : > { %2348 = vmatpush.bf16.xpose.msra.mxu3 %v2342_v15  ;;  %v2209_v15 = vpop.permute.xlu2 %2208 }
 0x697   : > { %2218 = vmatpush.bf16.msra.mxu2 %v2209_v15 }
 0x69c   : > { %v2286_v0 = vpop.permute.xlu0 %2285  ;;  %v2284_v46 = vpop.permute.xlu1 %2283 }
 0x69d   : > { %v2327_v6 = vsel %vm931_vm2, %v2286_v0, 0  ;;  %v2324_v36 = vsel %vm931_vm2, %v2284_v46, 0 }
 0x69e   : > { %2349 = vmatpush.bf16.xpose.msra.mxu3 %v2339_v60  ;;  %v2203_v62 = vpop.permute.xlu2 %2202 }
 0x6a4   : > { %v2270_v35 = vpop.permute.xlu0 %2269  ;;  %v2272_v52 = vpop.permute.xlu1 %2271 }
 0x6a6   : > { %2350 = vmatpush.bf16.xpose.msra.mxu3 %v2336_v7  ;;  %v2199_v47 = vpop.permute.xlu2 %2198 }
 0x6ac   : > { %v2276_v24 = vpop.permute.xlu0 %2275  ;;  %v2278_v50 = vpop.permute.xlu1 %2277 }
 0x6ae   : > { %2351 = vmatpush.bf16.xpose.msra.mxu3 %v2333_v55  ;;  %v2282_v54 = vpop.permute.xlu2 %2281 }
 0x6b4   : > { %v2207_v33 = vpop.permute.xlu0 %2206  ;;  %v2205_v60 = vpop.permute.xlu1 %2204 }
 0x6b5   : > { %2219 = vmatpush.bf16.msra.mxu2 %v2207_v33 }
 0x6b6   : > { %2352 = vmatpush.bf16.xpose.msra.mxu3 %v2330_v10 }
 0x6b9   : > { %2220 = vmatpush.bf16.msra.mxu2 %v2205_v60 }
 0x6bc   : > { %v2201_v7 = vpop.permute.xlu1 %2200  ;;  %v2280_v55 = vpop.permute.xlu0 %2279 }
 0x6bd   : > { %2221 = vmatpush.bf16.msra.mxu2 %v2203_v62 }
 0x6be   : > { %2353 = vmatpush.bf16.xpose.msra.mxu3 %v2327_v6 }
 0x6c1   : > { %2222 = vmatpush.bf16.msra.mxu2 %v2201_v7 }
 0x6c5   : > { %2223 = vmatpush.bf16.msra.mxu2 %v2199_v47 }
 0x6c6   : > { %2354 = vmatpush.bf16.xpose.msra.mxu3 %v2324_v36 }
 0x6cd   : > { %5348 = vmatmul.msk.bf16.vlgmr.msra.gmra.mxu3 %vm931_vm2, %v2268_v31 }
 0x6dd   : > { %5349 = vmatmul.msk.bf16.gmra.mxu3 %vm931_vm2, %v2270_v35 }
 0x6ed   : > { %5350 = vmatmul.msk.bf16.gmra.mxu3 %vm931_vm2, %v2272_v52 }
 0x6fd   : > { %5351 = vmatmul.msk.bf16.gmra.mxu3 %vm931_vm2, %v2274_v63 }
 0x70d   : > { %5352 = vmatmul.msk.bf16.gmra.mxu3 %vm931_vm2, %v2276_v24 }
 0x71d   : > { %5353 = vmatmul.msk.bf16.gmra.mxu3 %vm931_vm2, %v2278_v50 }
 0x72d   : > { %5354 = vmatmul.msk.bf16.gmra.mxu3 %vm931_vm2, %v2280_v55 }
 0x73d   : > { %5355 = vmatmul.msk.bf16.gmra.mxu3 %vm931_vm2, %v2282_v54 }
 0x750   : > { %v2356_v10 = vpop.f32.mrf.mxu3 }
 0x751   : > { %v2396_v0 = vmul.f32 0.35355338, %v2356_v10 }
 0x753   : > { %v7352_v6 = vadd.f32 %v6579_v39, %v2396_v0 }
 0x755   : > { %2428 = vmax.xlane.f32.xlu0 %v7352_v6 }
 0x758   : > { %v2358_v46 = vpop.f32.mrf.mxu3 }
 0x759   : > { %v2397_v36 = vmul.f32 0.35355338, %v2358_v46 }
 0x75b   : > { %v7356_v31 = vadd.f32 %v6579_v39, %v2397_v36 }
 0x75d   : > { %2430 = vmax.xlane.f32.xlu1 %v7356_v31 }
 0x760   : > { %v2361_v35 = vpop.f32.mrf.mxu3 }
 0x761   : > { %v2398_v52 = vmul.f32 0.35355338, %v2361_v35 }
 0x763   : > { %v7360_v63 = vadd.f32 %v6579_v39, %v2398_v52 }
 0x765   : > { %2432 = vmax.xlane.f32.xlu2 %v7360_v63 }
 0x768   : > { %v2363_v24 = vpop.f32.mrf.mxu3 }
 0x769   : > { %v2399_v50 = vmul.f32 0.35355338, %v2363_v24 }
 0x76b   : > { %v7364_v15 = vadd.f32 %v6579_v39, %v2399_v50 }
 0x76d   : > { %2434 = vmax.xlane.f32.xlu2 %v7364_v15 }
 0x770   : > { %v2366_v33 = vpop.f32.mrf.mxu3 }
 0x771   : > { %v2400_v60 = vmul.f32 0.35355338, %v2366_v33 }
 0x773   : > { %v7368_v62 = vadd.f32 %v6579_v39, %v2400_v60 }
 0x775   : > { %2436 = vmax.xlane.f32.xlu0 %v7368_v62 }
 0x778   : > { %v2368_v7 = vpop.f32.mrf.mxu3 }
 0x779   : > { %v2401_v47 = vmul.f32 0.35355338, %v2368_v7 }
 0x77b   : > { %v7372_v55 = vadd.f32 %v6579_v39, %v2401_v47 }
 0x77d   : > { %2438 = vmax.xlane.f32.xlu1 %v7372_v55 }
 0x780   : > { %v2371_v54 = vpop.f32.mrf.mxu3 }
 0x781   : > { %v2402_v10 = vmul.f32 0.35355338, %v2371_v54  ;;  %v2197_v54 = vpop.permute.xlu0 %2196 }
 0x782   : > { %2224 = vmatpush.bf16.msra.mxu2 %v2197_v54 }
 0x783   : > { %v7376_v0 = vadd.f32 %v6579_v39, %v2402_v10 }
 0x785   : > { %2440 = vmax.xlane.f32.xlu2 %v7376_v0 }
 0x788   : > { %v2373_v46 = vpop.f32.mrf.mxu3 }
 0x789   : > { %v2403_v36 = vmul.f32 0.35355338, %v2373_v46 }
 0x78b   : > { %v7380_v35 = vadd.f32 %v6579_v39, %v2403_v36  ;;  %v2195_v36 = vpop.permute.xlu1 %2194 }
 0x78c   : > { %2225 = vmatpush.bf16.msra.mxu2 %v2195_v36 }
 0x78d   : > { %2442 = vmax.xlane.f32.xlu0 %v7380_v35 }
 0x790   : > { %v2376_v52 = vpop.f32.mrf.mxu3 }
 0x791   : > { %v2404_v24 = vmul.f32 0.35355338, %v2376_v52 }
 0x793   : > { %v7384_v50 = vadd.f32 %v6579_v39, %v2404_v24  ;;  %v2130_v24 = vpack.c.bf16 %v7184_v49, %v7184_v49 }
 0x795   : > { %2444 = vmax.xlane.f32.xlu1 %v7384_v50  ;;  %v2162_v42 = vunpack.c.l.b16 %v2130_v24 }
 0x798   : > { %v2378_v33 = vpop.f32.mrf.mxu3 }
 0x799   : > { %v2405_v60 = vmul.f32 0.35355338, %v2378_v33  ;;  %v2131_v33 = vpack.c.bf16 %v7189_v43, %v7189_v43  ;;  %v2132_v43 = vpack.c.bf16 %v7194_v2, %v7194_v2 }
 0x79b   : > { %v7388_v7 = vadd.f32 %v6579_v39, %v2405_v60  ;;  %v2163_v13 = vunpack.c.l.b16 %v2131_v33  ;;  %v2164_v33 = vunpack.c.l.b16 %v2132_v43 }
 0x79d   : > { %2446 = vmax.xlane.f32.xlu2 %v7388_v7  ;;  %v2178_v54 = vpack.c.b16 %v2163_v13, %v2162_v42 }
 0x79f   : > { %2226 = vmatmul.bf16.vlgmr.msra.gmra.mxu2 %v2178_v54 }
 0x7a0   : > { %v2381_v47 = vpop.f32.mrf.mxu3 }
 0x7a1   : > { %v2406_v10 = vmul.f32 0.35355338, %v2381_v47 }
 0x7a3   : > { %v7392_v46 = vadd.f32 %v6579_v39, %v2406_v10 }
 0x7a5   : > { %2448 = vmax.xlane.f32.xlu0 %v7392_v46 }
 0x7a8   : > { %v2383_v52 = vpop.f32.mrf.mxu3 }
 0x7a9   : > { %v2407_v60 = vmul.f32 0.35355338, %v2383_v52  ;;  %v2133_v52 = vpack.c.bf16 %v7199_v51, %v7199_v51  ;;  %v2134_v51 = vpack.c.bf16 %v7204_v25, %v7204_v25 }
 0x7ab   : > { %v7400_v47 = vadd.f32 %v6579_v39, %v2407_v60  ;;  %v2165_v42 = vunpack.c.l.b16 %v2133_v52 }
 0x7ad   : > { %2450 = vmax.xlane.f32.xlu1 %v7400_v47  ;;  %v2179_v60 = vpack.c.b16 %v2165_v42, %v2164_v33 }
 0x7af   : > { %2231 = vmatmul.bf16.gmra.mxu2 %v2179_v60 }
 0x7b0   : > { %v2386_v10 = vpop.f32.mrf.mxu3 }
 0x7b1   : > { %v2408_v11 = vmul.f32 0.35355338, %v2386_v10 }
 0x7b3   : > { %v7404_v36 = vadd.f32 %v6579_v39, %v2408_v11 }
 0x7b5   : > { %2452 = vmax.xlane.f32.xlu2 %v7404_v36 }
 0x7b8   : > { %v2388_v49 = vpop.f32.mrf.mxu3 }
 0x7b9   : > { %v2409_v24 = vmul.f32 0.35355338, %v2388_v49  ;;  %v2135_v49 = vpack.c.bf16 %v7209_v19, %v7209_v19 }
 0x7bb   : > { %v7412_v13 = vadd.f32 %v6579_v39, %v2409_v24  ;;  %v2166_v24 = vunpack.c.l.b16 %v2134_v51  ;;  %v2167_v33 = vunpack.c.l.b16 %v2135_v49 }
 0x7bd   : > { %2454 = vmax.xlane.f32.xlu0 %v7412_v13 }
 0x7c0   : > { %v2391_v11 = vpop.f32.mrf.mxu3 }
 0x7c1   : > { %v2410_v54 = vmul.f32 0.35355338, %v2391_v11  ;;  %v2180_v11 = vpack.c.b16 %v2167_v33, %v2166_v24 }
 0x7c3   : > { %v7416_v10 = vadd.f32 %v6579_v39, %v2410_v54  ;;  %2236 = vmatmul.bf16.gmra.mxu2 %v2180_v11 }
 0x7c5   : > { %2456 = vmax.xlane.f32.xlu1 %v7416_v10 }
 0x7c8   : > { %v2393_v2 = vpop.f32.mrf.mxu3  ;;  %v2429_v41 = vpop.xlane.xlu0 %2428 }
 0x7c9   : > { %v2411_v43 = vmul.f32 0.35355338, %v2393_v2  ;;  %v2460_v52 = vsub.f32 %v7352_v6, %v2429_v41  ;;  %v2136_v6 = vpack.c.bf16 %v7214_v12, %v7214_v12  ;;  %v2137_v2 = vpack.c.bf16 %v7219_v58, %v7219_v58 }
 0x7cb   : > { %v7425_v42 = vadd.f32 %v6579_v39, %v2411_v43  ;;  %v2476_v60 = vmul.f32 1.442695, %v2460_v52  ;;  %v2168_v49 = vunpack.c.l.b16 %v2136_v6  ;;  %v2169_v43 = vunpack.c.l.b16 %v2137_v2 }
 0x7cd   : > { %5695 = vpow2.f32 %v2476_v60  ;;  %2458 = vmax.xlane.f32.xlu2 %v7425_v42  ;;  %v2181_v24 = vpack.c.b16 %v2169_v43, %v2168_v49 }
 0x7d0   : > { %v2431_v54 = vpop.xlane.xlu1 %2430 }
 0x7d1   : > { %v2461_v25 = vsub.f32 %v7356_v31, %v2431_v54  ;;  %v2139_v54 = vpack.c.bf16 %v7229_v9, %v7229_v9 }
 0x7d3   : > { %v7429_v48 = vpop.eup %5695  ;;  %v2478_v19 = vmul.f32 1.442695, %v2461_v25  ;;  %2241 = vmatmul.bf16.gmra.mxu2 %v2181_v24 }
 0x7d4   : > { %2508 = vadd.xlane.f32.xlu0 %v7429_v48 }
 0x7d5   : > { %5697 = vpow2.f32 %v2478_v19 }
 0x7d8   : > { %v2433_v41 = vpop.xlane.xlu2 %2432 }
 0x7d9   : > { %v2462_v51 = vsub.f32 %v7360_v63, %v2433_v41  ;;  %v2138_v63 = vpack.c.bf16 %v7224_v37, %v7224_v37  ;;  %v2171_v41 = vunpack.c.l.b16 %v2139_v54 }
 0x7db   : > { %v7437_v52 = vpop.eup %5697  ;;  %v2480_v31 = vmul.f32 1.442695, %v2462_v51  ;;  %v2170_v19 = vunpack.c.l.b16 %v2138_v63 }
 0x7dc   : > { %2510 = vadd.xlane.f32.xlu1 %v7437_v52 }
 0x7dd   : > { %5699 = vpow2.f32 %v2480_v31  ;;  %v2182_v2 = vpack.c.b16 %v2171_v41, %v2170_v19  ;;  %v2141_v31 = vpack.c.bf16 %v7239_v38, %v7239_v38  ;;  %v2143_v19 = vpack.c.bf16 %v7245_v61, %v7245_v61 }
 0x7e0   : > { %v2435_v33 = vpop.xlane.xlu2 %2434 }
 0x7e1   : > { %v2463_v60 = vsub.f32 %v7364_v15, %v2435_v33 }
 0x7e3   : > { %v7441_v11 = vpop.eup %5699  ;;  %v2482_v12 = vmul.f32 1.442695, %v2463_v60  ;;  %2246 = vmatmul.bf16.gmra.mxu2 %v2182_v2  ;;  %v2173_v60 = vunpack.c.l.b16 %v2141_v31  ;;  %v2175_v2 = vunpack.c.l.b16 %v2143_v19  ;;  %v2145_v31 = vpack.c.bf16 %v7251_v16, %v7251_v16 }
 0x7e4   : > { %2512 = vadd.xlane.f32.xlu2 %v7441_v11 }
 0x7e5   : > { %5701 = vpow2.f32 %v2482_v12 }
 0x7e8   : > { %v2437_v58 = vpop.xlane.xlu0 %2436 }
 0x7e9   : > { %v2464_v25 = vsub.f32 %v7368_v62, %v2437_v58  ;;  %v2140_v62 = vpack.c.bf16 %v7234_v3, %v7234_v3 }
 0x7eb   : > { %v7449_v6 = vpop.eup %5701  ;;  %v2484_v15 = vmul.f32 1.442695, %v2464_v25  ;;  %v2172_v33 = vunpack.c.l.b16 %v2140_v62 }
 0x7ec   : > { %2514 = vadd.xlane.f32.xlu0 %v7449_v6 }
 0x7ed   : > { %5703 = vpow2.f32 %v2484_v15  ;;  %v2183_v58 = vpack.c.b16 %v2173_v60, %v2172_v33  ;;  %v2177_v60 = vunpack.c.l.b16 %v2145_v31 }
 0x7f0   : > { %v2439_v51 = vpop.xlane.xlu1 %2438 }
 0x7f1   : > { %v2465_v49 = vsub.f32 %v7372_v55, %v2439_v51 }
 0x7f3   : > { %v7453_v43 = vpop.eup %5703  ;;  %v2486_v37 = vmul.f32 1.442695, %v2465_v49  ;;  %2251 = vmatmul.bf16.gmra.mxu2 %v2183_v58 }
 0x7f4   : > { %2516 = vadd.xlane.f32.xlu1 %v7453_v43 }
 0x7f5   : > { %5705 = vpow2.f32 %v2486_v37 }
 0x7f8   : > { %v2441_v9 = vpop.xlane.xlu2 %2440 }
 0x7f9   : > { %v2466_v24 = vsub.f32 %v7376_v0, %v2441_v9  ;;  %v2142_v0 = vpack.c.bf16 %v7242_v30, %v7242_v30 }
 0x7fb   : > { %v7461_v12 = vpop.eup %5705  ;;  %v2488_v55 = vmul.f32 1.442695, %v2466_v24  ;;  %v2174_v15 = vunpack.c.l.b16 %v2142_v0 }
 0x7fc   : > { %2518 = vadd.xlane.f32.xlu2 %v7461_v12 }
 0x7fd   : > { %5707 = vpow2.f32 %v2488_v55  ;;  %v2184_v49 = vpack.c.b16 %v2175_v2, %v2174_v15 }
 0x800   : > { %v2443_v63 = vpop.xlane.xlu0 %2442 }
 0x801   : > { %v2467_v54 = vsub.f32 %v7380_v35, %v2443_v63 }
 0x803   : > { %v7465_v25 = vpop.eup %5707  ;;  %v2490_v3 = vmul.f32 1.442695, %v2467_v54  ;;  %2256 = vmatmul.bf16.gmra.mxu2 %v2184_v49 }
 0x804   : > { %2520 = vadd.xlane.f32.xlu0 %v7465_v25 }
 0x805   : > { %5709 = vpow2.f32 %v2490_v3 }
 0x808   : > { %v2445_v38 = vpop.xlane.xlu1 %2444 }
 0x809   : > { %v2468_v41 = vsub.f32 %v7384_v50, %v2445_v38  ;;  %v2144_v50 = vpack.c.bf16 %v7248_v53, %v7248_v53 }
 0x80b   : > { %v7473_v51 = vpop.eup %5709  ;;  %v2492_v35 = vmul.f32 1.442695, %v2468_v41  ;;  %v2176_v33 = vunpack.c.l.b16 %v2144_v50 }
 0x80c   : > { %2522 = vadd.xlane.f32.xlu1 %v7473_v51 }
 0x80d   : > { %5711 = vpow2.f32 %v2492_v35  ;;  %v2185_v58 = vpack.c.b16 %v2177_v60, %v2176_v33 }
 0x810   : > { %v2447_v37 = vpop.xlane.xlu2 %2446 }
 0x811   : > { %v2469_v9 = vsub.f32 %v7388_v7, %v2447_v37 }
 0x813   : > { %v7477_v62 = vpop.eup %5711  ;;  %v2494_v30 = vmul.f32 1.442695, %v2469_v9  ;;  %2261 = vmatmul.bf16.gmra.mxu2 %v2185_v58 }
 0x814   : > { %2524 = vadd.xlane.f32.xlu2 %v7477_v62 }
 0x815   : > { %5713 = vpow2.f32 %v2494_v30 }
 0x818   : > { %v2449_v61 = vpop.xlane.xlu0 %2448 }
 0x819   : > { %v2470_v24 = vsub.f32 %v7392_v46, %v2449_v61 }
 0x81b   : > { %v7485_v55 = vpop.eup %5713  ;;  %v2496_v7 = vmul.f32 1.442695, %v2470_v24 }
 0x81c   : > { %2526 = vadd.xlane.f32.xlu0 %v7485_v55 }
 0x81d   : > { %5715 = vpow2.f32 %v2496_v7 }
 0x820   : > { %v2451_v63 = vpop.xlane.xlu1 %2450 }
 0x821   : > { %v2471_v54 = vsub.f32 %v7400_v47, %v2451_v63 }
 0x822   : > { %v7497_v15 = vpop.f32.mrf.mxu2 }
 0x823   : > { %v7489_v3 = vpop.eup %5715  ;;  %v2498_v53 = vmul.f32 1.442695, %v2471_v54 }
 0x824   : > { %2528 = vadd.xlane.f32.xlu1 %v7489_v3 }
 0x825   : > { %5717 = vpow2.f32 %v2498_v53 }
 0x828   : > { %v2453_v16 = vpop.xlane.xlu2 %2452 }
 0x829   : > { %v2472_v46 = vsub.f32 %v7404_v36, %v2453_v16 }
 0x82a   : > { %v7503_v49 = vpop.f32.mrf.mxu2 }
 0x82b   : > { %v7493_v38 = vpop.eup %5717  ;;  %v2500_v0 = vmul.f32 1.442695, %v2472_v46 }
 0x82c   : > { %2530 = vadd.xlane.f32.xlu2 %v7493_v38 }
 0x82d   : > { %5719 = vpow2.f32 %v2500_v0 }
 0x830   : > { %v2455_v19 = vpop.xlane.xlu0 %2454 }
 0x831   : > { %v2473_v41 = vsub.f32 %v7412_v13, %v2455_v19 }
 0x832   : > { %v7509_v61 = vpop.f32.mrf.mxu2 }
 0x833   : > { %v7499_v47 = vpop.eup %5719  ;;  %v2502_v2 = vmul.f32 1.442695, %v2473_v41 }
 0x834   : > { %2532 = vadd.xlane.f32.xlu0 %v7499_v47 }
 0x835   : > { %5721 = vpow2.f32 %v2502_v2 }
 0x838   : > { %v2457_v35 = vpop.xlane.xlu1 %2456 }
 0x839   : > { %v2474_v36 = vsub.f32 %v7416_v10, %v2457_v35 }
 0x83a   : > { %v7514_v24 = vpop.f32.mrf.mxu2 }
 0x83b   : > { %v7505_v37 = vpop.eup %5721  ;;  %v2504_v9 = vmul.f32 1.442695, %v2474_v36 }
 0x83c   : > { %2534 = vadd.xlane.f32.xlu1 %v7505_v37 }
 0x83d   : > { %5723 = vpow2.f32 %v2504_v9 }
 0x840   : > { %v2459_v13 = vpop.xlane.xlu2 %2458 }
 0x841   : > { %v2475_v30 = vsub.f32 %v7425_v42, %v2459_v13 }
 0x843   : > { %v7511_v50 = vpop.eup %5723  ;;  %v2506_v31 = vmul.f32 1.442695, %v2475_v30 }
 0x844   : > { %2536 = vadd.xlane.f32.xlu2 %v7511_v50 }
 0x845   : > { %5725 = vpow2.f32 %v2506_v31 }
 0x846   : > { %v7519_v54 = vpop.f32.mrf.mxu2 }
 0x847   : > { %v2509_v10 = vpop.xlane.xlu0 %2508 }
 0x848   : > { %5727 = vrcp.f32 %v2509_v10  ;;  %v2551_v63 = vand.u32 2147483648, %v2509_v10  ;;  %v2549_v16 = vand.u32 2147483647, %v2509_v10  ;;  %vm2545_vm6 = vweird.f32 %v2509_v10 }
 0x84a   : > { %v2552_v19 = vor.u32 1.1754944e-38, %v2551_v63  ;;  %vm2550_vm8 = vcmp.eq.f32.partialorder %v2549_v16, 8.507059e+37 }
 0x84b   : > { %v7516_v33 = vpop.eup %5725 }
 0x84c   : > { %2538 = vadd.xlane.f32.xlu0 %v7516_v33 }
 0x84e   : > { %v5728_v60 = vpop.eup %5727  ;;  %v7524_v31 = vpop.f32.mrf.mxu2 }
 0x84f   : > { %v2541_v7 = vmul.f32 %v5728_v60, %v2509_v10  ;;  %v2511_v58 = vpop.xlane.xlu1 %2510  ;;  %vm2546_vm5 = vweird.f32 %v5728_v60 }
 0x850   : > { %5729 = vrcp.f32 %v2511_v58  ;;  %vm2547_vm7 = vmor %vm2545_vm6, %vm2546_vm5  ;;  %v2565_v30 = vand.u32 2147483648, %v2511_v58  ;;  %vm2559_vm10 = vweird.f32 %v2511_v58 }
 0x851   : > { %v2542_v42 = vsub.f32 1.0, %v2541_v7 }
 0x853   : > { %v2543_v53 = vmul.f32 %v5728_v60, %v2542_v42  ;;  %v2563_v42 = vand.u32 2147483647, %v2511_v58 }
 0x855   : > { %v2544_v46 = vadd.f32 %v5728_v60, %v2543_v53  ;;  %vm2564_vm12 = vcmp.eq.f32.partialorder %v2563_v42, 8.507059e+37 }
 0x856   : > { %v5730_v0 = vpop.eup %5729 }
 0x857   : > { %v2548_v41 = vsel %vm2547_vm7, %v5728_v60, %v2544_v46  ;;  %v2555_v2 = vmul.f32 %v5730_v0, %v2511_v58  ;;  %v2513_v35 = vpop.xlane.xlu2 %2512  ;;  %vm2560_vm9 = vweird.f32 %v5730_v0  ;;  %v2566_v60 = vor.u32 1.1754944e-38, %v2565_v30 }
 0x858   : > { %v2553_v36 = vsel %vm2550_vm8, %v2552_v19, %v2548_v41  ;;  %5731 = vrcp.f32 %v2513_v35  ;;  %vm2561_vm11 = vmor %vm2559_vm10, %vm2560_vm9  ;;  %vm2573_vm14 = vweird.f32 %v2513_v35 }
 0x859   : > { %v7522_v9 = vmul.f32 %v7429_v48, %v2553_v36  ;;  %v2556_v13 = vsub.f32 1.0, %v2555_v2  ;;  %v2579_v2 = vand.u32 2147483648, %v2513_v35  ;;  %v7529_v36 = vpop.f32.mrf.mxu2 }
 0x85a   : > { %9096 = vst [vmem:[#allocation51_spill] sm:$0xff] %v7529_v36 }
 0x85b   : > { %v2557_v7 = vmul.f32 %v5730_v0, %v2556_v13 }
 0x85d   : > { %v2558_v10 = vadd.f32 %v5730_v0, %v2557_v7  ;;  %v2577_v7 = vand.u32 2147483647, %v2513_v35 }
 0x85e   : > { %v5732_v53 = vpop.eup %5731 }
 0x85f   : > { %v2562_v63 = vsel %vm2561_vm11, %v5730_v0, %v2558_v10  ;;  %v2569_v16 = vmul.f32 %v5732_v53, %v2513_v35  ;;  %v2515_v46 = vpop.xlane.xlu0 %2514  ;;  %vm2574_vm13 = vweird.f32 %v5732_v53  ;;  %v2580_v0 = vor.u32 1.1754944e-38, %v2579_v2 }
 0x860   : > { %v2567_v19 = vsel %vm2564_vm12, %v2566_v60, %v2562_v63  ;;  %5733 = vrcp.f32 %v2515_v46  ;;  %vm2575_vm15 = vmor %vm2573_vm14, %vm2574_vm13  ;;  %vm2578_vm0 = vcmp.eq.f32.partialorder %v2577_v7, 8.507059e+37  ;;  %vm2587_vm4 = vweird.f32 %v2515_v46 }
 0x861   : > { %v7527_v48 = vmul.f32 %v7437_v52, %v2567_v19  ;;  %v2570_v41 = vsub.f32 1.0, %v2569_v16  ;;  %v2593_v16 = vand.u32 2147483648, %v2515_v46  ;;  %v7534_v19 = vpop.f32.mrf.mxu2 }
 0x862   : > { %9097 = vst [vmem:[#allocation52_spill] sm:$0xff] %v7534_v19 }
 0x863   : > { %v2571_v13 = vmul.f32 %v5732_v53, %v2570_v41 }
 0x865   : > { %v2572_v58 = vadd.f32 %v5732_v53, %v2571_v13  ;;  %v2591_v13 = vand.u32 2147483647, %v2515_v46 }
 0x866   : > { %v5734_v1 = vpop.eup %5733 }
 0x867   : > { %v2576_v30 = vsel %vm2575_vm15, %v5732_v53, %v2572_v58  ;;  %v2583_v42 = vmul.f32 %v5734_v1, %v2515_v46  ;;  %v2517_v10 = vpop.xlane.xlu1 %2516  ;;  %vm2588_vm3 = vweird.f32 %v5734_v1  ;;  %v2594_v53 = vor.u32 1.1754944e-38, %v2593_v16 }
 0x868   : > { %v2581_v60 = vsel %vm2578_vm0, %v2580_v0, %v2576_v30  ;;  %5735 = vrcp.f32 %v2517_v10  ;;  %vm2589_vm5 = vmor %vm2587_vm4, %vm2588_vm3  ;;  %vm2592_vm6 = vcmp.eq.f32.partialorder %v2591_v13, 8.507059e+37  ;;  %vm2601_vm8 = vweird.f32 %v2517_v10 }
 0x869   : > { %v7532_v52 = vmul.f32 %v7441_v11, %v2581_v60  ;;  %v2584_v63 = vsub.f32 1.0, %v2583_v42  ;;  %v2607_v42 = vand.u32 2147483648, %v2517_v10  ;;  %v7539_v60 = vpop.f32.mrf.mxu2 }
 0x86a   : > { %9098 = vst [vmem:[#allocation53_spill] sm:$0xff] %v7539_v60 }
 0x86b   : > { %v2585_v41 = vmul.f32 %v5734_v1, %v2584_v63 }
 0x86d   : > { %v2586_v35 = vadd.f32 %v5734_v1, %v2585_v41  ;;  %v2605_v41 = vand.u32 2147483647, %v2517_v10 }
 0x86e   : > { %v5736_v36 = vpop.eup %5735 }
 0x86f   : > { %v2590_v2 = vsel %vm2589_vm5, %v5734_v1, %v2586_v35  ;;  %v2597_v7 = vmul.f32 %v5736_v36, %v2517_v10  ;;  %v2519_v58 = vpop.xlane.xlu2 %2518  ;;  %vm2602_vm7 = vweird.f32 %v5736_v36  ;;  %v2608_v1 = vor.u32 1.1754944e-38, %v2607_v42 }
 0x870   : > { %v2595_v0 = vsel %vm2592_vm6, %v2594_v53, %v2590_v2  ;;  %5737 = vrcp.f32 %v2519_v58  ;;  %vm2603_vm9 = vmor %vm2601_vm8, %vm2602_vm7  ;;  %vm2606_vm10 = vcmp.eq.f32.partialorder %v2605_v41, 8.507059e+37  ;;  %vm2615_vm12 = vweird.f32 %v2519_v58 }
 0x871   : > { %v7537_v11 = vmul.f32 %v7449_v6, %v2595_v0  ;;  %v2598_v30 = vsub.f32 1.0, %v2597_v7  ;;  %v2621_v7 = vand.u32 2147483648, %v2519_v58  ;;  %v7544_v0 = vpop.f32.mrf.mxu2 }
 0x872   : > { %9099 = vst [vmem:[#allocation54_spill] sm:$0xff] %v7544_v0 }
 0x873   : > { %v2599_v63 = vmul.f32 %v5736_v36, %v2598_v30 }
 0x875   : > { %v2600_v46 = vadd.f32 %v5736_v36, %v2599_v63  ;;  %v2619_v63 = vand.u32 2147483647, %v2519_v58 }
 0x876   : > { %v5738_v19 = vpop.eup %5737 }
 0x877   : > { %v2604_v16 = vsel %vm2603_vm9, %v5736_v36, %v2600_v46  ;;  %v2611_v13 = vmul.f32 %v5738_v19, %v2519_v58  ;;  %v2521_v35 = vpop.xlane.xlu0 %2520  ;;  %vm2616_vm11 = vweird.f32 %v5738_v19  ;;  %v2622_v36 = vor.u32 1.1754944e-38, %v2621_v7 }
 0x878   : > { %v2609_v53 = vsel %vm2606_vm10, %v2608_v1, %v2604_v16  ;;  %5739 = vrcp.f32 %v2521_v35  ;;  %vm2617_vm13 = vmor %vm2615_vm12, %vm2616_vm11  ;;  %vm2620_vm14 = vcmp.eq.f32.partialorder %v2619_v63, 8.507059e+37  ;;  %vm2629_vm0 = vweird.f32 %v2521_v35 }
 0x879   : > { %v7542_v6 = vmul.f32 %v7453_v43, %v2609_v53  ;;  %v2612_v2 = vsub.f32 1.0, %v2611_v13  ;;  %v2635_v13 = vand.u32 2147483648, %v2521_v35  ;;  %v7549_v53 = vpop.f32.mrf.mxu2 }
 0x87a   : > { %9100 = vst [vmem:[#allocation55_spill] sm:$0xff] %v7549_v53 }
 0x87b   : > { %v2613_v30 = vmul.f32 %v5738_v19, %v2612_v2 }
 0x87d   : > { %v2614_v10 = vadd.f32 %v5738_v19, %v2613_v30  ;;  %v2633_v30 = vand.u32 2147483647, %v2521_v35 }
 0x87e   : > { %v5740_v60 = vpop.eup %5739 }
 0x87f   : > { %v2618_v42 = vsel %vm2617_vm13, %v5738_v19, %v2614_v10  ;;  %v2625_v41 = vmul.f32 %v5740_v60, %v2521_v35  ;;  %v2523_v46 = vpop.xlane.xlu1 %2522  ;;  %vm2630_vm15 = vweird.f32 %v5740_v60  ;;  %v2636_v19 = vor.u32 1.1754944e-38, %v2635_v13 }
 0x880   : > { %v2623_v1 = vsel %vm2620_vm14, %v2622_v36, %v2618_v42  ;;  %5741 = vrcp.f32 %v2523_v46  ;;  %vm2631_vm3 = vmor %vm2629_vm0, %vm2630_vm15  ;;  %vm2634_vm4 = vcmp.eq.f32.partialorder %v2633_v30, 8.507059e+37  ;;  %vm2643_vm6 = vweird.f32 %v2523_v46 }
 0x881   : > { %v7547_v43 = vmul.f32 %v7461_v12, %v2623_v1  ;;  %v2626_v16 = vsub.f32 1.0, %v2625_v41  ;;  %v2649_v41 = vand.u32 2147483648, %v2523_v46  ;;  %v7554_v1 = vpop.f32.mrf.mxu2 }
 0x882   : > { %9101 = vst [vmem:[#allocation56_spill] sm:$0xff] %v7554_v1 }
 0x883   : > { %v2627_v2 = vmul.f32 %v5740_v60, %v2626_v16 }
 0x885   : > { %v2628_v58 = vadd.f32 %v5740_v60, %v2627_v2  ;;  %v2647_v2 = vand.u32 2147483647, %v2523_v46 }
 0x886   : > { %v5742_v0 = vpop.eup %5741 }
 0x887   : > { %v2632_v7 = vsel %vm2631_vm3, %v5740_v60, %v2628_v58  ;;  %v2639_v63 = vmul.f32 %v5742_v0, %v2523_v46  ;;  %v2525_v10 = vpop.xlane.xlu2 %2524  ;;  %vm2644_vm5 = vweird.f32 %v5742_v0  ;;  %v2650_v60 = vor.u32 1.1754944e-38, %v2649_v41 }
 0x888   : > { %v2637_v36 = vsel %vm2634_vm4, %v2636_v19, %v2632_v7  ;;  %5743 = vrcp.f32 %v2525_v10  ;;  %vm2645_vm7 = vmor %vm2643_vm6, %vm2644_vm5  ;;  %vm2648_vm8 = vcmp.eq.f32.partialorder %v2647_v2, 8.507059e+37  ;;  %vm2657_vm10 = vweird.f32 %v2525_v10 }
 0x889   : > { %v7552_v12 = vmul.f32 %v7465_v25, %v2637_v36  ;;  %v2640_v42 = vsub.f32 1.0, %v2639_v63  ;;  %v2663_v63 = vand.u32 2147483648, %v2525_v10  ;;  %v7559_v36 = vpop.f32.mrf.mxu2 }
 0x88a   : > { %9102 = vst [vmem:[#allocation57_spill] sm:$0xff] %v7559_v36 }
 0x88b   : > { %v2641_v16 = vmul.f32 %v5742_v0, %v2640_v42 }
 0x88d   : > { %v2642_v35 = vadd.f32 %v5742_v0, %v2641_v16  ;;  %v2661_v16 = vand.u32 2147483647, %v2525_v10 }
 0x88e   : > { %v5744_v53 = vpop.eup %5743 }
 0x88f   : > { %v2646_v13 = vsel %vm2645_vm7, %v5742_v0, %v2642_v35  ;;  %v2653_v30 = vmul.f32 %v5744_v53, %v2525_v10  ;;  %v2527_v58 = vpop.xlane.xlu0 %2526  ;;  %vm2658_vm9 = vweird.f32 %v5744_v53  ;;  %v2664_v0 = vor.u32 1.1754944e-38, %v2663_v63 }
 0x890   : > { %v2651_v19 = vsel %vm2648_vm8, %v2650_v60, %v2646_v13  ;;  %5745 = vrcp.f32 %v2527_v58  ;;  %vm2659_vm11 = vmor %vm2657_vm10, %vm2658_vm9  ;;  %vm2662_vm12 = vcmp.eq.f32.partialorder %v2661_v16, 8.507059e+37  ;;  %vm2671_vm14 = vweird.f32 %v2527_v58 }
 0x891   : > { %v7557_v25 = vmul.f32 %v7473_v51, %v2651_v19  ;;  %v2654_v7 = vsub.f32 1.0, %v2653_v30  ;;  %v2677_v30 = vand.u32 2147483648, %v2527_v58  ;;  %v7564_v19 = vpop.f32.mrf.mxu2 }
 0x892   : > { %9103 = vst [vmem:[#allocation58_spill] sm:$0xff] %v7564_v19 }
 0x893   : > { %v2655_v42 = vmul.f32 %v5744_v53, %v2654_v7 }
 0x895   : > { %v2656_v46 = vadd.f32 %v5744_v53, %v2655_v42  ;;  %v2675_v42 = vand.u32 2147483647, %v2527_v58 }
 0x896   : > { %v5746_v1 = vpop.eup %5745 }
 0x897   : > { %v2660_v41 = vsel %vm2659_vm11, %v5744_v53, %v2656_v46  ;;  %v2667_v2 = vmul.f32 %v5746_v1, %v2527_v58  ;;  %v2529_v35 = vpop.xlane.xlu1 %2528  ;;  %vm2672_vm13 = vweird.f32 %v5746_v1  ;;  %v2678_v53 = vor.u32 1.1754944e-38, %v2677_v30 }
 0x898   : > { %v2665_v60 = vsel %vm2662_vm12, %v2664_v0, %v2660_v41  ;;  %5747 = vrcp.f32 %v2529_v35  ;;  %vm2673_vm15 = vmor %vm2671_vm14, %vm2672_vm13  ;;  %vm2676_vm0 = vcmp.eq.f32.partialorder %v2675_v42, 8.507059e+37  ;;  %vm2685_vm4 = vweird.f32 %v2529_v35 }
 0x899   : > { %v7562_v51 = vmul.f32 %v7477_v62, %v2665_v60  ;;  %v2668_v13 = vsub.f32 1.0, %v2667_v2  ;;  %v2691_v2 = vand.u32 2147483648, %v2529_v35  ;;  %v7569_v60 = vpop.f32.mrf.mxu2 }
 0x89a   : > { %9104 = vst [vmem:[#allocation59_spill] sm:$0xff] %v7569_v60 }
 0x89b   : > { %v2669_v7 = vmul.f32 %v5746_v1, %v2668_v13 }
 0x89d   : > { %v2670_v10 = vadd.f32 %v5746_v1, %v2669_v7  ;;  %v2689_v7 = vand.u32 2147483647, %v2529_v35 }
 0x89e   : > { %v5748_v36 = vpop.eup %5747 }
 0x89f   : > { %v2674_v63 = vsel %vm2673_vm15, %v5746_v1, %v2670_v10  ;;  %v2681_v16 = vmul.f32 %v5748_v36, %v2529_v35  ;;  %v2531_v46 = vpop.xlane.xlu2 %2530  ;;  %vm2686_vm3 = vweird.f32 %v5748_v36  ;;  %v2692_v1 = vor.u32 1.1754944e-38, %v2691_v2 }
 0x8a0   : > { %v2679_v0 = vsel %vm2676_vm0, %v2678_v53, %v2674_v63  ;;  %5749 = vrcp.f32 %v2531_v46  ;;  %vm2687_vm5 = vmor %vm2685_vm4, %vm2686_vm3  ;;  %vm2690_vm6 = vcmp.eq.f32.partialorder %v2689_v7, 8.507059e+37  ;;  %vm2699_vm8 = vweird.f32 %v2531_v46 }
 0x8a1   : > { %v7567_v62 = vmul.f32 %v7485_v55, %v2679_v0  ;;  %v2682_v41 = vsub.f32 1.0, %v2681_v16  ;;  %v2705_v16 = vand.u32 2147483648, %v2531_v46  ;;  %v7574_v0 = vpop.f32.mrf.mxu2 }
 0x8a2   : > { %9105 = vst [vmem:[#allocation60_spill] sm:$0xff] %v7574_v0 }
 0x8a3   : > { %v2683_v13 = vmul.f32 %v5748_v36, %v2682_v41 }
 0x8a5   : > { %v2684_v58 = vadd.f32 %v5748_v36, %v2683_v13  ;;  %v2703_v13 = vand.u32 2147483647, %v2531_v46 }
 0x8a6   : > { %v5750_v19 = vpop.eup %5749 }
 0x8a7   : > { %v2688_v30 = vsel %vm2687_vm5, %v5748_v36, %v2684_v58  ;;  %v2695_v42 = vmul.f32 %v5750_v19, %v2531_v46  ;;  %v2533_v10 = vpop.xlane.xlu0 %2532  ;;  %vm2700_vm7 = vweird.f32 %v5750_v19  ;;  %v2706_v36 = vor.u32 1.1754944e-38, %v2705_v16 }
 0x8a8   : > { %v2693_v53 = vsel %vm2690_vm6, %v2692_v1, %v2688_v30  ;;  %5751 = vrcp.f32 %v2533_v10  ;;  %vm2701_vm9 = vmor %vm2699_vm8, %vm2700_vm7  ;;  %vm2704_vm10 = vcmp.eq.f32.partialorder %v2703_v13, 8.507059e+37  ;;  %vm2713_vm12 = vweird.f32 %v2533_v10 }
 0x8a9   : > { %v7572_v55 = vmul.f32 %v7489_v3, %v2693_v53  ;;  %v2696_v63 = vsub.f32 1.0, %v2695_v42  ;;  %v2719_v42 = vand.u32 2147483648, %v2533_v10 }
 0x8ab   : > { %v2697_v41 = vmul.f32 %v5750_v19, %v2696_v63  ;;  %v2717_v63 = vand.u32 2147483647, %v2533_v10 }
 0x8ad   : > { %v2698_v35 = vadd.f32 %v5750_v19, %v2697_v41  ;;  %v2720_v41 = vor.u32 1.1754944e-38, %v2719_v42  ;;  %vm2718_vm14 = vcmp.eq.f32.partialorder %v2717_v63, 8.507059e+37 }
 0x8ae   : > { %v5752_v60 = vpop.eup %5751 }
 0x8af   : > { %v2702_v2 = vsel %vm2701_vm9, %v5750_v19, %v2698_v35  ;;  %v2709_v7 = vmul.f32 %v5752_v60, %v2533_v10  ;;  %v2535_v58 = vpop.xlane.xlu1 %2534  ;;  %vm2714_vm11 = vweird.f32 %v5752_v60 }
 0x8b0   : > { %v2707_v1 = vsel %vm2704_vm10, %v2706_v36, %v2702_v2  ;;  %5753 = vrcp.f32 %v2535_v58  ;;  %vm2715_vm13 = vmor %vm2713_vm12, %vm2714_vm11  ;;  %v2733_v2 = vand.u32 2147483648, %v2535_v58  ;;  %vm2727_vm0 = vweird.f32 %v2535_v58 }
 0x8b1   : > { %v7577_v3 = vmul.f32 %v7493_v38, %v2707_v1  ;;  %v2710_v30 = vsub.f32 1.0, %v2709_v7  ;;  %v2731_v1 = vand.u32 2147483647, %v2535_v58 }
 0x8b3   : > { %v2711_v53 = vmul.f32 %v5752_v60, %v2710_v30  ;;  %vm2732_vm4 = vcmp.eq.f32.partialorder %v2731_v1, 8.507059e+37 }
 0x8b5   : > { %v2712_v0 = vadd.f32 %v5752_v60, %v2711_v53  ;;  %v2734_v53 = vor.u32 1.1754944e-38, %v2733_v2 }
 0x8b6   : > { %v5754_v46 = vpop.eup %5753 }
 0x8b7   : > { %v2716_v16 = vsel %vm2715_vm13, %v5752_v60, %v2712_v0  ;;  %v2723_v19 = vmul.f32 %v5754_v46, %v2535_v58  ;;  %v2537_v13 = vpop.xlane.xlu2 %2536  ;;  %vm2728_vm15 = vweird.f32 %v5754_v46 }
 0x8b8   : > { %v2721_v35 = vsel %vm2718_vm14, %v2720_v41, %v2716_v16  ;;  %5755 = vrcp.f32 %v2537_v13  ;;  %vm2729_vm3 = vmor %vm2727_vm0, %vm2728_vm15  ;;  %v2747_v16 = vand.u32 2147483648, %v2537_v13  ;;  %vm2741_vm6 = vweird.f32 %v2537_v13 }
 0x8b9   : > { %v7580_v36 = vmul.f32 %v7499_v47, %v2721_v35  ;;  %v2724_v38 = vsub.f32 1.0, %v2723_v19  ;;  %v2745_v35 = vand.u32 2147483647, %v2537_v13 }
 0x8bb   : > { %v2725_v7 = vmul.f32 %v5754_v46, %v2724_v38  ;;  %vm2746_vm8 = vcmp.eq.f32.partialorder %v2745_v35, 8.507059e+37 }
 0x8bd   : > { %v2726_v30 = vadd.f32 %v5754_v46, %v2725_v7  ;;  %v2748_v7 = vor.u32 1.1754944e-38, %v2747_v16 }
 0x8be   : > { %v5756_v10 = vpop.eup %5755 }
 0x8bf   : > { %v2730_v42 = vsel %vm2729_vm3, %v5754_v46, %v2726_v30  ;;  %v2737_v60 = vmul.f32 %v5756_v10, %v2537_v13  ;;  %v2539_v0 = vpop.xlane.xlu0 %2538  ;;  %vm2742_vm5 = vweird.f32 %v5756_v10 }
 0x8c0   : > { %v2735_v63 = vsel %vm2732_vm4, %v2734_v53, %v2730_v42  ;;  %5757 = vrcp.f32 %v2539_v0  ;;  %vm2743_vm7 = vmor %vm2741_vm6, %vm2742_vm5  ;;  %vm2755_vm10 = vweird.f32 %v2539_v0 }
 0x8c1   : > { %v7583_v41 = vmul.f32 %v7505_v37, %v2735_v63  ;;  %v2738_v47 = vsub.f32 1.0, %v2737_v60  ;;  %v2761_v37 = vand.u32 2147483648, %v2539_v0  ;;  %v2759_v60 = vand.u32 2147483647, %v2539_v0 }
 0x8c3   : > { %v2739_v19 = vmul.f32 %v5756_v10, %v2738_v47  ;;  %v2762_v47 = vor.u32 1.1754944e-38, %v2761_v37  ;;  %vm2760_vm12 = vcmp.eq.f32.partialorder %v2759_v60, 8.507059e+37 }
 0x8c5   : > { %v2740_v38 = vadd.f32 %v5756_v10, %v2739_v19 }
 0x8c6   : > { %v5758_v58 = vpop.eup %5757 }
 0x8c7   : > { %v2744_v2 = vsel %vm2743_vm7, %v5756_v10, %v2740_v38  ;;  %v2751_v46 = vmul.f32 %v5758_v58, %v2539_v0  ;;  %vm2756_vm9 = vweird.f32 %v5758_v58 }
 0x8c8   : > { %v2749_v1 = vsel %vm2746_vm8, %v2748_v7, %v2744_v2  ;;  %vm2757_vm11 = vmor %vm2755_vm10, %vm2756_vm9 }
 0x8c9   : > { %v7586_v30 = vmul.f32 %v7511_v50, %v2749_v1  ;;  %v2752_v53 = vsub.f32 1.0, %v2751_v46 }
 0x8cb   : > { %v2753_v42 = vmul.f32 %v5758_v58, %v2752_v53 }
 0x8cd   : > { %v2754_v63 = vadd.f32 %v5758_v58, %v2753_v42  ;;  %2782 = sbr.rel (%p5322_p1) target bundleno = 2274 (0x8e2), region = 68 }
 0x8cf   : > { %v2758_v13 = vsel %vm2757_vm11, %v5758_v58, %v2754_v63 }
 0x8d0   : > { %v2763_v19 = vsel %vm2760_vm12, %v2762_v47, %v2758_v13 }
 0x8d1   : > { %v7589_v10 = vmul.f32 %v7516_v33, %v2763_v19 }
 0x8d2   : > { %5357 = vst [vmem:[%s6289_s18 + $0x100] sm:$0xff] %v7522_v9 }
 0x8d3   : > { %5358 = vst [vmem:[%s6289_s18 + $0x108] sm:$0xff] %v7527_v48 }
 0x8d4   : > { %5359 = vst [vmem:[%s6289_s18 + $0x110] sm:$0xff] %v7532_v52 }
 0x8d5   : > { %5360 = vst [vmem:[%s6289_s18 + $0x118] sm:$0xff] %v7537_v11 }
 0x8d6   : > { %5361 = vst [vmem:[%s6289_s18 + $0x120] sm:$0xff] %v7542_v6 }
 0x8d7   : > { %5362 = vst [vmem:[%s6289_s18 + $0x128] sm:$0xff] %v7547_v43 }
 0x8d8   : > { %5363 = vst [vmem:[%s6289_s18 + $0x130] sm:$0xff] %v7552_v12 }
 0x8d9   : > { %5364 = vst [vmem:[%s6289_s18 + $0x138] sm:$0xff] %v7557_v25 }
 0x8da   : > { %5365 = vst [vmem:[%s6289_s18 + $0x140] sm:$0xff] %v7562_v51 }
 0x8db   : > { %5366 = vst [vmem:[%s6289_s18 + $0x148] sm:$0xff] %v7567_v62 }
 0x8dc   : > { %5367 = vst [vmem:[%s6289_s18 + $0x150] sm:$0xff] %v7572_v55 }
 0x8dd   : > { %5368 = vst [vmem:[%s6289_s18 + $0x158] sm:$0xff] %v7577_v3 }
 0x8de   : > { %5369 = vst [vmem:[%s6289_s18 + $0x160] sm:$0xff] %v7580_v36 }
 0x8df   : > { %5370 = vst [vmem:[%s6289_s18 + $0x168] sm:$0xff] %v7583_v41 }
 0x8e0   : > { %5371 = vst [vmem:[%s6289_s18 + $0x170] sm:$0xff] %v7586_v30 }
 0x8e1   : > { %5372 = vst [vmem:[%s6289_s18 + $0x178] sm:$0xff] %v7589_v10 }
 0x8e2 PF: > { %s6114_s29 = smov 104  }
 0x8e3   : > { %2967 = vrot.lane.b32.xlu0 %v6487_v4, %s6114_s29  ;;  %2963 = vrot.lane.b32.xlu1 %v6497_v27, %s6114_s29 }
 0x8e4   : > { %2959 = vrot.lane.b32.xlu2 %v6511_v5, %s6114_s29 }
 0x8eb   : > { %2965 = vrot.lane.b32.xlu0 %v6493_v20, %s6114_s29  ;;  %2961 = vrot.lane.b32.xlu1 %v6505_v44, %s6114_s29 }
 0x8ec   : > { %2957 = vrot.lane.b32.xlu2 %v6515_v18, %s6114_s29 }
 0x8f3   : > { %2955 = vrot.lane.b32.xlu0 %v6481_v34, %s6114_s29  ;;  %2953 = vrot.lane.b32.xlu1 %v6477_v23, %s6114_s29  ;;  %v9106_v23 = vld [vmem:[#allocation36_spill] sm:$0xff]  ;;  %v9107_v34 = vld [vmem:[#allocation33_spill] sm:$0xff] }
 0x8f4   : > { %2937 = vrot.lane.b32.xlu2 %v6528_v32, %s6114_s29 }
 0x8fb   : > { %2939 = vrot.lane.b32.xlu0 %v6534_v45, %s6114_s29  ;;  %2941 = vrot.lane.b32.xlu1 %v6540_v17, %s6114_s29 }
 0x8fc   : > { %2943 = vrot.lane.b32.xlu2 %v6546_v28, %s6114_s29 }
 0x903   : > { %2945 = vrot.lane.b32.xlu0 %v6552_v40, %s6114_s29  ;;  %2947 = vrot.lane.b32.xlu1 %v6558_v14, %s6114_s29 }
 0x904   : > { %2878 = vrot.lane.b32.xlu2 %v6982_v56, %s6113_s28 }
 0x90b   : > { %2876 = vrot.lane.b32.xlu0 %v6992_v21, %s6113_s28  ;;  %2874 = vrot.lane.b32.xlu1 %v7004_v22, %s6113_s28 }
 0x90c   : > { %2872 = vrot.lane.b32.xlu2 %v7014_v59, %s6113_s28 }
 0x913   : > { %2949 = vrot.lane.b32.xlu0 %v6564_v26, %s6114_s29  ;;  %2870 = vrot.lane.b32.xlu1 %v7026_v8, %s6113_s28 }
 0x914   : > { %2868 = vrot.lane.b32.xlu2 %v7036_v29, %s6113_s28 }
 0x91b   : > { %2866 = vrot.lane.b32.xlu0 %v7048_v57, %s6113_s28  ;;  %2864 = vrot.lane.b32.xlu1 %v9106_v23, %s6113_s28 }
 0x91c   : > { %2951 = vrot.lane.b32.xlu2 %v9107_v34, %s6114_s29 }
 0x93e   : > { %v2960_v17 = vpop.permute.xlu2 %2959 }
 0x93f   : > { %v3003_v28 = vsel %vm931_vm2, %v2960_v17, 0 }
 0x946   : > { %v2958_v40 = vpop.permute.xlu2 %2957 }
 0x947   : > { %v3000_v14 = vsel %vm931_vm2, %v2958_v40, 0 }
 0x94e   : > { %v2938_v16 = vpop.permute.xlu2 %2937 }
 0x955   : > { %v2968_v4 = vpop.permute.xlu0 %2967  ;;  %v2964_v5 = vpop.permute.xlu1 %2963 }
 0x956   : > { %v3015_v20 = vsel %vm931_vm2, %v2968_v4, 0  ;;  %v3009_v18 = vsel %vm931_vm2, %v2964_v5, 0  ;;  %v2944_v58 = vpop.permute.xlu2 %2943 }
 0x957   : > { %3017 = vmatpush.bf16.xpose.msra.mxu1 %v3015_v20 }
 0x95d   : > { %v2966_v27 = vpop.permute.xlu0 %2965  ;;  %v2962_v32 = vpop.permute.xlu1 %2961 }
 0x95e   : > { %v3012_v44 = vsel %vm931_vm2, %v2966_v27, 0  ;;  %v3006_v45 = vsel %vm931_vm2, %v2962_v32, 0  ;;  %v2879_v46 = vpop.permute.xlu2 %2878 }
 0x95f   : > { %3018 = vmatpush.bf16.xpose.msra.mxu1 %v3012_v44  ;;  %2888 = vmatpush.bf16.msra.mxu0 %v2879_v46 }
 0x965   : > { %v2956_v26 = vpop.permute.xlu0 %2955  ;;  %v2954_v33 = vpop.permute.xlu1 %2953 }
 0x966   : > { %v2997_v50 = vsel %vm931_vm2, %v2956_v26, 0  ;;  %v2994_v0 = vsel %vm931_vm2, %v2954_v33, 0  ;;  %v2873_v37 = vpop.permute.xlu2 %2872 }
 0x967   : > { %3019 = vmatpush.bf16.xpose.msra.mxu1 %v3009_v18 }
 0x96d   : > { %v2940_v35 = vpop.permute.xlu0 %2939  ;;  %v2942_v38 = vpop.permute.xlu1 %2941 }
 0x96e   : > { %v2869_v60 = vpop.permute.xlu2 %2868 }
 0x96f   : > { %3020 = vmatpush.bf16.xpose.msra.mxu1 %v3006_v45 }
 0x975   : > { %v2946_v7 = vpop.permute.xlu0 %2945  ;;  %v2948_v2 = vpop.permute.xlu1 %2947 }
 0x976   : > { %v2952_v47 = vpop.permute.xlu2 %2951 }
 0x977   : > { %3021 = vmatpush.bf16.xpose.msra.mxu1 %v3003_v28 }
 0x97d   : > { %v2877_v1 = vpop.permute.xlu0 %2876  ;;  %v2875_v53 = vpop.permute.xlu1 %2874 }
 0x97e   : > { %2889 = vmatpush.bf16.msra.mxu0 %v2877_v1 }
 0x97f   : > { %3022 = vmatpush.bf16.xpose.msra.mxu1 %v3000_v14 }
 0x982   : > { %2890 = vmatpush.bf16.msra.mxu0 %v2875_v53 }
 0x985   : > { %v2871_v42 = vpop.permute.xlu1 %2870  ;;  %v2950_v63 = vpop.permute.xlu0 %2949 }
 0x986   : > { %2891 = vmatpush.bf16.msra.mxu0 %v2873_v37 }
 0x987   : > { %3023 = vmatpush.bf16.xpose.msra.mxu1 %v2997_v50 }
 0x98a   : > { %2892 = vmatpush.bf16.msra.mxu0 %v2871_v42 }
 0x98e   : > { %2893 = vmatpush.bf16.msra.mxu0 %v2869_v60  ;;  %v2867_v60 = vpop.permute.xlu0 %2866 }
 0x98f   : > { %3024 = vmatpush.bf16.xpose.msra.mxu1 %v2994_v0 }
 0x992   : > { %2894 = vmatpush.bf16.msra.mxu0 %v2867_v60 }
 0x996   : > { %5373 = vmatmul.msk.bf16.vlgmr.msra.gmra.mxu1 %vm931_vm2, %v2938_v16 }
 0x9a6   : > { %5374 = vmatmul.msk.bf16.gmra.mxu1 %vm931_vm2, %v2940_v35 }
 0x9b6   : > { %5375 = vmatmul.msk.bf16.gmra.mxu1 %vm931_vm2, %v2942_v38 }
 0x9c6   : > { %5376 = vmatmul.msk.bf16.gmra.mxu1 %vm931_vm2, %v2944_v58 }
 0x9d6   : > { %5377 = vmatmul.msk.bf16.gmra.mxu1 %vm931_vm2, %v2946_v7 }
 0x9e6   : > { %5378 = vmatmul.msk.bf16.gmra.mxu1 %vm931_vm2, %v2948_v2 }
 0x9f6   : > { %5379 = vmatmul.msk.bf16.gmra.mxu1 %vm931_vm2, %v2950_v63 }
 0xa06   : > { %5380 = vmatmul.msk.bf16.gmra.mxu1 %vm931_vm2, %v2952_v47 }
 0xa13   : > { %v3026_v13 = vpop.f32.mrf.mxu1 }
 0xa14   : > { %v3066_v19 = vmul.f32 0.35355338, %v3026_v13  ;;  %v2865_v13 = vpop.permute.xlu1 %2864 }
 0xa15   : > { %2895 = vmatpush.bf16.msra.mxu0 %v2865_v13 }
 0xa16   : > { %v7690_v23 = vadd.f32 %v6579_v39, %v3066_v19 }
 0xa18   : > { %3098 = vmax.xlane.f32.xlu0 %v7690_v23 }
 0xa1b   : > { %v3028_v34 = vpop.f32.mrf.mxu1 }
 0xa1c   : > { %v3067_v4 = vmul.f32 0.35355338, %v3028_v34 }
 0xa1e   : > { %v7694_v20 = vadd.f32 %v6579_v39, %v3067_v4 }
 0xa20   : > { %3100 = vmax.xlane.f32.xlu1 %v7694_v20 }
 0xa23   : > { %v3031_v27 = vpop.f32.mrf.mxu1 }
 0xa24   : > { %v3068_v44 = vmul.f32 0.35355338, %v3031_v27  ;;  %v2800_v27 = vpack.c.bf16 %v7522_v9, %v7522_v9  ;;  %v2802_v9 = vpack.c.bf16 %v7532_v52, %v7532_v52 }
 0xa26   : > { %v7698_v5 = vadd.f32 %v6579_v39, %v3068_v44  ;;  %v2801_v44 = vpack.c.bf16 %v7527_v48, %v7527_v48  ;;  %v2803_v48 = vpack.c.bf16 %v7537_v11, %v7537_v11 }
 0xa28   : > { %3102 = vmax.xlane.f32.xlu2 %v7698_v5 }
 0xa2b   : > { %v3033_v18 = vpop.f32.mrf.mxu1 }
 0xa2c   : > { %v3069_v32 = vmul.f32 0.35355338, %v3033_v18 }
 0xa2e   : > { %v7702_v45 = vadd.f32 %v6579_v39, %v3069_v32  ;;  %v2832_v32 = vunpack.c.l.b16 %v2800_v27  ;;  %v2805_v27 = vpack.c.bf16 %v7547_v43, %v7547_v43  ;;  %v2806_v43 = vpack.c.bf16 %v7552_v12, %v7552_v12 }
 0xa30   : > { %3104 = vmax.xlane.f32.xlu2 %v7702_v45 }
 0xa33   : > { %v3036_v17 = vpop.f32.mrf.mxu1 }
 0xa34   : > { %v3070_v28 = vmul.f32 0.35355338, %v3036_v17  ;;  %v2833_v17 = vunpack.c.l.b16 %v2801_v44 }
 0xa36   : > { %v7706_v40 = vadd.f32 %v6579_v39, %v3070_v28 }
 0xa38   : > { %3106 = vmax.xlane.f32.xlu0 %v7706_v40 }
 0xa3b   : > { %v3038_v14 = vpop.f32.mrf.mxu1 }
 0xa3c   : > { %v3071_v26 = vmul.f32 0.35355338, %v3038_v14  ;;  %v2848_v14 = vpack.c.b16 %v2833_v17, %v2832_v32  ;;  %v2837_v32 = vunpack.c.l.b16 %v2805_v27 }
 0xa3e   : > { %v7710_v50 = vadd.f32 %v6579_v39, %v3071_v26  ;;  %2896 = vmatmul.bf16.vlgmr.msra.gmra.mxu0 %v2848_v14 }
 0xa40   : > { %3108 = vmax.xlane.f32.xlu1 %v7710_v50 }
 0xa43   : > { %v3041_v33 = vpop.f32.mrf.mxu1 }
 0xa44   : > { %v3072_v0 = vmul.f32 0.35355338, %v3041_v33 }
 0xa46   : > { %v7714_v16 = vadd.f32 %v6579_v39, %v3072_v0 }
 0xa48   : > { %3110 = vmax.xlane.f32.xlu2 %v7714_v16 }
 0xa4b   : > { %v3043_v35 = vpop.f32.mrf.mxu1 }
 0xa4c   : > { %v3073_v38 = vmul.f32 0.35355338, %v3043_v35 }
 0xa4e   : > { %v7718_v58 = vadd.f32 %v6579_v39, %v3073_v38 }
 0xa50   : > { %3112 = vmax.xlane.f32.xlu0 %v7718_v58 }
 0xa53   : > { %v3046_v7 = vpop.f32.mrf.mxu1 }
 0xa54   : > { %v3074_v2 = vmul.f32 0.35355338, %v3046_v7  ;;  %v2834_v7 = vunpack.c.l.b16 %v2802_v9 }
 0xa56   : > { %v7722_v46 = vadd.f32 %v6579_v39, %v3074_v2  ;;  %v2835_v2 = vunpack.c.l.b16 %v2803_v48  ;;  %v2838_v48 = vunpack.c.l.b16 %v2806_v43 }
 0xa58   : > { %3114 = vmax.xlane.f32.xlu1 %v7722_v46 }
 0xa5b   : > { %v3048_v1 = vpop.f32.mrf.mxu1 }
 0xa5c   : > { %v3075_v53 = vmul.f32 0.35355338, %v3048_v1 }
 0xa5e   : > { %v7726_v37 = vadd.f32 %v6579_v39, %v3075_v53  ;;  %v2849_v53 = vpack.c.b16 %v2835_v2, %v2834_v7 }
 0xa60   : > { %3116 = vmax.xlane.f32.xlu2 %v7726_v37  ;;  %2901 = vmatmul.bf16.gmra.mxu0 %v2849_v53 }
 0xa63   : > { %v3051_v42 = vpop.f32.mrf.mxu1 }
 0xa64   : > { %v3076_v63 = vmul.f32 0.35355338, %v3051_v42 }
 0xa66   : > { %v7730_v47 = vadd.f32 %v6579_v39, %v3076_v63 }
 0xa68   : > { %3118 = vmax.xlane.f32.xlu0 %v7730_v47 }
 0xa6b   : > { %v3053_v19 = vpop.f32.mrf.mxu1 }
 0xa6c   : > { %v3077_v34 = vmul.f32 0.35355338, %v3053_v19 }
 0xa6e   : > { %v7734_v4 = vadd.f32 %v6579_v39, %v3077_v34  ;;  %v2804_v34 = vpack.c.bf16 %v7542_v6, %v7542_v6 }
 0xa70   : > { %3120 = vmax.xlane.f32.xlu1 %v7734_v4 }
 0xa73   : > { %v3056_v18 = vpop.f32.mrf.mxu1 }
 0xa74   : > { %v3078_v28 = vmul.f32 0.35355338, %v3056_v18  ;;  %v2836_v18 = vunpack.c.l.b16 %v2804_v34 }
 0xa76   : > { %v7742_v26 = vadd.f32 %v6579_v39, %v3078_v28  ;;  %v2850_v28 = vpack.c.b16 %v2837_v32, %v2836_v18 }
 0xa78   : > { %3122 = vmax.xlane.f32.xlu2 %v7742_v26  ;;  %2906 = vmatmul.bf16.gmra.mxu0 %v2850_v28 }
 0xa7b   : > { %v3058_v33 = vpop.f32.mrf.mxu1 }
 0xa7c   : > { %v3079_v0 = vmul.f32 0.35355338, %v3058_v33 }
 0xa7e   : > { %v7746_v35 = vadd.f32 %v6579_v39, %v3079_v0 }
 0xa80   : > { %3124 = vmax.xlane.f32.xlu0 %v7746_v35 }
 0xa83   : > { %v3061_v38 = vpop.f32.mrf.mxu1 }
 0xa84   : > { %v3080_v1 = vmul.f32 0.35355338, %v3061_v38 }
 0xa86   : > { %v7754_v42 = vadd.f32 %v6579_v39, %v3080_v1 }
 0xa88   : > { %3126 = vmax.xlane.f32.xlu1 %v7754_v42 }
 0xa8b   : > { %v3063_v60 = vpop.f32.mrf.mxu1  ;;  %v3099_v63 = vpop.xlane.xlu0 %3098 }
 0xa8c   : > { %v3081_v13 = vmul.f32 0.35355338, %v3063_v60  ;;  %v3130_v19 = vsub.f32 %v7690_v23, %v3099_v63 }
 0xa8e   : > { %v7759_v52 = vadd.f32 %v6579_v39, %v3081_v13  ;;  %v3146_v11 = vmul.f32 1.442695, %v3130_v19 }
 0xa90   : > { %5759 = vpow2.f32 %v3146_v11  ;;  %3128 = vmax.xlane.f32.xlu2 %v7759_v52 }
 0xa93   : > { %v3101_v44 = vpop.xlane.xlu1 %3100 }
 0xa94   : > { %v3131_v17 = vsub.f32 %v7694_v20, %v3101_v44  ;;  %v2807_v20 = vpack.c.bf16 %v7557_v25, %v7557_v25  ;;  %v2808_v25 = vpack.c.bf16 %v7562_v51, %v7562_v51 }
 0xa96   : > { %v7767_v23 = vpop.eup %5759  ;;  %v3148_v39 = vmul.f32 1.442695, %v3131_v17  ;;  %v2839_v38 = vunpack.c.l.b16 %v2807_v20  ;;  %v2840_v19 = vunpack.c.l.b16 %v2808_v25 }
 0xa97   : > { %3178 = vadd.xlane.f32.xlu0 %v7767_v23 }
 0xa98   : > { %5761 = vpow2.f32 %v3148_v39  ;;  %v2851_v2 = vpack.c.b16 %v2839_v38, %v2838_v48 }
 0xa9a   : > { %2911 = vmatmul.bf16.gmra.mxu0 %v2851_v2 }
 0xa9b   : > { %v3103_v14 = vpop.xlane.xlu2 %3102 }
 0xa9c   : > { %v3132_v33 = vsub.f32 %v7698_v5, %v3103_v14 }
 0xa9e   : > { %v7771_v6 = vpop.eup %5761  ;;  %v3150_v0 = vmul.f32 1.442695, %v3132_v33 }
 0xa9f   : > { %3180 = vadd.xlane.f32.xlu1 %v7771_v6 }
 0xaa0   : > { %5763 = vpow2.f32 %v3150_v0 }
 0xaa3   : > { %v3105_v9 = vpop.xlane.xlu2 %3104 }
 0xaa4   : > { %v3133_v7 = vsub.f32 %v7702_v45, %v3105_v9  ;;  %v2809_v45 = vpack.c.bf16 %v7567_v62, %v7567_v62  ;;  %v2810_v62 = vpack.c.bf16 %v7572_v55, %v7572_v55 }
 0xaa6   : > { %v7779_v1 = vpop.eup %5763  ;;  %v3152_v5 = vmul.f32 1.442695, %v3133_v7  ;;  %v2841_v11 = vunpack.c.l.b16 %v2809_v45  ;;  %v2842_v39 = vunpack.c.l.b16 %v2810_v62 }
 0xaa7   : > { %3182 = vadd.xlane.f32.xlu2 %v7779_v1 }
 0xaa8   : > { %5765 = vpow2.f32 %v3152_v5  ;;  %v2852_v27 = vpack.c.b16 %v2841_v11, %v2840_v19 }
 0xaaa   : > { %2916 = vmatmul.bf16.gmra.mxu0 %v2852_v27 }
 0xaab   : > { %v3107_v53 = vpop.xlane.xlu0 %3106 }
 0xaac   : > { %v3134_v60 = vsub.f32 %v7706_v40, %v3107_v53 }
 0xaae   : > { %v7783_v12 = vpop.eup %5765  ;;  %v3154_v63 = vmul.f32 1.442695, %v3134_v60 }
 0xaaf   : > { %3184 = vadd.xlane.f32.xlu0 %v7783_v12 }
 0xab0   : > { %5767 = vpow2.f32 %v3154_v63 }
 0xab3   : > { %v3109_v13 = vpop.xlane.xlu1 %3108 }
 0xab4   : > { %v3135_v34 = vsub.f32 %v7710_v50, %v3109_v13  ;;  %v2811_v50 = vpack.c.bf16 %v7577_v3, %v7577_v3  ;;  %v2812_v3 = vpack.c.bf16 %v7580_v36, %v7580_v36 }
 0xab6   : > { %v7791_v44 = vpop.eup %5767  ;;  %v3156_v40 = vmul.f32 1.442695, %v3135_v34  ;;  %v2843_v14 = vunpack.c.l.b16 %v2811_v50  ;;  %v2844_v7 = vunpack.c.l.b16 %v2812_v3 }
 0xab7   : > { %3186 = vadd.xlane.f32.xlu1 %v7791_v44 }
 0xab8   : > { %5769 = vpow2.f32 %v3156_v40  ;;  %v2853_v0 = vpack.c.b16 %v2843_v14, %v2842_v39 }
 0xaba   : > { %2921 = vmatmul.bf16.gmra.mxu0 %v2853_v0 }
 0xabb   : > { %v3111_v18 = vpop.xlane.xlu2 %3110  ;;  %v7835_v62 = vpop.f32.mrf.mxu0 }
 0xabc   : > { %v3136_v32 = vsub.f32 %v7714_v16, %v3111_v18 }
 0xabe   : > { %v7795_v51 = vpop.eup %5769  ;;  %v3158_v17 = vmul.f32 1.442695, %v3136_v32 }
 0xabf   : > { %3188 = vadd.xlane.f32.xlu2 %v7795_v51 }
 0xac0   : > { %5771 = vpow2.f32 %v3158_v17 }
 0xac3   : > { %v3113_v28 = vpop.xlane.xlu0 %3112  ;;  %v7841_v14 = vpop.f32.mrf.mxu0 }
 0xac4   : > { %v3137_v33 = vsub.f32 %v7718_v58, %v3113_v28  ;;  %v2813_v58 = vpack.c.bf16 %v7583_v41, %v7583_v41  ;;  %v2814_v41 = vpack.c.bf16 %v7586_v30, %v7586_v30 }
 0xac6   : > { %v7803_v43 = vpop.eup %5771  ;;  %v3160_v16 = vmul.f32 1.442695, %v3137_v33  ;;  %v2845_v2 = vunpack.c.l.b16 %v2813_v58  ;;  %v2846_v19 = vunpack.c.l.b16 %v2814_v41 }
 0xac7   : > { %3190 = vadd.xlane.f32.xlu0 %v7803_v43 }
 0xac8   : > { %5773 = vpow2.f32 %v3160_v16  ;;  %v2854_v53 = vpack.c.b16 %v2845_v2, %v2844_v7 }
 0xaca   : > { %2926 = vmatmul.bf16.gmra.mxu0 %v2854_v53 }
 0xacb   : > { %v3115_v20 = vpop.xlane.xlu1 %3114 }
 0xacc   : > { %v3138_v9 = vsub.f32 %v7722_v46, %v3115_v20 }
 0xace   : > { %v7807_v55 = vpop.eup %5773  ;;  %v3162_v48 = vmul.f32 1.442695, %v3138_v9 }
 0xacf   : > { %3192 = vadd.xlane.f32.xlu1 %v7807_v55 }
 0xad0   : > { %5775 = vpow2.f32 %v3162_v48 }
 0xad3   : > { %v3117_v38 = vpop.xlane.xlu2 %3116 }
 0xad4   : > { %v3139_v5 = vsub.f32 %v7726_v37, %v3117_v38  ;;  %v2815_v37 = vpack.c.bf16 %v7589_v10, %v7589_v10 }
 0xad6   : > { %v7815_v60 = vpop.eup %5775  ;;  %v3164_v46 = vmul.f32 1.442695, %v3139_v5  ;;  %v2847_v11 = vunpack.c.l.b16 %v2815_v37 }
 0xad7   : > { %3194 = vadd.xlane.f32.xlu2 %v7815_v60 }
 0xad8   : > { %5777 = vpow2.f32 %v3164_v46  ;;  %v2855_v27 = vpack.c.b16 %v2847_v11, %v2846_v19 }
 0xada   : > { %2931 = vmatmul.bf16.gmra.mxu0 %v2855_v27 }
 0xadb   : > { %v3119_v63 = vpop.xlane.xlu0 %3118 }
 0xadc   : > { %v3140_v25 = vsub.f32 %v7730_v47, %v3119_v63 }
 0xadd   : > { %v7847_v20 = vpop.f32.mrf.mxu0 }
 0xade   : > { %v7819_v36 = vpop.eup %5777  ;;  %v3166_v45 = vmul.f32 1.442695, %v3140_v25 }
 0xadf   : > { %3196 = vadd.xlane.f32.xlu0 %v7819_v36 }
 0xae0   : > { %5779 = vpow2.f32 %v3166_v45 }
 0xae3   : > { %v3121_v13 = vpop.xlane.xlu1 %3120 }
 0xae4   : > { %v3141_v34 = vsub.f32 %v7734_v4, %v3121_v13 }
 0xae5   : > { %v7852_v3 = vpop.f32.mrf.mxu0 }
 0xae6   : > { %v7827_v40 = vpop.eup %5779  ;;  %v3168_v47 = vmul.f32 1.442695, %v3141_v34 }
 0xae7   : > { %3198 = vadd.xlane.f32.xlu1 %v7827_v40 }
 0xae8   : > { %5781 = vpow2.f32 %v3168_v47 }
 0xaeb   : > { %v3123_v18 = vpop.xlane.xlu2 %3122 }
 0xaec   : > { %v3142_v32 = vsub.f32 %v7742_v26, %v3123_v18 }
 0xaee   : > { %v7831_v30 = vpop.eup %5781  ;;  %v3170_v17 = vmul.f32 1.442695, %v3142_v32 }
 0xaef   : > { %3200 = vadd.xlane.f32.xlu2 %v7831_v30 }
 0xaf0   : > { %5783 = vpow2.f32 %v3170_v17 }
 0xaf3   : > { %v3125_v10 = vpop.xlane.xlu0 %3124 }
 0xaf4   : > { %v3143_v4 = vsub.f32 %v7746_v35, %v3125_v10 }
 0xaf5   : > { %v7857_v53 = vpop.f32.mrf.mxu0 }
 0xaf6   : > { %v7837_v50 = vpop.eup %5783  ;;  %v3172_v28 = vmul.f32 1.442695, %v3143_v4 }
 0xaf7   : > { %3202 = vadd.xlane.f32.xlu0 %v7837_v50 }
 0xaf8   : > { %5785 = vpow2.f32 %v3172_v28 }
 0xafb   : > { %v3127_v39 = vpop.xlane.xlu1 %3126 }
 0xafc   : > { %v3144_v26 = vsub.f32 %v7754_v42, %v3127_v39 }
 0xafd   : > { %v7862_v18 = vpop.f32.mrf.mxu0 }
 0xafe   : > { %v7843_v33 = vpop.eup %5785  ;;  %v3174_v0 = vmul.f32 1.442695, %v3144_v26 }
 0xaff   : > { %3204 = vadd.xlane.f32.xlu1 %v7843_v33 }
 0xb00   : > { %5787 = vpow2.f32 %v3174_v0 }
 0xb03   : > { %v3129_v35 = vpop.xlane.xlu2 %3128 }
 0xb04   : > { %v3145_v16 = vsub.f32 %v7759_v52, %v3129_v35 }
 0xb06   : > { %v7849_v9 = vpop.eup %5787  ;;  %v3176_v48 = vmul.f32 1.442695, %v3145_v16 }
 0xb07   : > { %3206 = vadd.xlane.f32.xlu2 %v7849_v9 }
 0xb08   : > { %5789 = vpow2.f32 %v3176_v48 }
 0xb0a   : > { %v3179_v42 = vpop.xlane.xlu0 %3178 }
 0xb0b   : > { %5791 = vrcp.f32 %v3179_v42  ;;  %v3221_v5 = vand.u32 2147483648, %v3179_v42  ;;  %v3219_v63 = vand.u32 2147483647, %v3179_v42  ;;  %vm3215_vm14 = vweird.f32 %v3179_v42 }
 0xb0d   : > { %v3222_v41 = vor.u32 1.1754944e-38, %v3221_v5  ;;  %vm3220_vm0 = vcmp.eq.f32.partialorder %v3219_v63, 8.507059e+37 }
 0xb0e   : > { %v7854_v58 = vpop.eup %5789 }
 0xb0f   : > { %3208 = vadd.xlane.f32.xlu0 %v7854_v58 }
 0xb11   : > { %v5792_v38 = vpop.eup %5791 }
 0xb12   : > { %v3211_v7 = vmul.f32 %v5792_v38, %v3179_v42  ;;  %v3181_v2 = vpop.xlane.xlu1 %3180  ;;  %vm3216_vm13 = vweird.f32 %v5792_v38 }
 0xb13   : > { %5793 = vrcp.f32 %v3181_v2  ;;  %vm3217_vm15 = vmor %vm3215_vm14, %vm3216_vm13  ;;  %v3235_v47 = vand.u32 2147483648, %v3181_v2  ;;  %v3233_v17 = vand.u32 2147483647, %v3181_v2  ;;  %vm3229_vm4 = vweird.f32 %v3181_v2 }
 0xb14   : > { %v3212_v52 = vsub.f32 1.0, %v3211_v7 }
 0xb15   : > { %v3236_v28 = vor.u32 1.1754944e-38, %v3235_v47  ;;  %vm3234_vm6 = vcmp.eq.f32.partialorder %v3233_v17, 8.507059e+37 }
 0xb16   : > { %v3213_v46 = vmul.f32 %v5792_v38, %v3212_v52 }
 0xb17   : > { %v7867_v42 = vpop.f32.mrf.mxu0 }
 0xb18   : > { %v3214_v25 = vadd.f32 %v5792_v38, %v3213_v46 }
 0xb19   : > { %v5794_v45 = vpop.eup %5793 }
 0xb1a   : > { %v3218_v37 = vsel %vm3217_vm15, %v5792_v38, %v3214_v25  ;;  %v3225_v13 = vmul.f32 %v5794_v45, %v3181_v2  ;;  %v3183_v19 = vpop.xlane.xlu2 %3182  ;;  %vm3230_vm3 = vweird.f32 %v5794_v45 }
 0xb1b   : > { %v3223_v11 = vsel %vm3220_vm0, %v3222_v41, %v3218_v37  ;;  %5795 = vrcp.f32 %v3183_v19  ;;  %vm3231_vm5 = vmor %vm3229_vm4, %vm3230_vm3  ;;  %v3249_v48 = vand.u32 2147483648, %v3183_v19  ;;  %v3247_v7 = vand.u32 2147483647, %v3183_v19 }
 0xb1c   : > { %v7860_v34 = vmul.f32 %v7767_v23, %v3223_v11  ;;  %v3226_v27 = vsub.f32 1.0, %v3225_v13  ;;  %vm3243_vm8 = vweird.f32 %v3183_v19 }
 0xb1d   : > { %v3250_v5 = vor.u32 1.1754944e-38, %v3249_v48  ;;  %vm3248_vm10 = vcmp.eq.f32.partialorder %v3247_v7, 8.507059e+37 }
 0xb1e   : > { %v3227_v32 = vmul.f32 %v5794_v45, %v3226_v27 }
 0xb1f   : > { %v7872_v13 = vpop.f32.mrf.mxu0 }
 0xb20   : > { %v3228_v10 = vadd.f32 %v5794_v45, %v3227_v32 }
 0xb21   : > { %v5796_v4 = vpop.eup %5795 }
 0xb22   : > { %v3232_v39 = vsel %vm3231_vm5, %v5794_v45, %v3228_v10  ;;  %v3239_v26 = vmul.f32 %v5796_v4, %v3183_v19  ;;  %v3185_v0 = vpop.xlane.xlu0 %3184  ;;  %vm3244_vm7 = vweird.f32 %v5796_v4 }
 0xb23   : > { %v3237_v35 = vsel %vm3234_vm6, %v3236_v28, %v3232_v39  ;;  %5797 = vrcp.f32 %v3185_v0  ;;  %vm3245_vm9 = vmor %vm3243_vm8, %vm3244_vm7  ;;  %v3263_v37 = vand.u32 2147483648, %v3185_v0  ;;  %v3261_v27 = vand.u32 2147483647, %v3185_v0 }
 0xb24   : > { %v7865_v23 = vmul.f32 %v7771_v6, %v3237_v35  ;;  %v3240_v16 = vsub.f32 1.0, %v3239_v26  ;;  %vm3257_vm12 = vweird.f32 %v3185_v0 }
 0xb25   : > { %v3264_v32 = vor.u32 1.1754944e-38, %v3263_v37  ;;  %vm3262_vm14 = vcmp.eq.f32.partialorder %v3261_v27, 8.507059e+37 }
 0xb26   : > { %v3241_v38 = vmul.f32 %v5796_v4, %v3240_v16 }
 0xb27   : > { %v7877_v35 = vpop.f32.mrf.mxu0 }
 0xb28   : > { %v3242_v2 = vadd.f32 %v5796_v4, %v3241_v38 }
 0xb29   : > { %v5798_v52 = vpop.eup %5797 }
 0xb2a   : > { %v3246_v46 = vsel %vm3245_vm9, %v5796_v4, %v3242_v2  ;;  %v3253_v63 = vmul.f32 %v5798_v52, %v3185_v0  ;;  %v3187_v25 = vpop.xlane.xlu1 %3186  ;;  %vm3258_vm11 = vweird.f32 %v5798_v52 }
 0xb2b   : > { %v3251_v45 = vsel %vm3248_vm10, %v3250_v5, %v3246_v46  ;;  %5799 = vrcp.f32 %v3187_v25  ;;  %vm3259_vm13 = vmor %vm3257_vm12, %vm3258_vm11  ;;  %v3277_v26 = vand.u32 2147483648, %v3187_v25  ;;  %v3275_v48 = vand.u32 2147483647, %v3187_v25 }
 0xb2c   : > { %v7870_v6 = vmul.f32 %v7779_v1, %v3251_v45  ;;  %v3254_v41 = vsub.f32 1.0, %v3253_v63  ;;  %vm3271_vm0 = vweird.f32 %v3187_v25 }
 0xb2d   : > { %v3278_v7 = vor.u32 1.1754944e-38, %v3277_v26  ;;  %vm3276_vm4 = vcmp.eq.f32.partialorder %v3275_v48, 8.507059e+37 }
 0xb2e   : > { %v3255_v11 = vmul.f32 %v5798_v52, %v3254_v41 }
 0xb2f   : > { %v7882_v41 = vpop.f32.mrf.mxu0 }
 0xb30   : > { %v3256_v19 = vadd.f32 %v5798_v52, %v3255_v11 }
 0xb31   : > { %v5800_v47 = vpop.eup %5799 }
 0xb32   : > { %v3260_v17 = vsel %vm3259_vm13, %v5798_v52, %v3256_v19  ;;  %v3267_v10 = vmul.f32 %v5800_v47, %v3187_v25  ;;  %v3189_v4 = vpop.xlane.xlu2 %3188  ;;  %vm3272_vm15 = vweird.f32 %v5800_v47 }
 0xb33   : > { %v3265_v28 = vsel %vm3262_vm14, %v3264_v32, %v3260_v17  ;;  %5801 = vrcp.f32 %v3189_v4  ;;  %vm3273_vm3 = vmor %vm3271_vm0, %vm3272_vm15  ;;  %v3291_v45 = vand.u32 2147483648, %v3189_v4  ;;  %v3289_v11 = vand.u32 2147483647, %v3189_v4 }
 0xb34   : > { %v7875_v1 = vmul.f32 %v7783_v12, %v3265_v28  ;;  %v3268_v39 = vsub.f32 1.0, %v3267_v10  ;;  %vm3285_vm6 = vweird.f32 %v3189_v4 }
 0xb35   : > { %v3292_v19 = vor.u32 1.1754944e-38, %v3291_v45  ;;  %vm3290_vm8 = vcmp.eq.f32.partialorder %v3289_v11, 8.507059e+37 }
 0xb36   : > { %v3269_v16 = vmul.f32 %v5800_v47, %v3268_v39 }
 0xb37   : > { %v7887_v26 = vpop.f32.mrf.mxu0 }
 0xb38   : > { %v3270_v0 = vadd.f32 %v5800_v47, %v3269_v16 }
 0xb39   : > { %v5802_v38 = vpop.eup %5801 }
 0xb3a   : > { %v3274_v2 = vsel %vm3273_vm3, %v5800_v47, %v3270_v0  ;;  %v3281_v52 = vmul.f32 %v5802_v38, %v3189_v4  ;;  %v3191_v5 = vpop.xlane.xlu0 %3190  ;;  %vm3286_vm5 = vweird.f32 %v5802_v38 }
 0xb3b   : > { %v3279_v46 = vsel %vm3276_vm4, %v3278_v7, %v3274_v2  ;;  %5803 = vrcp.f32 %v3191_v5  ;;  %vm3287_vm7 = vmor %vm3285_vm6, %vm3286_vm5  ;;  %v3305_v39 = vand.u32 2147483648, %v3191_v5  ;;  %v3303_v48 = vand.u32 2147483647, %v3191_v5 }
 0xb3c   : > { %v7880_v12 = vmul.f32 %v7791_v44, %v3279_v46  ;;  %v3282_v63 = vsub.f32 1.0, %v3281_v52  ;;  %vm3299_vm10 = vweird.f32 %v3191_v5 }
 0xb3d   : > { %vm3304_vm12 = vcmp.eq.f32.partialorder %v3303_v48, 8.507059e+37 }
 0xb3e   : > { %v3283_v37 = vmul.f32 %v5802_v38, %v3282_v63 }
 0xb40   : > { %v3284_v25 = vadd.f32 %v5802_v38, %v3283_v37  ;;  %v7892_v37 = vpop.f32.mrf.mxu0 }
 0xb41   : > { %v5804_v27 = vpop.eup %5803 }
 0xb42   : > { %v3288_v47 = vsel %vm3287_vm7, %v5802_v38, %v3284_v25  ;;  %v3295_v32 = vmul.f32 %v5804_v27, %v3191_v5  ;;  %v3193_v17 = vpop.xlane.xlu1 %3192  ;;  %vm3300_vm9 = vweird.f32 %v5804_v27  ;;  %v3306_v38 = vor.u32 1.1754944e-38, %v3305_v39 }
 0xb43   : > { %v3293_v10 = vsel %vm3290_vm8, %v3292_v19, %v3288_v47  ;;  %5805 = vrcp.f32 %v3193_v17  ;;  %vm3301_vm11 = vmor %vm3299_vm10, %vm3300_vm9  ;;  %v3319_v45 = vand.u32 2147483648, %v3193_v17  ;;  %v3317_v25 = vand.u32 2147483647, %v3193_v17 }
 0xb44   : > { %v7885_v44 = vmul.f32 %v7795_v51, %v3293_v10  ;;  %v3296_v28 = vsub.f32 1.0, %v3295_v32  ;;  %vm3313_vm14 = vweird.f32 %v3193_v17 }
 0xb45   : > { %vm3318_vm0 = vcmp.eq.f32.partialorder %v3317_v25, 8.507059e+37 }
 0xb46   : > { %v3297_v16 = vmul.f32 %v5804_v27, %v3296_v28 }
 0xb48   : > { %v3298_v4 = vadd.f32 %v5804_v27, %v3297_v16  ;;  %v7897_v48 = vpop.f32.mrf.mxu0 }
 0xb49   : > { %v5806_v0 = vpop.eup %5805 }
 0xb4a   : > { %v3302_v7 = vsel %vm3301_vm11, %v5804_v27, %v3298_v4  ;;  %v3309_v2 = vmul.f32 %v5806_v0, %v3193_v17  ;;  %v3195_v52 = vpop.xlane.xlu2 %3194  ;;  %vm3314_vm13 = vweird.f32 %v5806_v0  ;;  %v3320_v27 = vor.u32 1.1754944e-38, %v3319_v45 }
 0xb4b   : > { %v3307_v46 = vsel %vm3304_vm12, %v3306_v38, %v3302_v7  ;;  %5807 = vrcp.f32 %v3195_v52  ;;  %vm3315_vm15 = vmor %vm3313_vm14, %vm3314_vm13  ;;  %v3333_v16 = vand.u32 2147483648, %v3195_v52  ;;  %v3331_v38 = vand.u32 2147483647, %v3195_v52 }
 0xb4c   : > { %v7890_v51 = vmul.f32 %v7803_v43, %v3307_v46  ;;  %v3310_v63 = vsub.f32 1.0, %v3309_v2  ;;  %vm3327_vm4 = vweird.f32 %v3195_v52 }
 0xb4d   : > { %vm3332_vm6 = vcmp.eq.f32.partialorder %v3331_v38, 8.507059e+37 }
 0xb4e   : > { %v3311_v11 = vmul.f32 %v5806_v0, %v3310_v63 }
 0xb50   : > { %v3312_v5 = vadd.f32 %v5806_v0, %v3311_v11 }
 0xb51   : > { %v5808_v19 = vpop.eup %5807 }
 0xb52   : > { %v3316_v47 = vsel %vm3315_vm15, %v5806_v0, %v3312_v5  ;;  %v3323_v32 = vmul.f32 %v5808_v19, %v3195_v52  ;;  %v3197_v10 = vpop.xlane.xlu0 %3196  ;;  %vm3328_vm3 = vweird.f32 %v5808_v19  ;;  %v3334_v0 = vor.u32 1.1754944e-38, %v3333_v16  ;;  %v7902_v5 = vpop.f32.mrf.mxu0 }
 0xb53   : > { %v3321_v28 = vsel %vm3318_vm0, %v3320_v27, %v3316_v47  ;;  %5809 = vrcp.f32 %v3197_v10  ;;  %vm3329_vm5 = vmor %vm3327_vm4, %vm3328_vm3  ;;  %v3347_v25 = vand.u32 2147483648, %v3197_v10  ;;  %v3345_v47 = vand.u32 2147483647, %v3197_v10 }
 0xb54   : > { %v7895_v43 = vmul.f32 %v7807_v55, %v3321_v28  ;;  %v3324_v39 = vsub.f32 1.0, %v3323_v32  ;;  %vm3341_vm8 = vweird.f32 %v3197_v10 }
 0xb55   : > { %vm3346_vm10 = vcmp.eq.f32.partialorder %v3345_v47, 8.507059e+37 }
 0xb56   : > { %v3325_v4 = vmul.f32 %v5808_v19, %v3324_v39 }
 0xb58   : > { %v3326_v17 = vadd.f32 %v5808_v19, %v3325_v4 }
 0xb59   : > { %v5810_v7 = vpop.eup %5809 }
 0xb5a   : > { %v3330_v2 = vsel %vm3329_vm5, %v5808_v19, %v3326_v17  ;;  %v3337_v46 = vmul.f32 %v5810_v7, %v3197_v10  ;;  %v3199_v63 = vpop.xlane.xlu1 %3198  ;;  %vm3342_vm7 = vweird.f32 %v5810_v7  ;;  %v3348_v19 = vor.u32 1.1754944e-38, %v3347_v25 }
 0xb5b   : > { %v3335_v45 = vsel %vm3332_vm6, %v3334_v0, %v3330_v2  ;;  %5811 = vrcp.f32 %v3199_v63  ;;  %vm3343_vm9 = vmor %vm3341_vm8, %vm3342_vm7  ;;  %v3361_v17 = vand.u32 2147483648, %v3199_v63  ;;  %v7907_v0 = vpop.f32.mrf.mxu0  ;;  %vm3355_vm12 = vweird.f32 %v3199_v63 }
 0xb5c   : > { %v7900_v55 = vmul.f32 %v7815_v60, %v3335_v45  ;;  %v3338_v11 = vsub.f32 1.0, %v3337_v46  ;;  %v3359_v46 = vand.u32 2147483647, %v3199_v63 }
 0xb5e   : > { %v3339_v27 = vmul.f32 %v5810_v7, %v3338_v11  ;;  %vm3360_vm14 = vcmp.eq.f32.partialorder %v3359_v46, 8.507059e+37 }
 0xb60   : > { %v3340_v52 = vadd.f32 %v5810_v7, %v3339_v27 }
 0xb61   : > { %v5812_v32 = vpop.eup %5811 }
 0xb62   : > { %v3344_v28 = vsel %vm3343_vm9, %v5810_v7, %v3340_v52  ;;  %v3351_v39 = vmul.f32 %v5812_v32, %v3199_v63  ;;  %v3201_v16 = vpop.xlane.xlu2 %3200  ;;  %vm3356_vm11 = vweird.f32 %v5812_v32  ;;  %v3362_v7 = vor.u32 1.1754944e-38, %v3361_v17 }
 0xb63   : > { %v3349_v4 = vsel %vm3346_vm10, %v3348_v19, %v3344_v28  ;;  %5813 = vrcp.f32 %v3201_v16  ;;  %vm3357_vm13 = vmor %vm3355_vm12, %vm3356_vm11  ;;  %v3375_v19 = vand.u32 2147483648, %v3201_v16  ;;  %v7912_v28 = vpop.f32.mrf.mxu0  ;;  %vm3369_vm0 = vweird.f32 %v3201_v16 }
 0xb64   : > { %v7905_v60 = vmul.f32 %v7819_v36, %v3349_v4  ;;  %v3352_v38 = vsub.f32 1.0, %v3351_v39  ;;  %v3373_v4 = vand.u32 2147483647, %v3201_v16 }
 0xb66   : > { %v3353_v2 = vmul.f32 %v5812_v32, %v3352_v38  ;;  %vm3374_vm4 = vcmp.eq.f32.partialorder %v3373_v4, 8.507059e+37 }
 0xb68   : > { %v3354_v10 = vadd.f32 %v5812_v32, %v3353_v2 }
 0xb69   : > { %v5814_v45 = vpop.eup %5813 }
 0xb6a   : > { %v3358_v11 = vsel %vm3357_vm13, %v5812_v32, %v3354_v10  ;;  %v3365_v25 = vmul.f32 %v5814_v45, %v3201_v16  ;;  %v3203_v27 = vpop.xlane.xlu0 %3202  ;;  %vm3370_vm15 = vweird.f32 %v5814_v45  ;;  %v3376_v32 = vor.u32 1.1754944e-38, %v3375_v19 }
 0xb6b   : > { %v3363_v47 = vsel %vm3360_vm14, %v3362_v7, %v3358_v11  ;;  %5815 = vrcp.f32 %v3203_v27  ;;  %vm3371_vm3 = vmor %vm3369_vm0, %vm3370_vm15  ;;  %v3389_v11 = vand.u32 2147483648, %v3203_v27  ;;  %vm3383_vm6 = vweird.f32 %v3203_v27 }
 0xb6c   : > { %v7910_v36 = vmul.f32 %v7827_v40, %v3363_v47  ;;  %v3366_v52 = vsub.f32 1.0, %v3365_v25  ;;  %v3387_v47 = vand.u32 2147483647, %v3203_v27 }
 0xb6e   : > { %v3367_v39 = vmul.f32 %v5814_v45, %v3366_v52  ;;  %vm3388_vm8 = vcmp.eq.f32.partialorder %v3387_v47, 8.507059e+37 }
 0xb70   : > { %v3368_v63 = vadd.f32 %v5814_v45, %v3367_v39  ;;  %v3390_v39 = vor.u32 1.1754944e-38, %v3389_v11 }
 0xb71   : > { %v5816_v38 = vpop.eup %5815 }
 0xb72   : > { %v3372_v17 = vsel %vm3371_vm3, %v5814_v45, %v3368_v63  ;;  %v3379_v2 = vmul.f32 %v5816_v38, %v3203_v27  ;;  %v3205_v46 = vpop.xlane.xlu1 %3204  ;;  %vm3384_vm5 = vweird.f32 %v5816_v38 }
 0xb73   : > { %v3377_v10 = vsel %vm3374_vm4, %v3376_v32, %v3372_v17  ;;  %5817 = vrcp.f32 %v3205_v46  ;;  %vm3385_vm7 = vmor %vm3383_vm6, %vm3384_vm5  ;;  %v3403_v17 = vand.u32 2147483648, %v3205_v46  ;;  %vm3397_vm10 = vweird.f32 %v3205_v46 }
 0xb74   : > { %v7915_v40 = vmul.f32 %v7831_v30, %v3377_v10  ;;  %v3380_v7 = vsub.f32 1.0, %v3379_v2  ;;  %v3401_v10 = vand.u32 2147483647, %v3205_v46 }
 0xb76   : > { %v3381_v25 = vmul.f32 %v5816_v38, %v3380_v7  ;;  %vm3402_vm12 = vcmp.eq.f32.partialorder %v3401_v10, 8.507059e+37 }
 0xb78   : > { %v3382_v52 = vadd.f32 %v5816_v38, %v3381_v25  ;;  %v3404_v25 = vor.u32 1.1754944e-38, %v3403_v17 }
 0xb79   : > { %v5818_v16 = vpop.eup %5817 }
 0xb7a   : > { %v3386_v19 = vsel %vm3385_vm7, %v5816_v38, %v3382_v52  ;;  %v3393_v45 = vmul.f32 %v5818_v16, %v3205_v46  ;;  %v3207_v4 = vpop.xlane.xlu2 %3206  ;;  %vm3398_vm9 = vweird.f32 %v5818_v16 }
 0xb7b   : > { %v3391_v63 = vsel %vm3388_vm8, %v3390_v39, %v3386_v19  ;;  %5819 = vrcp.f32 %v3207_v4  ;;  %vm3399_vm11 = vmor %vm3397_vm10, %vm3398_vm9  ;;  %v3417_v19 = vand.u32 2147483648, %v3207_v4  ;;  %vm3411_vm14 = vweird.f32 %v3207_v4 }
 0xb7c   : > { %v7918_v32 = vmul.f32 %v7837_v50, %v3391_v63  ;;  %v3394_v30 = vsub.f32 1.0, %v3393_v45  ;;  %v3415_v63 = vand.u32 2147483647, %v3207_v4 }
 0xb7e   : > { %v3395_v2 = vmul.f32 %v5818_v16, %v3394_v30  ;;  %vm3416_vm0 = vcmp.eq.f32.partialorder %v3415_v63, 8.507059e+37 }
 0xb80   : > { %v3396_v7 = vadd.f32 %v5818_v16, %v3395_v2  ;;  %v3418_v2 = vor.u32 1.1754944e-38, %v3417_v19 }
 0xb81   : > { %v5820_v27 = vpop.eup %5819 }
 0xb82   : > { %v3400_v11 = vsel %vm3399_vm11, %v5818_v16, %v3396_v7  ;;  %v3407_v38 = vmul.f32 %v5820_v27, %v3207_v4  ;;  %v3209_v47 = vpop.xlane.xlu0 %3208  ;;  %vm3412_vm13 = vweird.f32 %v5820_v27 }
 0xb83   : > { %v3405_v52 = vsel %vm3402_vm12, %v3404_v25, %v3400_v11  ;;  %5821 = vrcp.f32 %v3209_v47  ;;  %vm3413_vm15 = vmor %vm3411_vm14, %vm3412_vm13  ;;  %vm3425_vm4 = vweird.f32 %v3209_v47 }
 0xb84   : > { %v7921_v39 = vmul.f32 %v7843_v33, %v3405_v52  ;;  %v3408_v50 = vsub.f32 1.0, %v3407_v38  ;;  %v3431_v33 = vand.u32 2147483648, %v3209_v47  ;;  %v3429_v38 = vand.u32 2147483647, %v3209_v47 }
 0xb86   : > { %v3409_v45 = vmul.f32 %v5820_v27, %v3408_v50  ;;  %v3432_v50 = vor.u32 1.1754944e-38, %v3431_v33  ;;  %vm3430_vm6 = vcmp.eq.f32.partialorder %v3429_v38, 8.507059e+37 }
 0xb88   : > { %v3410_v30 = vadd.f32 %v5820_v27, %v3409_v45 }
 0xb89   : > { %v5822_v46 = vpop.eup %5821 }
 0xb8a   : > { %v3414_v17 = vsel %vm3413_vm15, %v5820_v27, %v3410_v30  ;;  %v3421_v16 = vmul.f32 %v5822_v46, %v3209_v47  ;;  %vm3426_vm3 = vweird.f32 %v5822_v46 }
 0xb8b   : > { %v3419_v10 = vsel %vm3416_vm0, %v3418_v2, %v3414_v17  ;;  %vm3427_vm5 = vmor %vm3425_vm4, %vm3426_vm3 }
 0xb8c   : > { %v7924_v7 = vmul.f32 %v7849_v9, %v3419_v10  ;;  %v3422_v25 = vsub.f32 1.0, %v3421_v16 }
 0xb8e   : > { %v3423_v11 = vmul.f32 %v5822_v46, %v3422_v25 }
 0xb90   : > { %v3424_v52 = vadd.f32 %v5822_v46, %v3423_v11  ;;  %3452 = sbr.rel (%p5322_p1) target bundleno = 2981 (0xba5), region = 72 }
 0xb92   : > { %v3428_v4 = vsel %vm3427_vm5, %v5822_v46, %v3424_v52 }
 0xb93   : > { %v3433_v45 = vsel %vm3430_vm6, %v3432_v50, %v3428_v4 }
 0xb94   : > { %v7927_v27 = vmul.f32 %v7854_v58, %v3433_v45 }
 0xb95   : > { %5382 = vst [vmem:[%s6289_s18 + $0x180] sm:$0xff] %v7860_v34 }
 0xb96   : > { %5383 = vst [vmem:[%s6289_s18 + $0x188] sm:$0xff] %v7865_v23 }
 0xb97   : > { %5384 = vst [vmem:[%s6289_s18 + $0x190] sm:$0xff] %v7870_v6 }
 0xb98   : > { %5385 = vst [vmem:[%s6289_s18 + $0x198] sm:$0xff] %v7875_v1 }
 0xb99   : > { %5386 = vst [vmem:[%s6289_s18 + $0x1a0] sm:$0xff] %v7880_v12 }
 0xb9a   : > { %5387 = vst [vmem:[%s6289_s18 + $0x1a8] sm:$0xff] %v7885_v44 }
 0xb9b   : > { %5388 = vst [vmem:[%s6289_s18 + $0x1b0] sm:$0xff] %v7890_v51 }
 0xb9c   : > { %5389 = vst [vmem:[%s6289_s18 + $0x1b8] sm:$0xff] %v7895_v43 }
 0xb9d   : > { %5390 = vst [vmem:[%s6289_s18 + $0x1c0] sm:$0xff] %v7900_v55 }
 0xb9e   : > { %5391 = vst [vmem:[%s6289_s18 + $0x1c8] sm:$0xff] %v7905_v60 }
 0xb9f   : > { %5392 = vst [vmem:[%s6289_s18 + $0x1d0] sm:$0xff] %v7910_v36 }
 0xba0   : > { %5393 = vst [vmem:[%s6289_s18 + $0x1d8] sm:$0xff] %v7915_v40 }
 0xba1   : > { %5394 = vst [vmem:[%s6289_s18 + $0x1e0] sm:$0xff] %v7918_v32 }
 0xba2   : > { %5395 = vst [vmem:[%s6289_s18 + $0x1e8] sm:$0xff] %v7921_v39 }
 0xba3   : > { %5396 = vst [vmem:[%s6289_s18 + $0x1f0] sm:$0xff] %v7924_v7 }
 0xba4   : > { %5397 = vst [vmem:[%s6289_s18 + $0x1f8] sm:$0xff] %v7927_v27 }
 0xba5 PF: > { %3548 = vrot.lane.b32.xlu0 %v6982_v56, %s6114_s29  ;;  %3544 = vrot.lane.b32.xlu1 %v7004_v22, %s6114_s29  ;;  %v9108_v56 = vld [vmem:[#allocation36_spill] sm:$0xff]  ;;  %v3472_v2 = vpack.c.bf16 %v7870_v6, %v7870_v6  ;;  %v3473_v17 = vpack.c.bf16 %v7875_v1, %v7875_v1  ;;  %v3475_v25 = vpack.c.bf16 %v7885_v44, %v7885_v44  ;;  %s6115_s12 = smov 16   ;;  %s6116_s14 = smov 8   ;;  %vm3815_vm7 = vcmask 130048  }
 0xba6   : > { %3540 = vrot.lane.b32.xlu2 %v7026_v8, %s6114_s29  ;;  %v3476_v6 = vpack.c.bf16 %v7890_v51, %v7890_v51  ;;  %v3477_v1 = vpack.c.bf16 %v7895_v43, %v7895_v43  ;;  %v3479_v44 = vpack.c.bf16 %v7905_v60, %v7905_v60  ;;  %v5828_v51 = vpack.i.bf16 %v7841_v14, %v7835_v62  ;;  %s6117_s22 = smov 24   ;;  %s5051_s16 = sshll.u32 %s6289_s18, 4  ;;  %s8789_s16 = int_to_ptr.vmem [resolvable:$true] %s5051_s16 }
 0xba7   : > { %v3504_v16 = vunpack.c.l.b16 %v3472_v2  ;;  %v3507_v11 = vunpack.c.l.b16 %v3475_v25  ;;  %v3480_v43 = vpack.c.bf16 %v7910_v36, %v7910_v36  ;;  %v5843_v60 = vpack.i.bf16 %v7852_v3, %v7847_v20  ;;  %s6036_s15 = scalar_lea.hbm %s8977_s9, 1024 }
 0xba8   : > { %v3508_v52 = vunpack.c.l.b16 %v3476_v6  ;;  %v3509_v50 = vunpack.c.l.b16 %v3477_v1  ;;  %v5823_v62 = vpack.i.bf16 %v7503_v49, %v7497_v15  ;;  %v3483_v36 = vpack.c.bf16 %v7921_v39, %v7921_v39 }
 0xba9   : > { %v5858_v3 = vpack.i.bf16 %v7862_v18, %v7857_v53  ;;  %v5838_v15 = vpack.i.bf16 %v7514_v24, %v7509_v61  ;;  %v3485_v39 = vpack.c.bf16 %v7927_v27, %v7927_v27  ;;  %v5853_v61 = vpack.i.bf16 %v7524_v31, %v7519_v54  ;;  %v9110_v27 = vld [vmem:[#allocation52_spill] sm:$0xff]  ;;  %v5470_v31 = vld [vmem:[%s6266_s10] sm:$0xff] }
 0xbaa   : > { %v3521_v4 = vpack.c.b16 %v3509_v50, %v3508_v52  ;;  %v5888_v25 = vpack.i.bf16 %v7882_v41, %v7877_v35  ;;  %vm3832_vm8 = vcmask 195584  }
 0xbab   : > { %v3517_v53 = vunpack.c.l.b16 %v3485_v39 }
 0xbad   : > { %3546 = vrot.lane.b32.xlu0 %v6992_v21, %s6114_s29  ;;  %3542 = vrot.lane.b32.xlu1 %v7014_v59, %s6114_s29 }
 0xbae   : > { %3538 = vrot.lane.b32.xlu2 %v7036_v29, %s6114_s29  ;;  %v3470_v29 = vpack.c.bf16 %v7860_v34, %v7860_v34  ;;  %v3505_v34 = vunpack.c.l.b16 %v3473_v17 }
 0xbb0   : > { %v3502_v19 = vunpack.c.l.b16 %v3470_v29  ;;  %v3519_v10 = vpack.c.b16 %v3505_v34, %v3504_v16  ;;  %v5471_v34 = vld [vmem:[%s6266_s10 + $0x8] sm:$0xff]  ;;  %s5478_s10 = sshll.u32 %s6098_s13, 9  ;;  %s9151_s13 = sld [smem:[#allocation7_spill]] }
 0xbb1   : > { %3905 = vmatpush.bf16.msrb.mxu3 %v5471_v34  ;;  %v5933_v34 = vpack.i.bf16 %v7912_v28, %v7907_v0 }
 0xbb5   : > { %3536 = vrot.lane.b32.xlu0 %v7048_v57, %s6114_s29  ;;  %3534 = vrot.lane.b32.xlu1 %v9108_v56, %s6114_s29  ;;  %v3471_v57 = vpack.c.bf16 %v7865_v23, %v7865_v23  ;;  %v3474_v23 = vpack.c.bf16 %v7880_v12, %v7880_v12  ;;  %v3478_v12 = vpack.c.bf16 %v7900_v55, %v7900_v55  ;;  %v3511_v56 = vunpack.c.l.b16 %v3479_v44 }
 0xbb6   : > { %v3512_v55 = vunpack.c.l.b16 %v3480_v43  ;;  %5824 = vrot.lane.b32.xlu2 %v5823_v62, %s6116_s14  ;;  %3906 = vmatpush.bf16.msrb.mxu3 %v5470_v31  ;;  %v9119_v31 = vld [vmem:[#allocation57_spill] sm:$0xff]  ;;  %s9155_s18 = sand.u32 1, %s9151_s13  }
 0xbb7   : > { %v3503_v63 = vunpack.c.l.b16 %v3471_v57  ;;  %v3506_v33 = vunpack.c.l.b16 %v3474_v23  ;;  %v3510_v45 = vunpack.c.l.b16 %v3478_v12  ;;  %s5036_s25 = scalar_lea.sflag [#allocation4], %s9155_s18 }
 0xbb9   : > { %v3518_v46 = vpack.c.b16 %v3503_v63, %v3502_v19  ;;  %v3520_v38 = vpack.c.b16 %v3507_v11, %v3506_v33  ;;  %v5873_v63 = vpack.i.bf16 %v7872_v13, %v7867_v42  ;;  %v9111_v11 = vld [vmem:[#allocation53_spill] sm:$0xff] }
 0xbbd   : > { %5829 = vrot.lane.b32.xlu0 %v5828_v51, %s6115_s12 }
 0xbbe   : > { %5839 = vrot.lane.b32.xlu2 %v5838_v15, %s6116_s14  ;;  %v9115_v15 = vld [vmem:[#allocation38_spill] sm:$0xff] }
 0xbc5   : > { %5844 = vrot.lane.b32.xlu0 %v5843_v60, %s6115_s12 }
 0xbc6   : > { %5854 = vrot.lane.b32.xlu2 %v5853_v61, %s6116_s14 }
 0xbcd   : > { %5859 = vrot.lane.b32.xlu0 %v5858_v3, %s6115_s12 }
 0xbd5   : > { %5874 = vrot.lane.b32.xlu0 %v5873_v63, %s6115_s12 }
 0xbdd   : > { %5889 = vrot.lane.b32.xlu0 %v5888_v25, %s6115_s12  ;;  %v9121_v25 = vld [vmem:[#allocation40_spill] sm:$0xff] }
 0xc00   : > { %v3541_v8 = vpop.permute.xlu2 %3540 }
 0xc08   : > { %v3539_v59 = vpop.permute.xlu2 %3538 }
 0xc10   : > { %v5825_v33 = vpop.permute.xlu2 %5824 }
 0xc11   : > { %v5827_v1 = vunpack.i.h.bf16 %v5825_v33  ;;  %v5826_v52 = vunpack.i.l.bf16 %v5825_v33 }
 0xc17   : > { %v3549_v9 = vpop.permute.xlu0 %3548  ;;  %v3545_v22 = vpop.permute.xlu1 %3544 }
 0xc18   : > { %3558 = vmatpush.bf16.msrb.mxu2 %v3549_v9  ;;  %v3522_v9 = vpack.c.b16 %v3511_v56, %v3510_v45  ;;  %v9113_v45 = vld [vmem:[#allocation34_spill] sm:$0xff] }
 0xc19   : > { %v3800_v56 = vsel %vm931_vm2, %v9113_v45, %v5827_v1  ;;  %v9123_v45 = vld [vmem:[#allocation59_spill] sm:$0xff] }
 0xc1f   : > { %v3547_v58 = vpop.permute.xlu0 %3546  ;;  %v3543_v21 = vpop.permute.xlu1 %3542 }
 0xc20   : > { %3559 = vmatpush.bf16.msrb.mxu2 %v3547_v58 }
 0xc24   : > { %3560 = vmatpush.bf16.msrb.mxu2 %v3545_v22  ;;  %v3481_v22 = vpack.c.bf16 %v7915_v40, %v7915_v40 }
 0xc26   : > { %v3513_v58 = vunpack.c.l.b16 %v3481_v22 }
 0xc27   : > { %v3537_v47 = vpop.permute.xlu0 %3536  ;;  %v3535_v30 = vpop.permute.xlu1 %3534 }
 0xc28   : > { %3561 = vmatpush.bf16.msrb.mxu2 %v3543_v21  ;;  %v3482_v21 = vpack.c.bf16 %v7918_v32, %v7918_v32  ;;  %v3484_v32 = vpack.c.bf16 %v7924_v7, %v7924_v7  ;;  %v9109_v7 = vld [vmem:[#allocation51_spill] sm:$0xff] }
 0xc2a   : > { %v3514_v40 = vunpack.c.l.b16 %v3482_v21  ;;  %v5903_v21 = vpack.i.bf16 %v7892_v37, %v7887_v26 }
 0xc2c   : > { %3562 = vmatpush.bf16.msrb.mxu2 %v3541_v8  ;;  %v3523_v8 = vpack.c.b16 %v3513_v58, %v3512_v55  ;;  %5904 = vrot.lane.b32.xlu0 %v5903_v21, %s6115_s12 }
 0xc2f   : > { %v5830_v50 = vpop.permute.xlu0 %5829 }
 0xc30   : > { %3563 = vmatpush.bf16.msrb.mxu2 %v3539_v59  ;;  %v3515_v59 = vunpack.c.l.b16 %v3483_v36  ;;  %v5831_v12 = vunpack.i.l.bf16 %v5830_v50  ;;  %v5840_v36 = vpop.permute.xlu2 %5839 }
 0xc32   : > { %v3524_v29 = vpack.c.b16 %v3515_v59, %v3514_v40  ;;  %v5842_v40 = vunpack.i.h.bf16 %v5840_v36  ;;  %v5841_v59 = vunpack.i.l.bf16 %v5840_v36 }
 0xc34   : > { %3564 = vmatpush.bf16.msrb.mxu2 %v3537_v47  ;;  %v3516_v47 = vunpack.c.l.b16 %v3484_v32  ;;  %v9116_v32 = vld [vmem:[#allocation35_spill] sm:$0xff] }
 0xc35   : > { %v3801_v39 = vsel %vm931_vm2, %v9116_v32, %v5841_v59 }
 0xc36   : > { %v3525_v18 = vpack.c.b16 %v3517_v53, %v3516_v47 }
 0xc38   : > { %3565 = vmatpush.bf16.msrb.mxu2 %v3535_v30 }
 0xc3b   : > { %3566 = vmatmul.bf16.vlgmr.msrb.gmra.mxu2 %v3518_v46  ;;  %v5868_v46 = vpack.i.bf16 %v9110_v27, %v9109_v7  ;;  %v5918_v7 = vpack.i.bf16 %v7902_v5, %v7897_v48  ;;  %v5855_v27 = vpop.permute.xlu2 %5854 }
 0xc3d   : > { %5869 = vrot.lane.b32.xlu2 %v5868_v46, %s6116_s14  ;;  %v9117_v46 = vld [vmem:[#allocation55_spill] sm:$0xff]  ;;  %5919 = vrot.lane.b32.xlu0 %v5918_v7, %s6115_s12 }
 0xc45   : > { %5934 = vrot.lane.b32.xlu0 %v5933_v34, %s6115_s12  ;;  %v9129_v34 = vld [vmem:[#allocation46_spill] sm:$0xff] }
 0xc4b   : > { %3571 = vmatmul.bf16.gmra.mxu2 %v3519_v10 }
 0xc5b   : > { %3576 = vmatmul.bf16.gmra.mxu2 %v3520_v38  ;;  %v9112_v38 = vld [vmem:[#allocation54_spill] sm:$0xff] }
 0xc5c   : > { %v5883_v6 = vpack.i.bf16 %v9112_v38, %v9111_v11  ;;  %v9122_v11 = vld [vmem:[#allocation39_spill] sm:$0xff] }
 0xc5e   : > { %5884 = vrot.lane.b32.xlu2 %v5883_v6, %s6116_s14 }
 0xc6b   : > { %3581 = vmatmul.bf16.gmra.mxu2 %v3521_v4  ;;  %v5832_v4 = vunpack.i.h.bf16 %v5830_v50 }
 0xc6d   : > { %v3817_v43 = vsel %vm3815_vm7, %v3800_v56, %v5832_v4  ;;  %v9124_v56 = vld [vmem:[#allocation60_spill] sm:$0xff] }
 0xc7b   : > { %3586 = vmatmul.bf16.gmra.mxu2 %v3522_v9  ;;  %v9114_v9 = vld [vmem:[#allocation37_spill] sm:$0xff] }
 0xc7c   : > { %v3799_v35 = vsel %vm931_vm2, %v9114_v9, %v5826_v52  ;;  %v5928_v9 = vpack.i.bf16 %v9124_v56, %v9123_v45  ;;  %v9131_v56 = vld [vmem:[#allocation48_spill] sm:$0xff] }
 0xc7d   : > { %v3816_v51 = vsel %vm3815_vm7, %v3799_v35, %v5831_v12 }
 0xc8b   : > { %3591 = vmatmul.bf16.gmra.mxu2 %v3523_v8 }
 0xc9b   : > { %3596 = vmatmul.bf16.gmra.mxu2 %v3524_v29  ;;  %v5845_v29 = vpop.permute.xlu0 %5844 }
 0xc9c   : > { %v5846_v3 = vunpack.i.l.bf16 %v5845_v29 }
 0xc9e   : > { %v3818_v37 = vsel %vm3815_vm7, %v3801_v39, %v5846_v3 }
 0xcab   : > { %3601 = vmatmul.bf16.gmra.mxu2 %v3525_v18 }
 0xcbe   : > { %v3567_v14 = vpop.f32.mrf.mxu2 }
 0xcc6   : > { %v3569_v20 = vpop.f32.mrf.mxu2 }
 0xcc7   : > { %v5833_v57 = vpack.i.bf16 %v3569_v20, %v3567_v14  ;;  %v5847_v20 = vunpack.i.h.bf16 %v5845_v29 }
 0xcc9   : > { %5834 = vrot.lane.b32.xlu1 %v5833_v57, %s6117_s22 }
 0xcce   : > { %v3572_v49 = vpop.f32.mrf.mxu2 }
 0xcd6   : > { %v3574_v19 = vpop.f32.mrf.mxu2 }
 0xcd7   : > { %v5848_v30 = vpack.i.bf16 %v3574_v19, %v3572_v49  ;;  %v3802_v49 = vsel %vm931_vm2, %v9115_v15, %v5842_v40 }
 0xcd8   : > { %v3819_v47 = vsel %vm3815_vm7, %v3802_v49, %v5847_v20 }
 0xcd9   : > { %5849 = vrot.lane.b32.xlu1 %v5848_v30, %s6117_s22 }
 0xcde   : > { %v3577_v24 = vpop.f32.mrf.mxu2 }
 0xce6   : > { %v3579_v2 = vpop.f32.mrf.mxu2 }
 0xce7   : > { %v5863_v42 = vpack.i.bf16 %v3579_v2, %v3577_v24  ;;  %v9118_v2 = vld [vmem:[#allocation56_spill] sm:$0xff] }
 0xce9   : > { %5864 = vrot.lane.b32.xlu1 %v5863_v42, %s6117_s22  ;;  %v5898_v42 = vpack.i.bf16 %v9118_v2, %v9117_v46 }
 0xceb   : > { %5899 = vrot.lane.b32.xlu2 %v5898_v42, %s6116_s14 }
 0xcee   : > { %v3582_v13 = vpop.f32.mrf.mxu2 }
 0xcf6   : > { %v3584_v17 = vpop.f32.mrf.mxu2 }
 0xcf7   : > { %v5878_v16 = vpack.i.bf16 %v3584_v17, %v3582_v13  ;;  %v5857_v13 = vunpack.i.h.bf16 %v5855_v27  ;;  %v5856_v17 = vunpack.i.l.bf16 %v5855_v27 }
 0xcf9   : > { %5879 = vrot.lane.b32.xlu1 %v5878_v16, %s6117_s22  ;;  %v5860_v16 = vpop.permute.xlu0 %5859  ;;  %v3804_v33 = vsel %vm931_vm2, %v9121_v25, %v5857_v13  ;;  %v3803_v38 = vsel %vm931_vm2, %v9122_v11, %v5856_v17 }
 0xcfa   : > { %v5861_v48 = vunpack.i.l.bf16 %v5860_v16 }
 0xcfc   : > { %v3820_v1 = vsel %vm3815_vm7, %v3803_v38, %v5861_v48  ;;  %v9130_v48 = vld [vmem:[#allocation45_spill] sm:$0xff] }
 0xcfe   : > { %v3587_v54 = vpop.f32.mrf.mxu2 }
 0xd06   : > { %v3589_v10 = vpop.f32.mrf.mxu2 }
 0xd07   : > { %v5893_v23 = vpack.i.bf16 %v3589_v10, %v3587_v54  ;;  %v5862_v54 = vunpack.i.h.bf16 %v5860_v16  ;;  %v9120_v10 = vld [vmem:[#allocation58_spill] sm:$0xff] }
 0xd09   : > { %5894 = vrot.lane.b32.xlu1 %v5893_v23, %s6117_s22  ;;  %v5913_v23 = vpack.i.bf16 %v9120_v10, %v9119_v31  ;;  %v3821_v52 = vsel %vm3815_vm7, %v3804_v33, %v5862_v54 }
 0xd0b   : > { %5914 = vrot.lane.b32.xlu2 %v5913_v23, %s6116_s14 }
 0xd0e   : > { %v3592_v44 = vpop.f32.mrf.mxu2 }
 0xd13   : > { %5929 = vrot.lane.b32.xlu2 %v5928_v9, %s6116_s14 }
 0xd16   : > { %v3594_v62 = vpop.f32.mrf.mxu2 }
 0xd17   : > { %v5908_v14 = vpack.i.bf16 %v3594_v62, %v3592_v44  ;;  %v9126_v62 = vld [vmem:[#allocation41_spill] sm:$0xff] }
 0xd19   : > { %5909 = vrot.lane.b32.xlu1 %v5908_v14, %s6117_s22 }
 0xd1e   : > { %v3597_v57 = vpop.f32.mrf.mxu2 }
 0xd26   : > { %v3599_v61 = vpop.f32.mrf.mxu2 }
 0xd27   : > { %v5923_v24 = vpack.i.bf16 %v3599_v61, %v3597_v57 }
 0xd29   : > { %5924 = vrot.lane.b32.xlu1 %v5923_v24, %s6117_s22 }
 0xd2e   : > { %v3602_v5 = vpop.f32.mrf.mxu2 }
 0xd36   : > { %v3604_v44 = vpop.f32.mrf.mxu2 }
 0xd37   : > { %v5938_v35 = vpack.i.bf16 %v3604_v44, %v3602_v5 }
 0xd39   : > { %5939 = vrot.lane.b32.xlu1 %v5938_v35, %s6117_s22  ;;  %v9132_v35 = vld [vmem:[#allocation47_spill] sm:$0xff] }
 0xd3b   : > { %v5835_v41 = vpop.permute.xlu1 %5834 }
 0xd3c   : > { %v5837_v22 = vunpack.i.h.bf16 %v5835_v41  ;;  %v5836_v55 = vunpack.i.l.bf16 %v5835_v41  ;;  %v5870_v41 = vpop.permute.xlu2 %5869 }
 0xd3e   : > { %v3833_v58 = vsel %vm3832_vm8, %v3816_v51, %v5836_v55  ;;  %v3834_v8 = vsel %vm3832_vm8, %v3817_v43, %v5837_v22  ;;  %v5872_v51 = vunpack.i.h.bf16 %v5870_v41  ;;  %v5871_v43 = vunpack.i.l.bf16 %v5870_v41  ;;  %v5875_v22 = vpop.permute.xlu0 %5874 }
 0xd3f   : > { %v3849_v60 = vpack.c.bf16 %v3834_v8, %v3833_v58  ;;  %v5877_v55 = vunpack.i.h.bf16 %v5875_v22  ;;  %v5876_v58 = vunpack.i.l.bf16 %v5875_v22  ;;  %v9125_v8 = vld [vmem:[#allocation42_spill] sm:$0xff] }
 0xd40   : > { %v3805_v14 = vsel %vm931_vm2, %v9126_v62, %v5871_v43 }
 0xd41   : > { %5406 = vmatmul.msk.bf16.vlgmr.msrb.gmra.mxu3 %vm592_vm1, %v3849_v60  ;;  %v3806_v60 = vsel %vm931_vm2, %v9125_v8, %v5872_v51  ;;  %v3822_v36 = vsel %vm3815_vm7, %v3805_v14, %v5876_v58  ;;  %v9133_v8 = vld [vmem:[#allocation17_spill] sm:$0xff] }
 0xd42   : > { %v3823_v40 = vsel %vm3815_vm7, %v3806_v60, %v5877_v55 }
 0xd44   : > { %v5885_v15 = vpop.permute.xlu2 %5884 }
 0xd45   : > { %v5887_v49 = vunpack.i.h.bf16 %v5885_v15  ;;  %v5886_v32 = vunpack.i.l.bf16 %v5885_v15 }
 0xd4b   : > { %v5850_v26 = vpop.permute.xlu1 %5849 }
 0xd4c   : > { %v5852_v53 = vunpack.i.h.bf16 %v5850_v26  ;;  %v5851_v18 = vunpack.i.l.bf16 %v5850_v26  ;;  %v9127_v26 = vld [vmem:[#allocation44_spill] sm:$0xff]  ;;  %v5900_v42 = vpop.permute.xlu2 %5899 }
 0xd4d   : > { %v5902_v13 = vunpack.i.h.bf16 %v5900_v42  ;;  %v5901_v17 = vunpack.i.l.bf16 %v5900_v42 }
 0xd4e   : > { %v3835_v19 = vsel %vm3832_vm8, %v3818_v37, %v5851_v18  ;;  %v3836_v63 = vsel %vm3832_vm8, %v3819_v47, %v5852_v53  ;;  %v3808_v37 = vsel %vm931_vm2, %v9127_v26, %v5887_v49  ;;  %v9128_v47 = vld [vmem:[#allocation43_spill] sm:$0xff]  ;;  %v5890_v18 = vpop.permute.xlu0 %5889 }
 0xd4f   : > { %v3850_v30 = vpack.c.bf16 %v3836_v63, %v3835_v19  ;;  %v3807_v53 = vsel %vm931_vm2, %v9128_v47, %v5886_v32  ;;  %v5891_v61 = vunpack.i.l.bf16 %v5890_v18  ;;  %v3810_v54 = vsel %vm931_vm2, %v9129_v34, %v5902_v13 }
 0xd50   : > { %v3809_v5 = vsel %vm931_vm2, %v9130_v48, %v5901_v17 }
 0xd51   : > { %5407 = vmatmul.msk.bf16.gmra.mxu3 %vm592_vm1, %v3850_v30  ;;  %v5892_v30 = vunpack.i.h.bf16 %v5890_v18  ;;  %v3824_v24 = vsel %vm3815_vm7, %v3807_v53, %v5891_v61 }
 0xd53   : > { %v3825_v7 = vsel %vm3815_vm7, %v3808_v37, %v5892_v30  ;;  %v9136_v30 = vld [vmem:[#allocation49_spill] sm:$0xff] }
 0xd56   : > { %v5905_v16 = vpop.permute.xlu0 %5904 }
 0xd57   : > { %v5907_v31 = vunpack.i.h.bf16 %v5905_v16  ;;  %v5906_v10 = vunpack.i.l.bf16 %v5905_v16 }
 0xd59   : > { %v3826_v11 = vsel %vm3815_vm7, %v3809_v5, %v5906_v10  ;;  %v3827_v38 = vsel %vm3815_vm7, %v3810_v54, %v5907_v31  ;;  %v9138_v31 = vld [vmem:[#allocation22_spill] sm:$0xff] }
 0xd5b   : > { %v5865_v6 = vpop.permute.xlu1 %5864 }
 0xd5c   : > { %v5867_v0 = vunpack.i.h.bf16 %v5865_v6  ;;  %v5866_v28 = vunpack.i.l.bf16 %v5865_v6 }
 0xd5e   : > { %v3837_v50 = vsel %vm3832_vm8, %v3820_v1, %v5866_v28  ;;  %v3838_v4 = vsel %vm3832_vm8, %v3821_v52, %v5867_v0  ;;  %v8124_v0 = vld [vmem:[%s6281_s11 + $0x3] ss:$0 sm:$0xff]  ;;  %v5920_v44 = vpop.permute.xlu0 %5919 }
 0xd5f   : > { %v3851_v12 = vpack.c.bf16 %v3838_v4, %v3837_v50  ;;  %v5922_v51 = vunpack.i.h.bf16 %v5920_v44  ;;  %v5921_v22 = vunpack.i.l.bf16 %v5920_v44 }
 0xd61   : > { %5408 = vmatmul.msk.bf16.gmra.mxu3 %vm592_vm1, %v3851_v12 }
 0xd65   : > { %v5915_v28 = vpop.permute.xlu2 %5914 }
 0xd66   : > { %v5917_v50 = vunpack.i.h.bf16 %v5915_v28  ;;  %v5916_v4 = vunpack.i.l.bf16 %v5915_v28  ;;  %v5935_v32 = vpop.permute.xlu0 %5934  ;;  %v9140_v28 = vld [vmem:[#allocation26_spill] sm:$0xff] }
 0xd67   : > { %v5937_v37 = vunpack.i.h.bf16 %v5935_v32  ;;  %v5936_v47 = vunpack.i.l.bf16 %v5935_v32 }
 0xd68   : > { %v3812_v9 = vsel %vm931_vm2, %v9131_v56, %v5917_v50  ;;  %v3811_v41 = vsel %vm931_vm2, %v9132_v35, %v5916_v4  ;;  %v6118_v35 = vmov 32.0  }
 0xd69   : > { %v3829_v62 = vsel %vm3815_vm7, %v3812_v9, %v5922_v51  ;;  %v3828_v14 = vsel %vm3815_vm7, %v3811_v41, %v5921_v22  ;;  %5950 = vrcp.f32 %v6118_v35 }
 0xd6b   : > { %v5880_v21 = vpop.permute.xlu1 %5879 }
 0xd6c   : > { %v5882_v59 = vunpack.i.h.bf16 %v5880_v21  ;;  %v5881_v29 = vunpack.i.l.bf16 %v5880_v21 }
 0xd6d   : > { %v5930_v49 = vpop.permute.xlu2 %5929 }
 0xd6e   : > { %v3839_v20 = vsel %vm3832_vm8, %v3822_v36, %v5881_v29  ;;  %v3840_v3 = vsel %vm3832_vm8, %v3823_v40, %v5882_v59  ;;  %v5931_v26 = vunpack.i.l.bf16 %v5930_v49 }
 0xd6f   : > { %v3852_v57 = vpack.c.bf16 %v3840_v3, %v3839_v20  ;;  %v9134_v3 = vld [vmem:[#allocation18_spill] sm:$0xff]  ;;  %v5951_v41 = vpop.eup %5950 }
 0xd70   : > { %v3813_v61 = vsel %vm931_vm2, %v9136_v30, %v5931_v26  ;;  %v4015_v51 = vmul.f32 32.0, %v5951_v41 }
 0xd71   : > { %5409 = vmatmul.msk.bf16.gmra.mxu3 %vm592_vm1, %v3852_v57  ;;  %v3830_v42 = vsel %vm3815_vm7, %v3813_v61, %v5936_v47 }
 0xd7b   : > { %v5895_v39 = vpop.permute.xlu1 %5894 }
 0xd7c   : > { %v5897_v19 = vunpack.i.h.bf16 %v5895_v39  ;;  %v5896_v63 = vunpack.i.l.bf16 %v5895_v39  ;;  %v5932_v39 = vunpack.i.h.bf16 %v5930_v49  ;;  %v9142_v49 = vld [vmem:[#allocation30_spill] sm:$0xff] }
 0xd7e   : > { %v3841_v27 = vsel %vm3832_vm8, %v3824_v24, %v5896_v63  ;;  %v3842_v46 = vsel %vm3832_vm8, %v3825_v7, %v5897_v19  ;;  %v9135_v19 = vld [vmem:[#allocation50_spill] sm:$0xff] }
 0xd7f   : > { %v3853_v2 = vpack.c.bf16 %v3842_v46, %v3841_v27  ;;  %v3814_v63 = vsel %vm931_vm2, %v9135_v19, %v5932_v39  ;;  %v9137_v46 = vld [vmem:[#allocation21_spill] sm:$0xff]  ;;  %vm4019_vm2 = vweird.f32 %v5951_v41 }
 0xd80   : > { %v3831_v13 = vsel %vm3815_vm7, %v3814_v63, %v5937_v37  ;;  %v9143_v63 = vld [vmem:[#allocation31_spill] sm:$0xff] }
 0xd81   : > { %5410 = vmatmul.msk.bf16.gmra.mxu3 %vm592_vm1, %v3853_v2 }
 0xd8b   : > { %v5910_v23 = vpop.permute.xlu1 %5909 }
 0xd8c   : > { %v5912_v25 = vunpack.i.h.bf16 %v5910_v23  ;;  %v5911_v33 = vunpack.i.l.bf16 %v5910_v23 }
 0xd8e   : > { %v3843_v6 = vsel %vm3832_vm8, %v3826_v11, %v5911_v33  ;;  %v3844_v1 = vsel %vm3832_vm8, %v3827_v38, %v5912_v25  ;;  %v9139_v11 = vld [vmem:[#allocation25_spill] sm:$0xff] }
 0xd8f   : > { %v3854_v52 = vpack.c.bf16 %v3844_v1, %v3843_v6 }
 0xd91   : > { %5411 = vmatmul.msk.bf16.gmra.mxu3 %vm592_vm1, %v3854_v52 }
 0xd9b   : > { %v5925_v43 = vpop.permute.xlu1 %5924 }
 0xd9c   : > { %v5927_v55 = vunpack.i.h.bf16 %v5925_v43  ;;  %v5926_v58 = vunpack.i.l.bf16 %v5925_v43  ;;  %v4016_v43 = vsub.f32 1.0, %v4015_v51 }
 0xd9e   : > { %v3846_v21 = vsel %vm3832_vm8, %v3829_v62, %v5927_v55  ;;  %v3845_v40 = vsel %vm3832_vm8, %v3828_v14, %v5926_v58  ;;  %v4017_v55 = vmul.f32 %v5951_v41, %v4016_v43 }
 0xd9f   : > { %v3855_v59 = vpack.c.bf16 %v3846_v21, %v3845_v40 }
 0xda0   : > { %v4018_v58 = vadd.f32 %v5951_v41, %v4017_v55 }
 0xda1   : > { %5412 = vmatmul.msk.bf16.gmra.mxu3 %vm592_vm1, %v3855_v59 }
 0xdab   : > { %v5940_v24 = vpop.permute.xlu1 %5939 }
 0xdac   : > { %v5942_v7 = vunpack.i.h.bf16 %v5940_v24  ;;  %v5941_v27 = vunpack.i.l.bf16 %v5940_v24 }
 0xdae   : > { %v3847_v17 = vsel %vm3832_vm8, %v3830_v42, %v5941_v27  ;;  %v3848_v16 = vsel %vm3832_vm8, %v3831_v13, %v5942_v7  ;;  %v9144_v13 = vld [vmem:[#allocation32_spill] sm:$0xff] }
 0xdaf   : > { %v3856_v54 = vpack.c.bf16 %v3848_v16, %v3847_v17 }
 0xdb1   : > { %5413 = vmatmul.msk.bf16.gmra.mxu3 %vm592_vm1, %v3856_v54 }
 0xdc4   : > { %v3908_v12 = vpop.f32.mrf.mxu3 }
 0xdc5   : > { %v3909_v45 = vadd.f32 %v8124_v0, %v3908_v12 }
 0xdc7   : > { %v8132_v60 = vadd.f32 %v3909_v45, %v9133_v8  ;;  %v9141_v45 = vld [vmem:[#allocation29_spill] sm:$0xff]  ;;  %v8180_v8 = vsel %vm4019_vm2, %v5951_v41, %v4018_v58  ;;  %v9147_v58 = vld [vmem:[#allocation23_spill] sm:$0xff] }
 0xdc9   : > { %v3966_v36 = vsel %vm592_vm1, %v8132_v60, 0.0 }
 0xdca   : > { %3967 = vadd.xlane.f32.xlu2 %v3966_v36 }
 0xdcc   : > { %v3910_v29 = vpop.f32.mrf.mxu3 }
 0xdcd   : > { %v3911_v20 = vadd.f32 %v8124_v0, %v3910_v29 }
 0xdcf   : > { %v8143_v57 = vadd.f32 %v3911_v20, %v9134_v3 }
 0xdd1   : > { %v3969_v15 = vsel %vm592_vm1, %v8143_v57, 0.0 }
 0xdd2   : > { %3970 = vadd.xlane.f32.xlu0 %v3969_v15 }
 0xdd4   : > { %v3913_v53 = vpop.f32.mrf.mxu3 }
 0xdd5   : > { %v3914_v18 = vadd.f32 %v8124_v0, %v3913_v53 }
 0xdd7   : > { %v3950_v2 = vadd.f32 %v3914_v18, %v9137_v46 }
 0xdd9   : > { %v3972_v34 = vsel %vm592_vm1, %v3950_v2, 0.0 }
 0xdda   : > { %3973 = vadd.xlane.f32.xlu1 %v3972_v34 }
 0xddc   : > { %v3915_v48 = vpop.f32.mrf.mxu3 }
 0xddd   : > { %v3916_v5 = vadd.f32 %v8124_v0, %v3915_v48 }
 0xddf   : > { %v3951_v10 = vadd.f32 %v3916_v5, %v9138_v31 }
 0xde1   : > { %v3975_v23 = vsel %vm592_vm1, %v3951_v10, 0.0 }
 0xde2   : > { %3976 = vadd.xlane.f32.xlu2 %v3975_v23 }
 0xde4   : > { %v3918_v25 = vpop.f32.mrf.mxu3 }
 0xde5   : > { %v3919_v33 = vadd.f32 %v8124_v0, %v3918_v25  ;;  %v9145_v25 = vld [vmem:[#allocation19_spill] sm:$0xff] }
 0xde7   : > { %v8164_v38 = vadd.f32 %v3919_v33, %v9139_v11 }
 0xde9   : > { %v3978_v6 = vsel %vm592_vm1, %v8164_v38, 0.0 }
 0xdea   : > { %3979 = vadd.xlane.f32.xlu2 %v3978_v6 }
 0xdec   : > { %v3920_v1 = vpop.f32.mrf.mxu3 }
 0xded   : > { %v3921_v52 = vadd.f32 %v8124_v0, %v3920_v1 }
 0xdef   : > { %v8170_v50 = vadd.f32 %v3921_v52, %v9140_v28 }
 0xdf1   : > { %v3981_v4 = vsel %vm592_vm1, %v8170_v50, 0.0 }
 0xdf2   : > { %3982 = vadd.xlane.f32.xlu0 %v3981_v4 }
 0xdf4   : > { %v3923_v12 = vpop.f32.mrf.mxu3 }
 0xdf5   : > { %v3924_v44 = vadd.f32 %v8124_v0, %v3923_v12 }
 0xdf7   : > { %v8176_v56 = vadd.f32 %v3924_v44, %v9141_v45  ;;  %v9146_v44 = vld [vmem:[#allocation20_spill] sm:$0xff] }
 0xdf9   : > { %v3984_v9 = vsel %vm592_vm1, %v8176_v56, 0.0 }
 0xdfa   : > { %3985 = vadd.xlane.f32.xlu0 %v3984_v9 }
 0xdfc   : > { %v3925_v22 = vpop.f32.mrf.mxu3 }
 0xdfd   : > { %v3926_v59 = vadd.f32 %v8124_v0, %v3925_v22 }
 0xdff   : > { %v8192_v32 = vadd.f32 %v3926_v59, %v9142_v49  ;;  %v9149_v49 = vld [vmem:[#allocation27_spill] sm:$0xff] }
 0xe01   : > { %v3987_v47 = vsel %vm592_vm1, %v8192_v32, 0.0 }
 0xe04   : > { %v3928_v14 = vpop.f32.mrf.mxu3 }
 0xe05   : > { %v3929_v26 = vadd.f32 %v8124_v0, %v3928_v14 }
 0xe07   : > { %v8205_v30 = vadd.f32 %v3929_v26, %v9143_v63 }
 0xe09   : > { %v3990_v7 = vsel %vm592_vm1, %v8205_v30, 0.0 }
 0xe0c   : > { %v3930_v15 = vpop.f32.mrf.mxu3 }
 0xe0d   : > { %v3931_v24 = vadd.f32 %v8124_v0, %v3930_v15 }
 0xe0f   : > { %v8217_v17 = vadd.f32 %v3931_v24, %v9144_v13 }
 0xe11   : > { %v3993_v5 = vsel %vm592_vm1, %v8217_v17, 0.0 }
 0xe14   : > { %v3933_v19 = vpop.f32.mrf.mxu3 }
 0xe15   : > { %v3934_v54 = vadd.f32 %v8124_v0, %v3933_v19 }
 0xe17   : > { %v8229_v33 = vadd.f32 %v3934_v54, %v9145_v25 }
 0xe19   : > { %v3996_v6 = vsel %vm592_vm1, %v8229_v33, 0.0 }
 0xe1c   : > { %v3935_v16 = vpop.f32.mrf.mxu3 }
 0xe1d   : > { %v3936_v1 = vadd.f32 %v8124_v0, %v3935_v16 }
 0xe1f   : > { %v8242_v45 = vadd.f32 %v3936_v1, %v9146_v44 }
 0xe21   : > { %v3999_v9 = vsel %vm592_vm1, %v8242_v45, 0.0 }
 0xe24   : > { %v3938_v52 = vpop.f32.mrf.mxu3 }
 0xe25   : > { %v3939_v41 = vadd.f32 %v8124_v0, %v3938_v52 }
 0xe2c   : > { %v3940_v22 = vpop.f32.mrf.mxu3 }
 0xe3d   : > { %v3968_v62 = vpop.xlane.xlu2 %3967 }
 0xe3e   : > { %v4021_v21 = vmul.f32 %v8180_v8, %v3968_v62  ;;  %v8255_v62 = vadd.f32 %v3939_v41, %v9147_v58 }
 0xe40   : > { %v8184_v36 = vsub.f32 %v8132_v60, %v4021_v21  ;;  %v4002_v14 = vsel %vm592_vm1, %v8255_v62, 0.0 }
 0xe42   : > { %v4053_v40 = vmul.f32 %v8184_v36, %v8184_v36 }
 0xe44   : > { %v4069_v29 = vsel %vm592_vm1, %v4053_v40, 0.0  ;;  %v3941_v40 = vadd.f32 %v8124_v0, %v3940_v22 }
 0xe45   : > { %v3971_v20 = vpop.xlane.xlu0 %3970  ;;  %4070 = vadd.xlane.f32.xlu1 %v4069_v29  ;;  %v9148_v29 = vld [vmem:[#allocation24_spill] sm:$0xff] }
 0xe46   : > { %v4022_v3 = vmul.f32 %v8180_v8, %v3971_v20  ;;  %v8267_v20 = vadd.f32 %v3941_v40, %v9148_v29 }
 0xe48   : > { %v8195_v39 = vsub.f32 %v8143_v57, %v4022_v3  ;;  %v3943_v3 = vpop.f32.mrf.mxu3 }
 0xe49   : > { %v3944_v15 = vadd.f32 %v8124_v0, %v3943_v3  ;;  %v8310_v3 = vld [vmem:[%s6281_s11 + $0x4] ss:$0 sm:$0xff] }
 0xe4a   : > { %v4054_v60 = vmul.f32 %v8195_v39, %v8195_v39 }
 0xe4c   : > { %v4072_v37 = vsel %vm592_vm1, %v4054_v60, 0.0  ;;  %v8273_v60 = vadd.f32 %v3944_v15, %v9149_v49 }
 0xe4d   : > { %4073 = vadd.xlane.f32.xlu2 %v4072_v37  ;;  %3988 = vadd.xlane.f32.xlu1 %v3987_v47  ;;  %v3974_v53 = vpop.xlane.xlu1 %3973  ;;  %v5473_v37 = vld [vmem:[%s6271_s24 + $0x8] sm:$0xff] }
 0xe4e   : > { %v4023_v18 = vmul.f32 %v8180_v8, %v3974_v53  ;;  %v4008_v26 = vsel %vm592_vm1, %v8273_v60, 0.0  ;;  %4415 = vmatpush.bf16.msrb.mxu0 %v5473_v37 }
 0xe50   : > { %v8207_v57 = vsub.f32 %v3950_v2, %v4023_v18  ;;  %v5472_v18 = vld [vmem:[%s6271_s24] sm:$0xff]  ;;  %v3945_v52 = vpop.f32.mrf.mxu3 }
 0xe52   : > { %v4055_v61 = vmul.f32 %v8207_v57, %v8207_v57  ;;  %4416 = vmatpush.bf16.msrb.mxu0 %v5472_v18  ;;  %v8321_v18 = vld [vmem:[%s6281_s11 + $0x5] ss:$0 sm:$0xff] }
 0xe54   : > { %v4075_v27 = vsel %vm592_vm1, %v4055_v61, 0.0 }
 0xe55   : > { %v3977_v46 = vpop.xlane.xlu2 %3976  ;;  %3991 = vadd.xlane.f32.xlu1 %v3990_v7  ;;  %4076 = vadd.xlane.f32.xlu2 %v4075_v27 }
 0xe56   : > { %v4024_v42 = vmul.f32 %v8180_v8, %v3977_v46 }
 0xe58   : > { %v8219_v2 = vsub.f32 %v3951_v10, %v4024_v42 }
 0xe5a   : > { %v4056_v34 = vmul.f32 %v8219_v2, %v8219_v2 }
 0xe5c   : > { %v4078_v48 = vsel %vm592_vm1, %v4056_v34, 0.0 }
 0xe5d   : > { %v3980_v31 = vpop.xlane.xlu2 %3979  ;;  %4079 = vadd.xlane.f32.xlu0 %v4078_v48  ;;  %3994 = vadd.xlane.f32.xlu2 %v3993_v5 }
 0xe5e   : > { %v4025_v23 = vmul.f32 %v8180_v8, %v3980_v31 }
 0xe60   : > { %v8232_v10 = vsub.f32 %v8164_v38, %v4025_v23 }
 0xe62   : > { %v4057_v11 = vmul.f32 %v8232_v10, %v8232_v10 }
 0xe64   : > { %v4081_v28 = vsel %vm592_vm1, %v4057_v11, 0.0 }
 0xe65   : > { %v3983_v4 = vpop.xlane.xlu0 %3982  ;;  %4082 = vadd.xlane.f32.xlu0 %v4081_v28  ;;  %3997 = vadd.xlane.f32.xlu2 %v3996_v6 }
 0xe66   : > { %v4026_v12 = vmul.f32 %v8180_v8, %v3983_v4 }
 0xe68   : > { %v8245_v38 = vsub.f32 %v8170_v50, %v4026_v12 }
 0xe6a   : > { %v4058_v35 = vmul.f32 %v8245_v38, %v8245_v38 }
 0xe6c   : > { %v4084_v51 = vsel %vm592_vm1, %v4058_v35, 0.0 }
 0xe6d   : > { %v3986_v43 = vpop.xlane.xlu0 %3985  ;;  %4000 = vadd.xlane.f32.xlu0 %v3999_v9  ;;  %4085 = vadd.xlane.f32.xlu1 %v4084_v51  ;;  %v3946_v9 = vadd.f32 %v8124_v0, %v3945_v52 }
 0xe6e   : > { %v4027_v55 = vmul.f32 %v8180_v8, %v3986_v43 }
 0xe70   : > { %v8258_v50 = vsub.f32 %v8176_v56, %v4027_v55  ;;  %v4005_v56 = vsel %vm592_vm1, %v8267_v20, 0.0 }
 0xe72   : > { %v4059_v21 = vmul.f32 %v8258_v50, %v8258_v50 }
 0xe74   : > { %v4087_v59 = vsel %vm592_vm1, %v4059_v21, 0.0  ;;  %v9150_v21 = vld [vmem:[#allocation28_spill] sm:$0xff] }
 0xe75   : > { %4003 = vadd.xlane.f32.xlu0 %v4002_v14  ;;  %4088 = vadd.xlane.f32.xlu1 %v4087_v59  ;;  %v8303_v40 = vadd.f32 %v3946_v9, %v9150_v21 }
 0xe7d   : > { %4006 = vadd.xlane.f32.xlu1 %v4005_v56 }
 0xe85   : > { %4009 = vadd.xlane.f32.xlu1 %v4008_v26 }
 0xeb8   : > { %v4071_v47 = vpop.xlane.xlu1 %4070 }
 0xeb9   : > { %v4117_v53 = vmul.f32 %v4071_v47, %v8180_v8 }
 0xebb   : > { %v4133_v19 = vadd.f32 1e-12, %v4117_v53 }
 0xebd   : > { %5952 = vrsqrt.f32 %v4133_v19  ;;  %vm4155_vm10 = vweird.f32 %v4133_v19 }
 0xec0   : > { %v4074_v63 = vpop.xlane.xlu2 %4073  ;;  %v3989_v61 = vpop.xlane.xlu1 %3988 }
 0xec1   : > { %v4118_v24 = vmul.f32 %v4074_v63, %v8180_v8  ;;  %v4028_v7 = vmul.f32 %v8180_v8, %v3989_v61 }
 0xec3   : > { %v5953_v27 = vpop.eup %5952  ;;  %v4134_v46 = vadd.f32 1e-12, %v4118_v24  ;;  %v8283_v42 = vsub.f32 %v8192_v32, %v4028_v7 }
 0xec4   : > { %v4150_v13 = vmul.f32 %v5953_v27, %v4133_v19  ;;  %vm4156_vm9 = vweird.f32 %v5953_v27 }
 0xec5   : > { %5954 = vrsqrt.f32 %v4134_v46  ;;  %v4060_v16 = vmul.f32 %v8283_v42, %v8283_v42  ;;  %vm4157_vm11 = vmor %vm4155_vm10, %vm4156_vm9  ;;  %vm4165_vm13 = vweird.f32 %v4134_v46 }
 0xec6   : > { %v4151_v34 = vmul.f32 %v5953_v27, %v4150_v13 }
 0xec7   : > { %v4090_v54 = vsel %vm592_vm1, %v4060_v16, 0.0 }
 0xec8   : > { %v4152_v48 = vmul.f32 0.5, %v4151_v34  ;;  %v4077_v5 = vpop.xlane.xlu2 %4076  ;;  %4091 = vadd.xlane.f32.xlu2 %v4090_v54  ;;  %v3992_v31 = vpop.xlane.xlu1 %3991 }
 0xec9   : > { %v4119_v23 = vmul.f32 %v4077_v5, %v8180_v8  ;;  %v4029_v25 = vmul.f32 %v8180_v8, %v3992_v31 }
 0xeca   : > { %v4153_v11 = vsub.f32 1.5, %v4152_v48 }
 0xecb   : > { %v5955_v6 = vpop.eup %5954  ;;  %v8290_v32 = vadd.f32 1e-12, %v4119_v23  ;;  %v8293_v1 = vsub.f32 %v8205_v30, %v4029_v25 }
 0xecc   : > { %v4154_v28 = vmul.f32 %v5953_v27, %v4153_v11  ;;  %v4160_v4 = vmul.f32 %v5955_v6, %v4134_v46  ;;  %vm4166_vm12 = vweird.f32 %v5955_v6 }
 0xecd   : > { %5956 = vrsqrt.f32 %v8290_v32  ;;  %v4061_v12 = vmul.f32 %v8293_v1, %v8293_v1  ;;  %vm4167_vm14 = vmor %vm4165_vm13, %vm4166_vm12  ;;  %vm4175_vm0 = vweird.f32 %v8290_v32 }
 0xece   : > { %v4161_v44 = vmul.f32 %v5955_v6, %v4160_v4  ;;  %v4158_v43 = vsel %vm4157_vm11, %v5953_v27, %v4154_v28 }
 0xecf   : > { %v4093_v35 = vsel %vm592_vm1, %v4061_v12, 0.0  ;;  %v4309_v29 = vmul.f32 %v4158_v43, %v8184_v36 }
 0xed0   : > { %v4162_v41 = vmul.f32 0.5, %v4161_v44  ;;  %v4080_v30 = vpop.xlane.xlu0 %4079  ;;  %v3995_v51 = vpop.xlane.xlu2 %3994  ;;  %4094 = vadd.xlane.f32.xlu2 %v4093_v35 }
 0xed1   : > { %v4120_v22 = vmul.f32 %v4080_v30, %v8180_v8  ;;  %v4030_v55 = vmul.f32 %v8180_v8, %v3995_v51  ;;  %v4326_v53 = vmul.f32 %v8310_v3, %v4309_v29 }
 0xed2   : > { %v4163_v58 = vsub.f32 1.5, %v4162_v41 }
 0xed3   : > { %v5957_v14 = vpop.eup %5956  ;;  %v4136_v0 = vadd.f32 1e-12, %v4120_v22  ;;  %v8306_v59 = vsub.f32 %v8217_v17, %v4030_v55  ;;  %v4011_v17 = vsel %vm592_vm1, %v8303_v40, 0.0  ;;  %v8330_v34 = vadd.f32 %v8321_v18, %v4326_v53 }
 0xed4   : > { %v4164_v56 = vmul.f32 %v5955_v6, %v4163_v58  ;;  %v4170_v15 = vmul.f32 %v5957_v14, %v8290_v32  ;;  %vm4176_vm15 = vweird.f32 %v5957_v14 }
 0xed5   : > { %5958 = vrsqrt.f32 %v4136_v0  ;;  %v4062_v49 = vmul.f32 %v8306_v59, %v8306_v59  ;;  %vm4177_vm3 = vmor %vm4175_vm0, %vm4176_vm15  ;;  %vm4185_vm5 = vweird.f32 %v4136_v0 }
 0xed6   : > { %v4171_v26 = vmul.f32 %v5957_v14, %v4170_v15  ;;  %v4168_v37 = vsel %vm4167_vm14, %v5955_v6, %v4164_v56 }
 0xed7   : > { %v4096_v47 = vsel %vm592_vm1, %v4062_v49, 0.0  ;;  %v4310_v36 = vmul.f32 %v4168_v37, %v8195_v39 }
 0xed8   : > { %v4172_v19 = vmul.f32 0.5, %v4171_v26  ;;  %v4083_v63 = vpop.xlane.xlu0 %4082  ;;  %4097 = vadd.xlane.f32.xlu0 %v4096_v47  ;;  %v3998_v61 = vpop.xlane.xlu2 %3997  ;;  %4012 = vadd.xlane.f32.xlu2 %v4011_v17 }
 0xed9   : > { %v4121_v24 = vmul.f32 %v4083_v63, %v8180_v8  ;;  %v4031_v7 = vmul.f32 %v8180_v8, %v3998_v61  ;;  %v4327_v27 = vmul.f32 %v8310_v3, %v4310_v36 }
 0xeda   : > { %v4173_v46 = vsub.f32 1.5, %v4172_v19 }
 0xedb   : > { %v5959_v13 = vpop.eup %5958  ;;  %v4137_v16 = vadd.f32 1e-12, %v4121_v24  ;;  %v8327_v39 = vsub.f32 %v8229_v33, %v4031_v7  ;;  %v8333_v54 = vadd.f32 %v8321_v18, %v4327_v27 }
 0xedc   : > { %v4174_v48 = vmul.f32 %v5957_v14, %v4173_v46  ;;  %v4180_v5 = vmul.f32 %v5959_v13, %v4136_v0  ;;  %vm4186_vm4 = vweird.f32 %v5959_v13 }
 0xedd   : > { %5960 = vrsqrt.f32 %v4137_v16  ;;  %v4359_v31 = vpack.c.bf16 %v8333_v54, %v8330_v34  ;;  %v4063_v23 = vmul.f32 %v8327_v39, %v8327_v39  ;;  %vm4187_vm6 = vmor %vm4185_vm5, %vm4186_vm4  ;;  %vm4195_vm8 = vweird.f32 %v4137_v16 }
 0xede   : > { %v4181_v33 = vmul.f32 %v5959_v13, %v4180_v5  ;;  %v4178_v28 = vsel %vm4177_vm3, %v5957_v14, %v4174_v48 }
 0xedf   : > { %5422 = vmatmul.msk.bf16.vlgmr.msrb.gmra.mxu0 %vm592_vm1, %v4359_v31  ;;  %v4099_v25 = vsel %vm592_vm1, %v4063_v23, 0.0  ;;  %v4311_v41 = vmul.f32 %v4178_v28, %v8207_v57 }
 0xee0   : > { %v4182_v11 = vmul.f32 0.5, %v4181_v33  ;;  %v4001_v6 = vpop.xlane.xlu0 %4000  ;;  %4100 = vadd.xlane.f32.xlu0 %v4099_v25  ;;  %v4086_v52 = vpop.xlane.xlu1 %4085 }
 0xee1   : > { %v4032_v4 = vmul.f32 %v8180_v8, %v4001_v6  ;;  %v4122_v12 = vmul.f32 %v4086_v52, %v8180_v8 }
 0xee2   : > { %v4183_v44 = vsub.f32 1.5, %v4182_v11 }
 0xee3   : > { %v5961_v9 = vpop.eup %5960  ;;  %v8345_v32 = vsub.f32 %v8242_v45, %v4032_v4  ;;  %v4138_v35 = vadd.f32 1e-12, %v4122_v12  ;;  %v4328_v45 = vmul.f32 %v8310_v3, %v4311_v41 }
 0xee4   : > { %v4184_v30 = vmul.f32 %v5959_v13, %v4183_v44  ;;  %v4190_v51 = vmul.f32 %v5961_v9, %v4137_v16  ;;  %vm4196_vm7 = vweird.f32 %v5961_v9 }
 0xee5   : > { %5962 = vrsqrt.f32 %v4138_v35  ;;  %v4064_v43 = vmul.f32 %v8345_v32, %v8345_v32  ;;  %v8359_v37 = vadd.f32 %v8321_v18, %v4328_v45  ;;  %vm4197_vm2 = vmor %vm4195_vm8, %vm4196_vm7  ;;  %vm4205_vm10 = vweird.f32 %v4138_v35 }
 0xee6   : > { %v4191_v22 = vmul.f32 %v5961_v9, %v4190_v51  ;;  %v4188_v55 = vsel %vm4187_vm6, %v5959_v13, %v4184_v30 }
 0xee7   : > { %v4102_v58 = vsel %vm592_vm1, %v4064_v43, 0.0  ;;  %v4312_v14 = vmul.f32 %v4188_v55, %v8219_v2 }
 0xee8   : > { %v4192_v21 = vmul.f32 0.5, %v4191_v22  ;;  %v4004_v29 = vpop.xlane.xlu0 %4003  ;;  %v4089_v56 = vpop.xlane.xlu1 %4088  ;;  %4103 = vadd.xlane.f32.xlu1 %v4102_v58  ;;  %v5476_v22 = vld [vmem:[%s6276_s17 + $0x10] sm:$0xff]  ;;  %v5475_v58 = vld [vmem:[%s6276_s17 + $0x8] sm:$0xff] }
 0xee9   : > { %v4033_v57 = vmul.f32 %v8180_v8, %v4004_v29  ;;  %v4329_v0 = vmul.f32 %v8310_v3, %v4312_v14 }
 0xeea   : > { %v4193_v15 = vsub.f32 1.5, %v4192_v21 }
 0xeeb   : > { %v5963_v49 = vpop.eup %5962  ;;  %v8356_v26 = vsub.f32 %v8255_v62, %v4033_v57  ;;  %v8362_v2 = vadd.f32 %v8321_v18, %v4329_v0  ;;  %v5474_v57 = vld [vmem:[%s6276_s17] sm:$0xff] }
 0xeec   : > { %v4194_v47 = vmul.f32 %v5961_v9, %v4193_v15  ;;  %v4200_v17 = vmul.f32 %v5963_v49, %v4138_v35  ;;  %vm4206_vm9 = vweird.f32 %v5963_v49  ;;  %v5477_v35 = vld [vmem:[%s6276_s17 + $0x18] sm:$0xff] }
 0xeed   : > { %v4360_v36 = vpack.c.bf16 %v8362_v2, %v8359_v37  ;;  %v4065_v53 = vmul.f32 %v8356_v26, %v8356_v26  ;;  %vm4207_vm11 = vmor %vm4205_vm10, %vm4206_vm9  ;;  %4545 = vmatpush.bf16.msrb.mxu1 %v5477_v35  ;;  %vm4516_vm10 = vcmask 523264  }
 0xeee   : > { %v4201_v19 = vmul.f32 %v5963_v49, %v4200_v17  ;;  %v4198_v24 = vsel %vm4197_vm2, %v5961_v9, %v4194_v47 }
 0xeef   : > { %5423 = vmatmul.msk.bf16.gmra.mxu0 %vm592_vm1, %v4360_v36  ;;  %v4105_v62 = vsel %vm592_vm1, %v4065_v53, 0.0  ;;  %v4313_v13 = vmul.f32 %v4198_v24, %v8232_v10 }
 0xef0   : > { %v4202_v63 = vmul.f32 0.5, %v4201_v19  ;;  %v4007_v61 = vpop.xlane.xlu1 %4006  ;;  %4106 = vadd.xlane.f32.xlu2 %v4105_v62 }
 0xef1   : > { %v4034_v7 = vmul.f32 %v8180_v8, %v4007_v61  ;;  %v4330_v33 = vmul.f32 %v8310_v3, %v4313_v13  ;;  %4546 = vmatpush.bf16.msrb.mxu1 %v5476_v22 }
 0xef2   : > { %v4203_v27 = vsub.f32 1.5, %v4202_v63 }
 0xef3   : > { %v8372_v46 = vsub.f32 %v8267_v20, %v4034_v7  ;;  %v8386_v6 = vadd.f32 %v8321_v18, %v4330_v33 }
 0xef4   : > { %v4204_v16 = vmul.f32 %v5963_v49, %v4203_v27 }
 0xef5   : > { %v4066_v48 = vmul.f32 %v8372_v46, %v8372_v46  ;;  %4547 = vmatpush.bf16.msrb.mxu1 %v5475_v58 }
 0xef6   : > { %v4208_v5 = vsel %vm4207_vm11, %v5963_v49, %v4204_v16 }
 0xef7   : > { %v4108_v31 = vsel %vm592_vm1, %v4066_v48, 0.0  ;;  %v4314_v23 = vmul.f32 %v4208_v5, %v8245_v38 }
 0xef8   : > { %4109 = vadd.xlane.f32.xlu0 %v4108_v31  ;;  %v4010_v25 = vpop.xlane.xlu1 %4009 }
 0xef9   : > { %v4035_v20 = vmul.f32 %v8180_v8, %v4010_v25  ;;  %v4331_v10 = vmul.f32 %v8310_v3, %v4314_v23  ;;  %4548 = vmatpush.bf16.msrb.mxu1 %v5474_v57 }
 0xefb   : > { %v8383_v11 = vsub.f32 %v8273_v60, %v4035_v20  ;;  %v8389_v52 = vadd.f32 %v8321_v18, %v4331_v10  ;;  %v4123_v60 = vmul.f32 %v4089_v56, %v8180_v8 }
 0xefd   : > { %v4361_v38 = vpack.c.bf16 %v8389_v52, %v8386_v6  ;;  %v4067_v28 = vmul.f32 %v8383_v11, %v8383_v11  ;;  %v4139_v12 = vadd.f32 1e-12, %v4123_v60 }
 0xeff   : > { %5424 = vmatmul.msk.bf16.gmra.mxu0 %vm592_vm1, %v4361_v38  ;;  %v4111_v4 = vsel %vm592_vm1, %v4067_v28, 0.0  ;;  %5964 = vrsqrt.f32 %v4139_v12  ;;  %vm4215_vm13 = vweird.f32 %v4139_v12 }
 0xf00   : > { %4112 = vadd.xlane.f32.xlu1 %v4111_v4 }
 0xf05   : > { %v5965_v44 = vpop.eup %5964 }
 0xf06   : > { %v4210_v9 = vmul.f32 %v5965_v44, %v4139_v12  ;;  %vm4216_vm12 = vweird.f32 %v5965_v44 }
 0xf07   : > { %vm4217_vm14 = vmor %vm4215_vm13, %vm4216_vm12 }
 0xf08   : > { %v4211_v41 = vmul.f32 %v5965_v44, %v4210_v9 }
 0xf0a   : > { %v4212_v55 = vmul.f32 0.5, %v4211_v41 }
 0xf0c   : > { %v4213_v14 = vsub.f32 1.5, %v4212_v55 }
 0xf0e   : > { %v4214_v0 = vmul.f32 %v5965_v44, %v4213_v14 }
 0xf10   : > { %v4218_v53 = vsel %vm4217_vm14, %v5965_v44, %v4214_v0 }
 0xf11   : > { %v4315_v27 = vmul.f32 %v4218_v53, %v8258_v50 }
 0xf13   : > { %v4332_v25 = vmul.f32 %v8310_v3, %v4315_v27 }
 0xf15   : > { %v8418_v60 = vadd.f32 %v8321_v18, %v4332_v25 }
 0xf3b   : > { %v4092_v30 = vpop.xlane.xlu2 %4091 }
 0xf3c   : > { %v4124_v51 = vmul.f32 %v4092_v30, %v8180_v8 }
 0xf3e   : > { %v4140_v43 = vadd.f32 1e-12, %v4124_v51 }
 0xf40   : > { %5966 = vrsqrt.f32 %v4140_v43  ;;  %vm4225_vm0 = vweird.f32 %v4140_v43 }
 0xf43   : > { %v4095_v45 = vpop.xlane.xlu2 %4094 }
 0xf44   : > { %v4125_v21 = vmul.f32 %v4095_v45, %v8180_v8 }
 0xf46   : > { %v5967_v29 = vpop.eup %5966  ;;  %v4141_v56 = vadd.f32 1e-12, %v4125_v21 }
 0xf47   : > { %v4220_v15 = vmul.f32 %v5967_v29, %v4140_v43  ;;  %vm4226_vm15 = vweird.f32 %v5967_v29 }
 0xf48   : > { %5968 = vrsqrt.f32 %v4141_v56  ;;  %vm4227_vm3 = vmor %vm4225_vm0, %vm4226_vm15  ;;  %vm4235_vm5 = vweird.f32 %v4141_v56 }
 0xf49   : > { %v4221_v49 = vmul.f32 %v5967_v29, %v4220_v15 }
 0xf4b   : > { %v4222_v47 = vmul.f32 0.5, %v4221_v49  ;;  %v4098_v17 = vpop.xlane.xlu0 %4097  ;;  %v4013_v36 = vpop.xlane.xlu2 %4012 }
 0xf4c   : > { %v4126_v19 = vmul.f32 %v4098_v17, %v8180_v8  ;;  %v4036_v62 = vmul.f32 %v8180_v8, %v4013_v36 }
 0xf4d   : > { %v4223_v63 = vsub.f32 1.5, %v4222_v47 }
 0xf4e   : > { %v5969_v61 = vpop.eup %5968  ;;  %v4142_v24 = vadd.f32 1e-12, %v4126_v19  ;;  %v8407_v7 = vsub.f32 %v8303_v40, %v4036_v62 }
 0xf4f   : > { %v4224_v13 = vmul.f32 %v5967_v29, %v4223_v63  ;;  %v4230_v16 = vmul.f32 %v5969_v61, %v4141_v56  ;;  %vm4236_vm4 = vweird.f32 %v5969_v61  ;;  %v8429_v56 = vld [vmem:[%s6281_s11 + $0x6] ss:$0 sm:$0xff] }
 0xf50   : > { %5970 = vrsqrt.f32 %v4142_v24  ;;  %v4068_v48 = vmul.f32 %v8407_v7, %v8407_v7  ;;  %vm4237_vm6 = vmor %vm4235_vm5, %vm4236_vm4  ;;  %vm4245_vm8 = vweird.f32 %v4142_v24 }
 0xf51   : > { %v4231_v5 = vmul.f32 %v5969_v61, %v4230_v16  ;;  %v4228_v31 = vsel %vm4227_vm3, %v5967_v29, %v4224_v13 }
 0xf52   : > { %v4114_v23 = vsel %vm592_vm1, %v4068_v48, 0.0  ;;  %v4316_v33 = vmul.f32 %v4228_v31, %v8283_v42 }
 0xf53   : > { %v4232_v40 = vmul.f32 0.5, %v4231_v5  ;;  %v4101_v20 = vpop.xlane.xlu0 %4100  ;;  %4115 = vadd.xlane.f32.xlu2 %v4114_v23 }
 0xf54   : > { %v4127_v50 = vmul.f32 %v4101_v20, %v8180_v8  ;;  %v4333_v10 = vmul.f32 %v8310_v3, %v4316_v33 }
 0xf55   : > { %v4233_v38 = vsub.f32 1.5, %v4232_v40 }
 0xf56   : > { %v5971_v28 = vpop.eup %5970  ;;  %v4143_v4 = vadd.f32 1e-12, %v4127_v50  ;;  %v8421_v12 = vadd.f32 %v8321_v18, %v4333_v10 }
 0xf57   : > { %v4234_v44 = vmul.f32 %v5969_v61, %v4233_v38  ;;  %v4240_v42 = vmul.f32 %v5971_v28, %v4142_v24  ;;  %vm4246_vm7 = vweird.f32 %v5971_v28 }
 0xf58   : > { %5972 = vrsqrt.f32 %v4143_v4  ;;  %v4362_v9 = vpack.c.bf16 %v8421_v12, %v8418_v60  ;;  %vm4247_vm2 = vmor %vm4245_vm8, %vm4246_vm7  ;;  %vm4255_vm11 = vweird.f32 %v4143_v4 }
 0xf59   : > { %v4241_v35 = vmul.f32 %v5971_v28, %v4240_v42  ;;  %v4238_v51 = vsel %vm4237_vm6, %v5969_v61, %v4234_v44 }
 0xf5a   : > { %5425 = vmatmul.msk.bf16.gmra.mxu0 %vm592_vm1, %v4362_v9  ;;  %v4317_v45 = vmul.f32 %v4238_v51, %v8293_v1 }
 0xf5b   : > { %v4242_v41 = vmul.f32 0.5, %v4241_v35  ;;  %v4104_v30 = vpop.xlane.xlu1 %4103 }
 0xf5c   : > { %v4128_v43 = vmul.f32 %v4104_v30, %v8180_v8  ;;  %v4418_v22 = vpop.f32.mrf.mxu0  ;;  %v4334_v49 = vmul.f32 %v8310_v3, %v4317_v45 }
 0xf5d   : > { %v4243_v55 = vsub.f32 1.5, %v4242_v41  ;;  %v4419_v17 = vadd.f32 %v8429_v56, %v4418_v22 }
 0xf5e   : > { %v5973_v58 = vpop.eup %5972  ;;  %v4144_v14 = vadd.f32 1e-12, %v4128_v43  ;;  %v8438_v27 = vadd.f32 %v8321_v18, %v4334_v49 }
 0xf5f   : > { %v4244_v21 = vmul.f32 %v5971_v28, %v4243_v55  ;;  %v4250_v29 = vmul.f32 %v5973_v58, %v4143_v4  ;;  %vm4256_vm9 = vweird.f32 %v5973_v58  ;;  %v4458_v48 = vmax.f32 %v4419_v17, 0.0 }
 0xf60   : > { %5974 = vrsqrt.f32 %v4144_v14  ;;  %vm4257_vm12 = vmor %vm4255_vm11, %vm4256_vm9  ;;  %vm4265_vm14 = vweird.f32 %v4144_v14 }
 0xf61   : > { %v4251_v57 = vmul.f32 %v5973_v58, %v4250_v29  ;;  %v4248_v0 = vsel %vm4247_vm2, %v5971_v28, %v4244_v21 }
 0xf62   : > { %v4318_v15 = vmul.f32 %v4248_v0, %v8306_v59 }
 0xf63   : > { %v4252_v47 = vmul.f32 0.5, %v4251_v57  ;;  %v4107_v36 = vpop.xlane.xlu2 %4106 }
 0xf64   : > { %v4129_v53 = vmul.f32 %v4107_v36, %v8180_v8  ;;  %v4420_v1 = vpop.f32.mrf.mxu0  ;;  %v4335_v19 = vmul.f32 %v8310_v3, %v4318_v15 }
 0xf65   : > { %v4253_v62 = vsub.f32 1.5, %v4252_v47  ;;  %v4421_v63 = vadd.f32 %v8429_v56, %v4420_v1 }
 0xf66   : > { %v5975_v61 = vpop.eup %5974  ;;  %v4145_v24 = vadd.f32 1e-12, %v4129_v53  ;;  %v8441_v59 = vadd.f32 %v8321_v18, %v4335_v19 }
 0xf67   : > { %v4254_v13 = vmul.f32 %v5973_v58, %v4253_v62  ;;  %v4260_v16 = vmul.f32 %v5975_v61, %v4144_v14  ;;  %v4459_v5 = vmax.f32 %v4421_v63, 0.0  ;;  %vm4266_vm13 = vweird.f32 %v5975_v61 }
 0xf68   : > { %5976 = vrsqrt.f32 %v4145_v24  ;;  %v4363_v31 = vpack.c.bf16 %v8441_v59, %v8438_v27  ;;  %vm4267_vm15 = vmor %vm4265_vm14, %vm4266_vm13  ;;  %vm4275_vm3 = vweird.f32 %v4145_v24 }
 0xf69   : > { %v4261_v23 = vmul.f32 %v5975_v61, %v4260_v16  ;;  %v4474_v33 = vpack.c.bf16 %v4459_v5, %v4458_v48  ;;  %v4258_v20 = vsel %vm4257_vm12, %v5973_v58, %v4254_v13 }
 0xf6a   : > { %5426 = vmatmul.msk.bf16.gmra.mxu0 %vm592_vm1, %v4363_v31  ;;  %v4319_v42 = vmul.f32 %v4258_v20, %v8327_v39 }
 0xf6b   : > { %v4262_v25 = vmul.f32 0.5, %v4261_v23  ;;  %5446 = vmatmul.msk.bf16.vlgmr.msrb.gmra.mxu1 %vm4516_vm10, %v4474_v33  ;;  %v4110_v40 = vpop.xlane.xlu0 %4109 }
 0xf6c   : > { %v4130_v50 = vmul.f32 %v4110_v40, %v8180_v8  ;;  %v4423_v10 = vpop.f32.mrf.mxu0  ;;  %v4336_v51 = vmul.f32 %v8310_v3, %v4319_v42 }
 0xf6d   : > { %v4263_v38 = vsub.f32 1.5, %v4262_v25  ;;  %v4424_v22 = vadd.f32 %v8429_v56, %v4423_v10 }
 0xf6e   : > { %v5977_v28 = vpop.eup %5976  ;;  %v4146_v44 = vadd.f32 1e-12, %v4130_v50  ;;  %v8455_v14 = vadd.f32 %v8321_v18, %v4336_v51 }
 0xf6f   : > { %v4264_v4 = vmul.f32 %v5975_v61, %v4263_v38  ;;  %v4270_v9 = vmul.f32 %v5977_v28, %v4145_v24  ;;  %vm4276_vm0 = vweird.f32 %v5977_v28  ;;  %v4460_v0 = vmax.f32 %v4424_v22, 0.0 }
 0xf70   : > { %5978 = vrsqrt.f32 %v4146_v44  ;;  %vm4277_vm4 = vmor %vm4275_vm3, %vm4276_vm0  ;;  %vm4285_vm6 = vweird.f32 %v4146_v44 }
 0xf71   : > { %v4271_v35 = vmul.f32 %v5977_v28, %v4270_v9  ;;  %v4268_v41 = vsel %vm4267_vm15, %v5975_v61, %v4264_v4 }
 0xf72   : > { %v4320_v30 = vmul.f32 %v4268_v41, %v8345_v32 }
 0xf73   : > { %v4272_v43 = vmul.f32 0.5, %v4271_v35  ;;  %v4113_v20 = vpop.xlane.xlu1 %4112 }
 0xf74   : > { %v4425_v55 = vpop.f32.mrf.mxu0  ;;  %v4337_v58 = vmul.f32 %v8310_v3, %v4320_v30  ;;  %v4131_v50 = vmul.f32 %v4113_v20, %v8180_v8 }
 0xf75   : > { %v4273_v45 = vsub.f32 1.5, %v4272_v43  ;;  %v4426_v39 = vadd.f32 %v8429_v56, %v4425_v55 }
 0xf76   : > { %v5979_v21 = vpop.eup %5978  ;;  %v8458_v29 = vadd.f32 %v8321_v18, %v4337_v58  ;;  %v4147_v10 = vadd.f32 1e-12, %v4131_v50 }
 0xf77   : > { %v4274_v32 = vmul.f32 %v5977_v28, %v4273_v45  ;;  %v4280_v57 = vmul.f32 %v5979_v21, %v4146_v44  ;;  %v4461_v15 = vmax.f32 %v4426_v39, 0.0  ;;  %vm4286_vm5 = vweird.f32 %v5979_v21 }
 0xf78   : > { %v4364_v49 = vpack.c.bf16 %v8458_v29, %v8455_v14  ;;  %vm4287_vm7 = vmor %vm4285_vm6, %vm4286_vm5  ;;  %5980 = vrsqrt.f32 %v4147_v10  ;;  %vm4295_vm2 = vweird.f32 %v4147_v10 }
 0xf79   : > { %v4281_v47 = vmul.f32 %v5979_v21, %v4280_v57  ;;  %v4475_v17 = vpack.c.bf16 %v4461_v15, %v4460_v0  ;;  %v4278_v53 = vsel %vm4277_vm4, %v5977_v28, %v4274_v32 }
 0xf7a   : > { %5427 = vmatmul.msk.bf16.gmra.mxu0 %vm592_vm1, %v4364_v49  ;;  %v4321_v62 = vmul.f32 %v4278_v53, %v8356_v26 }
 0xf7b   : > { %v4282_v36 = vmul.f32 0.5, %v4281_v47  ;;  %5447 = vmatmul.msk.bf16.gmra.mxu1 %vm4516_vm10, %v4475_v17 }
 0xf7c   : > { %v4428_v1 = vpop.f32.mrf.mxu0  ;;  %v4338_v13 = vmul.f32 %v8310_v3, %v4321_v62 }
 0xf7d   : > { %v4283_v19 = vsub.f32 1.5, %v4282_v36  ;;  %v4429_v16 = vadd.f32 %v8429_v56, %v4428_v1 }
 0xf7e   : > { %v8471_v23 = vadd.f32 %v8321_v18, %v4338_v13  ;;  %v5981_v38 = vpop.eup %5980 }
 0xf7f   : > { %v4284_v63 = vmul.f32 %v5979_v21, %v4283_v19  ;;  %v4462_v33 = vmax.f32 %v4429_v16, 0.0  ;;  %v4290_v28 = vmul.f32 %v5981_v38, %v4147_v10  ;;  %vm4296_vm8 = vweird.f32 %v5981_v38 }
 0xf80   : > { %vm4297_vm9 = vmor %vm4295_vm2, %vm4296_vm8 }
 0xf81   : > { %v4288_v61 = vsel %vm4287_vm7, %v5979_v21, %v4284_v63  ;;  %v4291_v44 = vmul.f32 %v5981_v38, %v4290_v28  ;;  %v8498_v63 = vld [vmem:[%s6281_s11 + $0x7] ss:$0 sm:$0xff] }
 0xf82   : > { %v4322_v24 = vmul.f32 %v4288_v61, %v8372_v46 }
 0xf83   : > { %v4292_v35 = vmul.f32 0.5, %v4291_v44 }
 0xf84   : > { %v4430_v48 = vpop.f32.mrf.mxu0  ;;  %v4339_v5 = vmul.f32 %v8310_v3, %v4322_v24 }
 0xf85   : > { %v4431_v31 = vadd.f32 %v8429_v56, %v4430_v48  ;;  %v4293_v41 = vsub.f32 1.5, %v4292_v35 }
 0xf86   : > { %v8474_v26 = vadd.f32 %v8321_v18, %v4339_v5 }
 0xf87   : > { %v4463_v25 = vmax.f32 %v4431_v31, 0.0  ;;  %v4294_v51 = vmul.f32 %v5981_v38, %v4293_v41 }
 0xf88   : > { %v4365_v46 = vpack.c.bf16 %v8474_v26, %v8471_v23 }
 0xf89   : > { %v4476_v40 = vpack.c.bf16 %v4463_v25, %v4462_v33  ;;  %v4298_v58 = vsel %vm4297_vm9, %v5981_v38, %v4294_v51 }
 0xf8a   : > { %5428 = vmatmul.msk.bf16.gmra.mxu0 %vm592_vm1, %v4365_v46  ;;  %v4323_v21 = vmul.f32 %v4298_v58, %v8383_v11 }
 0xf8b   : > { %5448 = vmatmul.msk.bf16.gmra.mxu1 %vm4516_vm10, %v4476_v40 }
 0xf8c   : > { %v4340_v15 = vmul.f32 %v8310_v3, %v4323_v21 }
 0xf8e   : > { %v8489_v53 = vadd.f32 %v8321_v18, %v4340_v15 }
 0xfc6   : > { %v4116_v42 = vpop.xlane.xlu2 %4115 }
 0xfc7   : > { %v4132_v4 = vmul.f32 %v4116_v42, %v8180_v8 }
 0xfc9   : > { %v4148_v9 = vadd.f32 1e-12, %v4132_v4 }
 0xfcb   : > { %5982 = vrsqrt.f32 %v4148_v9  ;;  %vm4305_vm12 = vweird.f32 %v4148_v9 }
 0xfd1   : > { %v5983_v30 = vpop.eup %5982 }
 0xfd2   : > { %v4300_v43 = vmul.f32 %v5983_v30, %v4148_v9  ;;  %vm4306_vm11 = vweird.f32 %v5983_v30 }
 0xfd3   : > { %vm4307_vm13 = vmor %vm4305_vm12, %vm4306_vm11 }
 0xfd4   : > { %v4301_v22 = vmul.f32 %v5983_v30, %v4300_v43 }
 0xfd6   : > { %v4302_v55 = vmul.f32 0.5, %v4301_v22 }
 0xfd7   : > { %v4433_v45 = vpop.f32.mrf.mxu0 }
 0xfd8   : > { %v4303_v39 = vsub.f32 1.5, %v4302_v55  ;;  %v4434_v49 = vadd.f32 %v8429_v56, %v4433_v45 }
 0xfda   : > { %v4304_v32 = vmul.f32 %v5983_v30, %v4303_v39  ;;  %v4464_v1 = vmax.f32 %v4434_v49, 0.0 }
 0xfdc   : > { %v4308_v57 = vsel %vm4307_vm13, %v5983_v30, %v4304_v32 }
 0xfdd   : > { %v4324_v0 = vmul.f32 %v4308_v57, %v8407_v7 }
 0xfdf   : > { %v4435_v47 = vpop.f32.mrf.mxu0  ;;  %v4341_v17 = vmul.f32 %v8310_v3, %v4324_v0 }
 0xfe0   : > { %v4436_v36 = vadd.f32 %v8429_v56, %v4435_v47 }
 0xfe1   : > { %v8492_v11 = vadd.f32 %v8321_v18, %v4341_v17 }
 0xfe2   : > { %v4465_v19 = vmax.f32 %v4436_v36, 0.0 }
 0xfe3   : > { %v4366_v7 = vpack.c.bf16 %v8492_v11, %v8489_v53 }
 0xfe4   : > { %v4477_v62 = vpack.c.bf16 %v4465_v19, %v4464_v1 }
 0xfe5   : > { %5429 = vmatmul.msk.bf16.gmra.mxu0 %vm592_vm1, %v4366_v7 }
 0xfe6   : > { %5449 = vmatmul.msk.bf16.gmra.mxu1 %vm4516_vm10, %v4477_v62 }
 0xfe7   : > { %v4438_v3 = vpop.f32.mrf.mxu0 }
 0xfe8   : > { %v4550_v61 = vpop.f32.mrf.mxu1  ;;  %v4439_v16 = vadd.f32 %v8429_v56, %v4438_v3 }
 0xfe9   : > { %v4551_v24 = vadd.f32 %v8498_v63, %v4550_v61 }
 0xfea   : > { %v4466_v25 = vmax.f32 %v4439_v16, 0.0 }
 0xfeb   : > { %v8503_v13 = vadd.f32 %v4551_v24, %v8330_v34 }
 0xfed   : > { %v4608_v18 = vsel %vm592_vm1, %v8503_v13, 0.0 }
 0xfee   : > { %4609 = vadd.xlane.f32.xlu0 %v4608_v18 }
 0xfef   : > { %v4440_v48 = vpop.f32.mrf.mxu0 }
 0xff0   : > { %v4441_v5 = vadd.f32 %v8429_v56, %v4440_v48  ;;  %v4552_v31 = vpop.f32.mrf.mxu1 }
 0xff1   : > { %v4553_v33 = vadd.f32 %v8498_v63, %v4552_v31 }
 0xff2   : > { %v4467_v46 = vmax.f32 %v4441_v5, 0.0 }
 0xff3   : > { %v8511_v40 = vadd.f32 %v4553_v33, %v8333_v54 }
 0xff4   : > { %v4478_v20 = vpack.c.bf16 %v4467_v46, %v4466_v25 }
 0xff5   : > { %v4611_v34 = vsel %vm592_vm1, %v8511_v40, 0.0 }
 0xff6   : > { %5450 = vmatmul.msk.bf16.gmra.mxu1 %vm4516_vm10, %v4478_v20  ;;  %4612 = vadd.xlane.f32.xlu1 %v4611_v34 }
 0xff7   : > { %v4443_v50 = vpop.f32.mrf.mxu0 }
 0xff8   : > { %v4555_v10 = vpop.f32.mrf.mxu1  ;;  %v4444_v54 = vadd.f32 %v8429_v56, %v4443_v50 }
 0xff9   : > { %v4556_v38 = vadd.f32 %v8498_v63, %v4555_v10 }
 0xffa   : > { %v4468_v41 = vmax.f32 %v4444_v54, 0.0 }
 0xffb   : > { %v8518_v28 = vadd.f32 %v4556_v38, %v8359_v37 }
 0xffd   : > { %v4614_v44 = vsel %vm592_vm1, %v8518_v28, 0.0 }
 0xffe   : > { %4615 = vadd.xlane.f32.xlu2 %v4614_v44 }
 0xfff   : > { %v4445_v42 = vpop.f32.mrf.mxu0 }
0x1000   : > { %v4446_v4 = vadd.f32 %v8429_v56, %v4445_v42  ;;  %v4557_v9 = vpop.f32.mrf.mxu1 }
0x1001   : > { %v4558_v35 = vadd.f32 %v8498_v63, %v4557_v9 }
0x1002   : > { %v4469_v30 = vmax.f32 %v4446_v4, 0.0 }
0x1003   : > { %v8526_v51 = vadd.f32 %v4558_v35, %v8362_v2 }
0x1004   : > { %v4479_v43 = vpack.c.bf16 %v4469_v30, %v4468_v41 }
0x1005   : > { %v4617_v37 = vsel %vm592_vm1, %v8526_v51, 0.0 }
0x1006   : > { %4618 = vadd.xlane.f32.xlu0 %v4617_v37  ;;  %5451 = vmatmul.msk.bf16.gmra.mxu1 %vm4516_vm10, %v4479_v43 }
0x1007   : > { %v4448_v22 = vpop.f32.mrf.mxu0 }
0x1008   : > { %v4560_v55 = vpop.f32.mrf.mxu1  ;;  %v4449_v2 = vadd.f32 %v8429_v56, %v4448_v22 }
0x1009   : > { %v4561_v58 = vadd.f32 %v8498_v63, %v4560_v55 }
0x100a   : > { %v4470_v15 = vmax.f32 %v4449_v2, 0.0 }
0x100b   : > { %v8533_v45 = vadd.f32 %v4561_v58, %v8386_v6 }
0x100d   : > { %v4620_v39 = vsel %vm592_vm1, %v8533_v45, 0.0 }
0x100e   : > { %4621 = vadd.xlane.f32.xlu1 %v4620_v39 }
0x100f   : > { %v4450_v21 = vpop.f32.mrf.mxu0 }
0x1010   : > { %v4451_v32 = vadd.f32 %v8429_v56, %v4450_v21  ;;  %v4562_v57 = vpop.f32.mrf.mxu1 }
0x1011   : > { %v4563_v0 = vadd.f32 %v8498_v63, %v4562_v57 }
0x1012   : > { %v4471_v49 = vmax.f32 %v4451_v32, 0.0 }
0x1013   : > { %v8541_v47 = vadd.f32 %v4563_v0, %v8389_v52 }
0x1014   : > { %v4480_v17 = vpack.c.bf16 %v4471_v49, %v4470_v15 }
0x1015   : > { %v4623_v6 = vsel %vm592_vm1, %v8541_v47, 0.0 }
0x1016   : > { %4624 = vadd.xlane.f32.xlu2 %v4623_v6  ;;  %5452 = vmatmul.msk.bf16.gmra.mxu1 %vm4516_vm10, %v4480_v17 }
0x1061   : > { %v4610_v30 = vpop.xlane.xlu0 %4609 }
0x1062   : > { %v4453_v36 = vpop.f32.mrf.mxu0  ;;  %v4656_v37 = vmul.f32 %v4610_v30, %v8180_v8 }
0x1063   : > { %v4565_v1 = vpop.f32.mrf.mxu1  ;;  %v4454_v3 = vadd.f32 %v8429_v56, %v4453_v36 }
0x1064   : > { %v4566_v19 = vadd.f32 %v8498_v63, %v4565_v1  ;;  %v8591_v55 = vsub.f32 %v8503_v13, %v4656_v37 }
0x1065   : > { %v4472_v16 = vmax.f32 %v4454_v3, 0.0 }
0x1066   : > { %v4596_v7 = vadd.f32 %v4566_v19, %v8418_v60  ;;  %v4688_v2 = vmul.f32 %v8591_v55, %v8591_v55 }
0x1068   : > { %v4626_v62 = vsel %vm592_vm1, %v4596_v7, 0.0  ;;  %v4704_v32 = vsel %vm592_vm1, %v4688_v2, 0.0 }
0x1069   : > { %4627 = vadd.xlane.f32.xlu0 %v4626_v62  ;;  %v4613_v17 = vpop.xlane.xlu1 %4612 }
0x106a   : > { %v4455_v52 = vpop.f32.mrf.mxu0  ;;  %v4657_v1 = vmul.f32 %v4613_v17, %v8180_v8 }
0x106b   : > { %v4456_v61 = vadd.f32 %v8429_v56, %v4455_v52  ;;  %v4567_v24 = vpop.f32.mrf.mxu1 }
0x106c   : > { %v4568_v18 = vadd.f32 %v8498_v63, %v4567_v24 }
0x106d   : > { %v4473_v48 = vmax.f32 %v4456_v61, 0.0 }
0x106e   : > { %v8553_v5 = vadd.f32 %v4568_v18, %v8421_v12 }
0x106f   : > { %v4481_v31 = vpack.c.bf16 %v4473_v48, %v4472_v16 }
0x1070   : > { %v4629_v60 = vsel %vm592_vm1, %v8553_v5, 0.0 }
0x1071   : > { %4630 = vadd.xlane.f32.xlu1 %v4629_v60  ;;  %5453 = vmatmul.msk.bf16.gmra.mxu1 %vm4516_vm10, %v4481_v31  ;;  %v4616_v3 = vpop.xlane.xlu2 %4615 }
0x1072   : > { %v4658_v16 = vmul.f32 %v4616_v3, %v8180_v8 }
0x1073   : > { %v4570_v33 = vpop.f32.mrf.mxu1 }
0x1074   : > { %v4571_v25 = vadd.f32 %v8498_v63, %v4570_v33 }
0x1076   : > { %v8560_v56 = vadd.f32 %v4571_v25, %v8438_v27  ;;  %v8635_v25 = vsub.f32 %v8518_v28, %v4658_v16 }
0x1078   : > { %v4632_v46 = vsel %vm592_vm1, %v8560_v56, 0.0  ;;  %v4690_v28 = vmul.f32 %v8635_v25, %v8635_v25 }
0x1079   : > { %4633 = vadd.xlane.f32.xlu2 %v4632_v46  ;;  %v4619_v58 = vpop.xlane.xlu0 %4618 }
0x107a   : > { %v4659_v39 = vmul.f32 %v4619_v58, %v8180_v8 }
0x107b   : > { %v4572_v20 = vpop.f32.mrf.mxu1 }
0x107c   : > { %v4573_v12 = vadd.f32 %v8498_v63, %v4572_v20  ;;  %v8599_v21 = vsub.f32 %v8526_v51, %v4659_v39 }
0x107e   : > { %v4599_v34 = vadd.f32 %v4573_v12, %v8441_v59 }
0x1080   : > { %v4635_v50 = vsel %vm592_vm1, %v4599_v34, 0.0 }
0x1081   : > { %4636 = vadd.xlane.f32.xlu0 %v4635_v50  ;;  %v4622_v61 = vpop.xlane.xlu1 %4621 }
0x1082   : > { %v4660_v31 = vmul.f32 %v4622_v61, %v8180_v8 }
0x1083   : > { %v4575_v10 = vpop.f32.mrf.mxu1 }
0x1084   : > { %v4576_v38 = vadd.f32 %v8498_v63, %v4575_v10 }
0x1086   : > { %v8569_v44 = vadd.f32 %v4576_v38, %v8455_v14 }
0x1088   : > { %v4638_v27 = vsel %vm592_vm1, %v8569_v44, 0.0 }
0x1089   : > { %4639 = vadd.xlane.f32.xlu1 %v4638_v27  ;;  %v4625_v12 = vpop.xlane.xlu2 %4624  ;;  %v4710_v27 = vsel %vm592_vm1, %v4690_v28, 0.0 }
0x108b   : > { %v4577_v54 = vpop.f32.mrf.mxu1 }
0x108c   : > { %v4578_v42 = vadd.f32 %v8498_v63, %v4577_v54 }
0x108e   : > { %v8575_v4 = vadd.f32 %v4578_v42, %v8458_v29 }
0x1090   : > { %v4641_v59 = vsel %vm592_vm1, %v8575_v4, 0.0 }
0x1091   : > { %4642 = vadd.xlane.f32.xlu2 %v4641_v59 }
0x1093   : > { %v4580_v9 = vpop.f32.mrf.mxu1 }
0x1094   : > { %v4581_v35 = vadd.f32 %v8498_v63, %v4580_v9 }
0x1096   : > { %v8581_v14 = vadd.f32 %v4581_v35, %v8471_v23 }
0x1098   : > { %v4644_v41 = vsel %vm592_vm1, %v8581_v14, 0.0 }
0x1099   : > { %4645 = vadd.xlane.f32.xlu0 %v4644_v41 }
0x109b   : > { %v4582_v43 = vpop.f32.mrf.mxu1 }
0x109c   : > { %v4583_v29 = vadd.f32 %v8498_v63, %v4582_v43 }
0x109e   : > { %v8588_v22 = vadd.f32 %v4583_v29, %v8474_v26  ;;  %v4691_v26 = vmul.f32 %v8599_v21, %v8599_v21 }
0x10a0   : > { %v4647_v23 = vsel %vm592_vm1, %v8588_v22, 0.0  ;;  %v4713_v13 = vsel %vm592_vm1, %v4691_v26, 0.0 }
0x10a1   : > { %4648 = vadd.xlane.f32.xlu1 %v4647_v23 }
0x10a9   : > { %4705 = vadd.xlane.f32.xlu1 %v4704_v32 }
0x10b1   : > { %4714 = vadd.xlane.f32.xlu1 %v4713_v13 }
0x10dc   : > { %v4628_v57 = vpop.xlane.xlu0 %4627 }
0x10dd   : > { %v4662_v0 = vmul.f32 %v4628_v57, %v8180_v8 }
0x10df   : > { %v8606_v15 = vsub.f32 %v4596_v7, %v4662_v0  ;;  %v8619_v7 = vsub.f32 %v8511_v40, %v4657_v1 }
0x10e1   : > { %v4694_v49 = vmul.f32 %v8606_v15, %v8606_v15  ;;  %v4689_v60 = vmul.f32 %v8619_v7, %v8619_v7 }
0x10e3   : > { %v4722_v51 = vsel %vm592_vm1, %v4694_v49, 0.0 }
0x10e4   : > { %4723 = vadd.xlane.f32.xlu1 %v4722_v51  ;;  %v4631_v50 = vpop.xlane.xlu1 %4630 }
0x10e5   : > { %v4663_v10 = vmul.f32 %v4631_v50, %v8180_v8 }
0x10e7   : > { %v8655_v54 = vsub.f32 %v8553_v5, %v4663_v10 }
0x10ec   : > { %v4634_v42 = vpop.xlane.xlu2 %4633 }
0x10ed   : > { %v4664_v35 = vmul.f32 %v4634_v42, %v8180_v8 }
0x10ee   : > { %v4585_v6 = vpop.f32.mrf.mxu1 }
0x10ef   : > { %v4586_v36 = vadd.f32 %v8498_v63, %v4585_v6  ;;  %v8665_v43 = vsub.f32 %v8560_v56, %v4664_v35 }
0x10f1   : > { %v8614_v19 = vadd.f32 %v4586_v36, %v8489_v53  ;;  %v4696_v56 = vmul.f32 %v8665_v43, %v8665_v43 }
0x10f3   : > { %v4650_v62 = vsel %vm592_vm1, %v8614_v19, 0.0  ;;  %v4728_v0 = vsel %vm592_vm1, %v4696_v56, 0.0 }
0x10f4   : > { %v4637_v52 = vpop.xlane.xlu0 %4636  ;;  %4651 = vadd.xlane.f32.xlu2 %v4650_v62 }
0x10f5   : > { %v4665_v24 = vmul.f32 %v4637_v52, %v8180_v8 }
0x10f6   : > { %v4587_v18 = vpop.f32.mrf.mxu1 }
0x10f7   : > { %v8623_v48 = vsub.f32 %v4599_v34, %v4665_v24  ;;  %v4588_v53 = vadd.f32 %v8498_v63, %v4587_v18  ;;  %v8641_v63 = vsub.f32 %v8533_v45, %v4660_v31  ;;  %v4707_v34 = vsel %vm592_vm1, %v4689_v60, 0.0 }
0x10f9   : > { %v4697_v40 = vmul.f32 %v8623_v48, %v8623_v48  ;;  %v8632_v33 = vadd.f32 %v4588_v53, %v8492_v11  ;;  %v4661_v11 = vmul.f32 %v4625_v12, %v8180_v8  ;;  %v4692_v38 = vmul.f32 %v8641_v63, %v8641_v63  ;;  %v8702_v12 = vld [vmem:[%s6281_s11 + $0x8] ss:$0 sm:$0xff] }
0x10fb   : > { %v4731_v46 = vsel %vm592_vm1, %v4697_v40, 0.0  ;;  %v4653_v20 = vsel %vm592_vm1, %v8632_v33, 0.0  ;;  %v8651_v45 = vsub.f32 %v8541_v47, %v4661_v11  ;;  %v4716_v59 = vsel %vm592_vm1, %v4692_v38, 0.0  ;;  %v8705_v11 = vld [vmem:[%s6281_s11 + $0x9] ss:$0 sm:$0xff]  ;;  %s5050_s11 = scalar_lea.hbm %s8977_s9, %s5478_s10 }
0x10fc   : > { %4732 = vadd.xlane.f32.xlu1 %v4731_v46  ;;  %4654 = vadd.xlane.f32.xlu0 %v4653_v20  ;;  %v4640_v9 = vpop.xlane.xlu1 %4639  ;;  %v4695_v47 = vmul.f32 %v8655_v54, %v8655_v54  ;;  %s5053_s21 = sshll.u32 %s5050_s11, 4  ;;  %s5054_s21 = int_to_ptr.hbm [resolvable:$true] %s5053_s21 }
0x10fd   : > { %4708 = vadd.xlane.f32.xlu2 %v4707_v34  ;;  %v4693_v41 = vmul.f32 %v8651_v45, %v8651_v45  ;;  %v4666_v30 = vmul.f32 %v4640_v9, %v8180_v8  ;;  %s6030_s3 = sshra.s32 %s5054_s21, 4  ;;  %s6031_s3 = int_to_ptr.hbm [resolvable:$true] %s6030_s3 }
0x10fe   : > { %v4725_v58 = vsel %vm592_vm1, %v4695_v47, 0.0  ;;  %s6032_s26 = scalar_lea.hbm %s6031_s3, 512  ;;  %p6037_p6 = scmp.lt.s32.totalorder %s6031_s3, %s8977_s9 }
0x10ff   : > { %v4719_v5 = vsel %vm592_vm1, %v4693_v41, 0.0  ;;  %v8669_v37 = vsub.f32 %v8569_v44, %v4666_v30  ;;  %p6033_p2 = scmp.ne.s32.totalorder %s6031_s3, %s6032_s26  ;;  %p6038_p7 = scmp.lt.s32.totalorder %s6036_s15, %s6032_s26 }
0x1101   : > { %v4698_v44 = vmul.f32 %v8669_v37, %v8669_v37  ;;  %p6034_p4 = pnand %p6033_p2, %p6219_p3  ;;  %p6039_p8 = por %p6038_p7, %p6037_p6 }
0x1103   : > { %p6035_p5 = pneg %p6034_p4 }
0x1104   : > { %4711 = vadd.xlane.f32.xlu0 %v4710_v27  ;;  %v4643_v29 = vpop.xlane.xlu2 %4642 }
0x1105   : > { %4717 = vadd.xlane.f32.xlu2 %v4716_v59  ;;  %v4667_v2 = vmul.f32 %v4643_v29, %v8180_v8  ;;  %p6040_p10 = pnand %p6039_p8, %p6035_p5 }
0x1107   : > { %v8684_v13 = vsub.f32 %v8575_v4, %v4667_v2 }
0x1109   : > { %v4699_v6 = vmul.f32 %v8684_v13, %v8684_v13 }
0x110b   : > { %v4737_v36 = vsel %vm592_vm1, %v4699_v6, 0.0 }
0x110c   : > { %v4646_v23 = vpop.xlane.xlu0 %4645  ;;  %4720 = vadd.xlane.f32.xlu0 %v4719_v5 }
0x110d   : > { %v4668_v39 = vmul.f32 %v4646_v23, %v8180_v8  ;;  %4726 = vadd.xlane.f32.xlu2 %v4725_v58 }
0x110f   : > { %v8675_v32 = vsub.f32 %v8581_v14, %v4668_v39  ;;  %v4734_v14 = vsel %vm592_vm1, %v4698_v44, 0.0 }
0x1111   : > { %v4700_v26 = vmul.f32 %v8675_v32, %v8675_v32 }
0x1113   : > { %v4740_v57 = vsel %vm592_vm1, %v4700_v26, 0.0 }
0x1114   : > { %4741 = vadd.xlane.f32.xlu1 %v4740_v57  ;;  %4729 = vadd.xlane.f32.xlu0 %v4728_v0  ;;  %v4649_v49 = vpop.xlane.xlu1 %4648 }
0x1115   : > { %4735 = vadd.xlane.f32.xlu2 %v4734_v14  ;;  %v4669_v51 = vmul.f32 %v4649_v49, %v8180_v8 }
0x1117   : > { %v8691_v17 = vsub.f32 %v8588_v22, %v4669_v51 }
0x1119   : > { %v4701_v4 = vmul.f32 %v8691_v17, %v8691_v17 }
0x111b   : > { %v4743_v1 = vsel %vm592_vm1, %v4701_v4, 0.0 }
0x111c   : > { %4738 = vadd.xlane.f32.xlu0 %v4737_v36  ;;  %v4706_v62 = vpop.xlane.xlu1 %4705 }
0x111d   : > { %4744 = vadd.xlane.f32.xlu2 %v4743_v1  ;;  %v4752_v3 = vmul.f32 %v4706_v62, %v8180_v8 }
0x111f   : > { %v4768_v52 = vadd.f32 1e-12, %v4752_v3 }
0x1121   : > { %5984 = vrsqrt.f32 %v4768_v52  ;;  %vm4790_vm14 = vweird.f32 %v4768_v52 }
0x1124   : > { %v4715_v22 = vpop.xlane.xlu1 %4714 }
0x1125   : > { %v4755_v61 = vmul.f32 %v4715_v22, %v8180_v8 }
0x1127   : > { %v5985_v24 = vpop.eup %5984  ;;  %v4771_v18 = vadd.f32 1e-12, %v4755_v61 }
0x1128   : > { %v4785_v16 = vmul.f32 %v5985_v24, %v4768_v52  ;;  %vm4791_vm10 = vweird.f32 %v5985_v24 }
0x1129   : > { %5986 = vrsqrt.f32 %v4771_v18  ;;  %vm4792_vm15 = vmor %vm4790_vm14, %vm4791_vm10  ;;  %vm4820_vm3 = vweird.f32 %v4771_v18 }
0x112a   : > { %v4786_v53 = vmul.f32 %v5985_v24, %v4785_v16 }
0x112c   : > { %v4787_v31 = vmul.f32 0.5, %v4786_v53 }
0x112e   : > { %v4788_v60 = vsub.f32 1.5, %v4787_v31 }
0x112f   : > { %v5987_v40 = vpop.eup %5986 }
0x1130   : > { %v4789_v46 = vmul.f32 %v5985_v24, %v4788_v60  ;;  %v4815_v20 = vmul.f32 %v5987_v40, %v4771_v18  ;;  %vm4821_vm0 = vweird.f32 %v5987_v40 }
0x1131   : > { %vm4822_vm4 = vmor %vm4820_vm3, %vm4821_vm0 }
0x1132   : > { %v4793_v34 = vsel %vm4792_vm15, %v5985_v24, %v4789_v46  ;;  %v4816_v50 = vmul.f32 %v5987_v40, %v4815_v20 }
0x1133   : > { %v4944_v28 = vmul.f32 %v4793_v34, %v8591_v55 }
0x1134   : > { %v4817_v10 = vmul.f32 0.5, %v4816_v50 }
0x1135   : > { %v4961_v38 = vmul.f32 %v8702_v12, %v4944_v28 }
0x1136   : > { %v4818_v27 = vsub.f32 1.5, %v4817_v10 }
0x1137   : > { %v4978_v42 = vadd.f32 %v8705_v11, %v4961_v38 }
0x1138   : > { %v4819_v59 = vmul.f32 %v5987_v40, %v4818_v27 }
0x1139   : > { %4994 = vst.msk [vmem:[#allocation2] sm:$0xff] %vm592_vm1, %v4978_v42 }
0x113a   : > { %5010 = vst.msk [vmem:[%s6287_s4] sm:$0xff] %vm592_vm1, %v4978_v42  ;;  %v4823_v9 = vsel %vm4822_vm4, %v5987_v40, %v4819_v59 }
0x113b   : > { %v4947_v35 = vmul.f32 %v4823_v9, %v8599_v21 }
0x113d   : > { %v4964_v55 = vmul.f32 %v8702_v12, %v4947_v35 }
0x113f   : > { %v4981_v41 = vadd.f32 %v8705_v11, %v4964_v55 }
0x1141   : > { %4997 = vst.msk [vmem:[#allocation2 + $0x18] sm:$0xff] %vm592_vm1, %v4981_v41 }
0x1142   : > { %5013 = vst.msk [vmem:[%s6287_s4 + $0x18] sm:$0xff] %vm592_vm1, %v4981_v41 }
0x1157   : > { %v4724_v30 = vpop.xlane.xlu1 %4723 }
0x1158   : > { %v4758_v47 = vmul.f32 %v4724_v30, %v8180_v8 }
0x115a   : > { %v4774_v5 = vadd.f32 1e-12, %v4758_v47 }
0x115c   : > { %5988 = vrsqrt.f32 %v4774_v5  ;;  %vm4850_vm6 = vweird.f32 %v4774_v5 }
0x1162   : > { %v5989_v29 = vpop.eup %5988 }
0x1163   : > { %v4845_v23 = vmul.f32 %v5989_v29, %v4774_v5  ;;  %vm4851_vm5 = vweird.f32 %v5989_v29 }
0x1164   : > { %vm4852_vm7 = vmor %vm4850_vm6, %vm4851_vm5 }
0x1165   : > { %v4846_v58 = vmul.f32 %v5989_v29, %v4845_v23 }
0x1167   : > { %v4847_v39 = vmul.f32 0.5, %v4846_v58  ;;  %v4652_v2 = vpop.xlane.xlu2 %4651 }
0x1168   : > { %v4670_v21 = vmul.f32 %v4652_v2, %v8180_v8 }
0x1169   : > { %v4848_v56 = vsub.f32 1.5, %v4847_v39 }
0x116a   : > { %v8722_v44 = vsub.f32 %v8614_v19, %v4670_v21 }
0x116b   : > { %v4849_v26 = vmul.f32 %v5989_v29, %v4848_v56 }
0x116c   : > { %v4702_v57 = vmul.f32 %v8722_v44, %v8722_v44 }
0x116d   : > { %v4853_v0 = vsel %vm4852_vm7, %v5989_v29, %v4849_v26 }
0x116e   : > { %v4950_v14 = vmul.f32 %v4853_v0, %v8606_v15  ;;  %v4746_v49 = vsel %vm592_vm1, %v4702_v57, 0.0 }
0x116f   : > { %v4655_v51 = vpop.xlane.xlu0 %4654  ;;  %4747 = vadd.xlane.f32.xlu0 %v4746_v49  ;;  %v4733_v6 = vpop.xlane.xlu1 %4732 }
0x1170   : > { %v4967_v4 = vmul.f32 %v8702_v12, %v4950_v14  ;;  %v4671_v19 = vmul.f32 %v4655_v51, %v8180_v8  ;;  %v4709_v36 = vpop.xlane.xlu2 %4708  ;;  %v4761_v1 = vmul.f32 %v4733_v6, %v8180_v8 }
0x1171   : > { %v4753_v62 = vmul.f32 %v4709_v36, %v8180_v8 }
0x1172   : > { %v4984_v3 = vadd.f32 %v8705_v11, %v4967_v4  ;;  %v8734_v52 = vsub.f32 %v8632_v33, %v4671_v19  ;;  %v4777_v15 = vadd.f32 1e-12, %v4761_v1 }
0x1173   : > { %v4769_v22 = vadd.f32 1e-12, %v4753_v62 }
0x1174   : > { %5000 = vst.msk [vmem:[#allocation2 + $0x30] sm:$0xff] %vm592_vm1, %v4984_v3  ;;  %5990 = vrsqrt.f32 %v4777_v15  ;;  %v4703_v61 = vmul.f32 %v8734_v52, %v8734_v52  ;;  %vm4880_vm9 = vweird.f32 %v4777_v15 }
0x1175   : > { %5016 = vst.msk [vmem:[%s6287_s4 + $0x30] sm:$0xff] %vm592_vm1, %v4984_v3  ;;  %5992 = vrsqrt.f32 %v4769_v22  ;;  %vm4800_vm11 = vweird.f32 %v4769_v22 }
0x1176   : > { %v4749_v24 = vsel %vm592_vm1, %v4703_v61, 0.0 }
0x1177   : > { %4750 = vadd.xlane.f32.xlu1 %v4749_v24  ;;  %v4712_v18 = vpop.xlane.xlu0 %4711 }
0x1178   : > { %v4754_v16 = vmul.f32 %v4712_v18, %v8180_v8  ;;  %v4718_v53 = vpop.xlane.xlu2 %4717 }
0x1179   : > { %v4756_v33 = vmul.f32 %v4718_v53, %v8180_v8 }
0x117a   : > { %v5991_v31 = vpop.eup %5990  ;;  %v8744_v60 = vadd.f32 1e-12, %v4754_v16 }
0x117b   : > { %v5993_v40 = vpop.eup %5992  ;;  %v4875_v46 = vmul.f32 %v5991_v31, %v4777_v15  ;;  %v8746_v20 = vadd.f32 1e-12, %v4756_v33  ;;  %vm4881_vm8 = vweird.f32 %v5991_v31 }
0x117c   : > { %v4795_v34 = vmul.f32 %v5993_v40, %v4769_v22  ;;  %5994 = vrsqrt.f32 %v8744_v60  ;;  %vm4801_vm2 = vweird.f32 %v5993_v40  ;;  %vm4882_vm12 = vmor %vm4880_vm9, %vm4881_vm8  ;;  %vm4810_vm15 = vweird.f32 %v8744_v60 }
0x117d   : > { %v4876_v50 = vmul.f32 %v5991_v31, %v4875_v46  ;;  %5996 = vrsqrt.f32 %v8746_v20  ;;  %vm4802_vm13 = vmor %vm4800_vm11, %vm4801_vm2  ;;  %vm4830_vm3 = vweird.f32 %v8746_v20 }
0x117e   : > { %v4796_v28 = vmul.f32 %v5993_v40, %v4795_v34 }
0x117f   : > { %v4877_v10 = vmul.f32 0.5, %v4876_v50  ;;  %v4721_v38 = vpop.xlane.xlu0 %4720 }
0x1180   : > { %v4797_v27 = vmul.f32 0.5, %v4796_v28  ;;  %v4757_v42 = vmul.f32 %v4721_v38, %v8180_v8  ;;  %v4727_v59 = vpop.xlane.xlu2 %4726 }
0x1181   : > { %v4878_v9 = vsub.f32 1.5, %v4877_v10  ;;  %v4759_v35 = vmul.f32 %v4727_v59, %v8180_v8 }
0x1182   : > { %v8752_v55 = vpop.eup %5994  ;;  %v4798_v41 = vsub.f32 1.5, %v4797_v27  ;;  %v8754_v30 = vadd.f32 1e-12, %v4757_v42 }
0x1183   : > { %v8756_v47 = vpop.eup %5996  ;;  %v4879_v5 = vmul.f32 %v5991_v31, %v4878_v9  ;;  %v4805_v29 = vmul.f32 %v8752_v55, %v8744_v60  ;;  %v8760_v23 = vadd.f32 1e-12, %v4759_v35  ;;  %vm4811_vm10 = vweird.f32 %v8752_v55 }
0x1184   : > { %v4799_v58 = vmul.f32 %v5993_v40, %v4798_v41  ;;  %v4825_v39 = vmul.f32 %v8756_v47, %v8746_v20  ;;  %5998 = vrsqrt.f32 %v8754_v30  ;;  %vm4831_vm14 = vweird.f32 %v8756_v47  ;;  %vm8801_vm0 = vmor %vm4810_vm15, %vm4811_vm10 }
0x1185   : > { %v4883_v2 = vsel %vm4882_vm12, %v5991_v31, %v4879_v5  ;;  %v4806_v21 = vmul.f32 %v8752_v55, %v4805_v29  ;;  %6000 = vrsqrt.f32 %v8760_v23 }
0x1186   : > { %v4803_v56 = vsel %vm4802_vm13, %v5993_v40, %v4799_v58  ;;  %v4953_v26 = vmul.f32 %v4883_v2, %v8623_v48  ;;  %v4826_v57 = vmul.f32 %v8756_v47, %v4825_v39 }
0x1187   : > { %v4945_v0 = vmul.f32 %v4803_v56, %v8619_v7  ;;  %v4807_v14 = vmul.f32 0.5, %v4806_v21  ;;  %v4730_v49 = vpop.xlane.xlu0 %4729  ;;  %v4742_v51 = vpop.xlane.xlu1 %4741 }
0x1188   : > { %v4970_v6 = vmul.f32 %v8702_v12, %v4953_v26  ;;  %v4827_v4 = vmul.f32 0.5, %v4826_v57  ;;  %v4760_v19 = vmul.f32 %v4730_v49, %v8180_v8  ;;  %v4736_v36 = vpop.xlane.xlu2 %4735  ;;  %v4764_v1 = vmul.f32 %v4742_v51, %v8180_v8 }
0x1189   : > { %v4962_v48 = vmul.f32 %v8702_v12, %v4945_v0  ;;  %v4808_v62 = vsub.f32 1.5, %v4807_v14  ;;  %v4762_v7 = vmul.f32 %v4736_v36, %v8180_v8 }
0x118a   : > { %v8782_v3 = vpop.eup %5998  ;;  %v4987_v15 = vadd.f32 %v8705_v11, %v4970_v6  ;;  %v4828_v22 = vsub.f32 1.5, %v4827_v4  ;;  %v8785_v61 = vadd.f32 1e-12, %v4760_v19  ;;  %v8787_v24 = vadd.f32 1e-12, %v4764_v1 }
0x118b   : > { %v8791_v18 = vpop.eup %6000  ;;  %v4979_v16 = vadd.f32 %v8705_v11, %v4962_v48  ;;  %v4809_v53 = vmul.f32 %v8752_v55, %v4808_v62  ;;  %v4835_v33 = vmul.f32 %v8782_v3, %v8754_v30 }
0x118c   : > { %5003 = vst.msk [vmem:[#allocation2 + $0x48] sm:$0xff] %vm592_vm1, %v4987_v15  ;;  %v4829_v40 = vmul.f32 %v8756_v47, %v4828_v22  ;;  %v4855_v46 = vmul.f32 %v8791_v18, %v8760_v23  ;;  %6002 = vrsqrt.f32 %v8785_v61 }
0x118d   : > { %6043 = shalt.err (!%p6040_p10)
}
0x118e   : > { %s6119_s30 = smov 128   ;;  %4995 = vst.msk [vmem:[#allocation2 + $0x8] sm:$0xff] %vm592_vm1, %v4979_v16  ;;  %v4813_v60 = vsel %vm8801_vm0, %v8752_v55, %v4809_v53  ;;  %vm4832_vm4 = vmor %vm4830_vm3, %vm4831_vm14  ;;  %v4836_v34 = vmul.f32 %v8782_v3, %v4835_v33  ;;  %v8833_v50 = vadd.f32 1e-12, %v4762_v7  ;;  %v4856_v38 = vmul.f32 %v8791_v18, %v4855_v46 }
0x118f   : > { %5484 = dma.vmem_to_hbm [thread:$0]  (%p6219_p3), %s8789_s16, 8192, %s5054_s21, %s5036_s25, %s6119_s30, %s6119_s30, %s6116_s14   ;;  %v4946_v28 = vmul.f32 %v4813_v60, %v8635_v25  ;;  %v4833_v10 = vsel %vm4832_vm4, %v8756_v47, %v4829_v40  ;;  %6004 = vrsqrt.f32 %v8787_v24  ;;  %v4739_v42 = vpop.xlane.xlu0 %4738  ;;  %vm4841_vm5 = vweird.f32 %v8782_v3 }
0x1190   : > { %5011 = vst.msk [vmem:[%s6287_s4 + $0x8] sm:$0xff] %vm592_vm1, %v4979_v16  ;;  %v4948_v27 = vmul.f32 %v4833_v10, %v8641_v63  ;;  %v4837_v20 = vmul.f32 0.5, %v4836_v34  ;;  %6006 = vrsqrt.f32 %v8833_v50  ;;  %v4857_v9 = vmul.f32 0.5, %v4856_v38  ;;  %v4745_v25 = vpop.xlane.xlu2 %4744 }
0x1191   : > { %5019 = vst.msk [vmem:[%s6287_s4 + $0x48] sm:$0xff] %vm592_vm1, %v4987_v15  ;;  %v4963_v59 = vmul.f32 %v8702_v12, %v4946_v28  ;;  %v4763_v35 = vmul.f32 %v4739_v42, %v8180_v8  ;;  %v4765_v47 = vmul.f32 %v4745_v25, %v8180_v8  ;;  %vm4861_vm6 = vweird.f32 %v8791_v18 }
0x1192   : > { %v4965_v55 = vmul.f32 %v8702_v12, %v4948_v27  ;;  %v4838_v41 = vsub.f32 1.5, %v4837_v20  ;;  %v6003_v5 = vpop.eup %6002  ;;  %v4858_v29 = vsub.f32 1.5, %v4857_v9  ;;  %vm4840_vm7 = vweird.f32 %v8754_v30 }
0x1193   : > { %v4980_v63 = vadd.f32 %v8705_v11, %v4963_v59  ;;  %v8852_v58 = vadd.f32 1e-12, %v4763_v35  ;;  %v4865_v21 = vmul.f32 %v6003_v5, %v8785_v61  ;;  %vm4842_vm8 = vmor %vm4840_vm7, %vm4841_vm5  ;;  %vm4860_vm2 = vweird.f32 %v8760_v23 }
0x1194   : > { %v4982_v39 = vadd.f32 %v8705_v11, %v4965_v55  ;;  %v4839_v2 = vmul.f32 %v8782_v3, %v4838_v41  ;;  %v4859_v26 = vmul.f32 %v8791_v18, %v4858_v29  ;;  %v8862_v57 = vadd.f32 1e-12, %v4765_v47  ;;  %vm4862_vm9 = vmor %vm4860_vm2, %vm4861_vm6 }
0x1195   : > { %v6005_v56 = vpop.eup %6004  ;;  %4996 = vst.msk [vmem:[#allocation2 + $0x10] sm:$0xff] %vm592_vm1, %v4980_v63  ;;  %6008 = vrsqrt.f32 %v8852_v58  ;;  %v4866_v14 = vmul.f32 %v6003_v5, %v4865_v21  ;;  %vm4871_vm11 = vweird.f32 %v6003_v5  ;;  %vm4870_vm12 = vweird.f32 %v8785_v61 }
0x1196   : > { %v6007_v0 = vpop.eup %6006  ;;  %5012 = vst.msk [vmem:[%s6287_s4 + $0x10] sm:$0xff] %vm592_vm1, %v4980_v63  ;;  %v4843_v30 = vsel %vm4842_vm8, %v8782_v3, %v4839_v2  ;;  %v4905_v49 = vmul.f32 %v6005_v56, %v8787_v24  ;;  %v4863_v23 = vsel %vm4862_vm9, %v8791_v18, %v4859_v26  ;;  %6010 = vrsqrt.f32 %v8862_v57  ;;  %vm4872_vm10 = vmor %vm4870_vm12, %vm4871_vm11 }
0x1197   : > { %4998 = vst.msk [vmem:[#allocation2 + $0x20] sm:$0xff] %vm592_vm1, %v4982_v39  ;;  %v4949_v51 = vmul.f32 %v4843_v30, %v8651_v45  ;;  %v4885_v6 = vmul.f32 %v6007_v0, %v8833_v50  ;;  %v4951_v4 = vmul.f32 %v4863_v23, %v8655_v54  ;;  %v4867_v19 = vmul.f32 0.5, %v4866_v14 }
0x1198   : > { %5014 = vst.msk [vmem:[%s6287_s4 + $0x20] sm:$0xff] %vm592_vm1, %v4982_v39  ;;  %v4906_v36 = vmul.f32 %v6005_v56, %v4905_v49  ;;  %vm4911_vm13 = vweird.f32 %v6005_v56  ;;  %vm4891_vm14 = vweird.f32 %v6007_v0  ;;  %vm4910_vm15 = vweird.f32 %v8787_v24 }
0x1199   : > { %v4966_v1 = vmul.f32 %v8702_v12, %v4949_v51  ;;  %v4886_v48 = vmul.f32 %v6007_v0, %v4885_v6  ;;  %v4968_v62 = vmul.f32 %v8702_v12, %v4951_v4  ;;  %v4868_v7 = vsub.f32 1.5, %v4867_v19  ;;  %vm4912_vm3 = vmor %vm4910_vm15, %vm4911_vm13 }
0x119a   : > { %v4907_v45 = vmul.f32 0.5, %v4906_v36  ;;  %vm4890_vm0 = vweird.f32 %v8833_v50  ;;  %vm4900_vm6 = vweird.f32 %v8852_v58  ;;  %vm4920_vm2 = vweird.f32 %v8862_v57 }
0x119b   : > { %v6009_v3 = vpop.eup %6008  ;;  %v4983_v15 = vadd.f32 %v8705_v11, %v4966_v1  ;;  %v4887_v22 = vmul.f32 0.5, %v4886_v48  ;;  %v4985_v54 = vadd.f32 %v8705_v11, %v4968_v62  ;;  %v4869_v18 = vmul.f32 %v6003_v5, %v4868_v7  ;;  %vm4892_vm4 = vmor %vm4890_vm0, %vm4891_vm14 }
0x119c   : > { %v4908_v16 = vsub.f32 1.5, %v4907_v45  ;;  %v4895_v53 = vmul.f32 %v6009_v3, %v8852_v58  ;;  %v6011_v31 = vpop.eup %6010  ;;  %vm4901_vm5 = vweird.f32 %v6009_v3 }
0x119d   : > { %4999 = vst.msk [vmem:[#allocation2 + $0x28] sm:$0xff] %vm592_vm1, %v4983_v15  ;;  %v4888_v33 = vsub.f32 1.5, %v4887_v22  ;;  %v4873_v40 = vsel %vm4872_vm10, %v6003_v5, %v4869_v18  ;;  %v4915_v28 = vmul.f32 %v6011_v31, %v8862_v57  ;;  %vm4902_vm7 = vmor %vm4900_vm6, %vm4901_vm5  ;;  %vm4921_vm8 = vweird.f32 %v6011_v31 }
0x119e   : > { %5015 = vst.msk [vmem:[%s6287_s4 + $0x28] sm:$0xff] %vm592_vm1, %v4983_v15  ;;  %v4909_v46 = vmul.f32 %v6005_v56, %v4908_v16  ;;  %v4896_v61 = vmul.f32 %v6009_v3, %v4895_v53  ;;  %v4952_v60 = vmul.f32 %v4873_v40, %v8665_v43  ;;  %vm4922_vm9 = vmor %vm4920_vm2, %vm4921_vm8 }
0x119f   : > { %5001 = vst.msk [vmem:[#allocation2 + $0x38] sm:$0xff] %vm592_vm1, %v4985_v54  ;;  %v4889_v34 = vmul.f32 %v6007_v0, %v4888_v33  ;;  %v4916_v42 = vmul.f32 %v6011_v31, %v4915_v28 }
0x11a0   : > { %5017 = vst.msk [vmem:[%s6287_s4 + $0x38] sm:$0xff] %vm592_vm1, %v4985_v54  ;;  %v4913_v10 = vsel %vm4912_vm3, %v6005_v56, %v4909_v46  ;;  %v4897_v38 = vmul.f32 0.5, %v4896_v61  ;;  %v4969_v27 = vmul.f32 %v8702_v12, %v4952_v60 }
0x11a1   : > { %v4893_v24 = vsel %vm4892_vm4, %v6007_v0, %v4889_v34  ;;  %v4956_v20 = vmul.f32 %v4913_v10, %v8675_v32  ;;  %v4917_v35 = vmul.f32 0.5, %v4916_v42 }
0x11a2   : > { %v4954_v43 = vmul.f32 %v4893_v24, %v8669_v37  ;;  %v4898_v59 = vsub.f32 1.5, %v4897_v38  ;;  %v4986_v50 = vadd.f32 %v8705_v11, %v4969_v27 }
0x11a3   : > { %v4973_v9 = vmul.f32 %v8702_v12, %v4956_v20  ;;  %v4918_v37 = vsub.f32 1.5, %v4917_v35 }
0x11a4   : > { %v4971_v25 = vmul.f32 %v8702_v12, %v4954_v43  ;;  %v4899_v55 = vmul.f32 %v6009_v3, %v4898_v59  ;;  %5002 = vst.msk [vmem:[#allocation2 + $0x40] sm:$0xff] %vm592_vm1, %v4986_v50 }
0x11a5   : > { %v4990_v32 = vadd.f32 %v8705_v11, %v4973_v9  ;;  %5018 = vst.msk [vmem:[%s6287_s4 + $0x40] sm:$0xff] %vm592_vm1, %v4986_v50  ;;  %v4919_v63 = vmul.f32 %v6011_v31, %v4918_v37 }
0x11a6   : > { %v4988_v41 = vadd.f32 %v8705_v11, %v4971_v25  ;;  %v4903_v47 = vsel %vm4902_vm7, %v6009_v3, %v4899_v55 }
0x11a7   : > { %5006 = vst.msk [vmem:[#allocation2 + $0x60] sm:$0xff] %vm592_vm1, %v4990_v32  ;;  %v4955_v5 = vmul.f32 %v4903_v47, %v8684_v13  ;;  %v4923_v58 = vsel %vm4922_vm9, %v6011_v31, %v4919_v63 }
0x11a8   : > { %5004 = vst.msk [vmem:[#allocation2 + $0x50] sm:$0xff] %vm592_vm1, %v4988_v41  ;;  %v4957_v39 = vmul.f32 %v4923_v58, %v8691_v17 }
0x11a9   : > { %5020 = vst.msk [vmem:[%s6287_s4 + $0x50] sm:$0xff] %vm592_vm1, %v4988_v41  ;;  %v4972_v29 = vmul.f32 %v8702_v12, %v4955_v5 }
0x11aa   : > { %5022 = vst.msk [vmem:[%s6287_s4 + $0x60] sm:$0xff] %vm592_vm1, %v4990_v32  ;;  %v4974_v13 = vmul.f32 %v8702_v12, %v4957_v39 }
0x11ab   : > { %v4989_v2 = vadd.f32 %v8705_v11, %v4972_v29 }
0x11ac   : > { %v4991_v21 = vadd.f32 %v8705_v11, %v4974_v13 }
0x11ad   : > { %5005 = vst.msk [vmem:[#allocation2 + $0x58] sm:$0xff] %vm592_vm1, %v4989_v2 }
0x11ae   : > { %5021 = vst.msk [vmem:[%s6287_s4 + $0x58] sm:$0xff] %vm592_vm1, %v4989_v2 }
0x11af   : > { %5007 = vst.msk [vmem:[#allocation2 + $0x68] sm:$0xff] %vm592_vm1, %v4991_v21 }
0x11b0   : > { %5023 = vst.msk [vmem:[%s6287_s4 + $0x68] sm:$0xff] %vm592_vm1, %v4991_v21 }
0x11e2   : > { %v4748_v56 = vpop.xlane.xlu0 %4747 }
0x11e3   : > { %v4766_v26 = vmul.f32 %v4748_v56, %v8180_v8 }
0x11e5   : > { %v4782_v57 = vadd.f32 1e-12, %v4766_v26 }
0x11e7   : > { %6012 = vrsqrt.f32 %v4782_v57  ;;  %vm4930_vm12 = vweird.f32 %v4782_v57 }
0x11ea   : > { %v4751_v17 = vpop.xlane.xlu1 %4750 }
0x11eb   : > { %v4767_v0 = vmul.f32 %v4751_v17, %v8180_v8 }
0x11ed   : > { %v6013_v30 = vpop.eup %6012  ;;  %v4783_v14 = vadd.f32 1e-12, %v4767_v0 }
0x11ee   : > { %v4925_v49 = vmul.f32 %v6013_v30, %v4782_v57  ;;  %vm4931_vm11 = vweird.f32 %v6013_v30 }
0x11ef   : > { %6014 = vrsqrt.f32 %v4783_v14  ;;  %vm4932_vm13 = vmor %vm4930_vm12, %vm4931_vm11  ;;  %vm4940_vm14 = vweird.f32 %v4783_v14 }
0x11f0   : > { %v4926_v51 = vmul.f32 %v6013_v30, %v4925_v49 }
0x11f2   : > { %v4927_v23 = vmul.f32 0.5, %v4926_v51 }
0x11f4   : > { %v4928_v6 = vsub.f32 1.5, %v4927_v23 }
0x11f5   : > { %v6015_v4 = vpop.eup %6014 }
0x11f6   : > { %v4929_v19 = vmul.f32 %v6013_v30, %v4928_v6  ;;  %v4935_v36 = vmul.f32 %v6015_v4, %v4783_v14  ;;  %vm4941_vm10 = vweird.f32 %v6015_v4 }
0x11f7   : > { %vm4942_vm15 = vmor %vm4940_vm14, %vm4941_vm10 }
0x11f8   : > { %v4933_v1 = vsel %vm4932_vm13, %v6013_v30, %v4929_v19  ;;  %v4936_v48 = vmul.f32 %v6015_v4, %v4935_v36 }
0x11f9   : > { %v4958_v62 = vmul.f32 %v4933_v1, %v8722_v44 }
0x11fa   : > { %v4937_v8 = vmul.f32 0.5, %v4936_v48 }
0x11fb   : > { %v4975_v7 = vmul.f32 %v8702_v12, %v4958_v62 }
0x11fc   : > { %v4938_v45 = vsub.f32 1.5, %v4937_v8 }
0x11fd   : > { %v4992_v3 = vadd.f32 %v8705_v11, %v4975_v7 }
0x11fe   : > { %v4939_v15 = vmul.f32 %v6015_v4, %v4938_v45 }
0x11ff   : > { %5008 = vst.msk [vmem:[#allocation2 + $0x70] sm:$0xff] %vm592_vm1, %v4992_v3 }
0x1200   : > { %5024 = vst.msk [vmem:[%s6287_s4 + $0x70] sm:$0xff] %vm592_vm1, %v4992_v3  ;;  %v4943_v22 = vsel %vm4942_vm15, %v6015_v4, %v4939_v15 }
0x1201   : > { %v4959_v54 = vmul.f32 %v4943_v22, %v8734_v52 }
0x1203   : > { %v4976_v44 = vmul.f32 %v8702_v12, %v4959_v54 }
0x1205   : > { %v4993_v18 = vadd.f32 %v8705_v11, %v4976_v44 }
0x1207   : > { %5009 = vst.msk [vmem:[#allocation2 + $0x78] sm:$0xff] %vm592_vm1, %v4993_v18 }
0x1208   : > { %5025 = vst.msk [vmem:[%s6287_s4 + $0x78] sm:$0xff] %vm592_vm1, %v4993_v18 }
0x1209 PF: > { %s9156_s28 = sld [smem:[#allocation11_spill]] }
0x120a   : > { %s9157_s29 = sld [smem:[#allocation6_spill]] }
0x120f   : > { %p5490_p3 = scmp.ge.s32.totalorder %s9156_s28, 2 }
0x1210   : > { %s5080_s14 = sand.u32 1, %s9157_s29  }
0x1211   : > { %p5487_p11 = pnand %p5490_p3, %p6229_p9  ;;  %s5081_s22 = scalar_lea.sflag [#allocation4], %s5080_s14 }
0x1213   : > { %p5488_p12 = pneg %p5487_p11 }
0x1215   : > { %6077 = dma.done.wait (%p5488_p12), %s5081_s22, 8192  }
0x1216   : > { %6079 = vsyncadd (%p5488_p12), %s5081_s22, 4294959104  ;;  %s23_s16 = sadd.s32 1, %s9156_s28   ;;  %s9159_s30 = sld [smem:[#allocation7_spill]] }
0x1217   : > { %p20_p13 = scmp.ge.s32.totalorder %s23_s16, 6   ;;  %s9160_s10 = sld [smem:[#allocation8_spill]] }
0x1218   : > { %s9161_s11 = sld [smem:[#allocation16_spill]] }
0x1219   : > { %s9162_s12 = sld [smem:[#allocation9_spill]]  ;;  %22 = sbr.rel (!%p20_p13) target bundleno = 9 (0x9), region = 142 }
0x121a   : > { %s9163_s13 = sld [smem:[#allocation10_spill]] }
0x121b   : > { %s9164_s14 = sld [smem:[#allocation12_spill]] }
0x121c   : > { %s9165_s15 = sld [smem:[#allocation14_spill]] }
0x121e   :  { %5087 = vsyncpa [#allocation4], 1 }
0x121f   :  { %5089 = vsyncpa [#allocation4 + $0x1], 1 }

</bundles_post_ra>
